<compile_context>
chip_gen: v7x
topology: tpu7x:2x2x1
jax: 0.10.0
libtpu: 0.0.40
codegen_flags: <defaults>
</compile_context>

<pallas_src>
import jax
import jax.numpy as jnp
import numpy as np
from jax import lax
from jax.experimental import pallas as pl
from jax.experimental.pallas import tpu as pltpu

LEAK = 0.2


def _leaky(x):
    return jnp.where(x > 0, x, LEAK * x)


def rb_layer_kernel(x_ref, w1_ref, b1_ref, w2_ref, b2_ref,
                    wd_ref, bd_ref, wu_ref, bu_ref, o_ref, p_ref):
    NB, H, W, C = x_ref.shape
    M = NB * H * W
    f32 = jnp.float32

    # Zero only the two 1-wide halo rows of the padded scratch (cheap, and
    # correct under megacore grid sharding — no reliance on program_id==0).
    # The left/right halo columns are written (as zeros) together with the
    # interior below, so all scratch stores start at sublane offset 0.
    zrow = jnp.zeros((NB, 1, W + 2, C), f32)
    p_ref[:, 0:1, :, :] = zrow
    p_ref[:, H + 1:H + 2, :, :] = zrow
    zcol = jnp.zeros((NB, H, 1, C), f32)

    def store_padded(val):                      # val: (NB, H, W, C) f32
        # Single aligned full-width store of [0 | val | 0] into rows 1..H.
        p_ref[:, 1:H + 1, :, :] = jnp.concatenate([zcol, val, zcol], axis=2)

    def im2col_bf16():
        # (M, 9*C) slab: the 9 shifted 3x3-tap windows concatenated along the
        # channel axis, matching the (9*C_in, C_out) weight layout, so each
        # conv is a single big-K bf16 MXU matmul instead of 9 tiny ones.
        cols = [p_ref[:, dy:dy + H, dx:dx + W, :].reshape(M, C)
                for dy in range(3) for dx in range(3)]
        return jnp.concatenate(cols, axis=1).astype(jnp.bfloat16)

    x_f32 = x_ref[...]

    # ---- conv1: 3x3, stride 1, pad 1, then LeakyReLU(0.2) ----
    store_padded(x_f32)
    acc1 = jnp.dot(im2col_bf16(), w1_ref[...],
                   preferred_element_type=f32)                      # (M, C)
    act1 = _leaky(acc1 + b1_ref[...])

    # ---- conv2: 3x3, stride 1, pad 1 ----
    store_padded(act1.reshape(NB, H, W, C))
    acc2 = jnp.dot(im2col_bf16(), w2_ref[...],
                   preferred_element_type=f32) + b2_ref[...]        # (M, C)

    # ---- CALayer: per-image global avg pool -> 1x1 -> LeakyReLU -> 1x1 -> sigmoid
    y = acc2.reshape(NB, H * W, C)
    avg = jnp.mean(y, axis=1)                                       # (NB, C)
    h1 = _leaky(jnp.dot(avg, wd_ref[...],
                        preferred_element_type=f32) + bd_ref[...])  # (NB, C//r)
    h2 = jnp.dot(h1, wu_ref[...],
                 preferred_element_type=f32) + bu_ref[...]          # (NB, C)
    scale = pl.reciprocal(1.0 + jnp.exp(-h2), approx=True)          # sigmoid

    # ---- channel attention scaling + residual (residual stays exact f32) ----
    out = y * scale[:, None, :] + x_f32.reshape(NB, H * W, C)
    o_ref[...] = out.reshape(NB, H, W, C).astype(o_ref.dtype)


def _pick_batch_block(n, cap=8):
    """Largest divisor of n that is <= cap while leaving >= 2 grid steps
    (so the software pipeline / megacore have multiple steps to overlap)."""
    best = 1
    for d in range(1, min(n, cap) + 1):
        if n % d == 0 and n // d >= 2:
            best = d
    return best


def rb_layer_pallas(x, params, batch_block=None):
    w1, b1, w2, b2, wd, bd, wu, bu = params
    N, H, W, C = x.shape
    cr = wd.shape[1]
    nb = batch_block if batch_block is not None else _pick_batch_block(N)
    assert N % nb == 0

    # im2col weight layout (9*C_in, C_out), shipped as bf16 for the MXU.
    w1_2d = w1.reshape(9 * C, C).astype(jnp.bfloat16)
    w2_2d = w2.reshape(9 * C, C).astype(jnp.bfloat16)

    grid_spec = pltpu.PrefetchScalarGridSpec(
        num_scalar_prefetch=0,
        grid=(N // nb,),
        in_specs=[
            pl.BlockSpec((nb, H, W, C), lambda b: (b, 0, 0, 0)),   # x (residual too)
            pl.BlockSpec((9 * C, C), lambda b: (0, 0)),            # w1 (im2col, bf16)
            pl.BlockSpec((1, C), lambda b: (0, 0)),                # b1
            pl.BlockSpec((9 * C, C), lambda b: (0, 0)),            # w2 (im2col, bf16)
            pl.BlockSpec((1, C), lambda b: (0, 0)),                # b2
            pl.BlockSpec((C, cr), lambda b: (0, 0)),               # CA squeeze w
            pl.BlockSpec((1, cr), lambda b: (0, 0)),               # CA squeeze b
            pl.BlockSpec((cr, C), lambda b: (0, 0)),               # CA excite w
            pl.BlockSpec((1, C), lambda b: (0, 0)),                # CA excite b
        ],
        out_specs=pl.BlockSpec((nb, H, W, C), lambda b: (b, 0, 0, 0)),
        # Persistent padded scratch for the conv windows (f32, shared by both
        # convs; MXU inputs are cast to bf16 at the matmul).
        scratch_shapes=[pltpu.VMEM((nb, H + 2, W + 2, C), jnp.float32)],
    )
    return pl.pallas_call(
        rb_layer_kernel,
        out_shape=jax.ShapeDtypeStruct((N, H, W, C), x.dtype),
        grid_spec=grid_spec,
        compiler_params=pltpu.CompilerParams(
            dimension_semantics=("parallel",)),
    )(x, w1_2d, b1, w2_2d, b2, wd, bd, wu, bu)


def rb_layer_ref(x, params):
    """Pure-JAX f32 reference (same semantics as the PyTorch module, NHWC)."""
    w1, b1, w2, b2, wd, bd, wu, bu = params
    N, H, W, C = x.shape
    dn = ('NHWC', 'HWIO', 'NHWC')
    y = lax.conv_general_dilated(x, w1.reshape(3, 3, C, C), (1, 1), 'SAME',
                                 dimension_numbers=dn) + b1.reshape(1, 1, 1, C)
    y = jnp.where(y > 0, y, LEAK * y)
    y = lax.conv_general_dilated(y, w2.reshape(3, 3, C, C), (1, 1), 'SAME',
                                 dimension_numbers=dn) + b2.reshape(1, 1, 1, C)
    avg = jnp.mean(y, axis=(1, 2), keepdims=True)
    h = jnp.einsum('nhwc,cd->nhwd', avg, wd) + bd.reshape(1, 1, 1, -1)
    h = jnp.where(h > 0, h, LEAK * h)
    s = jnp.einsum('nhwd,dc->nhwc', h, wu) + bu.reshape(1, 1, 1, -1)
    s = 1.0 / (1.0 + jnp.exp(-s))
    return y * s + x


def init_params(key, nf, reduction=16):
    cr = nf // reduction
    ks = jax.random.split(key, 8)
    s3 = 1.0 / np.sqrt(9 * nf)
    w1 = jax.random.normal(ks[0], (9, nf, nf), jnp.float32) * s3
    b1 = jax.random.normal(ks[1], (1, nf), jnp.float32) * 0.01
    w2 = jax.random.normal(ks[2], (9, nf, nf), jnp.float32) * s3
    b2 = jax.random.normal(ks[3], (1, nf), jnp.float32) * 0.01
    wd = jax.random.normal(ks[4], (nf, cr), jnp.float32) * (1.0 / np.sqrt(nf))
    bd = jax.random.normal(ks[5], (1, cr), jnp.float32) * 0.01
    wu = jax.random.normal(ks[6], (cr, nf), jnp.float32) * (1.0 / np.sqrt(cr))
    bu = jax.random.normal(ks[7], (1, nf), jnp.float32) * 0.01
    return (w1, b1, w2, b2, wd, bd, wu, bu)


if __name__ == "__main__":
    nf = 32          # must be >= reduction(=16) so the squeeze width >= 1
    N, H, W = 4, 16, 16   # N=4 -> 2 images per grid step, 2 grid steps
    key = jax.random.PRNGKey(0)
    kx, kp = jax.random.split(key)
    x = jax.random.normal(kx, (N, H, W, nf), jnp.float32)
    params = init_params(kp, nf, reduction=16)

    out = jax.block_until_ready(rb_layer_pallas(x, params))
    ref = jax.block_until_ready(rb_layer_ref(x, params))

    assert out.shape == (N, H, W, nf)
    # Tolerance loosened vs. the pure-f32 version because the conv matmuls run
    # in bf16 (f32 accumulation); typical max abs err is ~1-2e-2 here.
    err = float(jnp.max(jnp.abs(out - ref)))
    assert err < 6e-2, f"max abs err {err}"
    print("KERNEL_OK")
</pallas_src>

<mosaic_0001>
module attributes {stable_mosaic.version = 11 : i64} {
  func.func @rb_layer_kernel(%arg0: i32, %arg1: memref<2x16x16x32xf32, #tpu.memory_space<vmem>>, %arg2: memref<288x32xbf16, #tpu.memory_space<vmem>>, %arg3: memref<1x32xf32, #tpu.memory_space<vmem>>, %arg4: memref<288x32xbf16, #tpu.memory_space<vmem>>, %arg5: memref<1x32xf32, #tpu.memory_space<vmem>>, %arg6: memref<32x2xf32, #tpu.memory_space<vmem>>, %arg7: memref<1x2xf32, #tpu.memory_space<vmem>>, %arg8: memref<2x32xf32, #tpu.memory_space<vmem>>, %arg9: memref<1x32xf32, #tpu.memory_space<vmem>>, %arg10: memref<2x16x16x32xf32, #tpu.memory_space<vmem>>, %arg11: memref<2x18x18x32xf32, #tpu.memory_space<vmem>>) attributes {dimension_semantics = [#tpu.dimension_semantics<parallel>], iteration_bounds = array<i64: 2>, scalar_prefetch = 0 : i64, scratch_operands = 1 : i64, tpu.core_type = #tpu.core_type<tc>, window_params = [{transform_indices = @transform_0, window_bounds = array<i64: 2, 16, 16, 32>}, {pipeline_mode = #tpu.pipeline_mode<synchronous>, transform_indices = @transform_1, window_bounds = array<i64: 288, 32>}, {pipeline_mode = #tpu.pipeline_mode<synchronous>, transform_indices = @transform_2, window_bounds = array<i64: 1, 32>}, {pipeline_mode = #tpu.pipeline_mode<synchronous>, transform_indices = @transform_3, window_bounds = array<i64: 288, 32>}, {pipeline_mode = #tpu.pipeline_mode<synchronous>, transform_indices = @transform_4, window_bounds = array<i64: 1, 32>}, {pipeline_mode = #tpu.pipeline_mode<synchronous>, transform_indices = @transform_5, window_bounds = array<i64: 32, 2>}, {pipeline_mode = #tpu.pipeline_mode<synchronous>, transform_indices = @transform_6, window_bounds = array<i64: 1, 2>}, {pipeline_mode = #tpu.pipeline_mode<synchronous>, transform_indices = @transform_7, window_bounds = array<i64: 2, 32>}, {pipeline_mode = #tpu.pipeline_mode<synchronous>, transform_indices = @transform_8, window_bounds = array<i64: 1, 32>}, {transform_indices = @transform_9, window_bounds = array<i64: 2, 16, 16, 32>}]} {
    %cst = arith.constant 0.000000e+00 : f32
    %0 = vector.broadcast %cst : f32 to vector<2x1x18x32xf32>
    %c0 = arith.constant 0 : index
    %c0_0 = arith.constant 0 : index
    %c0_1 = arith.constant 0 : index
    %c0_2 = arith.constant 0 : index
    %1 = vector.load %arg11[%c0, %c0_0, %c0_1, %c0_2] : memref<2x18x18x32xf32, #tpu.memory_space<vmem>>, vector<2x1x18x32xf32>
    tpu.vector_store %arg11[%c0, %c0_0, %c0_1, %c0_2], %0 {strides = array<i32>} : memref<2x18x18x32xf32, #tpu.memory_space<vmem>>, vector<2x1x18x32xf32>,
    %c0_3 = arith.constant 0 : index
    %c17 = arith.constant 17 : index
    %c0_4 = arith.constant 0 : index
    %c0_5 = arith.constant 0 : index
    %2 = vector.load %arg11[%c0_3, %c17, %c0_4, %c0_5] : memref<2x18x18x32xf32, #tpu.memory_space<vmem>>, vector<2x1x18x32xf32>
    tpu.vector_store %arg11[%c0_3, %c17, %c0_4, %c0_5], %0 {strides = array<i32>} : memref<2x18x18x32xf32, #tpu.memory_space<vmem>>, vector<2x1x18x32xf32>,
    %cst_6 = arith.constant 0.000000e+00 : f32
    %3 = vector.broadcast %cst_6 : f32 to vector<2x16x1x32xf32>
    %c0_7 = arith.constant 0 : index
    %c0_8 = arith.constant 0 : index
    %c0_9 = arith.constant 0 : index
    %c0_10 = arith.constant 0 : index
    %4 = vector.load %arg1[%c0_7, %c0_8, %c0_9, %c0_10] : memref<2x16x16x32xf32, #tpu.memory_space<vmem>>, vector<2x16x16x32xf32>
    %5 = tpu.concatenate %3, %4, %3 in 2 : vector<2x16x1x32xf32>, vector<2x16x16x32xf32>, vector<2x16x1x32xf32> -> vector<2x16x18x32xf32>
    %c0_11 = arith.constant 0 : index
    %c1 = arith.constant 1 : index
    %c0_12 = arith.constant 0 : index
    %c0_13 = arith.constant 0 : index
    %6 = vector.load %arg11[%c0_11, %c1, %c0_12, %c0_13] : memref<2x18x18x32xf32, #tpu.memory_space<vmem>>, vector<2x16x18x32xf32>
    tpu.vector_store %arg11[%c0_11, %c1, %c0_12, %c0_13], %5 {strides = array<i32>} : memref<2x18x18x32xf32, #tpu.memory_space<vmem>>, vector<2x16x18x32xf32>,
    %c0_14 = arith.constant 0 : index
    %c0_15 = arith.constant 0 : index
    %c0_16 = arith.constant 0 : index
    %c0_17 = arith.constant 0 : index
    %7 = vector.load %arg11[%c0_14, %c0_15, %c0_16, %c0_17] : memref<2x18x18x32xf32, #tpu.memory_space<vmem>>, vector<2x16x16x32xf32>
    %8 = vector.shape_cast %7 : vector<2x16x16x32xf32> to vector<512x32xf32>
    %c0_18 = arith.constant 0 : index
    %c0_19 = arith.constant 0 : index
    %c1_20 = arith.constant 1 : index
    %c0_21 = arith.constant 0 : index
    %9 = vector.load %arg11[%c0_18, %c0_19, %c1_20, %c0_21] : memref<2x18x18x32xf32, #tpu.memory_space<vmem>>, vector<2x16x16x32xf32>
    %10 = vector.shape_cast %9 : vector<2x16x16x32xf32> to vector<512x32xf32>
    %c0_22 = arith.constant 0 : index
    %c0_23 = arith.constant 0 : index
    %c2 = arith.constant 2 : index
    %c0_24 = arith.constant 0 : index
    %11 = vector.load %arg11[%c0_22, %c0_23, %c2, %c0_24] : memref<2x18x18x32xf32, #tpu.memory_space<vmem>>, vector<2x16x16x32xf32>
    %12 = vector.shape_cast %11 : vector<2x16x16x32xf32> to vector<512x32xf32>
    %c0_25 = arith.constant 0 : index
    %c1_26 = arith.constant 1 : index
    %c0_27 = arith.constant 0 : index
    %c0_28 = arith.constant 0 : index
    %13 = vector.load %arg11[%c0_25, %c1_26, %c0_27, %c0_28] : memref<2x18x18x32xf32, #tpu.memory_space<vmem>>, vector<2x16x16x32xf32>
    %14 = vector.shape_cast %13 : vector<2x16x16x32xf32> to vector<512x32xf32>
    %c0_29 = arith.constant 0 : index
    %c1_30 = arith.constant 1 : index
    %c1_31 = arith.constant 1 : index
    %c0_32 = arith.constant 0 : index
    %15 = vector.load %arg11[%c0_29, %c1_30, %c1_31, %c0_32] : memref<2x18x18x32xf32, #tpu.memory_space<vmem>>, vector<2x16x16x32xf32>
    %16 = vector.shape_cast %15 : vector<2x16x16x32xf32> to vector<512x32xf32>
    %c0_33 = arith.constant 0 : index
    %c1_34 = arith.constant 1 : index
    %c2_35 = arith.constant 2 : index
    %c0_36 = arith.constant 0 : index
    %17 = vector.load %arg11[%c0_33, %c1_34, %c2_35, %c0_36] : memref<2x18x18x32xf32, #tpu.memory_space<vmem>>, vector<2x16x16x32xf32>
    %18 = vector.shape_cast %17 : vector<2x16x16x32xf32> to vector<512x32xf32>
    %c0_37 = arith.constant 0 : index
    %c2_38 = arith.constant 2 : index
    %c0_39 = arith.constant 0 : index
    %c0_40 = arith.constant 0 : index
    %19 = vector.load %arg11[%c0_37, %c2_38, %c0_39, %c0_40] : memref<2x18x18x32xf32, #tpu.memory_space<vmem>>, vector<2x16x16x32xf32>
    %20 = vector.shape_cast %19 : vector<2x16x16x32xf32> to vector<512x32xf32>
    %c0_41 = arith.constant 0 : index
    %c2_42 = arith.constant 2 : index
    %c1_43 = arith.constant 1 : index
    %c0_44 = arith.constant 0 : index
    %21 = vector.load %arg11[%c0_41, %c2_42, %c1_43, %c0_44] : memref<2x18x18x32xf32, #tpu.memory_space<vmem>>, vector<2x16x16x32xf32>
    %22 = vector.shape_cast %21 : vector<2x16x16x32xf32> to vector<512x32xf32>
    %c0_45 = arith.constant 0 : index
    %c2_46 = arith.constant 2 : index
    %c2_47 = arith.constant 2 : index
    %c0_48 = arith.constant 0 : index
    %23 = vector.load %arg11[%c0_45, %c2_46, %c2_47, %c0_48] : memref<2x18x18x32xf32, #tpu.memory_space<vmem>>, vector<2x16x16x32xf32>
    %24 = vector.shape_cast %23 : vector<2x16x16x32xf32> to vector<512x32xf32>
    %25 = tpu.concatenate %8, %10, %12, %14, %16, %18, %20, %22, %24 in 1 : vector<512x32xf32>, vector<512x32xf32>, vector<512x32xf32>, vector<512x32xf32>, vector<512x32xf32>, vector<512x32xf32>, vector<512x32xf32>, vector<512x32xf32>, vector<512x32xf32> -> vector<512x288xf32>
    %26 = arith.truncf %25 : vector<512x288xf32> to vector<512x288xbf16>
    %c0_49 = arith.constant 0 : index
    %c0_50 = arith.constant 0 : index
    %27 = vector.load %arg2[%c0_49, %c0_50] : memref<288x32xbf16, #tpu.memory_space<vmem>>, vector<288x32xbf16>
    %cst_51 = arith.constant dense<0.000000e+00> : vector<512x32xf32>
    %28 = tpu.matmul %26, %27, %cst_51 {dimension_numbers = #tpu.dot_dimension_numbers<[1], [0], [0], [1], [0, 0, 1, 1], [], []>} : vector<512x288xbf16>, vector<288x32xbf16>, vector<512x32xf32> -> vector<512x32xf32>
    %c0_52 = arith.constant 0 : index
    %c0_53 = arith.constant 0 : index
    %29 = vector.load %arg3[%c0_52, %c0_53] : memref<1x32xf32, #tpu.memory_space<vmem>>, vector<1x32xf32>
    %30 = vector.broadcast %29 : vector<1x32xf32> to vector<512x32xf32>
    %31 = arith.addf %28, %30 : vector<512x32xf32>
    %cst_54 = arith.constant 0.000000e+00 : f32
    %32 = vector.broadcast %cst_54 : f32 to vector<512x32xf32>
    %33 = arith.cmpf ogt, %31, %32 : vector<512x32xf32>
    %cst_55 = arith.constant 2.000000e-01 : f32
    %34 = vector.broadcast %cst_55 : f32 to vector<512x32xf32>
    %35 = arith.mulf %34, %31 : vector<512x32xf32>
    %36 = arith.select %33, %31, %35 : vector<512x32xi1>, vector<512x32xf32>
    %37 = vector.shape_cast %36 : vector<512x32xf32> to vector<2x16x16x32xf32>
    %38 = tpu.concatenate %3, %37, %3 in 2 : vector<2x16x1x32xf32>, vector<2x16x16x32xf32>, vector<2x16x1x32xf32> -> vector<2x16x18x32xf32>
    %c0_56 = arith.constant 0 : index
    %c1_57 = arith.constant 1 : index
    %c0_58 = arith.constant 0 : index
    %c0_59 = arith.constant 0 : index
    %39 = vector.load %arg11[%c0_56, %c1_57, %c0_58, %c0_59] : memref<2x18x18x32xf32, #tpu.memory_space<vmem>>, vector<2x16x18x32xf32>
    tpu.vector_store %arg11[%c0_56, %c1_57, %c0_58, %c0_59], %38 {strides = array<i32>} : memref<2x18x18x32xf32, #tpu.memory_space<vmem>>, vector<2x16x18x32xf32>,
    %c0_60 = arith.constant 0 : index
    %c0_61 = arith.constant 0 : index
    %c0_62 = arith.constant 0 : index
    %c0_63 = arith.constant 0 : index
    %40 = vector.load %arg11[%c0_60, %c0_61, %c0_62, %c0_63] : memref<2x18x18x32xf32, #tpu.memory_space<vmem>>, vector<2x16x16x32xf32>
    %41 = vector.shape_cast %40 : vector<2x16x16x32xf32> to vector<512x32xf32>
    %c0_64 = arith.constant 0 : index
    %c0_65 = arith.constant 0 : index
    %c1_66 = arith.constant 1 : index
    %c0_67 = arith.constant 0 : index
    %42 = vector.load %arg11[%c0_64, %c0_65, %c1_66, %c0_67] : memref<2x18x18x32xf32, #tpu.memory_space<vmem>>, vector<2x16x16x32xf32>
    %43 = vector.shape_cast %42 : vector<2x16x16x32xf32> to vector<512x32xf32>
    %c0_68 = arith.constant 0 : index
    %c0_69 = arith.constant 0 : index
    %c2_70 = arith.constant 2 : index
    %c0_71 = arith.constant 0 : index
    %44 = vector.load %arg11[%c0_68, %c0_69, %c2_70, %c0_71] : memref<2x18x18x32xf32, #tpu.memory_space<vmem>>, vector<2x16x16x32xf32>
    %45 = vector.shape_cast %44 : vector<2x16x16x32xf32> to vector<512x32xf32>
    %c0_72 = arith.constant 0 : index
    %c1_73 = arith.constant 1 : index
    %c0_74 = arith.constant 0 : index
    %c0_75 = arith.constant 0 : index
    %46 = vector.load %arg11[%c0_72, %c1_73, %c0_74, %c0_75] : memref<2x18x18x32xf32, #tpu.memory_space<vmem>>, vector<2x16x16x32xf32>
    %47 = vector.shape_cast %46 : vector<2x16x16x32xf32> to vector<512x32xf32>
    %c0_76 = arith.constant 0 : index
    %c1_77 = arith.constant 1 : index
    %c1_78 = arith.constant 1 : index
    %c0_79 = arith.constant 0 : index
    %48 = vector.load %arg11[%c0_76, %c1_77, %c1_78, %c0_79] : memref<2x18x18x32xf32, #tpu.memory_space<vmem>>, vector<2x16x16x32xf32>
    %49 = vector.shape_cast %48 : vector<2x16x16x32xf32> to vector<512x32xf32>
    %c0_80 = arith.constant 0 : index
    %c1_81 = arith.constant 1 : index
    %c2_82 = arith.constant 2 : index
    %c0_83 = arith.constant 0 : index
    %50 = vector.load %arg11[%c0_80, %c1_81, %c2_82, %c0_83] : memref<2x18x18x32xf32, #tpu.memory_space<vmem>>, vector<2x16x16x32xf32>
    %51 = vector.shape_cast %50 : vector<2x16x16x32xf32> to vector<512x32xf32>
    %c0_84 = arith.constant 0 : index
    %c2_85 = arith.constant 2 : index
    %c0_86 = arith.constant 0 : index
    %c0_87 = arith.constant 0 : index
    %52 = vector.load %arg11[%c0_84, %c2_85, %c0_86, %c0_87] : memref<2x18x18x32xf32, #tpu.memory_space<vmem>>, vector<2x16x16x32xf32>
    %53 = vector.shape_cast %52 : vector<2x16x16x32xf32> to vector<512x32xf32>
    %c0_88 = arith.constant 0 : index
    %c2_89 = arith.constant 2 : index
    %c1_90 = arith.constant 1 : index
    %c0_91 = arith.constant 0 : index
    %54 = vector.load %arg11[%c0_88, %c2_89, %c1_90, %c0_91] : memref<2x18x18x32xf32, #tpu.memory_space<vmem>>, vector<2x16x16x32xf32>
    %55 = vector.shape_cast %54 : vector<2x16x16x32xf32> to vector<512x32xf32>
    %c0_92 = arith.constant 0 : index
    %c2_93 = arith.constant 2 : index
    %c2_94 = arith.constant 2 : index
    %c0_95 = arith.constant 0 : index
    %56 = vector.load %arg11[%c0_92, %c2_93, %c2_94, %c0_95] : memref<2x18x18x32xf32, #tpu.memory_space<vmem>>, vector<2x16x16x32xf32>
    %57 = vector.shape_cast %56 : vector<2x16x16x32xf32> to vector<512x32xf32>
    %58 = tpu.concatenate %41, %43, %45, %47, %49, %51, %53, %55, %57 in 1 : vector<512x32xf32>, vector<512x32xf32>, vector<512x32xf32>, vector<512x32xf32>, vector<512x32xf32>, vector<512x32xf32>, vector<512x32xf32>, vector<512x32xf32>, vector<512x32xf32> -> vector<512x288xf32>
    %59 = arith.truncf %58 : vector<512x288xf32> to vector<512x288xbf16>
    %c0_96 = arith.constant 0 : index
    %c0_97 = arith.constant 0 : index
    %60 = vector.load %arg4[%c0_96, %c0_97] : memref<288x32xbf16, #tpu.memory_space<vmem>>, vector<288x32xbf16>
    %cst_98 = arith.constant dense<0.000000e+00> : vector<512x32xf32>
    %61 = tpu.matmul %59, %60, %cst_98 {dimension_numbers = #tpu.dot_dimension_numbers<[1], [0], [0], [1], [0, 0, 1, 1], [], []>} : vector<512x288xbf16>, vector<288x32xbf16>, vector<512x32xf32> -> vector<512x32xf32>
    %c0_99 = arith.constant 0 : index
    %c0_100 = arith.constant 0 : index
    %62 = vector.load %arg5[%c0_99, %c0_100] : memref<1x32xf32, #tpu.memory_space<vmem>>, vector<1x32xf32>
    %63 = vector.broadcast %62 : vector<1x32xf32> to vector<512x32xf32>
    %64 = arith.addf %61, %63 : vector<512x32xf32>
    %65 = vector.shape_cast %64 : vector<512x32xf32> to vector<2x256x32xf32>
    %cst_101 = arith.constant dense<0.000000e+00> : vector<2x32xf32>
    %66 = vector.multi_reduction <add>, %65, %cst_101 [1] : vector<2x256x32xf32> to vector<2x32xf32>
    %cst_102 = arith.constant 2.560000e+02 : f32
    %67 = vector.broadcast %cst_102 : f32 to vector<2x32xf32>
    %68 = arith.divf %66, %67 : vector<2x32xf32>
    %c0_103 = arith.constant 0 : index
    %c0_104 = arith.constant 0 : index
    %69 = vector.load %arg6[%c0_103, %c0_104] : memref<32x2xf32, #tpu.memory_space<vmem>>, vector<32x2xf32>
    %cst_105 = arith.constant dense<0.000000e+00> : vector<2x2xf32>
    %70 = tpu.matmul %68, %69, %cst_105 {dimension_numbers = #tpu.dot_dimension_numbers<[1], [0], [0], [1], [0, 0, 1, 1], [], []>} : vector<2x32xf32>, vector<32x2xf32>, vector<2x2xf32> -> vector<2x2xf32>
    %c0_106 = arith.constant 0 : index
    %c0_107 = arith.constant 0 : index
    %71 = vector.load %arg7[%c0_106, %c0_107] : memref<1x2xf32, #tpu.memory_space<vmem>>, vector<1x2xf32>
    %72 = vector.broadcast %71 : vector<1x2xf32> to vector<2x2xf32>
    %73 = arith.addf %70, %72 : vector<2x2xf32>
    %cst_108 = arith.constant 0.000000e+00 : f32
    %74 = vector.broadcast %cst_108 : f32 to vector<2x2xf32>
    %75 = arith.cmpf ogt, %73, %74 : vector<2x2xf32>
    %cst_109 = arith.constant 2.000000e-01 : f32
    %76 = vector.broadcast %cst_109 : f32 to vector<2x2xf32>
    %77 = arith.mulf %76, %73 : vector<2x2xf32>
    %78 = arith.select %75, %73, %77 : vector<2x2xi1>, vector<2x2xf32>
    %c0_110 = arith.constant 0 : index
    %c0_111 = arith.constant 0 : index
    %79 = vector.load %arg8[%c0_110, %c0_111] : memref<2x32xf32, #tpu.memory_space<vmem>>, vector<2x32xf32>
    %cst_112 = arith.constant dense<0.000000e+00> : vector<2x32xf32>
    %80 = tpu.matmul %78, %79, %cst_112 {dimension_numbers = #tpu.dot_dimension_numbers<[1], [0], [0], [1], [0, 0, 1, 1], [], []>} : vector<2x2xf32>, vector<2x32xf32>, vector<2x32xf32> -> vector<2x32xf32>
    %c0_113 = arith.constant 0 : index
    %c0_114 = arith.constant 0 : index
    %81 = vector.load %arg9[%c0_113, %c0_114] : memref<1x32xf32, #tpu.memory_space<vmem>>, vector<1x32xf32>
    %82 = vector.broadcast %81 : vector<1x32xf32> to vector<2x32xf32>
    %83 = arith.addf %80, %82 : vector<2x32xf32>
    %cst_115 = arith.constant 0.000000e+00 : f32
    %84 = vector.broadcast %cst_115 : f32 to vector<2x32xf32>
    %85 = arith.subf %84, %83 : vector<2x32xf32>
    %86 = math.exp %85 : vector<2x32xf32>
    %cst_116 = arith.constant 1.000000e+00 : f32
    %87 = vector.broadcast %cst_116 : f32 to vector<2x32xf32>
    %88 = arith.addf %87, %86 : vector<2x32xf32>
    %89 = tpu.reciprocal %88 {approx = true} : vector<2x32xf32> -> vector<2x32xf32>
    %90 = vector.shape_cast %89 : vector<2x32xf32> to vector<2x1x32xf32>
    %91 = vector.broadcast %90 : vector<2x1x32xf32> to vector<2x256x32xf32>
    %92 = arith.mulf %65, %91 : vector<2x256x32xf32>
    %93 = vector.shape_cast %4 : vector<2x16x16x32xf32> to vector<2x256x32xf32>
    %94 = arith.addf %92, %93 : vector<2x256x32xf32>
    %95 = vector.shape_cast %94 : vector<2x256x32xf32> to vector<2x16x16x32xf32>
    %c0_117 = arith.constant 0 : index
    %c0_118 = arith.constant 0 : index
    %c0_119 = arith.constant 0 : index
    %c0_120 = arith.constant 0 : index
    %96 = vector.load %arg10[%c0_117, %c0_118, %c0_119, %c0_120] : memref<2x16x16x32xf32, #tpu.memory_space<vmem>>, vector<2x16x16x32xf32>
    tpu.vector_store %arg10[%c0_117, %c0_118, %c0_119, %c0_120], %95 {strides = array<i32>} : memref<2x16x16x32xf32, #tpu.memory_space<vmem>>, vector<2x16x16x32xf32>,
    return
  }
  func.func @transform_0(%arg0: i32) -> (i32, i32, i32, i32) {
    %c0_i32 = arith.constant 0 : i32
    %c0_i32_0 = arith.constant 0 : i32
    %c0_i32_1 = arith.constant 0 : i32
    %c0_i32_2 = arith.constant 0 : i32
    return %arg0, %c0_i32, %c0_i32_0, %c0_i32_1 : i32, i32, i32, i32
  }
  func.func @transform_1(%arg0: i32) -> (i32, i32) {
    %c0_i32 = arith.constant 0 : i32
    %c0_i32_0 = arith.constant 0 : i32
    %c0_i32_1 = arith.constant 0 : i32
    return %c0_i32, %c0_i32_0 : i32, i32
  }
  func.func @transform_2(%arg0: i32) -> (i32, i32) {
    %c0_i32 = arith.constant 0 : i32
    %c0_i32_0 = arith.constant 0 : i32
    %c0_i32_1 = arith.constant 0 : i32
    return %c0_i32, %c0_i32_0 : i32, i32
  }
  func.func @transform_3(%arg0: i32) -> (i32, i32) {
    %c0_i32 = arith.constant 0 : i32
    %c0_i32_0 = arith.constant 0 : i32
    %c0_i32_1 = arith.constant 0 : i32
    return %c0_i32, %c0_i32_0 : i32, i32
  }
  func.func @transform_4(%arg0: i32) -> (i32, i32) {
    %c0_i32 = arith.constant 0 : i32
    %c0_i32_0 = arith.constant 0 : i32
    %c0_i32_1 = arith.constant 0 : i32
    return %c0_i32, %c0_i32_0 : i32, i32
  }
  func.func @transform_5(%arg0: i32) -> (i32, i32) {
    %c0_i32 = arith.constant 0 : i32
    %c0_i32_0 = arith.constant 0 : i32
    %c0_i32_1 = arith.constant 0 : i32
    return %c0_i32, %c0_i32_0 : i32, i32
  }
  func.func @transform_6(%arg0: i32) -> (i32, i32) {
    %c0_i32 = arith.constant 0 : i32
    %c0_i32_0 = arith.constant 0 : i32
    %c0_i32_1 = arith.constant 0 : i32
    return %c0_i32, %c0_i32_0 : i32, i32
  }
  func.func @transform_7(%arg0: i32) -> (i32, i32) {
    %c0_i32 = arith.constant 0 : i32
    %c0_i32_0 = arith.constant 0 : i32
    %c0_i32_1 = arith.constant 0 : i32
    return %c0_i32, %c0_i32_0 : i32, i32
  }
  func.func @transform_8(%arg0: i32) -> (i32, i32) {
    %c0_i32 = arith.constant 0 : i32
    %c0_i32_0 = arith.constant 0 : i32
    %c0_i32_1 = arith.constant 0 : i32
    return %c0_i32, %c0_i32_0 : i32, i32
  }
  func.func @transform_9(%arg0: i32) -> (i32, i32, i32, i32) {
    %c0_i32 = arith.constant 0 : i32
    %c0_i32_0 = arith.constant 0 : i32
    %c0_i32_1 = arith.constant 0 : i32
    %c0_i32_2 = arith.constant 0 : i32
    return %arg0, %c0_i32, %c0_i32_0, %c0_i32_1 : i32, i32, i32, i32
  }
}

</mosaic_0001>

<bundles_post_ra>
// kernel: tpu_custom_call.1
= control target key start
LH: loop header
LB: loop body
LE: loop exit
PB: predicated region body
PF: predicated region fallthrough
CT: control target
= control target key end

     0   :  { %14 = vsyncpa [#allocation4], 0  ;;  %s16174_s0 = inlined_call_operand.hbm [shape: f32[4,16,16,32], index: 0, kind: input, shape index: {}]   ;;  %s16175_s1 = inlined_call_operand.vmem [shape: bf16[288,32], index: 1, kind: input, shape index: {}]   ;;  %s16176_s2 = inlined_call_operand.vmem [shape: f32[1,32], index: 2, kind: input, shape index: {}]   ;;  %s16177_s3 = inlined_call_operand.vmem [shape: bf16[288,32], index: 3, kind: input, shape index: {}]   ;;  %s16178_s4 = inlined_call_operand.vmem [shape: f32[1,32], index: 4, kind: input, shape index: {}]   ;;  %s16179_s5 = inlined_call_operand.vmem [shape: f32[32,2], index: 5, kind: input, shape index: {}]   ;;  %s16180_s6 = inlined_call_operand.vmem [shape: f32[1,2], index: 6, kind: input, shape index: {}]   ;;  %s16181_s7 = inlined_call_operand.vmem [shape: f32[2,32], index: 7, kind: input, shape index: {}]   ;;  %s16182_s8 = inlined_call_operand.vmem [shape: f32[1,32], index: 8, kind: input, shape index: {}]   ;;  %s16183_s9 = inlined_call_operand.hbm [shape: f32[4,16,16,32], index: 9, kind: output, shape index: {}]  }
   0x1   :  { %16 = vsyncpa [#allocation4 + $0x1], 0 }
   0x2   :  { %17 = vsyncpa [#allocation5], 0 }
   0x3   :  { %19 = vsyncpa [#allocation5 + $0x1], 0  ;;  %s11578_s30 = smov 0   ;;  %s11580_s10 = smov 0  }
   0x4   :  { %s11582_s11 = smov 0   ;;  %s11584_s12 = smov 0  }
   0x5 LB: > { %s11599_s13 = sadd.s32 4294967295, %s11512_s12   ;;  %s8932_s14 = sadd.s32 4294967294, %s11512_s12   ;;  %s11512_s12 = sphi %s11584_s12, %s16426_s12   ;;  %s11508_s11 = sphi %s11582_s11, %s16425_s11   ;;  %s11504_s10 = sphi %s11580_s10, %s16424_s10   ;;  %s11500_s30 = sphi %s11578_s30, %s16423_s30  }
   0x6   : > { %s11603_s15 = sadd.s32 1, %s11512_s12   ;;  %s32_s16 = sadd.s32 1, %s11508_s11 }
   0x7   : > { %s29_s17 = ssub.s32 %s11512_s12, %s11603_s15  ;;  %p39_p0 = scmp.ne.s32.totalorder %s11508_s11, %s11504_s10 }
   0x8   : > { %p30_p1 = scmp.eq.s32.totalorder %s29_s17, 0  ;;  %p40_p2 = scmp.eq.s32.totalorder %s11512_s12, 0 }
   0x9   : > { %p45_p3 = scmp.ne.s32.totalorder %s11504_s10, %s11500_s30  ;;  %p46_p4 = scmp.eq.s32.totalorder %s11599_s13, 0 }
   0xa   : > { %s11615_s18 = scalar_select %p30_p1, %s11508_s11, %s32_s16  }
   0xb   : > { %p11617_p5 = por %p40_p2, %p39_p0  ;;  %p11621_p6 = por %p46_p4, %p45_p3 }
   0xc   : > { %p237_p7 = scmp.eq.s32.totalorder %s11599_s13, 1  ;;  %p243_p8 = scmp.eq.s32.totalorder %s8932_s14, 1 }
   0xd   : > { %p9308_p10 = scmp.lt.s32.totalorder %s11512_s12, 2  ;;  %s287_s23 = sand.u32 1, %s11508_s11  }
   0xe   : > { %p11628_p11 = por %p237_p7, %p39_p0  ;;  %p11632_p12 = por %p243_p8, %p45_p3 }
   0xf   : > { %s9056_s24 = sshll.u32 %s11512_s12, 13  ;;  %s8935_s25 = sshll.u32 %s287_s23, 9 }
  0x10   : > { %s16242_s21 = scalar_select %p11628_p11, 1, 0 }
  0x11   : > { %s16243_s22 = scalar_select %p11632_p12, 1, 0 }
  0x12   : > { %s11641_s28 = scalar_lea.hbm %s16174_s0, %s9056_s24  ;;  %s291_s29 = scalar_lea.vmem [#allocation3], %s8935_s25 }
  0x13   : > { %s299_s14 = sshll.u32 %s291_s29, 4  ;;  %p11645_p13 = pnand %p9308_p10, %p11617_p5  ;;  %s11649_s14 = int_to_ptr.vmem [resolvable:$true] %s299_s14 }
  0x14   : > { %s11651_s17 = scalar_lea.sflag [#allocation4], %s287_s23  ;;  %s11416_s26 = scalar_lea.hbm %s11641_s28, 8192 }
  0x15   : > { %p11417_p0 = scmp.ne.s32.totalorder %s11641_s28, %s11416_s26  ;;  %p11418_p1 = pneg %p11645_p13 }
  0x16   : > { %s11421_s25 = scalar_lea.hbm %s16174_s0, 16384  ;;  %p11422_p4 = scmp.lt.u32.totalorder %s11641_s28, %s16174_s0 }
  0x17   : > { %p11419_p2 = pnand %p11418_p1, %p11417_p0  ;;  %p11423_p5 = scmp.lt.u32.totalorder %s11421_s25, %s11416_s26 }
  0x18   : > { %p11425_p8 = scmp.lt.u32.totalorder %s11416_s26, %s11641_s28 }
  0x19   : > { %p11420_p3 = pneg %p11419_p2  ;;  %p11424_p7 = por %p11423_p5, %p11422_p4 }
  0x1b   : > { %p11426_p10 = por %p11425_p8, %p11424_p7 }
  0x1d   : > { %p11427_p9 = pnand %p11426_p10, %p11420_p3 }
  0x1f   : > { %11430 = shalt.err (!%p11427_p9)
}
  0x20   : > { %s11431_s23 = scalar_lea.vmem %s11649_s14, 8192  ;;  %s11514_s24 = smov [#allocation3]  }
  0x21   : > { %p11432_p0 = scmp.ne.s32.totalorder %s11649_s14, %s11431_s23  ;;  %s11436_s19 = sshll.u32 %s11514_s24, 4  ;;  %s11437_s19 = int_to_ptr.vmem [resolvable:$false] %s11436_s19 }
  0x22   : > { %s11438_s27 = scalar_lea.vmem %s11437_s19, 16384  ;;  %p11439_p11 = scmp.lt.s32.totalorder %s11649_s14, %s11437_s19 }
  0x23   : > { %p11434_p2 = pnand %p11432_p0, %p11418_p1  ;;  %p11440_p4 = scmp.lt.s32.totalorder %s11438_s27, %s11431_s23 }
  0x25   : > { %p11435_p12 = pneg %p11434_p2  ;;  %p11441_p5 = por %p11440_p4, %p11439_p11 }
  0x27   : > { %p11442_p7 = pnand %p11441_p5, %p11435_p12 }
  0x29   : > { %11445 = shalt.err (!%p11442_p7)
}
  0x2a   : > { %s11515_s26 = smov 128   ;;  %s11516_s25 = smov 8  }
  0x2b   : > { %9303 = dma.hbm_to_vmem [thread:$0]  (!%p11645_p13), %s11641_s28, 8192, %s11649_s14, %s11651_s17, %s11515_s26, %s11515_s26, %s11516_s25  }
  0x2c   : > { %p8939_p9 = scmp.ge.s32.totalorder %s11512_s12, 1  ;;  %p307_p1 = scmp.lt.s32.totalorder %s11512_s12, 3 }
  0x2e   : > { %p308_p3 = pnand %p8939_p9, %p307_p1 }
  0x30   : > { %311 = sbr.rel (%p308_p3) target bundleno = 1849 (0x739), region = 56 }
  0x37   : > { %s11682_s29 = sand.u32 1, %s11504_s10  }
  0x38   : > { %s8940_s23 = sshll.u32 %s11682_s29, 9  ;;  %s314_s24 = scalar_lea.sflag [#allocation4], %s11682_s29 }
  0x39   : > { %s11688_s19 = scalar_lea.vmem [#allocation3], %s8940_s23 }
  0x3a   : > { %11491 = dma.done.wait (%p11621_p6), %s314_s24, 8192  }
  0x3b   : > { %11493 = vsyncadd (%p11621_p6), %s314_s24, 4294959104  ;;  %vm355_vm0 = vcmask 261120   ;;  %vm358_vm1 = vcmask 254976   ;;  %v16185_v0 = vmov 0.0   ;;  %v372_v1 = vld [vmem:[%s11688_s19 + $0x10] sm:$0xff]  ;;  %v373_v2 = vld [vmem:[%s11688_s19 + $0x18] sm:$0xff] }
  0x3c   : > { %356 = vst.msk [vmem:[#allocation2] sm:$0xff] %vm355_vm0, %v16185_v0  ;;  %357 = vst.msk [vmem:[#allocation2 + $0x8] sm:$0xff] %vm355_vm0, %v16185_v0  ;;  %vm498_vm2 = vcmask 1040384   ;;  %v370_v3 = vld [vmem:[%s11688_s19] sm:$0xff]  ;;  %v502_v6 = vrot.slane %v372_v1, 7  ;;  %v503_v7 = vrot.slane %v373_v2, 7 }
  0x3d   : > { %359 = vst.msk [vmem:[#allocation2 + $0x10] sm:$0x3] %vm358_vm1, %v16185_v0  ;;  %362 = vst.msk [vmem:[#allocation2 + $0x1c0] sm:$0x3] %vm358_vm1, %v16185_v0  ;;  %v371_v8 = vld [vmem:[%s11688_s19 + $0x8] sm:$0xff]  ;;  %v499_v9 = vrot.slane %v370_v3, 7 }
  0x3e   : > { %360 = vst.msk [vmem:[#allocation2 + $0x1b0] sm:$0xff] %vm355_vm0, %v16185_v0  ;;  %361 = vst.msk [vmem:[#allocation2 + $0x1b8] sm:$0xff] %vm355_vm0, %v16185_v0  ;;  %v500_v11 = vrot.slane %v371_v8, 7  ;;  %v374_v12 = vld [vmem:[%s11688_s19 + $0x20] sm:$0xff]  ;;  %v375_v13 = vld [vmem:[%s11688_s19 + $0x28] sm:$0xff]  ;;  %v504_v15 = vsel %vm498_vm2, %v502_v6, %v503_v7  ;;  %v692_v16 = vsel %vm498_vm2, 0.0, %v502_v6 }
  0x3f   : > { %364 = vst.msk [vmem:[#allocation2 + $0x198] sm:$0xff] %vm355_vm0, %v16185_v0  ;;  %365 = vst.msk [vmem:[#allocation2 + $0x1a0] sm:$0xff] %vm355_vm0, %v16185_v0  ;;  %v376_v14 = vld [vmem:[%s11688_s19 + $0x30] sm:$0xff]  ;;  %v724_v17 = vsel %vm498_vm2, %v503_v7, 0.0  ;;  %v691_v18 = vsel %vm498_vm2, 0.0, %v499_v9  ;;  %v377_v19 = vld [vmem:[%s11688_s19 + $0x38] sm:$0xff] }
  0x40   : > { %366 = vst.msk [vmem:[#allocation2 + $0x1a8] sm:$0x3] %vm358_vm1, %v16185_v0  ;;  %369 = vst.msk [vmem:[#allocation2 + $0x358] sm:$0x3] %vm358_vm1, %v16185_v0  ;;  %v378_v20 = vld [vmem:[%s11688_s19 + $0x40] sm:$0xff]  ;;  %v379_v21 = vld [vmem:[%s11688_s19 + $0x48] sm:$0xff]  ;;  %v501_v22 = vsel %vm498_vm2, %v499_v9, %v500_v11 }
  0x41   : > { %367 = vst.msk [vmem:[#allocation2 + $0x348] sm:$0xff] %vm355_vm0, %v16185_v0  ;;  %368 = vst.msk [vmem:[#allocation2 + $0x350] sm:$0xff] %vm355_vm0, %v16185_v0  ;;  %s11518_s20 = smov 32   ;;  %v723_v23 = vsel %vm498_vm2, %v500_v11, 0.0  ;;  %v505_v24 = vrot.slane %v374_v12, 7  ;;  %v506_v25 = vrot.slane %v375_v13, 7 }
  0x42   : > { %759 = vst.msk [vmem:[#allocation2 + $0x30] sm:$0xff] %vm355_vm0, %v692_v16  ;;  %760 = vst.msk [vmem:[#allocation2 + $0x38] sm:$0xff] %vm355_vm0, %v504_v15  ;;  %v380_v26 = vld [vmem:[%s11688_s19 + $0x50] sm:$0xff]  ;;  %v508_v27 = vrot.slane %v376_v14, 7  ;;  %v509_v28 = vrot.slane %v377_v19, 7  ;;  %v511_v29 = vrot.slane %v378_v20, 7 }
  0x43   : > { %v916_v4 = vld [vmem:[#allocation2 + $0x1] sm:$0xff]  ;;  %761 = vst.msk [vmem:[#allocation2 + $0x40] sm:$0x3] %vm358_vm1, %v724_v17  ;;  %758 = vst.msk [vmem:[#allocation2 + $0x28] sm:$0x3] %vm358_vm1, %v723_v23  ;;  %v512_v30 = vrot.slane %v379_v21, 7  ;;  %v507_v33 = vsel %vm498_vm2, %v505_v24, %v506_v25 }
  0x44   : > { %v917_v5 = vld [vmem:[#allocation2 + $0x9] sm:$0xff]  ;;  %756 = vst.msk [vmem:[#allocation2 + $0x18] sm:$0xff] %vm355_vm0, %v691_v18  ;;  %757 = vst.msk [vmem:[#allocation2 + $0x20] sm:$0xff] %vm355_vm0, %v501_v22  ;;  %v381_v31 = vld [vmem:[%s11688_s19 + $0x58] sm:$0xff]  ;;  %v693_v34 = vsel %vm498_vm2, 0.0, %v505_v24  ;;  %v725_v35 = vsel %vm498_vm2, %v506_v25, 0.0  ;;  %v510_v40 = vsel %vm498_vm2, %v508_v27, %v509_v28 }
  0x45   : > { %v9354_v10 = vpack.i.bf16 %v917_v5, %v916_v4  ;;  %v382_v32 = vld [vmem:[%s11688_s19 + $0x60] sm:$0xff]  ;;  %v514_v36 = vrot.slane %v380_v26, 7  ;;  %v383_v37 = vld [vmem:[%s11688_s19 + $0x68] sm:$0xff]  ;;  %v384_v38 = vld [vmem:[%s11688_s19 + $0x70] sm:$0xff]  ;;  %762 = vst.msk [vmem:[#allocation2 + $0x48] sm:$0xff] %vm355_vm0, %v693_v34  ;;  %v694_v41 = vsel %vm498_vm2, 0.0, %v508_v27  ;;  %v513_v43 = vsel %vm498_vm2, %v511_v29, %v512_v30 }
  0x46   : > { %v385_v39 = vld [vmem:[%s11688_s19 + $0x78] sm:$0xff]  ;;  %763 = vst.msk [vmem:[#allocation2 + $0x50] sm:$0xff] %vm355_vm0, %v507_v33  ;;  %v726_v42 = vsel %vm498_vm2, %v509_v28, 0.0  ;;  %v386_v44 = vld [vmem:[%s11688_s19 + $0x80] sm:$0xff]  ;;  %v387_v45 = vld [vmem:[%s11688_s19 + $0x88] sm:$0xff]  ;;  %v695_v46 = vsel %vm498_vm2, 0.0, %v511_v29 }
  0x47   : > { %9355 = vrot.lane.b32.xlu0 %v9354_v10, %s11518_s20  ;;  %764 = vst.msk [vmem:[#allocation2 + $0x58] sm:$0x3] %vm358_vm1, %v725_v35  ;;  %767 = vst.msk [vmem:[#allocation2 + $0x70] sm:$0x3] %vm358_vm1, %v726_v42  ;;  %v727_v47 = vsel %vm498_vm2, %v512_v30, 0.0  ;;  %v515_v48 = vrot.slane %v381_v31, 7 }
  0x48   : > { %765 = vst.msk [vmem:[#allocation2 + $0x60] sm:$0xff] %vm355_vm0, %v694_v41  ;;  %766 = vst.msk [vmem:[#allocation2 + $0x68] sm:$0xff] %vm355_vm0, %v510_v40  ;;  %v696_v49 = vsel %vm498_vm2, 0.0, %v514_v36  ;;  %v517_v50 = vrot.slane %v382_v32, 7  ;;  %v518_v51 = vrot.slane %v383_v37, 7  ;;  %v520_v52 = vrot.slane %v384_v38, 7 }
  0x49   : > { %769 = vst.msk [vmem:[#allocation2 + $0x80] sm:$0xff] %vm355_vm0, %v513_v43  ;;  %768 = vst.msk [vmem:[#allocation2 + $0x78] sm:$0xff] %vm355_vm0, %v695_v46  ;;  %v521_v53 = vrot.slane %v385_v39, 7  ;;  %v388_v54 = vld [vmem:[%s11688_s19 + $0x90] sm:$0xff]  ;;  %v389_v55 = vld [vmem:[%s11688_s19 + $0x98] sm:$0xff]  ;;  %v516_v56 = vsel %vm498_vm2, %v514_v36, %v515_v48  ;;  %v728_v57 = vsel %vm498_vm2, %v515_v48, 0.0 }
  0x4a   : > { %770 = vst.msk [vmem:[#allocation2 + $0x88] sm:$0x3] %vm358_vm1, %v727_v47  ;;  %v523_v58 = vrot.slane %v386_v44, 7  ;;  %v524_v59 = vrot.slane %v387_v45, 7  ;;  %v390_v60 = vld [vmem:[%s11688_s19 + $0xa0] sm:$0xff]  ;;  %v391_v61 = vld [vmem:[%s11688_s19 + $0xa8] sm:$0xff]  ;;  %v519_v2 = vsel %vm498_vm2, %v517_v50, %v518_v51 }
  0x4b   : > { %771 = vst.msk [vmem:[#allocation2 + $0x90] sm:$0xff] %vm355_vm0, %v696_v49  ;;  %v11776_v62 = vld [vmem:[%s11688_s19 + $0xb0] sm:$0xff]  ;;  %v921_v1 = vld [vmem:[#allocation2 + $0x39] sm:$0xff]  ;;  %772 = vst.msk [vmem:[#allocation2 + $0x98] sm:$0xff] %vm355_vm0, %v516_v56  ;;  %v697_v3 = vsel %vm498_vm2, 0.0, %v517_v50  ;;  %v729_v4 = vsel %vm498_vm2, %v518_v51, 0.0  ;;  %v522_v5 = vsel %vm498_vm2, %v520_v52, %v521_v53 }
  0x4c   : > { %v920_v63 = vld [vmem:[#allocation2 + $0x31] sm:$0xff]  ;;  %773 = vst.msk [vmem:[#allocation2 + $0xa0] sm:$0x3] %vm358_vm1, %v728_v57  ;;  %v918_v8 = vld [vmem:[#allocation2 + $0x19] sm:$0xff]  ;;  %v919_v9 = vld [vmem:[#allocation2 + $0x21] sm:$0xff]  ;;  %v698_v10 = vsel %vm498_vm2, 0.0, %v520_v52  ;;  %v525_v12 = vsel %vm498_vm2, %v523_v58, %v524_v59 }
  0x4d   : > { %v393_v6 = vld [vmem:[%s11688_s19 + $0xb8] sm:$0xff]  ;;  %v11785_v7 = vpack.i.bf16 %v921_v1, %v920_v63  ;;  %774 = vst.msk [vmem:[#allocation2 + $0xa8] sm:$0xff] %vm355_vm0, %v697_v3  ;;  %775 = vst.msk [vmem:[#allocation2 + $0xb0] sm:$0xff] %vm355_vm0, %v519_v2  ;;  %v730_v11 = vsel %vm498_vm2, %v521_v53, 0.0  ;;  %v11795_v13 = vld [vmem:[%s11688_s19 + $0xc0] sm:$0xff]  ;;  %v9359_v14 = vpack.i.bf16 %v919_v9, %v918_v8  ;;  %v699_v15 = vsel %vm498_vm2, 0.0, %v523_v58 }
  0x4e   : > { %776 = vst.msk [vmem:[#allocation2 + $0xb8] sm:$0x3] %vm358_vm1, %v729_v4  ;;  %779 = vst.msk [vmem:[#allocation2 + $0xd0] sm:$0x3] %vm358_vm1, %v730_v11  ;;  %v731_v16 = vsel %vm498_vm2, %v524_v59, 0.0  ;;  %v526_v17 = vrot.slane %v388_v54, 7 }
  0x4f   : > { %778 = vst.msk [vmem:[#allocation2 + $0xc8] sm:$0xff] %vm355_vm0, %v522_v5  ;;  %777 = vst.msk [vmem:[#allocation2 + $0xc0] sm:$0xff] %vm355_vm0, %v698_v10  ;;  %v395_v18 = vld [vmem:[%s11688_s19 + $0xc8] sm:$0xff]  ;;  %9365 = vrot.lane.b32.xlu1 %v11785_v7, %s11518_s20  ;;  %v923_v20 = vld [vmem:[#allocation2 + $0x51] sm:$0xff]  ;;  %v527_v21 = vrot.slane %v389_v55, 7  ;;  %v529_v22 = vrot.slane %v390_v60, 7  ;;  %9360 = vrot.lane.b32.xlu0 %v9359_v14, %s11518_s20 }
  0x50   : > { %781 = vst.msk [vmem:[#allocation2 + $0xe0] sm:$0xff] %vm355_vm0, %v525_v12  ;;  %v922_v19 = vld [vmem:[#allocation2 + $0x49] sm:$0xff]  ;;  %780 = vst.msk [vmem:[#allocation2 + $0xd8] sm:$0xff] %vm355_vm0, %v699_v15  ;;  %v530_v23 = vrot.slane %v391_v61, 7  ;;  %v532_v24 = vrot.slane %v11776_v62, 7  ;;  %v924_v27 = vld [vmem:[#allocation2 + $0x61] sm:$0xff] }
  0x51   : > { %782 = vst.msk [vmem:[#allocation2 + $0xe8] sm:$0x3] %vm358_vm1, %v731_v16  ;;  %v396_v25 = vld [vmem:[%s11688_s19 + $0xd0] sm:$0xff]  ;;  %v11810_v26 = vpack.i.bf16 %v923_v20, %v922_v19  ;;  %v700_v29 = vsel %vm498_vm2, 0.0, %v526_v17  ;;  %v533_v30 = vrot.slane %v393_v6, 7  ;;  %v535_v31 = vrot.slane %v11795_v13, 7 }
  0x52   : > { %v925_v28 = vld [vmem:[#allocation2 + $0x69] sm:$0xff]  ;;  %v397_v32 = vld [vmem:[%s11688_s19 + $0xd8] sm:$0xff]  ;;  %v927_v35 = vld [vmem:[#allocation2 + $0x81] sm:$0xff]  ;;  %v528_v36 = vsel %vm498_vm2, %v526_v17, %v527_v21  ;;  %v732_v37 = vsel %vm498_vm2, %v527_v21, 0.0  ;;  %783 = vst.msk [vmem:[#allocation2 + $0xf0] sm:$0xff] %vm355_vm0, %v700_v29  ;;  %v531_v38 = vsel %vm498_vm2, %v529_v22, %v530_v23  ;;  %v701_v41 = vsel %vm498_vm2, 0.0, %v529_v22 }
  0x53   : > { %v11815_v33 = vpack.i.bf16 %v925_v28, %v924_v27  ;;  %v926_v34 = vld [vmem:[#allocation2 + $0x79] sm:$0xff]  ;;  %784 = vst.msk [vmem:[#allocation2 + $0xf8] sm:$0xff] %vm355_vm0, %v528_v36  ;;  %v733_v42 = vsel %vm498_vm2, %v530_v23, 0.0  ;;  %787 = vst.msk [vmem:[#allocation2 + $0x110] sm:$0xff] %vm355_vm0, %v531_v38  ;;  %v534_v43 = vsel %vm498_vm2, %v532_v24, %v533_v30  ;;  %v399_v44 = vld [vmem:[%s11688_s19 + $0xe8] sm:$0xff]  ;;  %9370 = vrot.lane.b32.xlu1 %v11810_v26, %s11518_s20  ;;  %v702_v47 = vsel %vm498_vm2, 0.0, %v532_v24 }
  0x54   : > { %v398_v39 = vld [vmem:[%s11688_s19 + $0xe0] sm:$0xff]  ;;  %v11822_v40 = vpack.i.bf16 %v927_v35, %v926_v34  ;;  %785 = vst.msk [vmem:[#allocation2 + $0x100] sm:$0x3] %vm358_vm1, %v732_v37  ;;  %v928_v45 = vld [vmem:[#allocation2 + $0x91] sm:$0xff]  ;;  %788 = vst.msk [vmem:[#allocation2 + $0x118] sm:$0x3] %vm358_vm1, %v733_v42 }
  0x55   : > { %v929_v46 = vld [vmem:[#allocation2 + $0x99] sm:$0xff]  ;;  %786 = vst.msk [vmem:[#allocation2 + $0x108] sm:$0xff] %vm355_vm0, %v701_v41  ;;  %v734_v48 = vsel %vm498_vm2, %v533_v30, 0.0  ;;  %790 = vst.msk [vmem:[#allocation2 + $0x128] sm:$0xff] %vm355_vm0, %v534_v43  ;;  %v536_v49 = vrot.slane %v395_v18, 7  ;;  %v703_v50 = vsel %vm498_vm2, 0.0, %v535_v31  ;;  %9375 = vrot.lane.b32.xlu0 %v11815_v33, %s11518_s20 }
  0x56   : > { %v402_v51 = vld [vmem:[%s11688_s19 + $0x100] sm:$0xff]  ;;  %v403_v52 = vld [vmem:[%s11688_s19 + $0x108] sm:$0xff]  ;;  %v9384_v53 = vpack.i.bf16 %v929_v46, %v928_v45  ;;  %v931_v55 = vld [vmem:[#allocation2 + $0xb1] sm:$0xff]  ;;  %789 = vst.msk [vmem:[#allocation2 + $0x120] sm:$0xff] %vm355_vm0, %v702_v47  ;;  %v538_v56 = vrot.slane %v396_v25, 7  ;;  %v539_v57 = vrot.slane %v397_v32, 7 }
  0x57   : > { %v930_v54 = vld [vmem:[#allocation2 + $0xa9] sm:$0xff]  ;;  %791 = vst.msk [vmem:[#allocation2 + $0x130] sm:$0x3] %vm358_vm1, %v734_v48  ;;  %v541_v58 = vrot.slane %v398_v39, 7  ;;  %v932_v60 = vld [vmem:[#allocation2 + $0xc1] sm:$0xff]  ;;  %v537_v62 = vsel %vm498_vm2, %v535_v31, %v536_v49  ;;  %v735_v63 = vsel %vm498_vm2, %v536_v49, 0.0  ;;  %9380 = vrot.lane.b32.xlu1 %v11822_v40, %s11518_s20 }
  0x58   : > { %792 = vst.msk [vmem:[#allocation2 + $0x138] sm:$0xff] %vm355_vm0, %v703_v50  ;;  %v404_v59 = vld [vmem:[%s11688_s19 + $0x110] sm:$0xff]  ;;  %v542_v1 = vrot.slane %v399_v44, 7  ;;  %v405_v2 = vld [vmem:[%s11688_s19 + $0x118] sm:$0xff]  ;;  %793 = vst.msk [vmem:[#allocation2 + $0x140] sm:$0xff] %vm355_vm0, %v537_v62  ;;  %v540_v3 = vsel %vm498_vm2, %v538_v56, %v539_v57  ;;  %v704_v4 = vsel %vm498_vm2, 0.0, %v538_v56  ;;  %v9389_v10 = vpack.i.bf16 %v931_v55, %v930_v54 }
  0x59   : > { %v933_v61 = vld [vmem:[#allocation2 + $0xc9] sm:$0xff]  ;;  %794 = vst.msk [vmem:[#allocation2 + $0x148] sm:$0x3] %vm358_vm1, %v735_v63  ;;  %v736_v5 = vsel %vm498_vm2, %v539_v57, 0.0  ;;  %v406_v6 = vld [vmem:[%s11688_s19 + $0x120] sm:$0xff]  ;;  %v705_v12 = vsel %vm498_vm2, 0.0, %v541_v58  ;;  %9385 = vrot.lane.b32.xlu0 %v9384_v53, %s11518_s20 }
  0x5a   : > { %v407_v8 = vld [vmem:[%s11688_s19 + $0x128] sm:$0xff]  ;;  %v11858_v9 = vld [vmem:[%s11688_s19 + $0x130] sm:$0xff]  ;;  %795 = vst.msk [vmem:[#allocation2 + $0x150] sm:$0xff] %vm355_vm0, %v704_v4  ;;  %796 = vst.msk [vmem:[#allocation2 + $0x158] sm:$0xff] %vm355_vm0, %v540_v3  ;;  %v543_v11 = vsel %vm498_vm2, %v541_v58, %v542_v1  ;;  %v737_v13 = vsel %vm498_vm2, %v542_v1, 0.0  ;;  %v9394_v14 = vpack.i.bf16 %v933_v61, %v932_v60  ;;  %v547_v17 = vrot.slane %v402_v51, 7 }
  0x5b   : > { %797 = vst.msk [vmem:[#allocation2 + $0x160] sm:$0x3] %vm358_vm1, %v736_v5  ;;  %v934_v15 = vld [vmem:[#allocation2 + $0xd9] sm:$0xff]  ;;  %v935_v16 = vld [vmem:[#allocation2 + $0xe1] sm:$0xff]  ;;  %800 = vst.msk [vmem:[#allocation2 + $0x178] sm:$0x3] %vm358_vm1, %v737_v13  ;;  %9390 = vrot.lane.b32.xlu1 %v9389_v10, %s11518_s20 }
  0x5c   : > { %798 = vst.msk [vmem:[#allocation2 + $0x168] sm:$0xff] %vm355_vm0, %v705_v12  ;;  %799 = vst.msk [vmem:[#allocation2 + $0x170] sm:$0xff] %vm355_vm0, %v543_v11  ;;  %v548_v18 = vrot.slane %v403_v52, 7  ;;  %v550_v19 = vrot.slane %v404_v59, 7  ;;  %v936_v20 = vld [vmem:[#allocation2 + $0xf1] sm:$0xff]  ;;  %v937_v21 = vld [vmem:[#allocation2 + $0xf9] sm:$0xff]  ;;  %v9399_v34 = vpack.i.bf16 %v935_v16, %v934_v15 }
  0x5d   : > { %v551_v22 = vrot.slane %v405_v2, 7  ;;  %v553_v23 = vrot.slane %v406_v6, 7  ;;  %v554_v24 = vrot.slane %v407_v8, 7  ;;  %v556_v25 = vrot.slane %v11858_v9, 7  ;;  %v409_v30 = vld [vmem:[%s11688_s19 + $0x138] sm:$0xff]  ;;  %v410_v31 = vld [vmem:[%s11688_s19 + $0x140] sm:$0xff]  ;;  %9395 = vrot.lane.b32.xlu0 %v9394_v14, %s11518_s20 }
  0x5e   : > { %v549_v27 = vsel %vm498_vm2, %v547_v17, %v548_v18  ;;  %v707_v28 = vsel %vm498_vm2, 0.0, %v547_v17  ;;  %v739_v29 = vsel %vm498_vm2, %v548_v18, 0.0  ;;  %v411_v32 = vld [vmem:[%s11688_s19 + $0x148] sm:$0xff]  ;;  %v708_v36 = vsel %vm498_vm2, 0.0, %v550_v19  ;;  %v412_v38 = vld [vmem:[%s11688_s19 + $0x150] sm:$0xff]  ;;  %v413_v39 = vld [vmem:[%s11688_s19 + $0x158] sm:$0xff] }
  0x5f   : > { %804 = vst.msk [vmem:[#allocation2 + $0x1c8] sm:$0xff] %vm355_vm0, %v707_v28  ;;  %805 = vst.msk [vmem:[#allocation2 + $0x1d0] sm:$0xff] %vm355_vm0, %v549_v27  ;;  %v552_v35 = vsel %vm498_vm2, %v550_v19, %v551_v22  ;;  %v740_v37 = vsel %vm498_vm2, %v551_v22, 0.0  ;;  %v11889_v41 = vld [vmem:[%s11688_s19 + $0x160] sm:$0xff]  ;;  %v9404_v42 = vpack.i.bf16 %v937_v21, %v936_v20  ;;  %v938_v43 = vld [vmem:[#allocation2 + $0x109] sm:$0xff]  ;;  %v555_v45 = vsel %vm498_vm2, %v553_v23, %v554_v24  ;;  %s11520_s27 = smov 64  }
  0x60   : > { %806 = vst.msk [vmem:[#allocation2 + $0x1d8] sm:$0x3] %vm358_vm1, %v739_v29  ;;  %v939_v44 = vld [vmem:[#allocation2 + $0x111] sm:$0xff]  ;;  %809 = vst.msk [vmem:[#allocation2 + $0x1f0] sm:$0x3] %vm358_vm1, %v740_v37  ;;  %v709_v46 = vsel %vm498_vm2, 0.0, %v553_v23  ;;  %9400 = vrot.lane.b32.xlu1 %v9399_v34, %s11518_s20 }
  0x61   : > { %807 = vst.msk [vmem:[#allocation2 + $0x1e0] sm:$0xff] %vm355_vm0, %v708_v36  ;;  %808 = vst.msk [vmem:[#allocation2 + $0x1e8] sm:$0xff] %vm355_vm0, %v552_v35  ;;  %v741_v47 = vsel %vm498_vm2, %v554_v24, 0.0  ;;  %v940_v48 = vld [vmem:[#allocation2 + $0x121] sm:$0xff]  ;;  %v941_v49 = vld [vmem:[#allocation2 + $0x129] sm:$0xff]  ;;  %v557_v50 = vrot.slane %v409_v30, 7  ;;  %v9409_v59 = vpack.i.bf16 %v939_v44, %v938_v43  ;;  %9405 = vrot.lane.b32.xlu0 %v9404_v42, %s11518_s20 }
  0x62   : > { %810 = vst.msk [vmem:[#allocation2 + $0x1f8] sm:$0xff] %vm355_vm0, %v709_v46  ;;  %811 = vst.msk [vmem:[#allocation2 + $0x200] sm:$0xff] %vm355_vm0, %v555_v45  ;;  %v710_v51 = vsel %vm498_vm2, 0.0, %v556_v25  ;;  %v559_v52 = vrot.slane %v410_v31, 7  ;;  %v560_v53 = vrot.slane %v411_v32, 7  ;;  %v562_v54 = vrot.slane %v412_v38, 7 }
  0x63   : > { %812 = vst.msk [vmem:[#allocation2 + $0x208] sm:$0x3] %vm358_vm1, %v741_v47  ;;  %v563_v55 = vrot.slane %v413_v39, 7  ;;  %v415_v56 = vld [vmem:[%s11688_s19 + $0x168] sm:$0xff]  ;;  %v565_v57 = vrot.slane %v11889_v41, 7  ;;  %v416_v58 = vld [vmem:[%s11688_s19 + $0x170] sm:$0xff]  ;;  %v558_v60 = vsel %vm498_vm2, %v556_v25, %v557_v50  ;;  %v9414_v3 = vpack.i.bf16 %v941_v49, %v940_v48 }
  0x64   : > { %813 = vst.msk [vmem:[#allocation2 + $0x210] sm:$0xff] %vm355_vm0, %v710_v51  ;;  %v742_v61 = vsel %vm498_vm2, %v557_v50, 0.0  ;;  %v561_v62 = vsel %vm498_vm2, %v559_v52, %v560_v53  ;;  %v417_v63 = vld [vmem:[%s11688_s19 + $0x178] sm:$0xff]  ;;  %v418_v1 = vld [vmem:[%s11688_s19 + $0x180] sm:$0xff]  ;;  %v419_v2 = vld [vmem:[%s11688_s19 + $0x188] sm:$0xff]  ;;  %v711_v6 = vsel %vm498_vm2, 0.0, %v559_v52  ;;  %9410 = vrot.lane.b32.xlu1 %v9409_v59, %s11518_s20 }
  0x65   : > { %v942_v4 = vld [vmem:[#allocation2 + $0x139] sm:$0xff]  ;;  %v943_v5 = vld [vmem:[#allocation2 + $0x141] sm:$0xff]  ;;  %814 = vst.msk [vmem:[#allocation2 + $0x218] sm:$0xff] %vm355_vm0, %v558_v60  ;;  %v743_v8 = vsel %vm498_vm2, %v560_v53, 0.0  ;;  %817 = vst.msk [vmem:[#allocation2 + $0x230] sm:$0xff] %vm355_vm0, %v561_v62  ;;  %v564_v9 = vsel %vm498_vm2, %v562_v54, %v563_v55  ;;  %v712_v13 = vsel %vm498_vm2, 0.0, %v562_v54  ;;  %9415 = vrot.lane.b32.xlu0 %v9414_v3, %s11518_s20 }
  0x66   : > { %815 = vst.msk [vmem:[#allocation2 + $0x220] sm:$0x3] %vm358_vm1, %v742_v61  ;;  %v11921_v10 = vld [vmem:[%s11688_s19 + $0x190] sm:$0xff]  ;;  %v945_v12 = vld [vmem:[#allocation2 + $0x159] sm:$0xff]  ;;  %818 = vst.msk [vmem:[#allocation2 + $0x238] sm:$0x3] %vm358_vm1, %v743_v8  ;;  %v9419_v24 = vpack.i.bf16 %v943_v5, %v942_v4 }
  0x67   : > { %v944_v11 = vld [vmem:[#allocation2 + $0x151] sm:$0xff]  ;;  %816 = vst.msk [vmem:[#allocation2 + $0x228] sm:$0xff] %vm355_vm0, %v711_v6  ;;  %v744_v14 = vsel %vm498_vm2, %v563_v55, 0.0  ;;  %820 = vst.msk [vmem:[#allocation2 + $0x248] sm:$0xff] %vm355_vm0, %v564_v9  ;;  %v566_v15 = vrot.slane %v415_v56, 7  ;;  %v713_v16 = vsel %vm498_vm2, 0.0, %v565_v57 }
  0x68   : > { %v421_v17 = vld [vmem:[%s11688_s19 + $0x198] sm:$0xff]  ;;  %v11930_v18 = vld [vmem:[#allocation2 + $0x169] sm:$0xff]  ;;  %819 = vst.msk [vmem:[#allocation2 + $0x240] sm:$0xff] %vm355_vm0, %v712_v13  ;;  %822 = vst.msk [vmem:[#allocation2 + $0x258] sm:$0xff] %vm355_vm0, %v713_v16  ;;  %v568_v20 = vrot.slane %v416_v58, 7  ;;  %v569_v21 = vrot.slane %v417_v63, 7  ;;  %v9424_v32 = vpack.i.bf16 %v945_v12, %v944_v11  ;;  %9420 = vrot.lane.b32.xlu1 %v9419_v24, %s11518_s20 }
  0x69   : > { %v11932_v19 = vld [vmem:[#allocation2 + $0x171] sm:$0xff]  ;;  %821 = vst.msk [vmem:[#allocation2 + $0x250] sm:$0x3] %vm358_vm1, %v744_v14  ;;  %v571_v22 = vrot.slane %v418_v1, 7  ;;  %v572_v23 = vrot.slane %v419_v2, 7  ;;  %v567_v25 = vsel %vm498_vm2, %v565_v57, %v566_v15  ;;  %v745_v27 = vsel %vm498_vm2, %v566_v15, 0.0 }
  0x6a   : > { %v574_v28 = vrot.slane %v11921_v10, 7  ;;  %v422_v29 = vld [vmem:[%s11688_s19 + $0x1a0] sm:$0xff]  ;;  %v423_v30 = vld [vmem:[%s11688_s19 + $0x1a8] sm:$0xff]  ;;  %v424_v31 = vld [vmem:[%s11688_s19 + $0x1b0] sm:$0xff]  ;;  %823 = vst.msk [vmem:[#allocation2 + $0x260] sm:$0xff] %vm355_vm0, %v567_v25  ;;  %v570_v34 = vsel %vm498_vm2, %v568_v20, %v569_v21  ;;  %v714_v35 = vsel %vm498_vm2, 0.0, %v568_v20  ;;  %v9429_v41 = vpack.i.bf16 %v11932_v19, %v11930_v18  ;;  %9425 = vrot.lane.b32.xlu0 %v9424_v32, %s11518_s20 }
  0x6b   : > { %824 = vst.msk [vmem:[#allocation2 + $0x268] sm:$0x3] %vm358_vm1, %v745_v27  ;;  %v746_v36 = vsel %vm498_vm2, %v569_v21, 0.0  ;;  %v425_v37 = vld [vmem:[%s11688_s19 + $0x1b8] sm:$0xff]  ;;  %v426_v38 = vld [vmem:[%s11688_s19 + $0x1c0] sm:$0xff]  ;;  %v427_v39 = vld [vmem:[%s11688_s19 + $0x1c8] sm:$0xff]  ;;  %v573_v44 = vsel %vm498_vm2, %v571_v22, %v572_v23 }
  0x6c   : > { %v948_v42 = vld [vmem:[#allocation2 + $0x1b1] sm:$0xff]  ;;  %v949_v43 = vld [vmem:[#allocation2 + $0x1b9] sm:$0xff]  ;;  %825 = vst.msk [vmem:[#allocation2 + $0x270] sm:$0xff] %vm355_vm0, %v714_v35  ;;  %826 = vst.msk [vmem:[#allocation2 + $0x278] sm:$0xff] %vm355_vm0, %v570_v34  ;;  %v715_v45 = vsel %vm498_vm2, 0.0, %v571_v22  ;;  %v747_v46 = vsel %vm498_vm2, %v572_v23, 0.0  ;;  %9430 = vrot.lane.b32.xlu1 %v9429_v41, %s11518_s20 }
  0x6d   : > { %827 = vst.msk [vmem:[#allocation2 + $0x280] sm:$0x3] %vm358_vm1, %v746_v36  ;;  %830 = vst.msk [vmem:[#allocation2 + $0x298] sm:$0x3] %vm358_vm1, %v747_v46  ;;  %v575_v47 = vrot.slane %v421_v17, 7  ;;  %v716_v48 = vsel %vm498_vm2, 0.0, %v574_v28  ;;  %v9434_v57 = vpack.i.bf16 %v949_v43, %v948_v42 }
  0x6e   : > { %828 = vst.msk [vmem:[#allocation2 + $0x288] sm:$0xff] %vm355_vm0, %v715_v45  ;;  %829 = vst.msk [vmem:[#allocation2 + $0x290] sm:$0xff] %vm355_vm0, %v573_v44  ;;  %v577_v49 = vrot.slane %v422_v29, 7  ;;  %v578_v50 = vrot.slane %v423_v30, 7  ;;  %v950_v51 = vld [vmem:[#allocation2 + $0x1c9] sm:$0xff]  ;;  %v951_v52 = vld [vmem:[#allocation2 + $0x1d1] sm:$0xff] }
  0x6f   : > { %831 = vst.msk [vmem:[#allocation2 + $0x2a0] sm:$0xff] %vm355_vm0, %v716_v48  ;;  %v580_v53 = vrot.slane %v424_v31, 7  ;;  %v581_v54 = vrot.slane %v425_v37, 7  ;;  %v583_v55 = vrot.slane %v426_v38, 7  ;;  %v584_v56 = vrot.slane %v427_v39, 7  ;;  %v952_v58 = vld [vmem:[#allocation2 + $0x1e1] sm:$0xff]  ;;  %9435 = vrot.lane.b32.xlu0 %v9434_v57, %s11518_s20 }
  0x70   : > { %v576_v59 = vsel %vm498_vm2, %v574_v28, %v575_v47  ;;  %v748_v60 = vsel %vm498_vm2, %v575_v47, 0.0  ;;  %v579_v61 = vsel %vm498_vm2, %v577_v49, %v578_v50  ;;  %v428_v62 = vld [vmem:[%s11688_s19 + $0x1d0] sm:$0xff]  ;;  %v429_v63 = vld [vmem:[%s11688_s19 + $0x1d8] sm:$0xff]  ;;  %v717_v2 = vsel %vm498_vm2, 0.0, %v577_v49  ;;  %v430_v5 = vld [vmem:[%s11688_s19 + $0x1e0] sm:$0xff]  ;;  %s11521_s17 = smov 96  }
  0x71   : > { %v953_v1 = vld [vmem:[#allocation2 + $0x1e9] sm:$0xff]  ;;  %832 = vst.msk [vmem:[#allocation2 + $0x2a8] sm:$0xff] %vm355_vm0, %v576_v59  ;;  %v749_v3 = vsel %vm498_vm2, %v578_v50, 0.0  ;;  %835 = vst.msk [vmem:[#allocation2 + $0x2c0] sm:$0xff] %vm355_vm0, %v579_v61  ;;  %v582_v4 = vsel %vm498_vm2, %v580_v53, %v581_v54  ;;  %v9439_v8 = vpack.i.bf16 %v951_v52, %v950_v51  ;;  %v718_v9 = vsel %vm498_vm2, 0.0, %v580_v53  ;;  %v954_v17 = vld [vmem:[#allocation2 + $0x1f9] sm:$0xff] }
  0x72   : > { %833 = vst.msk [vmem:[#allocation2 + $0x2b0] sm:$0x3] %vm358_vm1, %v748_v60  ;;  %v431_v6 = vld [vmem:[%s11688_s19 + $0x1e8] sm:$0xff]  ;;  %836 = vst.msk [vmem:[#allocation2 + $0x2c8] sm:$0x3] %vm358_vm1, %v749_v3  ;;  %v750_v10 = vsel %vm498_vm2, %v581_v54, 0.0  ;;  %v585_v11 = vsel %vm498_vm2, %v583_v55, %v584_v56  ;;  %v9444_v16 = vpack.i.bf16 %v953_v1, %v952_v58 }
  0x73   : > { %834 = vst.msk [vmem:[#allocation2 + $0x2b8] sm:$0xff] %vm355_vm0, %v717_v2  ;;  %838 = vst.msk [vmem:[#allocation2 + $0x2d8] sm:$0xff] %vm355_vm0, %v582_v4  ;;  %v719_v12 = vsel %vm498_vm2, 0.0, %v583_v55  ;;  %v751_v13 = vsel %vm498_vm2, %v584_v56, 0.0  ;;  %v586_v14 = vrot.slane %v428_v62, 7  ;;  %v587_v15 = vrot.slane %v429_v63, 7  ;;  %9440 = vrot.lane.b32.xlu1 %v9439_v8, %s11518_s20 }
  0x74   : > { %837 = vst.msk [vmem:[#allocation2 + $0x2d0] sm:$0xff] %vm355_vm0, %v718_v9  ;;  %841 = vst.msk [vmem:[#allocation2 + $0x2f0] sm:$0xff] %vm355_vm0, %v585_v11  ;;  %v955_v18 = vld [vmem:[#allocation2 + $0x201] sm:$0xff]  ;;  %v589_v19 = vrot.slane %v430_v5, 7  ;;  %v590_v20 = vrot.slane %v431_v6, 7  ;;  %v956_v21 = vld [vmem:[#allocation2 + $0x211] sm:$0xff]  ;;  %9445 = vrot.lane.b32.xlu0 %v9444_v16, %s11518_s20 }
  0x75   : > { %839 = vst.msk [vmem:[#allocation2 + $0x2e0] sm:$0x3] %vm358_vm1, %v750_v10  ;;  %842 = vst.msk [vmem:[#allocation2 + $0x2f8] sm:$0x3] %vm358_vm1, %v751_v13  ;;  %v957_v22 = vld [vmem:[#allocation2 + $0x219] sm:$0xff]  ;;  %v588_v23 = vsel %vm498_vm2, %v586_v14, %v587_v15  ;;  %v720_v24 = vsel %vm498_vm2, 0.0, %v586_v14  ;;  %v9449_v30 = vpack.i.bf16 %v955_v18, %v954_v17 }
  0x76   : > { %840 = vst.msk [vmem:[#allocation2 + $0x2e8] sm:$0xff] %vm355_vm0, %v719_v12  ;;  %v752_v25 = vsel %vm498_vm2, %v587_v15, 0.0  ;;  %843 = vst.msk [vmem:[#allocation2 + $0x300] sm:$0xff] %vm355_vm0, %v720_v24  ;;  %v591_v27 = vsel %vm498_vm2, %v589_v19, %v590_v20  ;;  %v721_v28 = vsel %vm498_vm2, 0.0, %v589_v19  ;;  %v753_v29 = vsel %vm498_vm2, %v590_v20, 0.0  ;;  %v958_v32 = vld [vmem:[#allocation2 + $0x229] sm:$0xff] }
  0x77   : > { %844 = vst.msk [vmem:[#allocation2 + $0x308] sm:$0xff] %vm355_vm0, %v588_v23  ;;  %846 = vst.msk [vmem:[#allocation2 + $0x318] sm:$0xff] %vm355_vm0, %v721_v28  ;;  %v9454_v31 = vpack.i.bf16 %v957_v22, %v956_v21  ;;  %v959_v34 = vld [vmem:[#allocation2 + $0x231] sm:$0xff]  ;;  %v960_v35 = vld [vmem:[#allocation2 + $0x241] sm:$0xff]  ;;  %v16187_v37 = vmov 0   ;;  %9450 = vrot.lane.b32.xlu1 %v9449_v30, %s11518_s20  ;;  %vm3029_vm3 = vcmask 523264  }
  0x78   : > { %845 = vst.msk [vmem:[#allocation2 + $0x310] sm:$0x3] %vm358_vm1, %v752_v25  ;;  %848 = vst.msk [vmem:[#allocation2 + $0x328] sm:$0x3] %vm358_vm1, %v753_v29  ;;  %v961_v36 = vld [vmem:[#allocation2 + $0x249] sm:$0xff]  ;;  %3694 = vmatprep.subr.bf16.mxu0 %v16187_v37  ;;  %v9459_v38 = vpack.i.bf16 %v959_v34, %v958_v32  ;;  %v962_v41 = vld [vmem:[#allocation2 + $0x259] sm:$0xff] }
  0x79   : > { %847 = vst.msk [vmem:[#allocation2 + $0x320] sm:$0xff] %vm355_vm0, %v591_v27  ;;  %9455 = vrot.lane.b32.xlu0 %v9454_v31, %s11518_s20  ;;  %v9464_v39 = vpack.i.bf16 %v961_v36, %v960_v35  ;;  %v963_v42 = vld [vmem:[#allocation2 + $0x261] sm:$0xff]  ;;  %v964_v43 = vld [vmem:[#allocation2 + $0x271] sm:$0xff]  ;;  %v965_v44 = vld [vmem:[#allocation2 + $0x279] sm:$0xff]  ;;  %vm3094_vm4 = vcmask 785408   ;;  %s15883_s24 = scalar_lea.vmem [#allocation6], %s8940_s23 }
  0x7a   : > { %v9469_v45 = vpack.i.bf16 %v963_v42, %v962_v41  ;;  %v9474_v46 = vpack.i.bf16 %v965_v44, %v964_v43  ;;  %v966_v47 = vld [vmem:[#allocation2 + $0x289] sm:$0xff]  ;;  %v967_v48 = vld [vmem:[#allocation2 + $0x291] sm:$0xff]  ;;  %v968_v49 = vld [vmem:[#allocation2 + $0x2a1] sm:$0xff]  ;;  %s9058_s23 = sshll.u32 %s11599_s13, 13  ;;  %s8859_s28 = sshll.u32 %s15883_s24, 4  ;;  %s16110_s28 = int_to_ptr.vmem [resolvable:$true] %s8859_s28 }
  0x7b   : > { %9460 = vrot.lane.b32.xlu1 %v9459_v38, %s11518_s20  ;;  %v969_v50 = vld [vmem:[#allocation2 + $0x2a9] sm:$0xff]  ;;  %v9479_v51 = vpack.i.bf16 %v967_v48, %v966_v47  ;;  %v970_v53 = vld [vmem:[#allocation2 + $0x2b9] sm:$0xff]  ;;  %v971_v54 = vld [vmem:[#allocation2 + $0x2c1] sm:$0xff]  ;;  %s8845_s13 = scalar_lea.sflag [#allocation5], %s11682_s29  ;;  %p16420_p11 = scmp.ne.s32.totalorder %s16242_s21, 0 }
  0x7c   : > { %v9484_v52 = vpack.i.bf16 %v969_v50, %v968_v49  ;;  %v972_v55 = vld [vmem:[#allocation2 + $0x2d1] sm:$0xff]  ;;  %v973_v56 = vld [vmem:[#allocation2 + $0x2d9] sm:$0xff]  ;;  %v9489_v57 = vpack.i.bf16 %v971_v54, %v970_v53  ;;  %v980_v4 = vld [vmem:[#allocation2 + $0x2] sm:$0xff]  ;;  %s11525_s14 = smov [#allocation6]  }
  0x7d   : > { %9465 = vrot.lane.b32.xlu0 %v9464_v39, %s11518_s20  ;;  %v9494_v58 = vpack.i.bf16 %v973_v56, %v972_v55  ;;  %v974_v59 = vld [vmem:[#allocation2 + $0x2e9] sm:$0xff]  ;;  %v975_v60 = vld [vmem:[#allocation2 + $0x2f1] sm:$0xff]  ;;  %v982_v8 = vld [vmem:[#allocation2 + $0x1a] sm:$0xff]  ;;  %s11450_s16 = sshll.u32 %s11525_s14, 4  ;;  %s11451_s16 = int_to_ptr.vmem [resolvable:$false] %s11450_s16 }
  0x7e   : > { %v976_v61 = vld [vmem:[#allocation2 + $0x301] sm:$0xff]  ;;  %v9499_v63 = vpack.i.bf16 %v975_v60, %v974_v59  ;;  %v981_v5 = vld [vmem:[#allocation2 + $0xa] sm:$0xff]  ;;  %v984_v11 = vld [vmem:[#allocation2 + $0x32] sm:$0xff]  ;;  %s11452_s26 = scalar_lea.vmem %s11451_s16, 16384  ;;  %p11453_p8 = scmp.lt.s32.totalorder %s16110_s28, %s11451_s16 }
  0x7f   : > { %9470 = vrot.lane.b32.xlu1 %v9469_v45, %s11518_s20  ;;  %v977_v62 = vld [vmem:[#allocation2 + $0x309] sm:$0xff]  ;;  %v9514_v9 = vpack.i.bf16 %v981_v5, %v980_v4  ;;  %v985_v12 = vld [vmem:[#allocation2 + $0x3a] sm:$0xff]  ;;  %v987_v18 = vld [vmem:[#allocation2 + $0x52] sm:$0xff] }
  0x80   : > { %v9504_v1 = vpack.i.bf16 %v977_v62, %v976_v61  ;;  %v978_v2 = vld [vmem:[#allocation2 + $0x319] sm:$0xff]  ;;  %v979_v3 = vld [vmem:[#allocation2 + $0x321] sm:$0xff]  ;;  %v12033_v16 = vpack.i.bf16 %v985_v12, %v984_v11  ;;  %v986_v17 = vld [vmem:[#allocation2 + $0x4a] sm:$0xff] }
  0x81   : > { %9475 = vrot.lane.b32.xlu0 %v9474_v46, %s11518_s20  ;;  %v9509_v6 = vpack.i.bf16 %v979_v3, %v978_v2  ;;  %v983_v10 = vld [vmem:[#allocation2 + $0x22] sm:$0xff]  ;;  %v989_v20 = vld [vmem:[#allocation2 + $0x6a] sm:$0xff]  ;;  %v12038_v21 = vpack.i.bf16 %v987_v18, %v986_v17  ;;  %v990_v22 = vld [vmem:[#allocation2 + $0x7a] sm:$0xff] }
  0x82   : > { %v11274_v13 = vld [vmem:[%s16175_s1] sm:$0xff]   ;;  %v12027_v14 = vpack.i.bf16 %v983_v10, %v982_v8  ;;  %v11275_v15 = vld [vmem:[%s16175_s1 + $0x8] sm:$0xff]   ;;  %v11276_v23 = vld [vmem:[%s16175_s1 + $0x10] sm:$0xff]  }
  0x83   : > { %9480 = vrot.lane.b32.xlu1 %v9479_v51, %s11518_s20  ;;  %3695 = vmatpush1.bf16.msra.mxu0 %v11274_v13  ;;  %v988_v19 = vld [vmem:[#allocation2 + $0x62] sm:$0xff]  ;;  %v992_v27 = vld [vmem:[#allocation2 + $0x92] sm:$0xff]  ;;  %v993_v28 = vld [vmem:[#allocation2 + $0x9a] sm:$0xff] }
  0x84   : > { %3696 = vmatprep.subr.bf16.mxu0 %v16187_v37  ;;  %v12045_v24 = vpack.i.bf16 %v989_v20, %v988_v19  ;;  %v991_v25 = vld [vmem:[#allocation2 + $0x82] sm:$0xff]  ;;  %v11277_v30 = vld [vmem:[%s16175_s1 + $0x18] sm:$0xff]   ;;  %v12057_v31 = vpack.i.bf16 %v993_v28, %v992_v27  ;;  %v994_v32 = vld [vmem:[#allocation2 + $0xaa] sm:$0xff] }
  0x85   : > { %9485 = vrot.lane.b32.xlu0 %v9484_v52, %s11518_s20  ;;  %v12050_v29 = vpack.i.bf16 %v991_v25, %v990_v22  ;;  %v995_v34 = vld [vmem:[#allocation2 + $0xb2] sm:$0xff]  ;;  %v996_v35 = vld [vmem:[#allocation2 + $0xc2] sm:$0xff]  ;;  %v997_v36 = vld [vmem:[#allocation2 + $0xca] sm:$0xff] }
  0x86   : > { %v12062_v38 = vpack.i.bf16 %v995_v34, %v994_v32  ;;  %v998_v39 = vld [vmem:[#allocation2 + $0xda] sm:$0xff]  ;;  %v999_v41 = vld [vmem:[#allocation2 + $0xe2] sm:$0xff]  ;;  %v12069_v43 = vpack.i.bf16 %v997_v36, %v996_v35  ;;  %v1000_v44 = vld [vmem:[#allocation2 + $0xf2] sm:$0xff] }
  0x87   : > { %9490 = vrot.lane.b32.xlu1 %v9489_v57, %s11518_s20  ;;  %3697 = vmatpush1.bf16.msra.mxu0 %v11275_v15  ;;  %v11278_v42 = vld [vmem:[%s16175_s1 + $0x20] sm:$0xff]   ;;  %v1002_v46 = vld [vmem:[#allocation2 + $0x10a] sm:$0xff]  ;;  %v12074_v47 = vpack.i.bf16 %v999_v41, %v998_v39  ;;  %v1003_v50 = vld [vmem:[#allocation2 + $0x112] sm:$0xff] }
  0x88   : > { %3698 = vmatprep.subr.bf16.mxu0 %v16187_v37  ;;  %v1001_v45 = vld [vmem:[#allocation2 + $0xfa] sm:$0xff]  ;;  %v11279_v48 = vld [vmem:[%s16175_s1 + $0x28] sm:$0xff]   ;;  %v11280_v53 = vld [vmem:[%s16175_s1 + $0x30] sm:$0xff]   ;;  %v12089_v54 = vpack.i.bf16 %v1003_v50, %v1002_v46 }
  0x89   : > { %9495 = vrot.lane.b32.xlu0 %v9494_v58, %s11518_s20  ;;  %v12081_v49 = vpack.i.bf16 %v1001_v45, %v1000_v44  ;;  %v1004_v51 = vld [vmem:[#allocation2 + $0x122] sm:$0xff]  ;;  %v1005_v52 = vld [vmem:[#allocation2 + $0x12a] sm:$0xff]  ;;  %v1006_v57 = vld [vmem:[#allocation2 + $0x13a] sm:$0xff] }
  0x8a   : > { %v400_v55 = vld [vmem:[%s11688_s19 + $0xf0] sm:$0xff]  ;;  %v12094_v56 = vpack.i.bf16 %v1005_v52, %v1004_v51  ;;  %v1007_v58 = vld [vmem:[#allocation2 + $0x142] sm:$0xff]  ;;  %v12105_v2 = vld [vmem:[#allocation2 + $0x38] sm:$0xff] }
  0x8b   : > { %9500 = vrot.lane.b32.xlu1 %v9499_v63, %s11518_s20  ;;  %3699 = vmatpush1.bf16.msra.mxu0 %v11276_v23  ;;  %v1008_v59 = vld [vmem:[#allocation2 + $0x152] sm:$0xff]  ;;  %v544_v60 = vrot.slane %v400_v55, 7  ;;  %v11289_v10 = vld [vmem:[%s16175_s1 + $0x80] sm:$0xff]   ;;  %v11291_v17 = vld [vmem:[%s16175_s1 + $0x88] sm:$0xff]  }
  0x8c   : > { %3700 = vmatprep.subr.bf16.mxu0 %v16187_v37  ;;  %v12097_v61 = vld [vmem:[#allocation2 + $0x30] sm:$0xff]  ;;  %v401_v63 = vld [vmem:[%s11688_s19 + $0xf8] sm:$0xff]  ;;  %v11282_v11 = vld [vmem:[%s16175_s1 + $0x40] sm:$0xff]   ;;  %9134 = vmatprep.subr.bf16.mxu1 %v11289_v10 }
  0x8d   : > { %9505 = vrot.lane.b32.xlu0 %v9504_v1, %s11518_s20  ;;  %v706_v62 = vsel %vm498_vm2, 0.0, %v544_v60  ;;  %v12103_v1 = vpack.i.bf16 %v1007_v58, %v1006_v57  ;;  %v11281_v3 = vld [vmem:[%s16175_s1 + $0x38] sm:$0xff]   ;;  %v545_v4 = vrot.slane %v401_v63, 7  ;;  %v9584_v5 = vpack.i.bf16 %v12097_v61, %v1008_v59  ;;  %v12135_v15 = vld [vmem:[#allocation2 + $0x20] sm:$0xff]  ;;  %v11283_v18 = vld [vmem:[%s16175_s1 + $0x48] sm:$0xff]   ;;  %9135 = vmatpush3.bf16.msra.mxu1 %v11289_v10 }
  0x8e   : > { %801 = vst.msk [vmem:[#allocation2 + $0x180] sm:$0xff] %vm355_vm0, %v706_v62  ;;  %v12133_v13 = vld [vmem:[#allocation2 + $0x18] sm:$0xff]  ;;  %v1367_v22 = vld [vmem:[#allocation2 + $0x4a] sm:$0xff]  ;;  %9136 = vmatprep.subr.bf16.mxu1 %v11291_v17  ;;  %v11286_v41 = vld [vmem:[%s16175_s1 + $0x60] sm:$0xff]  }
  0x8f   : > { %9510 = vrot.lane.b32.xlu1 %v9509_v6, %s11518_s20  ;;  %3701 = vmatpush1.bf16.msra.mxu0 %v11277_v30  ;;  %v12114_v6 = vld [vmem:[#allocation2 + $0x48] sm:$0xff]  ;;  %v546_v8 = vsel %vm498_vm2, %v544_v60, %v545_v4  ;;  %v1365_v19 = vld [vmem:[#allocation2 + $0x32] sm:$0xff]  ;;  %v1366_v20 = vld [vmem:[#allocation2 + $0x3a] sm:$0xff]  ;;  %v9604_v23 = vpack.i.bf16 %v12135_v15, %v12133_v13 }
  0x90   : > { %3702 = vmatprep.subr.bf16.mxu0 %v16187_v37  ;;  %802 = vst.msk [vmem:[#allocation2 + $0x188] sm:$0xff] %vm355_vm0, %v546_v8  ;;  %v9594_v12 = vpack.i.bf16 %v12114_v6, %v12105_v2  ;;  %v3353_v25 = vpack.c.bf16 %v1366_v20, %v1365_v19  ;;  %v1368_v27 = vld [vmem:[#allocation2 + $0x52] sm:$0xff]  ;;  %v12151_v30 = vld [vmem:[#allocation2 + $0x60] sm:$0xff]  ;;  %v1242_v36 = vld [vmem:[#allocation2 + $0x68] sm:$0xff] }
  0x91   : > { %9515 = vrot.lane.b32.xlu0 %v9514_v9, %s11520_s27  ;;  %v738_v9 = vsel %vm498_vm2, %v545_v4, 0.0  ;;  %v12149_v28 = vld [vmem:[#allocation2 + $0x50] sm:$0xff]  ;;  %v3356_v32 = vpack.c.bf16 %v1368_v27, %v1367_v22  ;;  %9137 = vmatpush3.bf16.msra.mxu1 %v11291_v17  ;;  %v11285_v35 = vld [vmem:[%s16175_s1 + $0x58] sm:$0xff]   ;;  %v1372_v46 = vld [vmem:[#allocation2 + $0x82] sm:$0xff] }
  0x92   : > { %803 = vst.msk [vmem:[#allocation2 + $0x190] sm:$0x3] %vm358_vm1, %v738_v9  ;;  %9138 = vmatprep.mubr.msk.bf16.mxu1 %vm355_vm0, %v3353_v25  ;;  %v9614_v34 = vpack.i.bf16 %v12151_v30, %v12149_v28  ;;  %7719 = vmatprep.subr.bf16.mxu1 %v16187_v37  ;;  %v12174_v39 = vld [vmem:[#allocation2 + $0x78] sm:$0xff]  ;;  %v1370_v44 = vld [vmem:[#allocation2 + $0x6a] sm:$0xff]  ;;  %v9644_v52 = vpack.i.bf16 %v12149_v28, %v12114_v6  ;;  %v868_v25 = vld [vmem:[#allocation2 + $0xc0] sm:$0xff] }
  0x93   : > { %9520 = vrot.lane.b32.xlu1 %v12027_v14, %s11520_s27  ;;  %3703 = vmatpush1.bf16.msra.mxu0 %v11278_v42  ;;  %v1369_v42 = vld [vmem:[#allocation2 + $0x62] sm:$0xff]  ;;  %v1371_v45 = vld [vmem:[#allocation2 + $0x7a] sm:$0xff]  ;;  %v12197_v55 = vld [vmem:[#allocation2 + $0x90] sm:$0xff] }
  0x94   : > { %3704 = vmatprep.subr.bf16.mxu0 %v16187_v37  ;;  %9139 = vmatmul.mubr.msk.bf16.vlgmr.msra.gmra.mrb[0].mxu1 %vm355_vm0, %v3356_v32  ;;  %v3362_v50 = vpack.c.bf16 %v1372_v46, %v1371_v45  ;;  %v11287_v51 = vld [vmem:[%s16175_s1 + $0x68] sm:$0xff]   ;;  %v11288_v57 = vld [vmem:[%s16175_s1 + $0x70] sm:$0xff]   ;;  %v11290_v60 = vld [vmem:[%s16175_s1 + $0x78] sm:$0xff]  }
  0x95   : > { %9525 = vrot.lane.b32.xlu0 %v12033_v16, %s11520_s27  ;;  %v865_v63 = vld [vmem:[#allocation2 + $0x98] sm:$0xff]  ;;  %v1375_v8 = vld [vmem:[#allocation2 + $0xaa] sm:$0xff] }
  0x96   : > { %v1376_v9 = vld [vmem:[#allocation2 + $0xb2] sm:$0xff]  ;;  %v1311_v32 = vld [vmem:[#allocation2 + $0xa9] sm:$0xff]  ;;  %v1379_v46 = vld [vmem:[#allocation2 + $0xda] sm:$0xff] }
  0x97   : > { %9530 = vrot.lane.b32.xlu1 %v12038_v21, %s11520_s27  ;;  %3705 = vmatpush1.bf16.msra.mxu0 %v11279_v48  ;;  %v9634_v48 = vpack.i.bf16 %v12174_v39, %v1242_v36  ;;  %v3368_v17 = vpack.c.bf16 %v1376_v9, %v1375_v8  ;;  %v867_v22 = vld [vmem:[#allocation2 + $0xb0] sm:$0xff]  ;;  %v1316_v8 = vld [vmem:[#allocation2 + $0xe1] sm:$0xff] }
  0x98   : > { %3706 = vmatprep.subr.bf16.mxu0 %v16187_v37 }
  0x99   : > { %9535 = vrot.lane.b32.xlu0 %v12045_v24, %s11520_s27 }
  0x9b   : > { %9540 = vrot.lane.b32.xlu1 %v12050_v29, %s11520_s27  ;;  %3707 = vmatpush1.bf16.msra.mxu0 %v11280_v53  ;;  %v1244_v53 = vld [vmem:[#allocation2 + $0x80] sm:$0xff] }
  0x9c   : > { %3708 = vmatprep.subr.bf16.mxu0 %v16187_v37  ;;  %v9684_v20 = vpack.i.bf16 %v1244_v53, %v12174_v39  ;;  %v869_v39 = vld [vmem:[#allocation2 + $0xc8] sm:$0xff] }
  0x9d   : > { %9545 = vrot.lane.b32.xlu0 %v12057_v31, %s11520_s27 }
  0x9f   : > { %9550 = vrot.lane.b32.xlu1 %v12062_v38, %s11520_s27  ;;  %3709 = vmatpush1.bf16.msra.mxu0 %v11281_v3  ;;  %v12221_v3 = vld [vmem:[#allocation2 + $0xa8] sm:$0xff] }
  0xa0   : > { %3710 = vmatprep.subr.bf16.mxu0 %v16187_v37  ;;  %v9674_v10 = vpack.i.bf16 %v12221_v3, %v865_v63 }
  0xa1   : > { %9555 = vrot.lane.b32.xlu0 %v12069_v43, %s11520_s27 }
  0xa3   : > { %9560 = vrot.lane.b32.xlu1 %v12074_v47, %s11520_s27  ;;  %3711 = vmatpush1.bf16.msra.mxu0 %v11282_v11  ;;  %v1309_v11 = vld [vmem:[#allocation2 + $0x91] sm:$0xff] }
  0xa4   : > { %3712 = vmatprep.subr.bf16.mxu0 %v16187_v37 }
  0xa5   : > { %9565 = vrot.lane.b32.xlu0 %v12081_v49, %s11520_s27 }
  0xa7   : > { %9570 = vrot.lane.b32.xlu1 %v12089_v54, %s11520_s27  ;;  %3713 = vmatpush1.bf16.msra.mxu0 %v11283_v18 }
  0xa8   : > { %3714 = vmatprep.subr.bf16.mxu0 %v16187_v37 }
  0xa9   : > { %9575 = vrot.lane.b32.xlu0 %v12094_v56, %s11520_s27 }
  0xab   : > { %9580 = vrot.lane.b32.xlu1 %v12103_v1, %s11520_s27 }
  0xad   : > { %9585 = vrot.lane.b32.xlu0 %v9584_v5, %s11520_s27  ;;  %v1373_v5 = vld [vmem:[#allocation2 + $0x92] sm:$0xff] }
  0xaf   : > { %9590 = vrot.lane.b32.xlu1 %v12027_v14, %s11518_s20  ;;  %v11284_v14 = vld [vmem:[%s16175_s1 + $0x50] sm:$0xff]  }
  0xb0   : > { %3715 = vmatpush1.bf16.msra.mxu0 %v11284_v14  ;;  %v1312_v14 = vld [vmem:[#allocation2 + $0xb1] sm:$0xff] }
  0xb1   : > { %9595 = vrot.lane.b32.xlu0 %v9594_v12, %s11520_s27  ;;  %3716 = vmatprep.subr.bf16.mxu0 %v16187_v37  ;;  %v1310_v12 = vld [vmem:[#allocation2 + $0x99] sm:$0xff] }
  0xb3   : > { %9600 = vrot.lane.b32.xlu1 %v11785_v7, %s11521_s17  ;;  %v9624_v7 = vpack.i.bf16 %v12105_v2, %v12097_v61 }
  0xb4   : > { %3717 = vmatpush1.bf16.msra.mxu0 %v11285_v35  ;;  %v9699_v35 = vpack.i.bf16 %v1312_v14, %v1311_v32  ;;  %v1383_v32 = vld [vmem:[#allocation2 + $0x10a] sm:$0xff]  ;;  %v1384_v14 = vld [vmem:[#allocation2 + $0x112] sm:$0xff] }
  0xb5   : > { %9605 = vrot.lane.b32.xlu0 %v9604_v23, %s11521_s17  ;;  %3718 = vmatprep.subr.bf16.mxu0 %v16187_v37 }
  0xb7   : > { %9610 = vrot.lane.b32.xlu1 %v12033_v16, %s11518_s20  ;;  %v3359_v16 = vpack.c.bf16 %v1370_v44, %v1369_v42  ;;  %v1377_v42 = vld [vmem:[#allocation2 + $0xc2] sm:$0xff]  ;;  %v1378_v44 = vld [vmem:[#allocation2 + $0xca] sm:$0xff] }
  0xb8   : > { %3719 = vmatpush1.bf16.msra.mxu0 %v11286_v41  ;;  %v3371_v45 = vpack.c.bf16 %v1378_v44, %v1377_v42  ;;  %v3380_v42 = vpack.c.bf16 %v1384_v14, %v1383_v32  ;;  %v1388_v32 = vld [vmem:[#allocation2 + $0x142] sm:$0xff] }
  0xb9   : > { %9615 = vrot.lane.b32.xlu0 %v9614_v34, %s11520_s27  ;;  %9142 = vmatprep.mubr.msk.bf16.mxu1 %vm355_vm0, %v3359_v16  ;;  %v870_v16 = vld [vmem:[#allocation2 + $0xd8] sm:$0xff]  ;;  %v1321_v14 = vld [vmem:[#allocation2 + $0x121] sm:$0xff] }
  0xba   : > { %9143 = vmatmul.mubr.msk.bf16.gmra.mrb[4].mxu1 %vm355_vm0, %v3362_v50  ;;  %3720 = vmatprep.subr.bf16.mxu0 %v16187_v37  ;;  %v1313_v50 = vld [vmem:[#allocation2 + $0xc1] sm:$0xff] }
  0xbb   : > { %9620 = vrot.lane.b32.xlu1 %v11810_v26, %s11521_s17  ;;  %v12192_v26 = vpop.permute.xlu0 %9355 }
  0xbc   : > { %3721 = vmatpush1.bf16.msra.mxu0 %v11287_v51  ;;  %v1314_v51 = vld [vmem:[#allocation2 + $0xc9] sm:$0xff] }
  0xbd   : > { %9625 = vrot.lane.b32.xlu0 %v9624_v7, %s11521_s17  ;;  %3722 = vmatprep.subr.bf16.mxu0 %v16187_v37  ;;  %v9704_v7 = vpack.i.bf16 %v865_v63, %v12197_v55  ;;  %v871_v63 = vld [vmem:[#allocation2 + $0xe0] sm:$0xff] }
  0xbf   : > { %9630 = vrot.lane.b32.xlu1 %v12038_v21, %s11518_s20  ;;  %v9654_v21 = vpack.i.bf16 %v12197_v55, %v1244_v53 }
  0xc0   : > { %3723 = vmatpush1.bf16.msra.mxu0 %v11288_v57  ;;  %v9719_v57 = vpack.i.bf16 %v1314_v51, %v1313_v50  ;;  %v876_v50 = vld [vmem:[#allocation2 + $0x120] sm:$0xff] }
  0xc1   : > { %9635 = vrot.lane.b32.xlu0 %v9634_v48, %s11520_s27  ;;  %v12207_v58 = vpop.permute.xlu1 %9365  ;;  %v12209_v59 = vpop.permute.xlu0 %9360  ;;  %3724 = vmatprep.subr.bf16.mxu0 %v16187_v37  ;;  %v1380_v48 = vld [vmem:[#allocation2 + $0xe2] sm:$0xff] }
  0xc3   : > { %9640 = vrot.lane.b32.xlu1 %v11815_v33, %s11521_s17  ;;  %v9664_v33 = vpack.i.bf16 %v1242_v36, %v12151_v30  ;;  %v9694_v30 = vpack.i.bf16 %v868_v25, %v867_v22 }
  0xc4   : > { %3725 = vmatpush1.bf16.msra.mxu0 %v11290_v60 }
  0xc5   : > { %9645 = vrot.lane.b32.xlu0 %v9644_v52, %s11521_s17  ;;  %v12219_v62 = vpop.permute.xlu1 %9370  ;;  %v3374_v52 = vpack.c.bf16 %v1380_v48, %v1379_v46 }
  0xc7   : > { %9650 = vrot.lane.b32.xlu1 %v12045_v24, %s11518_s20  ;;  %v12223_v4 = vpop.permute.xlu0 %9375  ;;  %v1374_v24 = vld [vmem:[#allocation2 + $0x9a] sm:$0xff] }
  0xc8   : > { %v3365_v6 = vpack.c.bf16 %v1374_v24, %v1373_v5  ;;  %v872_v5 = vld [vmem:[#allocation2 + $0xf0] sm:$0xff] }
  0xc9   : > { %9655 = vrot.lane.b32.xlu0 %v9654_v21, %s11520_s27  ;;  %v12229_v18 = vpop.permute.xlu1 %9380  ;;  %v9724_v21 = vpack.i.bf16 %v867_v22, %v12221_v3  ;;  %v9734_v24 = vpack.i.bf16 %v872_v5, %v871_v63  ;;  %v874_v22 = vld [vmem:[#allocation2 + $0x108] sm:$0xff] }
  0xca   : > { %9146 = vmatprep.mubr.msk.bf16.mxu1 %vm355_vm0, %v3365_v6  ;;  %v1315_v6 = vld [vmem:[#allocation2 + $0xd9] sm:$0xff] }
  0xcb   : > { %9660 = vrot.lane.b32.xlu1 %v11822_v40, %s11521_s17  ;;  %v12232_v19 = vpop.permute.xlu0 %9385  ;;  %9147 = vmatmul.mubr.msk.bf16.gmra.mrb[8].mxu1 %vm355_vm0, %v3368_v17  ;;  %v9679_v40 = vpack.i.bf16 %v1310_v12, %v1309_v11  ;;  %v9739_v3 = vpack.i.bf16 %v1316_v8, %v1315_v6  ;;  %v873_v12 = vld [vmem:[#allocation2 + $0xf8] sm:$0xff]  ;;  %v877_v6 = vld [vmem:[#allocation2 + $0x128] sm:$0xff] }
  0xcc   : > { %9150 = vmatprep.mubr.msk.bf16.mxu1 %vm355_vm0, %v3371_v45  ;;  %v9764_v45 = vpack.i.bf16 %v871_v63, %v870_v16  ;;  %v9784_v63 = vpack.i.bf16 %v873_v12, %v872_v5  ;;  %v1322_v5 = vld [vmem:[#allocation2 + $0x129] sm:$0xff] }
  0xcd   : > { %9665 = vrot.lane.b32.xlu0 %v9664_v33, %s11521_s17  ;;  %v12239_v23 = vpop.permute.xlu1 %9390 }
  0xcf   : > { %9670 = vrot.lane.b32.xlu1 %v12050_v29, %s11518_s20  ;;  %v12241_v27 = vpop.permute.xlu0 %9395 }
  0xd1   : > { %9675 = vrot.lane.b32.xlu0 %v9674_v10, %s11520_s27  ;;  %v9744_v10 = vpack.i.bf16 %v869_v39, %v868_v25 }
  0xd2   : > { %v12245_v34 = vpop.permute.xlu1 %9400 }
  0xd3   : > { %9680 = vrot.lane.b32.xlu1 %v9679_v40, %s11521_s17  ;;  %v12247_v29 = vpop.permute.xlu0 %9405  ;;  %9151 = vmatmul.mubr.msk.bf16.gmra.mrb[12].mxu1 %vm355_vm0, %v3374_v52  ;;  %v1381_v40 = vld [vmem:[#allocation2 + $0xf2] sm:$0xff]  ;;  %v1319_v52 = vld [vmem:[#allocation2 + $0x109] sm:$0xff] }
  0xd5   : > { %9685 = vrot.lane.b32.xlu0 %v9684_v20, %s11521_s17  ;;  %v1382_v20 = vld [vmem:[#allocation2 + $0xfa] sm:$0xff] }
  0xd6   : > { %v12253_v36 = vpop.permute.xlu1 %9410 }
  0xd7   : > { %9690 = vrot.lane.b32.xlu1 %v12057_v31, %s11518_s20  ;;  %v12255_v41 = vpop.permute.xlu0 %9415  ;;  %v9714_v31 = vpack.i.bf16 %v870_v16, %v869_v39 }
  0xd9   : > { %9695 = vrot.lane.b32.xlu0 %v9694_v30, %s11520_s27  ;;  %v3377_v30 = vpack.c.bf16 %v1382_v20, %v1381_v40  ;;  %v12314_v40 = vld [vmem:[#allocation2 + $0x138] sm:$0xff] }
  0xda   : > { %v12259_v53 = vpop.permute.xlu1 %9420 }
  0xdb   : > { %9700 = vrot.lane.b32.xlu1 %v9699_v35, %s11521_s17  ;;  %v1317_v35 = vld [vmem:[#allocation2 + $0xf1] sm:$0xff]  ;;  %9154 = vmatprep.mubr.msk.bf16.mxu1 %vm355_vm0, %v3377_v30  ;;  %v1387_v30 = vld [vmem:[#allocation2 + $0x13a] sm:$0xff] }
  0xdc   : > { %v12262_v55 = vpop.permute.xlu0 %9425  ;;  %9155 = vmatmul.mubr.msk.bf16.gmra.mrb[16].mxu1 %vm355_vm0, %v3380_v42 }
  0xdd   : > { %9705 = vrot.lane.b32.xlu0 %v9704_v7, %s11521_s17  ;;  %16245 = vst [vmem:[#allocation9_spill] sm:$0xff] %v12262_v55  ;;  %v1318_v7 = vld [vmem:[#allocation2 + $0xf9] sm:$0xff] }
  0xde   : > { %v12269_v60 = vpop.permute.xlu1 %9430  ;;  %v9759_v44 = vpack.i.bf16 %v1318_v7, %v1317_v35  ;;  %v9799_v7 = vpack.i.bf16 %v1322_v5, %v1321_v14  ;;  %v12348_v14 = vld [vmem:[#allocation2 + $0x168] sm:$0xff] }
  0xdf   : > { %9710 = vrot.lane.b32.xlu1 %v12062_v38, %s11518_s20  ;;  %16246 = vst [vmem:[#allocation10_spill] sm:$0xff] %v12269_v60 }
  0xe1   : > { %9715 = vrot.lane.b32.xlu0 %v9714_v31, %s11520_s27  ;;  %v12271_v33 = vpop.permute.xlu0 %9435  ;;  %v875_v31 = vld [vmem:[#allocation2 + $0x110] sm:$0xff] }
  0xe2   : > { %16247 = vst [vmem:[#allocation11_spill] sm:$0xff] %v12271_v33  ;;  %v9774_v51 = vpack.i.bf16 %v876_v50, %v875_v31  ;;  %v9804_v42 = vpack.i.bf16 %v875_v31, %v874_v22  ;;  %v9824_v31 = vpack.i.bf16 %v877_v6, %v876_v50  ;;  %v1326_v50 = vld [vmem:[#allocation2 + $0x159] sm:$0xff] }
  0xe3   : > { %9720 = vrot.lane.b32.xlu1 %v9719_v57, %s11521_s17  ;;  %v1320_v57 = vld [vmem:[#allocation2 + $0x111] sm:$0xff] }
  0xe4   : > { %v9779_v16 = vpack.i.bf16 %v1320_v57, %v1319_v52  ;;  %v12332_v52 = vld [vmem:[#allocation2 + $0x150] sm:$0xff] }
  0xe5   : > { %9725 = vrot.lane.b32.xlu0 %v9724_v21, %s11521_s17  ;;  %v12275_v9 = vpop.permute.xlu1 %9440 }
  0xe6   : > { %16248 = vst [vmem:[#allocation12_spill] sm:$0xff] %v12275_v9  ;;  %v12277_v38 = vpop.permute.xlu0 %9445 }
  0xe7   : > { %16249 = vst [vmem:[#allocation13_spill] sm:$0xff] %v12277_v38  ;;  %9730 = vrot.lane.b32.xlu1 %v12069_v43, %s11518_s20  ;;  %v9754_v43 = vpack.i.bf16 %v874_v22, %v873_v12  ;;  %v3386_v12 = vpack.c.bf16 %v1388_v32, %v1387_v30  ;;  %v1389_v32 = vld [vmem:[#allocation2 + $0x152] sm:$0xff] }
  0xe9   : > { %9735 = vrot.lane.b32.xlu0 %v9734_v24, %s11520_s27  ;;  %v12282_v11 = vpop.permute.xlu1 %9450 }
  0xea   : > { %16250 = vst [vmem:[#allocation14_spill] sm:$0xff] %v12282_v11 }
  0xeb   : > { %v12284_v17 = vpop.permute.xlu0 %9455  ;;  %9740 = vrot.lane.b32.xlu1 %v9739_v3, %s11521_s17  ;;  %v1385_v3 = vld [vmem:[#allocation2 + $0x122] sm:$0xff] }
  0xec   : > { %16251 = vst [vmem:[#allocation15_spill] sm:$0xff] %v12284_v17 }
  0xed   : > { %9745 = vrot.lane.b32.xlu0 %v9744_v10, %s11521_s17  ;;  %v12288_v25 = vpop.permute.xlu1 %9460  ;;  %v1386_v10 = vld [vmem:[#allocation2 + $0x12a] sm:$0xff] }
  0xee   : > { %16252 = vst [vmem:[#allocation16_spill] sm:$0xff] %v12288_v25  ;;  %v3383_v20 = vpack.c.bf16 %v1386_v10, %v1385_v3  ;;  %v852_v25 = vld [vmem:[#allocation2] sm:$0xff] }
  0xef   : > { %v12291_v39 = vpop.permute.xlu0 %9465  ;;  %9750 = vrot.lane.b32.xlu1 %v12074_v47, %s11518_s20 }
  0xf0   : > { %16253 = vst [vmem:[#allocation17_spill] sm:$0xff] %v12291_v39  ;;  %9158 = vmatprep.mubr.msk.bf16.mxu1 %vm355_vm0, %v3383_v20  ;;  %v881_v20 = vld [vmem:[#allocation2 + $0x158] sm:$0xff] }
  0xf1   : > { %9755 = vrot.lane.b32.xlu0 %v9754_v43, %s11520_s27  ;;  %v12297_v46 = vpop.permute.xlu1 %9470  ;;  %9159 = vmatmul.mubr.msk.bf16.gmra.mrb[20].mxu1 %vm355_vm0, %v3386_v12  ;;  %v1391_v12 = vld [vmem:[#allocation2 + $0x16a] sm:$0xff]  ;;  %v9864_v0 = vpack.i.bf16 %v881_v20, %v12332_v52 }
  0xf2   : > { %16254 = vst [vmem:[#allocation18_spill] sm:$0xff] %v12297_v46  ;;  %v9357_v46 = vunpack.i.l.bf16 %v12192_v26 }
  0xf3   : > { %v12299_v48 = vpop.permute.xlu0 %9475  ;;  %9760 = vrot.lane.b32.xlu1 %v9759_v44, %s11521_s17 }
  0xf4   : > { %16255 = vst [vmem:[#allocation19_spill] sm:$0xff] %v12299_v48  ;;  %v1109_v48 = vld [vmem:[#allocation2 + $0x21] sm:$0xff] }
  0xf5   : > { %9765 = vrot.lane.b32.xlu0 %v9764_v45, %s11521_s17  ;;  %v12303_v21 = vpop.permute.xlu1 %9480 }
  0xf6   : > { %16256 = vst [vmem:[#allocation20_spill] sm:$0xff] %v12303_v21 }
  0xf7   : > { %v12305_v47 = vpop.permute.xlu0 %9485  ;;  %9770 = vrot.lane.b32.xlu1 %v12081_v49, %s11518_s20  ;;  %v9794_v49 = vpack.i.bf16 %v12314_v40, %v877_v6 }
  0xf8   : > { %16257 = vst [vmem:[#allocation21_spill] sm:$0xff] %v12305_v47 }
  0xf9   : > { %9775 = vrot.lane.b32.xlu0 %v9774_v51, %s11520_s27  ;;  %v12310_v24 = vpop.permute.xlu1 %9490  ;;  %v879_v51 = vld [vmem:[#allocation2 + $0x140] sm:$0xff] }
  0xfa   : > { %16258 = vst [vmem:[#allocation22_spill] sm:$0xff] %v12310_v24  ;;  %v9814_v57 = vpack.i.bf16 %v12332_v52, %v879_v51 }
  0xfb   : > { %v12312_v8 = vpop.permute.xlu0 %9495  ;;  %9780 = vrot.lane.b32.xlu1 %v9779_v16, %s11521_s17  ;;  %v1323_v16 = vld [vmem:[#allocation2 + $0x139] sm:$0xff] }
  0xfc   : > { %16259 = vst [vmem:[#allocation23_spill] sm:$0xff] %v12312_v8 }
  0xfd   : > { %9785 = vrot.lane.b32.xlu0 %v9784_v63, %s11521_s17  ;;  %v12319_v43 = vpop.permute.xlu1 %9500  ;;  %v1324_v63 = vld [vmem:[#allocation2 + $0x141] sm:$0xff] }
  0xfe   : > { %16260 = vst [vmem:[#allocation24_spill] sm:$0xff] %v12319_v43  ;;  %v9819_v22 = vpack.i.bf16 %v1324_v63, %v1323_v16  ;;  %v1394_v43 = vld [vmem:[#allocation2 + $0x18a] sm:$0xff] }
  0xff   : > { %v12322_v35 = vpop.permute.xlu0 %9505  ;;  %9790 = vrot.lane.b32.xlu1 %v12089_v54, %s11518_s20 }
 0x100   : > { %16261 = vst [vmem:[#allocation25_spill] sm:$0xff] %v12322_v35  ;;  %v1393_v35 = vld [vmem:[#allocation2 + $0x182] sm:$0xff] }
 0x101   : > { %9795 = vrot.lane.b32.xlu0 %v9794_v49, %s11520_s27  ;;  %v12328_v44 = vpop.permute.xlu1 %9510  ;;  %v1390_v49 = vld [vmem:[#allocation2 + $0x15a] sm:$0xff] }
 0x102   : > { %16262 = vst [vmem:[#allocation26_spill] sm:$0xff] %v12328_v44  ;;  %v3389_v5 = vpack.c.bf16 %v1390_v49, %v1389_v32  ;;  %v1199_v32 = vld [vmem:[#allocation2 + $0x15a] sm:$0xff] }
 0x103   : > { %v12330_v45 = vpop.permute.xlu0 %9515  ;;  %9800 = vrot.lane.b32.xlu1 %v9799_v7, %s11521_s17  ;;  %v1392_v7 = vld [vmem:[#allocation2 + $0x172] sm:$0xff] }
 0x104   : > { %v3392_v6 = vpack.c.bf16 %v1392_v7, %v1391_v12  ;;  %9162 = vmatprep.mubr.msk.bf16.mxu1 %vm355_vm0, %v3389_v5  ;;  %v12365_v12 = vld [vmem:[#allocation2 + $0x180] sm:$0xff]  ;;  %v12369_v5 = vld [vmem:[#allocation2 + $0x170] sm:$0xff]  ;;  %v9518_v9 = vunpack.i.h.bf16 %v12330_v45 }
 0x105   : > { %9805 = vrot.lane.b32.xlu0 %v9804_v42, %s11521_s17  ;;  %v12337_v54 = vpop.permute.xlu1 %9520  ;;  %v1325_v42 = vld [vmem:[#allocation2 + $0x151] sm:$0xff] }
 0x106   : > { %9163 = vmatmul.mubr.msk.bf16.gmra.mrb[24].mxu1 %vm355_vm0, %v3392_v6  ;;  %v9839_v63 = vpack.i.bf16 %v1326_v50, %v1325_v42 }
 0x107   : > { %v12339_v3 = vpop.permute.xlu0 %9525  ;;  %9810 = vrot.lane.b32.xlu1 %v12094_v56, %s11518_s20  ;;  %v9834_v56 = vpack.i.bf16 %v12348_v14, %v881_v20  ;;  %v1329_v20 = vld [vmem:[#allocation2 + $0x181] sm:$0xff] }
 0x109   : > { %9815 = vrot.lane.b32.xlu0 %v9814_v57, %s11520_s27  ;;  %v12344_v10 = vpop.permute.xlu1 %9530 }
 0x10b   : > { %v12346_v30 = vpop.permute.xlu0 %9535  ;;  %9820 = vrot.lane.b32.xlu1 %v9819_v22, %s11521_s17  ;;  %v9844_v22 = vpack.i.bf16 %v879_v51, %v12314_v40  ;;  %v1328_v40 = vld [vmem:[#allocation2 + $0x171] sm:$0xff] }
 0x10d   : > { %9825 = vrot.lane.b32.xlu0 %v9824_v31, %s11521_s17  ;;  %v12353_v57 = vpop.permute.xlu1 %9540  ;;  %v1198_v31 = vld [vmem:[#allocation2 + $0x152] sm:$0xff] }
 0x10e   : > { %v9849_v6 = vpack.i.bf16 %v1199_v32, %v1198_v31  ;;  %v1201_v31 = vld [vmem:[#allocation2 + $0x172] sm:$0xff] }
 0x10f   : > { %v12356_v16 = vpop.permute.xlu0 %9545  ;;  %9830 = vrot.lane.b32.xlu1 %v12103_v1, %s11518_s20  ;;  %v9854_v1 = vpack.i.bf16 %v12365_v12, %v12369_v5 }
 0x111   : > { %9835 = vrot.lane.b32.xlu0 %v9834_v56, %s11520_s27  ;;  %v12363_v49 = vpop.permute.xlu1 %9550  ;;  %v1327_v56 = vld [vmem:[#allocation2 + $0x169] sm:$0xff] }
 0x112   : > { %v9859_v50 = vpack.i.bf16 %v1328_v40, %v1327_v56  ;;  %v1395_v56 = vld [vmem:[#allocation2 + $0x19a] sm:$0xff]  ;;  %v1396_v40 = vld [vmem:[#allocation2 + $0x1a2] sm:$0xff] }
 0x113   : > { %v12367_v7 = vpop.permute.xlu0 %9555  ;;  %9840 = vrot.lane.b32.xlu1 %v9839_v63, %s11521_s17  ;;  %v1200_v63 = vld [vmem:[#allocation2 + $0x16a] sm:$0xff]  ;;  %v3398_v24 = vpack.c.bf16 %v1396_v40, %v1395_v56  ;;  %v12405_v40 = vld [vmem:[#allocation2 + $0x199] sm:$0xff] }
 0x114   : > { %v12389_v8 = vpack.i.bf16 %v1201_v31, %v1200_v63  ;;  %v1203_v63 = vld [vmem:[#allocation2 + $0x18a] sm:$0xff]  ;;  %v1268_v31 = vld [vmem:[#allocation2 + $0x1a0] sm:$0xff] }
 0x115   : > { %9845 = vrot.lane.b32.xlu0 %v9844_v22, %s11521_s17  ;;  %v12375_v51 = vpop.permute.xlu1 %9560  ;;  %v12384_v22 = vld [vmem:[#allocation2 + $0x188] sm:$0xff] }
 0x116   : > { %v9874_v52 = vpack.i.bf16 %v1199_v32, %v12384_v22  ;;  %v1202_v32 = vld [vmem:[#allocation2 + $0x182] sm:$0xff] }
 0x117   : > { %v12377_v42 = vpop.permute.xlu0 %9565  ;;  %9850 = vrot.lane.b32.xlu1 %v9849_v6, %s11518_s20  ;;  %v3395_v6 = vpack.c.bf16 %v1394_v43, %v1393_v35  ;;  %v1267_v35 = vld [vmem:[#allocation2 + $0x198] sm:$0xff]  ;;  %v9889_v11 = vpack.i.bf16 %v1203_v63, %v1202_v32  ;;  %v2965_v32 = vsel %vm355_vm0, %v852_v25, %v9357_v46 }
 0x118   : > { %v9894_v38 = vpack.i.bf16 %v1268_v31, %v1267_v35 }
 0x119   : > { %9855 = vrot.lane.b32.xlu0 %v9854_v1, %s11520_s27  ;;  %v12382_v37 = vpop.permute.xlu1 %9570  ;;  %v1330_v1 = vld [vmem:[#allocation2 + $0x189] sm:$0xff]  ;;  %9166 = vmatprep.mubr.msk.bf16.mxu1 %vm355_vm0, %v3395_v6  ;;  %v9358_v6 = vunpack.i.h.bf16 %v12192_v26  ;;  %v9517_v26 = vunpack.i.l.bf16 %v12330_v45  ;;  %v9363_v45 = vunpack.i.h.bf16 %v12209_v59 }
 0x11a   : > { %9167 = vmatmul.mubr.msk.bf16.gmra.mrb[28].mxu1 %vm355_vm0, %v3398_v24  ;;  %v9879_v43 = vpack.i.bf16 %v1330_v1, %v1329_v20  ;;  %v1108_v24 = vld [vmem:[#allocation2 + $0x19] sm:$0xff] }
 0x11b   : > { %v12386_v44 = vpop.permute.xlu0 %9575  ;;  %9860 = vrot.lane.b32.xlu1 %v9859_v50, %s11521_s17  ;;  %v853_v50 = vld [vmem:[#allocation2 + $0x8] sm:$0xff]  ;;  %v3030_v25 = vsel %vm3029_vm3, %v2965_v32, %v9517_v26 }
 0x11c   : > { %v2966_v60 = vsel %vm355_vm0, %v853_v50, %v9358_v6 }
 0x11d   : > { %9865 = vrot.lane.b32.xlu0 %v9864_v0, %s11521_s17  ;;  %v12393_v47 = vpop.permute.xlu1 %9580  ;;  %v9884_v0 = vpack.i.bf16 %v12369_v5, %v12348_v14  ;;  %v1204_v14 = vld [vmem:[#allocation2 + $0x1ca] sm:$0xff]  ;;  %v1205_v5 = vld [vmem:[#allocation2 + $0x1d2] sm:$0xff]  ;;  %v3031_v46 = vsel %vm3029_vm3, %v2966_v60, %v9518_v9  ;;  %v9522_v60 = vunpack.i.l.bf16 %v12337_v54 }
 0x11e   : > { %16263 = vst [vmem:[#allocation27_spill] sm:$0xff] %v12393_v47  ;;  %v12423_v35 = vpack.i.bf16 %v1205_v5, %v1204_v14 }
 0x11f   : > { %v12396_v21 = vpop.permute.xlu0 %9585  ;;  %9870 = vrot.lane.b32.xlu1 %v12389_v8, %s11518_s20 }
 0x120   : > { %v9588_v55 = vunpack.i.h.bf16 %v12396_v21 }
 0x121   : > { %9875 = vrot.lane.b32.xlu0 %v9874_v52, %s11520_s27  ;;  %v9591_v56 = vpop.permute.xlu1 %9590  ;;  %v12410_v52 = vld [vmem:[#allocation2 + $0x1a1] sm:$0xff] }
 0x122   : > { %v9593_v20 = vunpack.i.h.bf16 %v9591_v56  ;;  %v9592_v1 = vunpack.i.l.bf16 %v9591_v56 }
 0x123   : > { %v12408_v39 = vpop.permute.xlu0 %9595  ;;  %9880 = vrot.lane.b32.xlu1 %v9879_v43, %s11521_s17  ;;  %v9904_v43 = vpack.i.bf16 %v12410_v52, %v12405_v40  ;;  %v12440_v52 = vld [vmem:[#allocation2 + $0x1e0] sm:$0xff] }
 0x124   : > { %v9597_v17 = vunpack.i.l.bf16 %v12408_v39  ;;  %v3159_v56 = vsel %vm355_vm0, %v1108_v24, %v9592_v1  ;;  %v3160_v33 = vsel %vm355_vm0, %v1109_v48, %v9593_v20  ;;  %v12437_v20 = vld [vmem:[#allocation2 + $0x1ba] sm:$0xff] }
 0x125   : > { %9885 = vrot.lane.b32.xlu0 %v9884_v0, %s11521_s17  ;;  %v9601_v47 = vpop.permute.xlu1 %9600  ;;  %v3223_v48 = vsel %vm3029_vm3, %v3159_v56, %v9588_v55  ;;  %v1110_v55 = vld [vmem:[#allocation2 + $0x31] sm:$0xff]  ;;  %v12444_v56 = vld [vmem:[#allocation2 + $0x1e8] sm:$0xff] }
 0x126   : > { %v9603_v63 = vunpack.i.h.bf16 %v9601_v47  ;;  %v9602_v0 = vunpack.i.l.bf16 %v9601_v47  ;;  %v3224_v50 = vsel %vm3029_vm3, %v3160_v33, %v9597_v17  ;;  %v12435_v47 = vld [vmem:[#allocation2 + $0x1b2] sm:$0xff] }
 0x127   : > { %v9606_v31 = vpop.permute.xlu0 %9605  ;;  %9890 = vrot.lane.b32.xlu1 %v9889_v11, %s11518_s20  ;;  %v9362_v11 = vunpack.i.l.bf16 %v12209_v59  ;;  %v1111_v33 = vld [vmem:[#allocation2 + $0x39] sm:$0xff]  ;;  %v12449_v59 = vld [vmem:[#allocation2 + $0x1e1] sm:$0xff] }
 0x128   : > { %v9608_v24 = vunpack.i.h.bf16 %v9606_v31  ;;  %v9607_v1 = vunpack.i.l.bf16 %v9606_v31  ;;  %v3287_v6 = vsel %vm3094_vm4, %v3223_v48, %v9602_v0  ;;  %v3288_v40 = vsel %vm3094_vm4, %v3224_v50, %v9603_v63  ;;  %v12451_v0 = vld [vmem:[#allocation2 + $0x1e9] sm:$0xff] }
 0x129   : > { %9895 = vrot.lane.b32.xlu0 %v9894_v38, %s11520_s27  ;;  %v9611_v17 = vpop.permute.xlu1 %9610  ;;  %v3352_v38 = vpack.c.bf16 %v3288_v40, %v3287_v6  ;;  %v9924_v48 = vpack.i.bf16 %v12437_v20, %v12435_v47  ;;  %v12462_v50 = vld [vmem:[#allocation2 + $0x1c8] sm:$0xff]  ;;  %v12464_v6 = vld [vmem:[#allocation2 + $0x1d0] sm:$0xff]  ;;  %v9523_v40 = vunpack.i.h.bf16 %v12337_v54 }
 0x12a   : > { %v3095_v14 = vsel %vm3094_vm4, %v3030_v25, %v9607_v1  ;;  %v3096_v5 = vsel %vm3094_vm4, %v3031_v46, %v9608_v24  ;;  %v9613_v9 = vunpack.i.h.bf16 %v9611_v17  ;;  %v9612_v26 = vunpack.i.l.bf16 %v9611_v17  ;;  %v1206_v54 = vld [vmem:[#allocation2 + $0x1e2] sm:$0xff] }
 0x12b   : > { %v12447_v32 = vpop.permute.xlu0 %9615  ;;  %v3351_v63 = vpack.c.bf16 %v3096_v5, %v3095_v14  ;;  %9900 = vrot.lane.b32.xlu1 %v12389_v8, %s11520_s27  ;;  %3726 = vmatprep.mubr.bf16.mxu0 %v3352_v38  ;;  %v9909_v24 = vpack.i.bf16 %v12384_v22, %v12365_v12  ;;  %v9919_v1 = vpack.i.bf16 %v12444_v56, %v12440_v52  ;;  %v9598_v25 = vunpack.i.h.bf16 %v12408_v39  ;;  %v1207_v5 = vld [vmem:[#allocation2 + $0x1ea] sm:$0xff] }
 0x12c   : > { %v9617_v31 = vunpack.i.l.bf16 %v12447_v32  ;;  %v3162_v8 = vsel %vm355_vm0, %v1111_v33, %v9613_v9  ;;  %v3161_v46 = vsel %vm355_vm0, %v1110_v55, %v9612_v26  ;;  %v2968_v12 = vsel %vm355_vm0, %v12135_v15, %v9363_v45  ;;  %v1397_v15 = vld [vmem:[#allocation2 + $0x1e2] sm:$0xff]  ;;  %v1398_v45 = vld [vmem:[#allocation2 + $0x1ea] sm:$0xff]  ;;  %v1399_v26 = vld [vmem:[#allocation2 + $0x1fa] sm:$0xff] }
 0x12d   : > { %9905 = vrot.lane.b32.xlu0 %v9904_v43, %s11521_s17  ;;  %3727 = vmatmul.mubr.bf16.vlgmr.msra.gmra.mrb[0].mxu0 %v3351_v63  ;;  %v2967_v22 = vsel %vm355_vm0, %v12133_v13, %v9362_v11  ;;  %v9621_v52 = vpop.permute.xlu1 %9620  ;;  %v9929_v17 = vpack.i.bf16 %v12451_v0, %v12449_v59  ;;  %v3225_v43 = vsel %vm3029_vm3, %v3161_v46, %v9598_v25  ;;  %v1400_v63 = vld [vmem:[#allocation2 + $0x202] sm:$0xff] }
 0x12e   : > { %v9623_v33 = vunpack.i.h.bf16 %v9621_v52  ;;  %v9622_v38 = vunpack.i.l.bf16 %v9621_v52  ;;  %v3032_v14 = vsel %vm3029_vm3, %v2967_v22, %v9522_v60  ;;  %v3226_v11 = vsel %vm3029_vm3, %v3162_v8, %v9617_v31  ;;  %v1112_v22 = vld [vmem:[#allocation2 + $0x49] sm:$0xff]  ;;  %v1336_v59 = vld [vmem:[#allocation2 + $0x201] sm:$0xff] }
 0x12f   : > { %v9626_v55 = vpop.permute.xlu0 %9625  ;;  %9910 = vrot.lane.b32.xlu1 %v9909_v24, %s11521_s17  ;;  %v3401_v9 = vpack.c.bf16 %v1398_v45, %v1397_v15  ;;  %v3033_v60 = vsel %vm3029_vm3, %v2968_v12, %v9523_v40  ;;  %v3404_v46 = vpack.c.bf16 %v1400_v63, %v1399_v26  ;;  %v12490_v15 = vpack.i.bf16 %v1207_v5, %v1206_v54  ;;  %v432_v45 = vld [vmem:[%s11688_s19 + $0x1f0] sm:$0xff]  ;;  %v1114_v0 = vld [vmem:[#allocation2 + $0x61] sm:$0xff] }
 0x130   : > { %v9628_v56 = vunpack.i.h.bf16 %v9626_v55  ;;  %v9627_v13 = vunpack.i.l.bf16 %v9626_v55  ;;  %v3289_v52 = vsel %vm3094_vm4, %v3225_v43, %v9622_v38  ;;  %v3290_v25 = vsel %vm3094_vm4, %v3226_v11, %v9623_v33  ;;  %v1113_v55 = vld [vmem:[#allocation2 + $0x51] sm:$0xff] }
 0x131   : > { %9915 = vrot.lane.b32.xlu0 %v12423_v35, %s11518_s20  ;;  %v9631_v24 = vpop.permute.xlu1 %9630  ;;  %v3355_v39 = vpack.c.bf16 %v3290_v25, %v3289_v52  ;;  %9170 = vmatprep.mubr.msk.bf16.mxu1 %vm355_vm0, %v3401_v9  ;;  %v9367_v38 = vunpack.i.l.bf16 %v12207_v58  ;;  %v433_v11 = vld [vmem:[%s11688_s19 + $0x1f8] sm:$0xff]  ;;  %v9368_v26 = vunpack.i.h.bf16 %v12207_v58  ;;  %v592_v5 = vrot.slane %v432_v45, 7 }
 0x132   : > { %v3097_v31 = vsel %vm3094_vm4, %v3032_v14, %v9627_v13  ;;  %v3098_v8 = vsel %vm3094_vm4, %v3033_v60, %v9628_v56  ;;  %v9633_v33 = vunpack.i.h.bf16 %v9631_v24  ;;  %v9632_v43 = vunpack.i.l.bf16 %v9631_v24  ;;  %9171 = vmatmul.mubr.msk.bf16.gmra.mrb[32].mxu1 %vm355_vm0, %v3404_v46  ;;  %v890_v56 = vld [vmem:[#allocation2 + $0x1f8] sm:$0xff]  ;;  %v891_v13 = vld [vmem:[#allocation2 + $0x200] sm:$0xff] }
 0x133   : > { %v12494_v40 = vpop.permute.xlu0 %9635  ;;  %v3354_v12 = vpack.c.bf16 %v3098_v8, %v3097_v31  ;;  %v9528_v14 = vunpack.i.h.bf16 %v12339_v3  ;;  %9920 = vrot.lane.b32.xlu1 %v9919_v1, %s11520_s27  ;;  %3734 = vmatprep.mubr.bf16.mxu0 %v3355_v39  ;;  %v9527_v9 = vunpack.i.l.bf16 %v12339_v3  ;;  %v593_v58 = vrot.slane %v433_v11, 7 }
 0x134   : > { %v9637_v54 = vunpack.i.l.bf16 %v12494_v40  ;;  %v3164_v63 = vsel %vm355_vm0, %v1113_v55, %v9633_v33  ;;  %v3163_v52 = vsel %vm355_vm0, %v1112_v22, %v9632_v43  ;;  %v9618_v25 = vunpack.i.h.bf16 %v12447_v32  ;;  %v1335_v43 = vld [vmem:[#allocation2 + $0x1f9] sm:$0xff] }
 0x135   : > { %9925 = vrot.lane.b32.xlu0 %v9924_v48, %s11520_s27  ;;  %3735 = vmatmul.mubr.bf16.gmra.mrb[4].mxu0 %v3354_v12  ;;  %v9641_v1 = vpop.permute.xlu1 %9640  ;;  %v9944_v39 = vpack.i.bf16 %v891_v13, %v890_v56  ;;  %v722_v46 = vsel %vm498_vm2, 0.0, %v592_v5  ;;  %v2969_v3 = vsel %vm355_vm0, %v12097_v61, %v9367_v38  ;;  %v594_v31 = vsel %vm498_vm2, %v592_v5, %v593_v58 }
 0x136   : > { %v3228_v60 = vsel %vm3029_vm3, %v3164_v63, %v9637_v54  ;;  %v9643_v55 = vunpack.i.h.bf16 %v9641_v1  ;;  %v9642_v22 = vunpack.i.l.bf16 %v9641_v1  ;;  %849 = vst.msk [vmem:[#allocation2 + $0x330] sm:$0xff] %vm355_vm0, %v722_v46  ;;  %v2970_v47 = vsel %vm355_vm0, %v12105_v2, %v9368_v26  ;;  %850 = vst.msk [vmem:[#allocation2 + $0x338] sm:$0xff] %vm355_vm0, %v594_v31  ;;  %v1208_v63 = vld [vmem:[#allocation2 + $0x1fa] sm:$0xff] }
 0x137   : > { %v9646_v24 = vpop.permute.xlu0 %9645  ;;  %9930 = vrot.lane.b32.xlu1 %v9929_v17, %s11521_s17  ;;  %v3227_v48 = vsel %vm3029_vm3, %v3163_v52, %v9618_v25  ;;  %v16264_v61 = vpack.i.bf16 %v12464_v6, %v12462_v50  ;;  %v3034_v38 = vsel %vm3029_vm3, %v2969_v3, %v9527_v9  ;;  %v3035_v33 = vsel %vm3029_vm3, %v2970_v47, %v9528_v14  ;;  %v1115_v17 = vld [vmem:[#allocation2 + $0x69] sm:$0xff]  ;;  %v12535_v50 = vld [vmem:[#allocation2 + $0x1e0] sm:$0xff]  ;;  %v1274_v46 = vld [vmem:[#allocation2 + $0x218] sm:$0xff] }
 0x138   : > { %v9648_v20 = vunpack.i.h.bf16 %v9646_v24  ;;  %v9647_v32 = vunpack.i.l.bf16 %v9646_v24  ;;  %v3291_v8 = vsel %vm3094_vm4, %v3227_v48, %v9642_v22  ;;  %v3292_v2 = vsel %vm3094_vm4, %v3228_v60, %v9643_v55  ;;  %v1079_v9 = vld [vmem:[#allocation2 + $0x1e8] sm:$0xff]  ;;  %v1273_v60 = vld [vmem:[#allocation2 + $0x210] sm:$0xff] }
 0x139   : > { %9935 = vrot.lane.b32.xlu0 %v16264_v61, %s11521_s17  ;;  %v9651_v12 = vpop.permute.xlu1 %9650  ;;  %v3358_v45 = vpack.c.bf16 %v3292_v2, %v3291_v8  ;;  %v754_v6 = vsel %vm498_vm2, %v593_v58, 0.0  ;;  %v9373_v54 = vunpack.i.h.bf16 %v12219_v62  ;;  %v1209_v52 = vld [vmem:[#allocation2 + $0x202] sm:$0xff]  ;;  %v9372_v25 = vunpack.i.l.bf16 %v12219_v62 }
 0x13a   : > { %v3099_v11 = vsel %vm3094_vm4, %v3034_v38, %v9647_v32  ;;  %v3100_v26 = vsel %vm3094_vm4, %v3035_v33, %v9648_v20  ;;  %v9653_v5 = vunpack.i.h.bf16 %v9651_v12  ;;  %v9652_v56 = vunpack.i.l.bf16 %v9651_v12  ;;  %851 = vst.msk [vmem:[#allocation2 + $0x340] sm:$0x3] %vm358_vm1, %v754_v6  ;;  %v11314_v38 = vld [vmem:[#allocation2 + $0x48] sm:$0xff] }
 0x13b   : > { %v12539_v13 = vpop.permute.xlu0 %9655  ;;  %v3357_v14 = vpack.c.bf16 %v3100_v26, %v3099_v11  ;;  %9940 = vrot.lane.b32.xlu1 %v12490_v15, %s11518_s20  ;;  %3742 = vmatprep.mubr.bf16.mxu0 %v3358_v45  ;;  %v9954_v58 = vpack.i.bf16 %v1336_v59, %v1335_v43  ;;  %v9533_v3 = vunpack.i.h.bf16 %v12344_v10  ;;  %v9532_v55 = vunpack.i.l.bf16 %v12344_v10  ;;  %v1116_v59 = vld [vmem:[#allocation2 + $0x79] sm:$0xff]  ;;  %v1117_v11 = vld [vmem:[#allocation2 + $0x81] sm:$0xff] }
 0x13c   : > { %v9657_v1 = vunpack.i.l.bf16 %v12539_v13  ;;  %v3166_v22 = vsel %vm355_vm0, %v1115_v17, %v9653_v5  ;;  %v3165_v24 = vsel %vm355_vm0, %v1114_v0, %v9652_v56  ;;  %v9638_v62 = vunpack.i.h.bf16 %v12494_v40  ;;  %v12574_v5 = vld [vmem:[#allocation2 + $0x219] sm:$0xff] }
 0x13d   : > { %9945 = vrot.lane.b32.xlu0 %v9944_v39, %s11520_s27  ;;  %3743 = vmatmul.mubr.bf16.gmra.mrb[8].mxu0 %v3357_v14  ;;  %v9661_v31 = vpop.permute.xlu1 %9660  ;;  %v9959_v47 = vpack.i.bf16 %v1079_v9, %v12535_v50  ;;  %v12553_v20 = vpack.i.bf16 %v1209_v52, %v1208_v63  ;;  %v2972_v48 = vsel %vm355_vm0, %v12149_v28, %v9373_v54  ;;  %v9378_v45 = vunpack.i.h.bf16 %v12223_v4  ;;  %v12572_v54 = vld [vmem:[#allocation2 + $0x211] sm:$0xff] }
 0x13e   : > { %v3230_v32 = vsel %vm3029_vm3, %v3166_v22, %v9657_v1  ;;  %v9663_v10 = vunpack.i.h.bf16 %v9661_v31  ;;  %v9662_v61 = vunpack.i.l.bf16 %v9661_v31  ;;  %v12558_v2 = vpack.i.bf16 %v1274_v46, %v1273_v60  ;;  %v1401_v1 = vld [vmem:[#allocation2 + $0x212] sm:$0xff]  ;;  %v1403_v22 = vld [vmem:[#allocation2 + $0x22a] sm:$0xff] }
 0x13f   : > { %v9666_v8 = vpop.permute.xlu0 %9665  ;;  %v2971_v39 = vsel %vm355_vm0, %v11314_v38, %v9372_v25  ;;  %9950 = vrot.lane.b32.xlu1 %v12423_v35, %s11520_s27  ;;  %v3229_v43 = vsel %vm3029_vm3, %v3165_v24, %v9638_v62  ;;  %v3037_v12 = vsel %vm3029_vm3, %v2972_v48, %v9533_v3  ;;  %v9377_v56 = vunpack.i.l.bf16 %v12223_v4  ;;  %v12579_v25 = vld [vmem:[#allocation2 + $0x1f8] sm:$0xff] }
 0x140   : > { %v9668_v33 = vunpack.i.h.bf16 %v9666_v8  ;;  %v9667_v40 = vunpack.i.l.bf16 %v9666_v8  ;;  %v3293_v28 = vsel %vm3094_vm4, %v3229_v43, %v9662_v61  ;;  %v3294_v0 = vsel %vm3094_vm4, %v3230_v32, %v9663_v10  ;;  %v1404_v24 = vld [vmem:[#allocation2 + $0x232] sm:$0xff]  ;;  %v11315_v61 = vld [vmem:[#allocation2 + $0x68] sm:$0xff] }
 0x141   : > { %9955 = vrot.lane.b32.xlu0 %v9954_v58, %s11521_s17  ;;  %v3036_v17 = vsel %vm3029_vm3, %v2971_v39, %v9532_v55  ;;  %v9671_v26 = vpop.permute.xlu1 %9670  ;;  %v3361_v50 = vpack.c.bf16 %v3294_v0, %v3293_v28  ;;  %v1402_v58 = vld [vmem:[#allocation2 + $0x21a] sm:$0xff]  ;;  %v9538_v60 = vunpack.i.h.bf16 %v12346_v30  ;;  %v9658_v46 = vunpack.i.h.bf16 %v12539_v13 }
 0x142   : > { %v3101_v35 = vsel %vm3094_vm4, %v3036_v17, %v9667_v40  ;;  %v3102_v6 = vsel %vm3094_vm4, %v3037_v12, %v9668_v33  ;;  %v9673_v14 = vunpack.i.h.bf16 %v9671_v26  ;;  %v9672_v9 = vunpack.i.l.bf16 %v9671_v26  ;;  %v1081_v55 = vld [vmem:[#allocation2 + $0x200] sm:$0xff]  ;;  %v1210_v17 = vld [vmem:[#allocation2 + $0x212] sm:$0xff] }
 0x143   : > { %v12577_v63 = vpop.permute.xlu0 %9675  ;;  %v3360_v52 = vpack.c.bf16 %v3102_v6, %v3101_v35  ;;  %9960 = vrot.lane.b32.xlu1 %v9959_v47, %s11521_s17  ;;  %3750 = vmatprep.mubr.bf16.mxu0 %v3361_v50  ;;  %v3407_v4 = vpack.c.bf16 %v1402_v58, %v1401_v1  ;;  %v9537_v62 = vunpack.i.l.bf16 %v12346_v30  ;;  %v3410_v13 = vpack.c.bf16 %v1404_v24, %v1403_v22  ;;  %v11316_v40 = vld [vmem:[#allocation2 + $0x60] sm:$0xff]  ;;  %v1275_v35 = vld [vmem:[#allocation2 + $0x228] sm:$0xff]  ;;  %v1276_v6 = vld [vmem:[#allocation2 + $0x230] sm:$0xff] }
 0x144   : > { %v9677_v3 = vunpack.i.l.bf16 %v12577_v63  ;;  %v3168_v31 = vsel %vm355_vm0, %v1117_v11, %v9673_v14  ;;  %v3167_v32 = vsel %vm355_vm0, %v1116_v59, %v9672_v9  ;;  %v9979_v47 = vpack.i.bf16 %v12574_v5, %v12572_v54  ;;  %v1211_v50 = vld [vmem:[#allocation2 + $0x21a] sm:$0xff]  ;;  %v1118_v5 = vld [vmem:[#allocation2 + $0x91] sm:$0xff] }
 0x145   : > { %9965 = vrot.lane.b32.xlu0 %v12553_v20, %s11518_s20  ;;  %3751 = vmatmul.mubr.bf16.gmra.mrb[12].mxu0 %v3360_v52  ;;  %v9681_v48 = vpop.permute.xlu1 %9680  ;;  %v2974_v30 = vsel %vm355_vm0, %v11315_v61, %v9378_v45  ;;  %v9984_v33 = vpack.i.bf16 %v1081_v55, %v12579_v25  ;;  %v2973_v43 = vsel %vm355_vm0, %v11316_v40, %v9377_v56  ;;  %v9678_v54 = vunpack.i.h.bf16 %v12577_v63  ;;  %v1119_v56 = vld [vmem:[#allocation2 + $0x99] sm:$0xff] }
 0x146   : > { %v3232_v10 = vsel %vm3029_vm3, %v3168_v31, %v9677_v3  ;;  %9174 = vmatprep.mubr.msk.bf16.mxu1 %vm355_vm0, %v3407_v4  ;;  %v9683_v8 = vunpack.i.h.bf16 %v9681_v48  ;;  %v9682_v38 = vunpack.i.l.bf16 %v9681_v48  ;;  %v3231_v0 = vsel %vm3029_vm3, %v3167_v32, %v9658_v46  ;;  %v1340_v32 = vld [vmem:[#allocation2 + $0x231] sm:$0xff]  ;;  %v11317_v61 = vld [vmem:[#allocation2 + $0x80] sm:$0xff] }
 0x147   : > { %v9686_v39 = vpop.permute.xlu0 %9685  ;;  %9175 = vmatmul.mubr.msk.bf16.gmra.mrb[36].mxu1 %vm355_vm0, %v3410_v13  ;;  %9970 = vrot.lane.b32.xlu1 %v12558_v2, %s11520_s27  ;;  %v3038_v11 = vsel %vm3029_vm3, %v2973_v43, %v9537_v62  ;;  %v3039_v26 = vsel %vm3029_vm3, %v2974_v30, %v9538_v60  ;;  %v9383_v25 = vunpack.i.h.bf16 %v12229_v18  ;;  %v9382_v3 = vunpack.i.l.bf16 %v12229_v18  ;;  %v1339_v18 = vld [vmem:[#allocation2 + $0x229] sm:$0xff]  ;;  %v11318_v40 = vld [vmem:[#allocation2 + $0x78] sm:$0xff] }
 0x148   : > { %v9688_v59 = vunpack.i.h.bf16 %v9686_v39  ;;  %v9687_v28 = vunpack.i.l.bf16 %v9686_v39  ;;  %v3295_v12 = vsel %vm3094_vm4, %v3231_v0, %v9682_v38  ;;  %v3296_v45 = vsel %vm3094_vm4, %v3232_v10, %v9683_v8  ;;  %v1120_v0 = vld [vmem:[#allocation2 + $0xa9] sm:$0xff] }
 0x149   : > { %9975 = vrot.lane.b32.xlu0 %v12490_v15, %s11520_s27  ;;  %v9691_v14 = vpop.permute.xlu1 %9690  ;;  %v3364_v9 = vpack.c.bf16 %v3296_v45, %v3295_v12  ;;  %v12616_v63 = vpack.i.bf16 %v1211_v50, %v1210_v17  ;;  %v12618_v4 = vpack.i.bf16 %v1276_v6, %v1275_v35  ;;  %v9543_v22 = vunpack.i.h.bf16 %v12353_v57 }
 0x14a   : > { %v3103_v52 = vsel %vm3094_vm4, %v3038_v11, %v9687_v28  ;;  %v3104_v15 = vsel %vm3094_vm4, %v3039_v26, %v9688_v59  ;;  %v9693_v1 = vunpack.i.h.bf16 %v9691_v14  ;;  %v9692_v58 = vunpack.i.l.bf16 %v9691_v14  ;;  %v1121_v26 = vld [vmem:[#allocation2 + $0xb1] sm:$0xff] }
 0x14b   : > { %v12611_v46 = vpop.permute.xlu0 %9695  ;;  %v3363_v60 = vpack.c.bf16 %v3104_v15, %v3103_v52  ;;  %9980 = vrot.lane.b32.xlu1 %v9979_v47, %s11521_s17  ;;  %3758 = vmatprep.mubr.bf16.mxu0 %v3364_v9  ;;  %v9542_v24 = vunpack.i.l.bf16 %v12353_v57  ;;  %v9388_v13 = vunpack.i.h.bf16 %v12232_v19  ;;  %v2976_v30 = vsel %vm355_vm0, %v11317_v61, %v9383_v25 }
 0x14c   : > { %v9697_v55 = vunpack.i.l.bf16 %v12611_v46  ;;  %v3170_v62 = vsel %vm355_vm0, %v1119_v56, %v9693_v1  ;;  %v3169_v31 = vsel %vm355_vm0, %v1118_v5, %v9692_v58  ;;  %v9387_v57 = vunpack.i.l.bf16 %v12232_v19  ;;  %v1212_v5 = vld [vmem:[#allocation2 + $0x22a] sm:$0xff]  ;;  %v1213_v56 = vld [vmem:[#allocation2 + $0x232] sm:$0xff]  ;;  %v1277_v58 = vld [vmem:[#allocation2 + $0x240] sm:$0xff] }
 0x14d   : > { %9985 = vrot.lane.b32.xlu0 %v9984_v33, %s11521_s17  ;;  %3759 = vmatmul.mubr.bf16.gmra.mrb[16].mxu0 %v3363_v60  ;;  %v9701_v48 = vpop.permute.xlu1 %9700  ;;  %v3233_v47 = vsel %vm3029_vm3, %v3169_v31, %v9678_v54  ;;  %v2975_v33 = vsel %vm355_vm0, %v11318_v40, %v9382_v3  ;;  %v10004_v28 = vpack.i.bf16 %v1340_v32, %v1339_v18  ;;  %v9698_v11 = vunpack.i.h.bf16 %v12611_v46  ;;  %v1278_v46 = vld [vmem:[#allocation2 + $0x248] sm:$0xff]  ;;  %v11320_v31 = vld [vmem:[#allocation2 + $0x90] sm:$0xff] }
 0x14e   : > { %v3234_v10 = vsel %vm3029_vm3, %v3170_v62, %v9697_v55  ;;  %v9703_v8 = vunpack.i.h.bf16 %v9701_v48  ;;  %v9702_v38 = vunpack.i.l.bf16 %v9701_v48  ;;  %v3040_v12 = vsel %vm3029_vm3, %v2975_v33, %v9542_v24  ;;  %v11319_v24 = vld [vmem:[#allocation2 + $0x98] sm:$0xff] }
 0x14f   : > { %v9706_v39 = vpop.permute.xlu0 %9705  ;;  %9990 = vrot.lane.b32.xlu1 %v12616_v63, %s11518_s20  ;;  %v3041_v45 = vsel %vm3029_vm3, %v2976_v30, %v9543_v22  ;;  %v9547_v25 = vunpack.i.l.bf16 %v12356_v16  ;;  %v9548_v60 = vunpack.i.h.bf16 %v12356_v16  ;;  %v12652_v22 = vpack.i.bf16 %v1213_v56, %v1212_v5  ;;  %v1407_v33 = vld [vmem:[#allocation2 + $0x25a] sm:$0xff] }
 0x150   : > { %v9708_v43 = vunpack.i.h.bf16 %v9706_v39  ;;  %v9707_v59 = vunpack.i.l.bf16 %v9706_v39  ;;  %v3297_v17 = vsel %vm3094_vm4, %v3233_v47, %v9702_v38  ;;  %v3298_v19 = vsel %vm3094_vm4, %v3234_v10, %v9703_v8  ;;  %v1405_v8 = vld [vmem:[#allocation2 + $0x242] sm:$0xff]  ;;  %v1406_v38 = vld [vmem:[#allocation2 + $0x24a] sm:$0xff] }
 0x151   : > { %9995 = vrot.lane.b32.xlu0 %v12618_v4, %s11520_s27  ;;  %v9711_v50 = vpop.permute.xlu1 %9710  ;;  %v3367_v35 = vpack.c.bf16 %v3298_v19, %v3297_v17  ;;  %v2978_v62 = vsel %vm355_vm0, %v11319_v24, %v9388_v13  ;;  %v9393_v48 = vunpack.i.h.bf16 %v12239_v23  ;;  %v12659_v30 = vpack.i.bf16 %v1278_v46, %v1277_v58  ;;  %v1341_v17 = vld [vmem:[#allocation2 + $0x241] sm:$0xff]  ;;  %v1342_v19 = vld [vmem:[#allocation2 + $0x249] sm:$0xff] }
 0x152   : > { %v3105_v6 = vsel %vm3094_vm4, %v3040_v12, %v9707_v59  ;;  %v3106_v54 = vsel %vm3094_vm4, %v3041_v45, %v9708_v43  ;;  %v9713_v14 = vunpack.i.h.bf16 %v9711_v50  ;;  %v9712_v9 = vunpack.i.l.bf16 %v9711_v50  ;;  %v1408_v43 = vld [vmem:[#allocation2 + $0x262] sm:$0xff] }
 0x153   : > { %v12642_v52 = vpop.permute.xlu0 %9715  ;;  %v3366_v15 = vpack.c.bf16 %v3106_v54, %v3105_v6  ;;  %10000 = vrot.lane.b32.xlu1 %v12553_v20, %s11520_s27  ;;  %3766 = vmatprep.mubr.bf16.mxu0 %v3367_v35  ;;  %v2977_v20 = vsel %vm355_vm0, %v11320_v31, %v9387_v57  ;;  %v3413_v57 = vpack.c.bf16 %v1406_v38, %v1405_v8  ;;  %v9392_v54 = vunpack.i.l.bf16 %v12239_v23 }
 0x154   : > { %v9717_v1 = vunpack.i.l.bf16 %v12642_v52  ;;  %v3172_v3 = vsel %vm355_vm0, %v1121_v26, %v9713_v14  ;;  %v3171_v55 = vsel %vm355_vm0, %v1120_v0, %v9712_v9  ;;  %v3042_v13 = vsel %vm3029_vm3, %v2977_v20, %v9547_v25  ;;  %v1214_v25 = vld [vmem:[#allocation2 + $0x242] sm:$0xff] }
 0x155   : > { %10005 = vrot.lane.b32.xlu0 %v10004_v28, %s11521_s17  ;;  %3767 = vmatmul.mubr.bf16.gmra.mrb[20].mxu0 %v3366_v15  ;;  %v9721_v18 = vpop.permute.xlu1 %9720  ;;  %v3235_v32 = vsel %vm3029_vm3, %v3171_v55, %v9698_v11  ;;  %v3043_v0 = vsel %vm3029_vm3, %v2978_v62, %v9548_v60  ;;  %v3416_v12 = vpack.c.bf16 %v1408_v43, %v1407_v33  ;;  %v9718_v45 = vunpack.i.h.bf16 %v12642_v52  ;;  %v1123_v11 = vld [vmem:[#allocation2 + $0xc9] sm:$0xff]  ;;  %v1280_v55 = vld [vmem:[#allocation2 + $0x260] sm:$0xff] }
 0x156   : > { %v3236_v16 = vsel %vm3029_vm3, %v3172_v3, %v9717_v1  ;;  %v9723_v47 = vunpack.i.h.bf16 %v9721_v18  ;;  %v9722_v10 = vunpack.i.l.bf16 %v9721_v18  ;;  %9178 = vmatprep.mubr.msk.bf16.mxu1 %vm355_vm0, %v3413_v57  ;;  %v10029_v15 = vpack.i.bf16 %v1342_v19, %v1341_v17  ;;  %v1215_v60 = vld [vmem:[#allocation2 + $0x24a] sm:$0xff]  ;;  %v1279_v3 = vld [vmem:[#allocation2 + $0x258] sm:$0xff]  ;;  %v1344_v43 = vld [vmem:[#allocation2 + $0x261] sm:$0xff] }
 0x157   : > { %v9726_v61 = vpop.permute.xlu0 %9725  ;;  %10010 = vrot.lane.b32.xlu1 %v12558_v2, %s11521_s17  ;;  %v1122_v2 = vld [vmem:[#allocation2 + $0xc1] sm:$0xff]  ;;  %9179 = vmatmul.mubr.msk.bf16.gmra.mrb[40].mxu1 %vm355_vm0, %v3416_v12  ;;  %v9553_v1 = vunpack.i.h.bf16 %v12363_v49  ;;  %v9552_v58 = vunpack.i.l.bf16 %v12363_v49  ;;  %v9398_v24 = vunpack.i.h.bf16 %v12241_v27  ;;  %v11321_v18 = vld [vmem:[#allocation2 + $0xb0] sm:$0xff]  ;;  %v12692_v38 = vpack.i.bf16 %v1215_v60, %v1214_v25  ;;  %v1343_v33 = vld [vmem:[#allocation2 + $0x259] sm:$0xff] }
 0x158   : > { %v9728_v39 = vunpack.i.h.bf16 %v9726_v61  ;;  %v9727_v40 = vunpack.i.l.bf16 %v9726_v61  ;;  %v3299_v59 = vsel %vm3094_vm4, %v3235_v32, %v9722_v10  ;;  %v3300_v28 = vsel %vm3094_vm4, %v3236_v16, %v9723_v47  ;;  %v11322_v32 = vld [vmem:[#allocation2 + $0xa8] sm:$0xff] }
 0x159   : > { %10015 = vrot.lane.b32.xlu0 %v12652_v22, %s11518_s20  ;;  %v9731_v26 = vpop.permute.xlu1 %9730  ;;  %v3370_v50 = vpack.c.bf16 %v3300_v28, %v3299_v59  ;;  %v2980_v49 = vsel %vm355_vm0, %v11321_v18, %v9393_v48  ;;  %v2979_v16 = vsel %vm355_vm0, %v11322_v32, %v9392_v54  ;;  %v1124_v28 = vld [vmem:[#allocation2 + $0xd9] sm:$0xff]  ;;  %v9558_v54 = vunpack.i.h.bf16 %v12367_v7 }
 0x15a   : > { %v3107_v35 = vsel %vm3094_vm4, %v3042_v13, %v9727_v40  ;;  %v3108_v6 = vsel %vm3094_vm4, %v3043_v0, %v9728_v39  ;;  %v9733_v5 = vunpack.i.h.bf16 %v9731_v26  ;;  %v9732_v56 = vunpack.i.l.bf16 %v9731_v26  ;;  %v1125_v0 = vld [vmem:[#allocation2 + $0xe1] sm:$0xff] }
 0x15b   : > { %v12674_v14 = vpop.permute.xlu0 %9735  ;;  %v3369_v9 = vpack.c.bf16 %v3108_v6, %v3107_v35  ;;  %10020 = vrot.lane.b32.xlu1 %v12659_v30, %s11520_s27  ;;  %3774 = vmatprep.mubr.bf16.mxu0 %v3370_v50  ;;  %v12694_v39 = vpack.i.bf16 %v1280_v55, %v1279_v3  ;;  %v3044_v13 = vsel %vm3029_vm3, %v2979_v16, %v9552_v58  ;;  %v9403_v55 = vunpack.i.h.bf16 %v12245_v34  ;;  %v1281_v16 = vld [vmem:[#allocation2 + $0x270] sm:$0xff] }
 0x15c   : > { %v9737_v52 = vunpack.i.l.bf16 %v12674_v14  ;;  %v3174_v23 = vsel %vm355_vm0, %v1123_v11, %v9733_v5  ;;  %v3173_v46 = vsel %vm355_vm0, %v1122_v2, %v9732_v56  ;;  %v3045_v57 = vsel %vm3029_vm3, %v2980_v49, %v9553_v1  ;;  %v11323_v1 = vld [vmem:[#allocation2 + $0xc8] sm:$0xff] }
 0x15d   : > { %10025 = vrot.lane.b32.xlu0 %v12616_v63, %s11520_s27  ;;  %3775 = vmatmul.mubr.bf16.gmra.mrb[24].mxu0 %v3369_v9  ;;  %v9741_v62 = vpop.permute.xlu1 %9740  ;;  %v3237_v31 = vsel %vm3029_vm3, %v3173_v46, %v9718_v45  ;;  %v9738_v59 = vunpack.i.h.bf16 %v12674_v14  ;;  %v9397_v45 = vunpack.i.l.bf16 %v12241_v27  ;;  %v10054_v6 = vpack.i.bf16 %v1344_v43, %v1343_v33  ;;  %v1216_v14 = vld [vmem:[#allocation2 + $0x25a] sm:$0xff]  ;;  %v1217_v9 = vld [vmem:[#allocation2 + $0x262] sm:$0xff] }
 0x15e   : > { %v3238_v20 = vsel %vm3029_vm3, %v3174_v23, %v9737_v52  ;;  %v9743_v47 = vunpack.i.h.bf16 %v9741_v62  ;;  %v9742_v10 = vunpack.i.l.bf16 %v9741_v62  ;;  %v9557_v5 = vunpack.i.l.bf16 %v12367_v7  ;;  %v11324_v23 = vld [vmem:[#allocation2 + $0xc0] sm:$0xff] }
 0x15f   : > { %v9746_v63 = vpop.permute.xlu0 %9745  ;;  %10030 = vrot.lane.b32.xlu1 %v10029_v15, %s11521_s17  ;;  %v2982_v58 = vsel %vm355_vm0, %v11323_v1, %v9398_v24  ;;  %v2981_v7 = vsel %vm355_vm0, %v11324_v23, %v9397_v45  ;;  %v1411_v45 = vld [vmem:[#allocation2 + $0x28a] sm:$0xff] }
 0x160   : > { %v9748_v61 = vunpack.i.h.bf16 %v9746_v63  ;;  %v9747_v8 = vunpack.i.l.bf16 %v9746_v63  ;;  %v3301_v40 = vsel %vm3094_vm4, %v3237_v31, %v9742_v10  ;;  %v3302_v48 = vsel %vm3094_vm4, %v3238_v20, %v9743_v47  ;;  %v1282_v47 = vld [vmem:[#allocation2 + $0x278] sm:$0xff] }
 0x161   : > { %10035 = vrot.lane.b32.xlu0 %v12618_v4, %s11521_s17  ;;  %v9751_v17 = vpop.permute.xlu1 %9750  ;;  %v3373_v19 = vpack.c.bf16 %v3302_v48, %v3301_v40  ;;  %v12724_v20 = vpack.i.bf16 %v1217_v9, %v1216_v14  ;;  %v3046_v49 = vsel %vm3029_vm3, %v2981_v7, %v9557_v5  ;;  %v3047_v32 = vsel %vm3029_vm3, %v2982_v58, %v9558_v54  ;;  %v1126_v63 = vld [vmem:[#allocation2 + $0xf1] sm:$0xff] }
 0x162   : > { %v3109_v12 = vsel %vm3094_vm4, %v3044_v13, %v9747_v8  ;;  %v3110_v4 = vsel %vm3094_vm4, %v3045_v57, %v9748_v61  ;;  %v9753_v2 = vunpack.i.h.bf16 %v9751_v17  ;;  %v9752_v11 = vunpack.i.l.bf16 %v9751_v17  ;;  %v1127_v61 = vld [vmem:[#allocation2 + $0xf9] sm:$0xff] }
 0x163   : > { %v12706_v26 = vpop.permute.xlu0 %9755  ;;  %v3372_v50 = vpack.c.bf16 %v3110_v4, %v3109_v12  ;;  %10040 = vrot.lane.b32.xlu1 %v12692_v38, %s11518_s20  ;;  %3782 = vmatprep.mubr.bf16.mxu0 %v3373_v19  ;;  %v9402_v13 = vunpack.i.l.bf16 %v12245_v34  ;;  %v9563_v17 = vunpack.i.h.bf16 %v12375_v51  ;;  %v12741_v12 = vpack.i.bf16 %v1282_v47, %v1281_v16  ;;  %v1412_v34 = vld [vmem:[#allocation2 + $0x292] sm:$0xff] }
 0x164   : > { %v9757_v35 = vunpack.i.l.bf16 %v12706_v26  ;;  %v3176_v56 = vsel %vm355_vm0, %v1125_v0, %v9753_v2  ;;  %v3175_v27 = vsel %vm355_vm0, %v1124_v28, %v9752_v11  ;;  %v9758_v10 = vunpack.i.h.bf16 %v12706_v26  ;;  %v1409_v28 = vld [vmem:[#allocation2 + $0x272] sm:$0xff]  ;;  %v1410_v0 = vld [vmem:[#allocation2 + $0x27a] sm:$0xff] }
 0x165   : > { %10045 = vrot.lane.b32.xlu0 %v12694_v39, %s11520_s27  ;;  %3783 = vmatmul.mubr.bf16.gmra.mrb[28].mxu0 %v3372_v50  ;;  %v9761_v52 = vpop.permute.xlu1 %9760  ;;  %v3239_v15 = vsel %vm3029_vm3, %v3175_v27, %v9738_v59  ;;  %v3419_v4 = vpack.c.bf16 %v1410_v0, %v1409_v28  ;;  %v9562_v2 = vunpack.i.l.bf16 %v12375_v51  ;;  %v1345_v50 = vld [vmem:[#allocation2 + $0x271] sm:$0xff]  ;;  %v9408_v27 = vunpack.i.h.bf16 %v12247_v29  ;;  %v1347_v28 = vld [vmem:[#allocation2 + $0x289] sm:$0xff] }
 0x166   : > { %v3240_v25 = vsel %vm3029_vm3, %v3176_v56, %v9757_v35  ;;  %v9763_v46 = vunpack.i.h.bf16 %v9761_v52  ;;  %v9762_v60 = vunpack.i.l.bf16 %v9761_v52  ;;  %v1346_v35 = vld [vmem:[#allocation2 + $0x279] sm:$0xff]  ;;  %v1348_v0 = vld [vmem:[#allocation2 + $0x291] sm:$0xff] }
 0x167   : > { %v9766_v3 = vpop.permute.xlu0 %9765  ;;  %10050 = vrot.lane.b32.xlu1 %v12652_v22, %s11520_s27  ;;  %9182 = vmatprep.mubr.msk.bf16.mxu1 %vm355_vm0, %v3419_v4  ;;  %v11325_v56 = vld [vmem:[#allocation2 + $0xe0] sm:$0xff]  ;;  %v10079_v23 = vpack.i.bf16 %v1346_v35, %v1345_v50  ;;  %v1218_v7 = vld [vmem:[#allocation2 + $0x272] sm:$0xff]  ;;  %v9413_v35 = vunpack.i.h.bf16 %v12253_v36 }
 0x168   : > { %v9768_v62 = vunpack.i.h.bf16 %v9766_v3  ;;  %v9767_v31 = vunpack.i.l.bf16 %v9766_v3  ;;  %v3303_v18 = vsel %vm3094_vm4, %v3239_v15, %v9762_v60  ;;  %v3304_v24 = vsel %vm3094_vm4, %v3240_v25, %v9763_v46  ;;  %v11326_v15 = vld [vmem:[#allocation2 + $0xd8] sm:$0xff] }
 0x169   : > { %10055 = vrot.lane.b32.xlu0 %v10054_v6, %s11521_s17  ;;  %v9771_v8 = vpop.permute.xlu1 %9770  ;;  %v3376_v22 = vpack.c.bf16 %v3304_v24, %v3303_v18  ;;  %v3422_v6 = vpack.c.bf16 %v1412_v34, %v1411_v45  ;;  %v2984_v51 = vsel %vm355_vm0, %v11325_v56, %v9403_v55  ;;  %v2983_v25 = vsel %vm355_vm0, %v11326_v15, %v9402_v13  ;;  %v1284_v18 = vld [vmem:[#allocation2 + $0x290] sm:$0xff]  ;;  %v11327_v45 = vld [vmem:[#allocation2 + $0xf8] sm:$0xff] }
 0x16a   : > { %v3111_v40 = vsel %vm3094_vm4, %v3046_v49, %v9767_v31  ;;  %v3112_v48 = vsel %vm3094_vm4, %v3047_v32, %v9768_v62  ;;  %v9773_v57 = vunpack.i.h.bf16 %v9771_v8  ;;  %v9772_v33 = vunpack.i.l.bf16 %v9771_v8  ;;  %v1219_v62 = vld [vmem:[#allocation2 + $0x27a] sm:$0xff]  ;;  %v1283_v31 = vld [vmem:[#allocation2 + $0x288] sm:$0xff]  ;;  %v1129_v32 = vld [vmem:[#allocation2 + $0x111] sm:$0xff] }
 0x16b   : > { %v12735_v43 = vpop.permute.xlu0 %9775  ;;  %v3375_v59 = vpack.c.bf16 %v3112_v48, %v3111_v40  ;;  %10060 = vrot.lane.b32.xlu1 %v12659_v30, %s11521_s17  ;;  %3790 = vmatprep.mubr.bf16.mxu0 %v3376_v22  ;;  %v3048_v3 = vsel %vm3029_vm3, %v2983_v25, %v9562_v2  ;;  %v3049_v55 = vsel %vm3029_vm3, %v2984_v51, %v9563_v17  ;;  %v1128_v49 = vld [vmem:[#allocation2 + $0x109] sm:$0xff] }
 0x16c   : > { %v9777_v19 = vunpack.i.l.bf16 %v12735_v43  ;;  %v3178_v11 = vsel %vm355_vm0, %v1127_v61, %v9773_v57  ;;  %v3177_v26 = vsel %vm355_vm0, %v1126_v63, %v9772_v33  ;;  %9183 = vmatmul.mubr.msk.bf16.gmra.mrb[44].mxu1 %vm355_vm0, %v3422_v6  ;;  %v9778_v24 = vunpack.i.h.bf16 %v12735_v43  ;;  %v11328_v2 = vld [vmem:[#allocation2 + $0xf0] sm:$0xff] }
 0x16d   : > { %10065 = vrot.lane.b32.xlu0 %v12724_v20, %s11518_s20  ;;  %3791 = vmatmul.mubr.bf16.gmra.mrb[32].mxu0 %v3375_v59  ;;  %v9781_v30 = vpop.permute.xlu1 %9780  ;;  %v3241_v54 = vsel %vm3029_vm3, %v3177_v26, %v9758_v10  ;;  %v9407_v63 = vunpack.i.l.bf16 %v12247_v29  ;;  %v12771_v13 = vpack.i.bf16 %v1219_v62, %v1218_v7  ;;  %v12773_v57 = vpack.i.bf16 %v1284_v18, %v1283_v31  ;;  %v1285_v18 = vld [vmem:[#allocation2 + $0x2a0] sm:$0xff] }
 0x16e   : > { %v3242_v5 = vsel %vm3029_vm3, %v3178_v11, %v9777_v19  ;;  %v9783_v14 = vunpack.i.h.bf16 %v9781_v30  ;;  %v9782_v9 = vunpack.i.l.bf16 %v9781_v30  ;;  %v9568_v33 = vunpack.i.h.bf16 %v12377_v42 }
 0x16f   : > { %v9786_v52 = vpop.permute.xlu0 %9785  ;;  %10070 = vrot.lane.b32.xlu1 %v12741_v12, %s11520_s27  ;;  %v9567_v43 = vunpack.i.l.bf16 %v12377_v42  ;;  %v2986_v34 = vsel %vm355_vm0, %v11327_v45, %v9408_v27  ;;  %v2985_v42 = vsel %vm355_vm0, %v11328_v2, %v9407_v63  ;;  %v10104_v30 = vpack.i.bf16 %v1348_v0, %v1347_v28 }
 0x170   : > { %v9788_v1 = vunpack.i.h.bf16 %v9786_v52  ;;  %v9787_v58 = vunpack.i.l.bf16 %v9786_v52  ;;  %v3305_v46 = vsel %vm3094_vm4, %v3241_v54, %v9782_v9  ;;  %v3306_v60 = vsel %vm3094_vm4, %v3242_v5, %v9783_v14  ;;  %v1130_v54 = vld [vmem:[#allocation2 + $0x121] sm:$0xff]  ;;  %v1131_v9 = vld [vmem:[#allocation2 + $0x129] sm:$0xff] }
 0x171   : > { %10075 = vrot.lane.b32.xlu0 %v12692_v38, %s11520_s27  ;;  %v9791_v16 = vpop.permute.xlu1 %9790  ;;  %v3379_v47 = vpack.c.bf16 %v3306_v60, %v3305_v46  ;;  %v3050_v51 = vsel %vm3029_vm3, %v2985_v42, %v9567_v43  ;;  %v3051_v27 = vsel %vm3029_vm3, %v2986_v34, %v9568_v33  ;;  %v9412_v7 = vunpack.i.l.bf16 %v12253_v36  ;;  %v1413_v43 = vld [vmem:[#allocation2 + $0x2a2] sm:$0xff] }
 0x172   : > { %v3113_v10 = vsel %vm3094_vm4, %v3048_v3, %v9787_v58  ;;  %v3114_v38 = vsel %vm3094_vm4, %v3049_v55, %v9788_v1  ;;  %v9793_v61 = vunpack.i.h.bf16 %v9791_v16  ;;  %v9792_v8 = vunpack.i.l.bf16 %v9791_v16  ;;  %v1220_v58 = vld [vmem:[#allocation2 + $0x28a] sm:$0xff]  ;;  %v1349_v42 = vld [vmem:[#allocation2 + $0x2a1] sm:$0xff] }
 0x173   : > { %v12767_v22 = vpop.permute.xlu0 %9795  ;;  %v3378_v40 = vpack.c.bf16 %v3114_v38, %v3113_v10  ;;  %10080 = vrot.lane.b32.xlu1 %v10079_v23, %s11521_s17  ;;  %3798 = vmatprep.mubr.bf16.mxu0 %v3379_v47  ;;  %v1221_v23 = vld [vmem:[#allocation2 + $0x292] sm:$0xff]  ;;  %v9572_v62 = vunpack.i.l.bf16 %v12382_v37  ;;  %v9418_v38 = vunpack.i.h.bf16 %v12255_v41 }
 0x174   : > { %v9797_v48 = vunpack.i.l.bf16 %v12767_v22  ;;  %v3180_v29 = vsel %vm355_vm0, %v1129_v32, %v9793_v61  ;;  %v3179_v59 = vsel %vm355_vm0, %v1128_v49, %v9792_v8  ;;  %v9798_v14 = vunpack.i.h.bf16 %v12767_v22  ;;  %v11329_v47 = vld [vmem:[#allocation2 + $0x110] sm:$0xff] }
 0x175   : > { %10085 = vrot.lane.b32.xlu0 %v12694_v39, %s11521_s17  ;;  %3799 = vmatmul.mubr.bf16.gmra.mrb[36].mxu0 %v3378_v40  ;;  %v9801_v17 = vpop.permute.xlu1 %9800  ;;  %v3243_v19 = vsel %vm3029_vm3, %v3179_v59, %v9778_v24  ;;  %v1286_v24 = vld [vmem:[#allocation2 + $0x2a8] sm:$0xff]  ;;  %v9573_v49 = vunpack.i.h.bf16 %v12382_v37  ;;  %v12808_v16 = vpack.i.bf16 %v1221_v23, %v1220_v58  ;;  %v2988_v10 = vsel %vm355_vm0, %v11329_v47, %v9413_v35 }
 0x176   : > { %v3244_v4 = vsel %vm3029_vm3, %v3180_v29, %v9797_v48  ;;  %v9803_v11 = vunpack.i.h.bf16 %v9801_v17  ;;  %v9802_v26 = vunpack.i.l.bf16 %v9801_v17  ;;  %v11330_v37 = vld [vmem:[#allocation2 + $0x108] sm:$0xff]  ;;  %v12815_v33 = vpack.i.bf16 %v1286_v24, %v1285_v18 }
 0x177   : > { %v9806_v50 = vpop.permute.xlu0 %9805  ;;  %10090 = vrot.lane.b32.xlu1 %v12771_v13, %s11518_s20  ;;  %v2987_v8 = vsel %vm355_vm0, %v11330_v37, %v9412_v7  ;;  %v1414_v29 = vld [vmem:[#allocation2 + $0x2aa] sm:$0xff]  ;;  %v3053_v2 = vsel %vm3029_vm3, %v2988_v10, %v9573_v49  ;;  %v1133_v35 = vld [vmem:[#allocation2 + $0x141] sm:$0xff]  ;;  %v1287_v7 = vld [vmem:[#allocation2 + $0x2b8] sm:$0xff] }
 0x178   : > { %v9808_v39 = vunpack.i.h.bf16 %v9806_v50  ;;  %v9807_v6 = vunpack.i.l.bf16 %v9806_v50  ;;  %v3307_v5 = vsel %vm3094_vm4, %v3243_v19, %v9802_v26  ;;  %v3308_v56 = vsel %vm3094_vm4, %v3244_v4, %v9803_v11  ;;  %v1415_v19 = vld [vmem:[#allocation2 + $0x2ba] sm:$0xff]  ;;  %v1416_v4 = vld [vmem:[#allocation2 + $0x2c2] sm:$0xff]  ;;  %v1223_v23 = vld [vmem:[#allocation2 + $0x2aa] sm:$0xff] }
 0x179   : > { %10095 = vrot.lane.b32.xlu0 %v12773_v57, %s11520_s27  ;;  %v9811_v52 = vpop.permute.xlu1 %9810  ;;  %v3382_v15 = vpack.c.bf16 %v3308_v56, %v3307_v5  ;;  %v3052_v0 = vsel %vm3029_vm3, %v2987_v8, %v9572_v62  ;;  %v3425_v17 = vpack.c.bf16 %v1414_v29, %v1413_v43  ;;  %v1350_v11 = vld [vmem:[#allocation2 + $0x2a9] sm:$0xff]  ;;  %v3428_v26 = vpack.c.bf16 %v1416_v4, %v1415_v19  ;;  %v1351_v37 = vld [vmem:[#allocation2 + $0x2b9] sm:$0xff]  ;;  %v1352_v8 = vld [vmem:[#allocation2 + $0x2c1] sm:$0xff] }
 0x17a   : > { %v3115_v25 = vsel %vm3094_vm4, %v3050_v51, %v9807_v6  ;;  %v3116_v1 = vsel %vm3094_vm4, %v3051_v27, %v9808_v39  ;;  %v9813_v46 = vunpack.i.h.bf16 %v9811_v52  ;;  %v9812_v60 = vunpack.i.l.bf16 %v9811_v52  ;;  %v11331_v62 = vld [vmem:[#allocation2 + $0x128] sm:$0xff]  ;;  %v1135_v43 = vld [vmem:[#allocation2 + $0x159] sm:$0xff] }
 0x17b   : > { %v12798_v3 = vpop.permute.xlu0 %9815  ;;  %v3381_v55 = vpack.c.bf16 %v3116_v1, %v3115_v25  ;;  %10100 = vrot.lane.b32.xlu1 %v12724_v20, %s11520_s27  ;;  %3806 = vmatprep.mubr.bf16.mxu0 %v3382_v15  ;;  %v9417_v5 = vunpack.i.l.bf16 %v12255_v41  ;;  %v10129_v52 = vpack.i.bf16 %v1350_v11, %v1349_v42  ;;  %v1222_v15 = vld [vmem:[#allocation2 + $0x2a2] sm:$0xff]  ;;  %v9578_v25 = vunpack.i.h.bf16 %v12386_v44 }
 0x17c   : > { %v9817_v31 = vunpack.i.l.bf16 %v12798_v3  ;;  %v3182_v32 = vsel %vm355_vm0, %v1131_v9, %v9813_v46  ;;  %v3181_v36 = vsel %vm355_vm0, %v1130_v54, %v9812_v60  ;;  %v9818_v50 = vunpack.i.h.bf16 %v12798_v3  ;;  %9186 = vmatprep.mubr.msk.bf16.mxu1 %vm355_vm0, %v3425_v17  ;;  %v1288_v46 = vld [vmem:[#allocation2 + $0x2c0] sm:$0xff] }
 0x17d   : > { %10105 = vrot.lane.b32.xlu0 %v10104_v30, %s11521_s17  ;;  %3807 = vmatmul.mubr.bf16.gmra.mrb[40].mxu0 %v3381_v55  ;;  %v9821_v20 = vpop.permute.xlu1 %9820  ;;  %v3245_v63 = vsel %vm3029_vm3, %v3181_v36, %v9798_v14  ;;  %v9577_v1 = vunpack.i.l.bf16 %v12386_v44  ;;  %v11332_v44 = vld [vmem:[#allocation2 + $0x120] sm:$0xff]  ;;  %v12847_v47 = vpack.i.bf16 %v1223_v23, %v1222_v15  ;;  %v12849_v10 = vpack.i.bf16 %v1288_v46, %v1287_v7 }
 0x17e   : > { %v3246_v61 = vsel %vm3029_vm3, %v3182_v32, %v9817_v31  ;;  %v9823_v22 = vunpack.i.h.bf16 %v9821_v20  ;;  %v9822_v40 = vunpack.i.l.bf16 %v9821_v20  ;;  %9187 = vmatmul.mubr.msk.bf16.gmra.mrb[48].mxu1 %vm355_vm0, %v3428_v26  ;;  %v2990_v31 = vsel %vm355_vm0, %v11331_v62, %v9418_v38 }
 0x17f   : > { %v9826_v48 = vpop.permute.xlu0 %9825  ;;  %10110 = vrot.lane.b32.xlu1 %v12741_v12, %s11521_s17  ;;  %v1132_v12 = vld [vmem:[#allocation2 + $0x139] sm:$0xff]  ;;  %v2989_v18 = vsel %vm355_vm0, %v11332_v44, %v9417_v5  ;;  %v9423_v17 = vunpack.i.h.bf16 %v12259_v53  ;;  %v9422_v42 = vunpack.i.l.bf16 %v12259_v53  ;;  %v10154_v26 = vpack.i.bf16 %v1352_v8, %v1351_v37 }
 0x180   : > { %v9828_v59 = vunpack.i.h.bf16 %v9826_v48  ;;  %v9827_v28 = vunpack.i.l.bf16 %v9826_v48  ;;  %v3309_v45 = vsel %vm3094_vm4, %v3245_v63, %v9822_v40  ;;  %v3310_v34 = vsel %vm3094_vm4, %v3246_v61, %v9823_v22  ;;  %v12857_v22 = vpop.f32.mrb[0].mxu1  ;;  %v1134_v48 = vld [vmem:[#allocation2 + $0x151] sm:$0xff]  ;;  %v1224_v53 = vld [vmem:[#allocation2 + $0x2ba] sm:$0xff] }
 0x181   : > { %10115 = vrot.lane.b32.xlu0 %v12808_v16, %s11518_s20  ;;  %v9831_v39 = vpop.permute.xlu1 %9830  ;;  %v3385_v6 = vpack.c.bf16 %v3310_v34, %v3309_v45  ;;  %v3054_v63 = vsel %vm3029_vm3, %v2989_v18, %v9577_v1  ;;  %v3055_v61 = vsel %vm3029_vm3, %v2990_v31, %v9578_v25  ;;  %v1289_v31 = vld [vmem:[#allocation2 + $0x2d0] sm:$0xff]  ;;  %v1290_v44 = vld [vmem:[#allocation2 + $0x2d8] sm:$0xff]  ;;  %v9587_v8 = vunpack.i.l.bf16 %v12396_v21 }
 0x182   : > { %v3117_v30 = vsel %vm3094_vm4, %v3052_v0, %v9827_v28  ;;  %v3118_v54 = vsel %vm3094_vm4, %v3053_v2, %v9828_v59  ;;  %v9833_v56 = vunpack.i.h.bf16 %v9831_v39  ;;  %v9832_v51 = vunpack.i.l.bf16 %v9831_v39  ;;  %v12862_v0 = vpop.f32.mrb[1].mxu1  ;;  %v11335_v21 = vld [vmem:[#allocation2 + $0x158] sm:$0xff] }
 0x183   : > { %v12830_v27 = vpop.permute.xlu0 %9835  ;;  %v3384_v14 = vpack.c.bf16 %v3118_v54, %v3117_v30  ;;  %10120 = vrot.lane.b32.xlu1 %v12815_v33, %s11520_s27  ;;  %3814 = vmatprep.mubr.bf16.mxu0 %v3385_v6  ;;  %v12867_v2 = vpop.f32.mrb[2].mxu1  ;;  %v1225_v54 = vld [vmem:[#allocation2 + $0x2c2] sm:$0xff] }
 0x184   : > { %v9837_v9 = vunpack.i.l.bf16 %v12830_v27  ;;  %v3184_v41 = vsel %vm355_vm0, %v1133_v35, %v9833_v56  ;;  %v3183_v58 = vsel %vm355_vm0, %v1132_v12, %v9832_v51  ;;  %v9838_v40 = vunpack.i.h.bf16 %v12830_v27  ;;  %v16265_v12 = vld [vmem:[#allocation27_spill] sm:$0xff]  ;;  %v11333_v27 = vld [vmem:[#allocation2 + $0x140] sm:$0xff] }
 0x185   : > { %10125 = vrot.lane.b32.xlu0 %v12771_v13, %s11520_s27  ;;  %3815 = vmatmul.mubr.bf16.gmra.mrb[44].mxu0 %v3384_v14  ;;  %v9841_v60 = vpop.permute.xlu1 %9840  ;;  %v3247_v3 = vsel %vm3029_vm3, %v3183_v58, %v9818_v50  ;;  %v12873_v50 = vpop.f32.mrb[3].mxu1  ;;  %v9583_v35 = vunpack.i.h.bf16 %v16265_v12  ;;  %v9582_v39 = vunpack.i.l.bf16 %v16265_v12  ;;  %v2992_v14 = vsel %vm355_vm0, %v11333_v27, %v9423_v17 }
 0x186   : > { %v3248_v55 = vsel %vm3029_vm3, %v3184_v41, %v9837_v9  ;;  %v9843_v24 = vunpack.i.h.bf16 %v9841_v60  ;;  %v9842_v49 = vunpack.i.l.bf16 %v9841_v60  ;;  %v16266_v9 = vld [vmem:[#allocation9_spill] sm:$0xff]  ;;  %v11334_v41 = vld [vmem:[#allocation2 + $0x138] sm:$0xff]  ;;  %v12888_v46 = vpack.i.bf16 %v1225_v54, %v1224_v53 }
 0x187   : > { %v9846_v32 = vpop.permute.xlu0 %9845  ;;  %10130 = vrot.lane.b32.xlu1 %v10129_v52, %s11521_s17  ;;  %v9428_v52 = vunpack.i.h.bf16 %v16266_v9  ;;  %v2991_v58 = vsel %vm355_vm0, %v11334_v41, %v9422_v42  ;;  %v3057_v62 = vsel %vm3029_vm3, %v2992_v14, %v9583_v35  ;;  %v11336_v42 = vld [vmem:[#allocation2 + $0x150] sm:$0xff]  ;;  %v1418_v53 = vld [vmem:[#allocation2 + $0x2da] sm:$0xff] }
 0x188   : > { %v9848_v36 = vunpack.i.h.bf16 %v9846_v32  ;;  %v9847_v13 = vunpack.i.l.bf16 %v9846_v32  ;;  %v3311_v20 = vsel %vm3094_vm4, %v3247_v3, %v9842_v49  ;;  %v3312_v38 = vsel %vm3094_vm4, %v3248_v55, %v9843_v24  ;;  %v1136_v24 = vld [vmem:[#allocation2 + $0x169] sm:$0xff]  ;;  %v1137_v49 = vld [vmem:[#allocation2 + $0x171] sm:$0xff] }
 0x189   : > { %10135 = vrot.lane.b32.xlu0 %v12773_v57, %s11521_s17  ;;  %v9851_v29 = vpop.permute.xlu1 %9850  ;;  %v3388_v59 = vpack.c.bf16 %v3312_v38, %v3311_v20  ;;  %v3056_v55 = vsel %vm3029_vm3, %v2991_v58, %v9582_v39  ;;  %v9427_v20 = vunpack.i.l.bf16 %v16266_v9  ;;  %v1419_v14 = vld [vmem:[#allocation2 + $0x2ea] sm:$0xff]  ;;  %v1420_v9 = vld [vmem:[#allocation2 + $0x2f2] sm:$0xff]  ;;  %v1227_v58 = vld [vmem:[#allocation2 + $0x2da] sm:$0xff] }
 0x18a   : > { %v3119_v57 = vsel %vm3094_vm4, %v3054_v63, %v9847_v13  ;;  %v3120_v28 = vsel %vm3094_vm4, %v3055_v61, %v9848_v36  ;;  %v9853_v19 = vunpack.i.h.bf16 %v9851_v29  ;;  %v9852_v4 = vunpack.i.l.bf16 %v9851_v29  ;;  %v1354_v29 = vld [vmem:[#allocation2 + $0x2d9] sm:$0xff] }
 0x18b   : > { %v12865_v45 = vpop.permute.xlu0 %9855  ;;  %v3387_v34 = vpack.c.bf16 %v3120_v28, %v3119_v57  ;;  %10140 = vrot.lane.b32.xlu1 %v12847_v47, %s11518_s20  ;;  %3822 = vmatprep.mubr.bf16.mxu0 %v3388_v59  ;;  %v1226_v41 = vld [vmem:[#allocation2 + $0x2d2] sm:$0xff] }
 0x18c   : > { %v9857_v11 = vunpack.i.l.bf16 %v12865_v45  ;;  %v3186_v6 = vsel %vm355_vm0, %v1135_v43, %v9853_v19  ;;  %v3185_v30 = vsel %vm355_vm0, %v1134_v48, %v9852_v4  ;;  %v9858_v18 = vunpack.i.h.bf16 %v12865_v45  ;;  %v1353_v43 = vld [vmem:[#allocation2 + $0x2d1] sm:$0xff] }
 0x18d   : > { %10145 = vrot.lane.b32.xlu0 %v12849_v10, %s11520_s27  ;;  %3823 = vmatmul.mubr.bf16.gmra.mrb[48].mxu0 %v3387_v34  ;;  %v9861_v5 = vpop.permute.xlu1 %9860  ;;  %v3249_v56 = vsel %vm3029_vm3, %v3185_v30, %v9838_v40  ;;  %v12902_v48 = vpack.i.bf16 %v1290_v44, %v1289_v31  ;;  %v12908_v17 = vpop.f32.mrb[4].mxu1  ;;  %v2994_v19 = vsel %vm355_vm0, %v11335_v21, %v9428_v52  ;;  %v1417_v30 = vld [vmem:[#allocation2 + $0x2d2] sm:$0xff]  ;;  %v1138_v52 = vld [vmem:[#allocation2 + $0x181] sm:$0xff] }
 0x18e   : > { %v3250_v51 = vsel %vm3029_vm3, %v3186_v6, %v9857_v11  ;;  %v9863_v15 = vunpack.i.h.bf16 %v9861_v5  ;;  %v9862_v25 = vunpack.i.l.bf16 %v9861_v5  ;;  %v12913_v34 = vpop.f32.mrb[5].mxu1  ;;  %v2993_v11 = vsel %vm355_vm0, %v11336_v42, %v9427_v20  ;;  %v1291_v31 = vld [vmem:[#allocation2 + $0x2e8] sm:$0xff]  ;;  %v1292_v44 = vld [vmem:[#allocation2 + $0x2f0] sm:$0xff] }
 0x18f   : > { %v9866_v1 = vpop.permute.xlu0 %9865  ;;  %10150 = vrot.lane.b32.xlu1 %v12808_v16, %s11520_s27  ;;  %v10179_v39 = vpack.i.bf16 %v1354_v29, %v1353_v43  ;;  %v12916_v6 = vpop.f32.mrb[6].mxu1  ;;  %v3431_v27 = vpack.c.bf16 %v1418_v53, %v1417_v30 }
 0x190   : > { %v9868_v23 = vunpack.i.h.bf16 %v9866_v1  ;;  %v9867_v7 = vunpack.i.l.bf16 %v9866_v1  ;;  %v3313_v60 = vsel %vm3094_vm4, %v3249_v56, %v9862_v25  ;;  %v3314_v3 = vsel %vm3094_vm4, %v3250_v51, %v9863_v15  ;;  %v12921_v51 = vpop.f32.mrb[7].mxu1 }
 0x191   : > { %10155 = vrot.lane.b32.xlu0 %v10154_v26, %s11521_s17  ;;  %v9871_v32 = vpop.permute.xlu1 %9870  ;;  %v3391_v16 = vpack.c.bf16 %v3314_v3, %v3313_v60  ;;  %v3058_v56 = vsel %vm3029_vm3, %v2993_v11, %v9587_v8  ;;  %9190 = vmatprep.mubr.msk.bf16.mxu1 %vm355_vm0, %v3431_v27  ;;  %v1355_v8 = vld [vmem:[#allocation2 + $0x2e9] sm:$0xff] }
 0x192   : > { %v3121_v36 = vsel %vm3094_vm4, %v3056_v55, %v9867_v7  ;;  %v3122_v13 = vsel %vm3094_vm4, %v3057_v62, %v9868_v23  ;;  %v9873_v38 = vunpack.i.h.bf16 %v9871_v32  ;;  %v9872_v63 = vunpack.i.l.bf16 %v9871_v32  ;;  %v1139_v7 = vld [vmem:[#allocation2 + $0x189] sm:$0xff] }
 0x193   : > { %v9876_v61 = vpop.permute.xlu0 %9875  ;;  %v3390_v37 = vpack.c.bf16 %v3122_v13, %v3121_v36  ;;  %10160 = vrot.lane.b32.xlu1 %v12815_v33, %s11521_s17  ;;  %3830 = vmatprep.mubr.bf16.mxu0 %v3391_v16  ;;  %v3434_v23 = vpack.c.bf16 %v1420_v9, %v1419_v14  ;;  %v12933_v36 = vpack.i.bf16 %v1227_v58, %v1226_v41  ;;  %v1140_v27 = vld [vmem:[#allocation2 + $0x1c9] sm:$0xff]  ;;  %v1141_v14 = vld [vmem:[#allocation2 + $0x1d1] sm:$0xff] }
 0x194   : > { %v9877_v40 = vunpack.i.l.bf16 %v9876_v61  ;;  %v3188_v59 = vsel %vm355_vm0, %v1137_v49, %v9873_v38  ;;  %v3187_v57 = vsel %vm355_vm0, %v1136_v24, %v9872_v63  ;;  %v9878_v28 = vunpack.i.h.bf16 %v9876_v61  ;;  %v16267_v63 = vld [vmem:[#allocation10_spill] sm:$0xff] }
 0x195   : > { %10165 = vrot.lane.b32.xlu0 %v12888_v46, %s11518_s20  ;;  %3831 = vmatmul.mubr.bf16.gmra.mrb[52].mxu0 %v3390_v37  ;;  %v9881_v33 = vpop.permute.xlu1 %9880  ;;  %v3251_v4 = vsel %vm3029_vm3, %v3187_v57, %v9858_v18  ;;  %v12939_v38 = vpack.i.bf16 %v1292_v44, %v1291_v31  ;;  %v9433_v61 = vunpack.i.h.bf16 %v16267_v63  ;;  %v9432_v43 = vunpack.i.l.bf16 %v16267_v63 }
 0x196   : > { %v3252_v45 = vsel %vm3029_vm3, %v3188_v59, %v9877_v40  ;;  %v9883_v26 = vunpack.i.h.bf16 %v9881_v33  ;;  %v9882_v12 = vunpack.i.l.bf16 %v9881_v33  ;;  %v3059_v1 = vsel %vm3029_vm3, %v2994_v19, %v9878_v28  ;;  %9191 = vmatmul.mubr.msk.bf16.gmra.mrb[52].mxu1 %vm355_vm0, %v3434_v23  ;;  %v1356_v40 = vld [vmem:[#allocation2 + $0x2f1] sm:$0xff]  ;;  %v1293_v23 = vld [vmem:[#allocation2 + $0x300] sm:$0xff] }
 0x197   : > { %v9886_v35 = vpop.permute.xlu0 %9885  ;;  %10170 = vrot.lane.b32.xlu1 %v12902_v48, %s11520_s27 }
 0x198   : > { %v9888_v54 = vunpack.i.h.bf16 %v9886_v35  ;;  %v9887_v5 = vunpack.i.l.bf16 %v9886_v35  ;;  %v3315_v15 = vsel %vm3094_vm4, %v3251_v4, %v9882_v12  ;;  %v3316_v25 = vsel %vm3094_vm4, %v3252_v45, %v9883_v26  ;;  %v11337_v4 = vld [vmem:[#allocation2 + $0x170] sm:$0xff] }
 0x199   : > { %10175 = vrot.lane.b32.xlu0 %v12847_v47, %s11520_s27  ;;  %v9891_v60 = vpop.permute.xlu1 %9890  ;;  %v3394_v3 = vpack.c.bf16 %v3316_v25, %v3315_v15  ;;  %v2996_v45 = vsel %vm355_vm0, %v11337_v4, %v9433_v61  ;;  %v1228_v12 = vld [vmem:[#allocation2 + $0x2ea] sm:$0xff]  ;;  %v1229_v35 = vld [vmem:[#allocation2 + $0x2f2] sm:$0xff] }
 0x19a   : > { %v3123_v55 = vsel %vm3094_vm4, %v3058_v56, %v9887_v5  ;;  %v3124_v62 = vsel %vm3094_vm4, %v3059_v1, %v9888_v54  ;;  %v9893_v47 = vunpack.i.h.bf16 %v9891_v60  ;;  %v9892_v18 = vunpack.i.l.bf16 %v9891_v60  ;;  %v16268_v60 = vld [vmem:[#allocation11_spill] sm:$0xff] }
 0x19b   : > { %v9896_v24 = vpop.permute.xlu0 %9895  ;;  %v3393_v49 = vpack.c.bf16 %v3124_v62, %v3123_v55  ;;  %10180 = vrot.lane.b32.xlu1 %v10179_v39, %s11521_s17  ;;  %3838 = vmatprep.mubr.bf16.mxu0 %v3394_v3  ;;  %v11338_v39 = vld [vmem:[#allocation2 + $0x168] sm:$0xff]  ;;  %v12958_v1 = vpack.i.bf16 %v1229_v35, %v1228_v12  ;;  %v9438_v3 = vunpack.i.h.bf16 %v16268_v60 }
 0x19c   : > { %v9898_v32 = vunpack.i.h.bf16 %v9896_v24  ;;  %v9897_v16 = vunpack.i.l.bf16 %v9896_v24  ;;  %v3190_v13 = vsel %vm355_vm0, %v1139_v7, %v9893_v47  ;;  %v3189_v20 = vsel %vm355_vm0, %v1138_v52, %v9892_v18  ;;  %v1294_v7 = vld [vmem:[#allocation2 + $0x308] sm:$0xff] }
 0x19d   : > { %10185 = vrot.lane.b32.xlu0 %v12849_v10, %s11521_s17  ;;  %3839 = vmatmul.mubr.bf16.gmra.mrb[56].mxu0 %v3393_v49  ;;  %v9901_v37 = vpop.permute.xlu1 %9900  ;;  %v10204_v10 = vpack.i.bf16 %v1356_v40, %v1355_v8  ;;  %v2995_v30 = vsel %vm355_vm0, %v11338_v39, %v9432_v43  ;;  %v1358_v8 = vld [vmem:[#allocation2 + $0x309] sm:$0xff] }
 0x19e   : > { %v3253_v59 = vsel %vm3029_vm3, %v3189_v20, %v9897_v16  ;;  %v3254_v57 = vsel %vm3029_vm3, %v3190_v13, %v9898_v32  ;;  %v9903_v28 = vunpack.i.h.bf16 %v9901_v37  ;;  %v9902_v21 = vunpack.i.l.bf16 %v9901_v37  ;;  %v885_v32 = vld [vmem:[#allocation2 + $0x1b8] sm:$0xff]  ;;  %v884_v20 = vld [vmem:[#allocation2 + $0x1b0] sm:$0xff]  ;;  %v1357_v37 = vld [vmem:[#allocation2 + $0x301] sm:$0xff] }
 0x19f   : > { %v9906_v29 = vpop.permute.xlu0 %9905  ;;  %10190 = vrot.lane.b32.xlu1 %v12933_v36, %s11518_s20  ;;  %v9437_v16 = vunpack.i.l.bf16 %v16268_v60  ;;  %v12972_v13 = vpack.i.bf16 %v1294_v7, %v1293_v23  ;;  %v10229_v4 = vpack.i.bf16 %v1358_v8, %v1357_v37  ;;  %v1230_v39 = vld [vmem:[#allocation2 + $0x302] sm:$0xff] }
 0x1a0   : > { %v9908_v19 = vunpack.i.h.bf16 %v9906_v29  ;;  %v9907_v33 = vunpack.i.l.bf16 %v9906_v29  ;;  %v3060_v15 = vsel %vm3029_vm3, %v2995_v30, %v9902_v21  ;;  %v3061_v25 = vsel %vm3029_vm3, %v2996_v45, %v9903_v28  ;;  %v1231_v30 = vld [vmem:[#allocation2 + $0x30a] sm:$0xff]  ;;  %v1421_v7 = vld [vmem:[#allocation2 + $0x302] sm:$0xff] }
 0x1a1   : > { %10195 = vrot.lane.b32.xlu0 %v12939_v38, %s11520_s27  ;;  %v9911_v42 = vpop.permute.xlu1 %9910  ;;  %v12995_v23 = vpack.i.bf16 %v1231_v30, %v1230_v39 }
 0x1a2   : > { %v3317_v11 = vsel %vm3094_vm4, %v3253_v59, %v9907_v33  ;;  %v3318_v26 = vsel %vm3094_vm4, %v3254_v57, %v9908_v19  ;;  %v9913_v53 = vunpack.i.h.bf16 %v9911_v42  ;;  %v9912_v54 = vunpack.i.l.bf16 %v9911_v42  ;;  %v1142_v42 = vld [vmem:[#allocation2 + $0x1e1] sm:$0xff] }
 0x1a3   : > { %v9916_v5 = vpop.permute.xlu0 %9915  ;;  %v3397_v56 = vpack.c.bf16 %v3318_v26, %v3317_v11  ;;  %10200 = vrot.lane.b32.xlu1 %v12888_v46, %s11520_s27  ;;  %v12963_v46 = vpop.f32.mrb[8].mxu1  ;;  %v2998_v59 = vsel %vm355_vm0, %v885_v32, %v9438_v3  ;;  %v2997_v19 = vsel %vm355_vm0, %v884_v20, %v9437_v16  ;;  %v1359_v32 = vld [vmem:[#allocation2 + $0x319] sm:$0xff]  ;;  %v1360_v16 = vld [vmem:[#allocation2 + $0x321] sm:$0xff] }
 0x1a4   : > { %v9918_v9 = vunpack.i.h.bf16 %v9916_v5  ;;  %v9917_v52 = vunpack.i.l.bf16 %v9916_v5  ;;  %v3125_v41 = vsel %vm3094_vm4, %v3060_v15, %v9912_v54  ;;  %v3126_v58 = vsel %vm3094_vm4, %v3061_v25, %v9913_v53  ;;  %v12967_v49 = vpop.f32.mrb[9].mxu1  ;;  %v1143_v53 = vld [vmem:[#allocation2 + $0x1e9] sm:$0xff] }
 0x1a5   : > { %10205 = vrot.lane.b32.xlu0 %v10204_v10, %s11521_s17  ;;  %3846 = vmatprep.mubr.bf16.mxu0 %v3397_v56  ;;  %v9921_v55 = vpop.permute.xlu1 %9920  ;;  %v3396_v62 = vpack.c.bf16 %v3126_v58, %v3125_v41  ;;  %v12979_v21 = vpop.f32.mrb[10].mxu1 }
 0x1a6   : > { %v3192_v31 = vsel %vm355_vm0, %v1141_v14, %v9918_v9  ;;  %v3191_v44 = vsel %vm355_vm0, %v1140_v27, %v9917_v52  ;;  %v9923_v47 = vunpack.i.h.bf16 %v9921_v55  ;;  %v9922_v18 = vunpack.i.l.bf16 %v9921_v55  ;;  %v12984_v45 = vpop.f32.mrb[11].mxu1  ;;  %v1295_v14 = vld [vmem:[#allocation2 + $0x318] sm:$0xff] }
 0x1a7   : > { %v9926_v24 = vpop.permute.xlu0 %9925  ;;  %10210 = vrot.lane.b32.xlu1 %v12902_v48, %s11521_s17  ;;  %3847 = vmatmul.mubr.bf16.gmra.mrb[60].mxu0 %v3396_v62  ;;  %v1422_v62 = vld [vmem:[#allocation2 + $0x30a] sm:$0xff] }
 0x1a8   : > { %v9928_v63 = vunpack.i.h.bf16 %v9926_v24  ;;  %v9927_v61 = vunpack.i.l.bf16 %v9926_v24  ;;  %v3255_v43 = vsel %vm3029_vm3, %v3191_v44, %v9922_v18  ;;  %v3256_v29 = vsel %vm3029_vm3, %v3192_v31, %v9923_v47  ;;  %v1423_v31 = vld [vmem:[#allocation2 + $0x31a] sm:$0xff]  ;;  %v1424_v44 = vld [vmem:[#allocation2 + $0x322] sm:$0xff] }
 0x1a9   : > { %10215 = vrot.lane.b32.xlu0 %v12958_v1, %s11518_s20  ;;  %v9931_v40 = vpop.permute.xlu1 %9930  ;;  %v16269_v47 = vld [vmem:[#allocation12_spill] sm:$0xff]  ;;  %v3437_v20 = vpack.c.bf16 %v1422_v62, %v1421_v7 }
 0x1aa   : > { %v9933_v57 = vunpack.i.h.bf16 %v9931_v40  ;;  %v9932_v48 = vunpack.i.l.bf16 %v9931_v40  ;;  %v3062_v12 = vsel %vm3029_vm3, %v2997_v19, %v9927_v61  ;;  %v3063_v35 = vsel %vm3029_vm3, %v2998_v59, %v9928_v63 }
 0x1ab   : > { %v9936_v28 = vpop.permute.xlu0 %9935  ;;  %10220 = vrot.lane.b32.xlu1 %v12972_v13, %s11520_s27  ;;  %v9443_v18 = vunpack.i.h.bf16 %v16269_v47  ;;  %v3440_v63 = vpack.c.bf16 %v1424_v44, %v1423_v31  ;;  %v9442_v61 = vunpack.i.l.bf16 %v16269_v47  ;;  %9194 = vmatprep.mubr.msk.bf16.mxu1 %vm355_vm0, %v3437_v20 }
 0x1ac   : > { %v9938_v33 = vunpack.i.h.bf16 %v9936_v28  ;;  %v9937_v10 = vunpack.i.l.bf16 %v9936_v28  ;;  %v3319_v11 = vsel %vm3094_vm4, %v3255_v43, %v9932_v48  ;;  %v3320_v26 = vsel %vm3094_vm4, %v3256_v29, %v9933_v57  ;;  %v11339_v48 = vld [vmem:[#allocation2 + $0x1d0] sm:$0xff] }
 0x1ad   : > { %10225 = vrot.lane.b32.xlu0 %v12933_v36, %s11520_s27  ;;  %v9941_v54 = vpop.permute.xlu1 %9940  ;;  %v3400_v5 = vpack.c.bf16 %v3320_v26, %v3319_v11  ;;  %v1296_v36 = vld [vmem:[#allocation2 + $0x320] sm:$0xff]  ;;  %v10254_v57 = vpack.i.bf16 %v1360_v16, %v1359_v32  ;;  %9195 = vmatmul.mubr.msk.bf16.gmra.mrb[56].mxu1 %vm355_vm0, %v3440_v63  ;;  %v3000_v28 = vsel %vm355_vm0, %v11339_v48, %v9443_v18  ;;  %v11340_v11 = vld [vmem:[#allocation2 + $0x1c8] sm:$0xff] }
 0x1ae   : > { %v3127_v56 = vsel %vm3094_vm4, %v3062_v12, %v9937_v10  ;;  %v3128_v27 = vsel %vm3094_vm4, %v3063_v35, %v9938_v33  ;;  %v9943_v9 = vunpack.i.h.bf16 %v9941_v54  ;;  %v9942_v52 = vunpack.i.l.bf16 %v9941_v54  ;;  %v1145_v54 = vld [vmem:[#allocation2 + $0x201] sm:$0xff] }
 0x1af   : > { %v9946_v15 = vpop.permute.xlu0 %9945  ;;  %v3399_v25 = vpack.c.bf16 %v3128_v27, %v3127_v56  ;;  %10230 = vrot.lane.b32.xlu1 %v10229_v4, %s11521_s17  ;;  %3854 = vmatprep.mubr.bf16.mxu0 %v3400_v5  ;;  %v13001_v55 = vpack.i.bf16 %v1296_v36, %v1295_v14  ;;  %v1232_v4 = vld [vmem:[#allocation2 + $0x31a] sm:$0xff]  ;;  %v2999_v26 = vsel %vm355_vm0, %v11340_v11, %v9442_v61  ;;  %v13021_v36 = vpop.f32.mrb[12].mxu1 }
 0x1b0   : > { %v9948_v41 = vunpack.i.h.bf16 %v9946_v15  ;;  %v9947_v58 = vunpack.i.l.bf16 %v9946_v15  ;;  %v3194_v60 = vsel %vm355_vm0, %v1143_v53, %v9943_v9  ;;  %v3193_v3 = vsel %vm355_vm0, %v1142_v42, %v9942_v52  ;;  %v1233_v42 = vld [vmem:[#allocation2 + $0x322] sm:$0xff]  ;;  %v1144_v53 = vld [vmem:[#allocation2 + $0x1f9] sm:$0xff] }
 0x1b1   : > { %10235 = vrot.lane.b32.xlu0 %v12939_v38, %s11521_s17  ;;  %3855 = vmatmul.mubr.bf16.gmra.mrb[64].mxu0 %v3399_v25  ;;  %v9951_v24 = vpop.permute.xlu1 %9950  ;;  %v13024_v9 = vpack.i.bf16 %v1233_v42, %v1232_v4  ;;  %v1297_v25 = vld [vmem:[#allocation2 + $0x330] sm:$0xff] }
 0x1b2   : > { %v3257_v8 = vsel %vm3029_vm3, %v3193_v3, %v9947_v58  ;;  %v3258_v38 = vsel %vm3029_vm3, %v3194_v60, %v9948_v41  ;;  %v9953_v40 = vunpack.i.h.bf16 %v9951_v24  ;;  %v9952_v43 = vunpack.i.l.bf16 %v9951_v24  ;;  %v1298_v41 = vld [vmem:[#allocation2 + $0x338] sm:$0xff]  ;;  %v13028_v58 = vpop.f32.mrb[13].mxu1 }
 0x1b3   : > { %v9956_v37 = vpop.permute.xlu0 %9955  ;;  %10240 = vrot.lane.b32.xlu1 %v12995_v23, %s11518_s20  ;;  %v13033_v24 = vpop.f32.mrb[14].mxu1  ;;  %v13038_v16 = vpack.i.bf16 %v1298_v41, %v1297_v25  ;;  %v1146_v42 = vld [vmem:[#allocation2 + $0x211] sm:$0xff] }
 0x1b4   : > { %v9958_v29 = vunpack.i.h.bf16 %v9956_v37  ;;  %v9957_v59 = vunpack.i.l.bf16 %v9956_v37  ;;  %v3064_v27 = vsel %vm3029_vm3, %v2999_v26, %v9952_v43  ;;  %v3065_v14 = vsel %vm3029_vm3, %v3000_v28, %v9953_v40  ;;  %v13040_v20 = vpop.f32.mrb[15].mxu1  ;;  %v1361_v37 = vld [vmem:[#allocation2 + $0x331] sm:$0xff]  ;;  %v11342_v28 = vld [vmem:[#allocation2 + $0x1e0] sm:$0xff] }
 0x1b5   : > { %10245 = vrot.lane.b32.xlu0 %v13001_v55, %s11520_s27  ;;  %v9961_v19 = vpop.permute.xlu1 %9960 }
 0x1b6   : > { %v3321_v33 = vsel %vm3094_vm4, %v3257_v8, %v9957_v59  ;;  %v3322_v10 = vsel %vm3094_vm4, %v3258_v38, %v9958_v29  ;;  %v9963_v12 = vunpack.i.h.bf16 %v9961_v19  ;;  %v9962_v35 = vunpack.i.l.bf16 %v9961_v19  ;;  %v1362_v8 = vld [vmem:[#allocation2 + $0x339] sm:$0xff]  ;;  %v11341_v29 = vld [vmem:[#allocation2 + $0x1e8] sm:$0xff] }
 0x1b7   : > { %v9966_v39 = vpop.permute.xlu0 %9965  ;;  %v3403_v30 = vpack.c.bf16 %v3322_v10, %v3321_v33  ;;  %10250 = vrot.lane.b32.xlu1 %v12958_v1, %s11520_s27  ;;  %v16270_v1 = vld [vmem:[#allocation13_spill] sm:$0xff]  ;;  %v10279_v4 = vpack.i.bf16 %v1362_v8, %v1361_v37  ;;  %v1425_v37 = vld [vmem:[#allocation2 + $0x332] sm:$0xff] }
 0x1b8   : > { %v9968_v5 = vunpack.i.h.bf16 %v9966_v39  ;;  %v9967_v56 = vunpack.i.l.bf16 %v9966_v39  ;;  %v3129_v52 = vsel %vm3094_vm4, %v3064_v27, %v9962_v35  ;;  %v3130_v15 = vsel %vm3094_vm4, %v3065_v14, %v9963_v12  ;;  %v1234_v39 = vld [vmem:[#allocation2 + $0x332] sm:$0xff]  ;;  %v1299_v14 = vld [vmem:[#allocation2 + $0x348] sm:$0xff]  ;;  %v1426_v8 = vld [vmem:[#allocation2 + $0x33a] sm:$0xff] }
 0x1b9   : > { %10255 = vrot.lane.b32.xlu0 %v10254_v57, %s11521_s17  ;;  %3862 = vmatprep.mubr.bf16.mxu0 %v3403_v30  ;;  %v9448_v7 = vunpack.i.h.bf16 %v16270_v1  ;;  %v9971_v60 = vpop.permute.xlu1 %9970  ;;  %v3402_v3 = vpack.c.bf16 %v3130_v15, %v3129_v52  ;;  %v9447_v32 = vunpack.i.l.bf16 %v16270_v1  ;;  %v1235_v30 = vld [vmem:[#allocation2 + $0x33a] sm:$0xff] }
 0x1ba   : > { %v3196_v62 = vsel %vm355_vm0, %v1145_v54, %v9968_v5  ;;  %v3195_v31 = vsel %vm355_vm0, %v1144_v53, %v9967_v56  ;;  %v9973_v44 = vunpack.i.h.bf16 %v9971_v60  ;;  %v9972_v47 = vunpack.i.l.bf16 %v9971_v60  ;;  %v1147_v53 = vld [vmem:[#allocation2 + $0x219] sm:$0xff] }
 0x1bb   : > { %v9976_v18 = vpop.permute.xlu0 %9975  ;;  %10260 = vrot.lane.b32.xlu1 %v12972_v13, %s11521_s17  ;;  %3863 = vmatmul.mubr.bf16.gmra.mrb[68].mxu0 %v3402_v3  ;;  %v3002_v13 = vsel %vm355_vm0, %v11341_v29, %v9448_v7  ;;  %v3001_v19 = vsel %vm355_vm0, %v11342_v28, %v9447_v32  ;;  %v10289_v60 = vpack.i.bf16 %v1235_v30, %v1234_v39  ;;  %v11344_v39 = vld [vmem:[#allocation2 + $0x1f8] sm:$0xff] }
 0x1bc   : > { %v9978_v63 = vunpack.i.h.bf16 %v9976_v18  ;;  %v9977_v61 = vunpack.i.l.bf16 %v9976_v18  ;;  %v3259_v40 = vsel %vm3029_vm3, %v3195_v31, %v9972_v47  ;;  %v3260_v43 = vsel %vm3029_vm3, %v3196_v62, %v9973_v44  ;;  %v1363_v44 = vld [vmem:[#allocation2 + $0x349] sm:$0xff]  ;;  %v1364_v47 = vld [vmem:[#allocation2 + $0x351] sm:$0xff] }
 0x1bd   : > { %10265 = vrot.lane.b32.xlu0 %v13024_v9, %s11518_s20  ;;  %v9981_v38 = vpop.permute.xlu1 %9980  ;;  %v16271_v18 = vld [vmem:[#allocation14_spill] sm:$0xff] }
 0x1be   : > { %v9983_v59 = vunpack.i.h.bf16 %v9981_v38  ;;  %v9982_v57 = vunpack.i.l.bf16 %v9981_v38  ;;  %v3066_v12 = vsel %vm3029_vm3, %v3001_v19, %v9977_v61  ;;  %v3067_v35 = vsel %vm3029_vm3, %v3002_v13, %v9978_v63  ;;  %v1427_v38 = vld [vmem:[#allocation2 + $0x34a] sm:$0xff] }
 0x1bf   : > { %v9986_v48 = vpop.permute.xlu0 %9985  ;;  %10270 = vrot.lane.b32.xlu1 %v13038_v16, %s11520_s27  ;;  %v9453_v32 = vunpack.i.h.bf16 %v16271_v18  ;;  %v9452_v63 = vunpack.i.l.bf16 %v16271_v18 }
 0x1c0   : > { %v9988_v33 = vunpack.i.h.bf16 %v9986_v48  ;;  %v9987_v10 = vunpack.i.l.bf16 %v9986_v48  ;;  %v3323_v11 = vsel %vm3094_vm4, %v3259_v40, %v9982_v57  ;;  %v3324_v26 = vsel %vm3094_vm4, %v3260_v43, %v9983_v59  ;;  %v13065_v40 = vpop.f32.mrb[16].mxu1  ;;  %v1428_v57 = vld [vmem:[#allocation2 + $0x352] sm:$0xff] }
 0x1c1   : > { %10275 = vrot.lane.b32.xlu0 %v12995_v23, %s11520_s27  ;;  %v9991_v54 = vpop.permute.xlu1 %9990  ;;  %v3406_v5 = vpack.c.bf16 %v3324_v26, %v3323_v11  ;;  %v1300_v23 = vld [vmem:[#allocation2 + $0x350] sm:$0xff]  ;;  %v3443_v59 = vpack.c.bf16 %v1426_v8, %v1425_v37  ;;  %v13069_v48 = vpop.f32.mrb[17].mxu1  ;;  %v3003_v30 = vsel %vm355_vm0, %v11344_v39, %v9452_v63  ;;  %v893_v37 = vld [vmem:[#allocation2 + $0x218] sm:$0xff] }
 0x1c2   : > { %v3131_v56 = vsel %vm3094_vm4, %v3066_v12, %v9987_v10  ;;  %v3132_v27 = vsel %vm3094_vm4, %v3067_v35, %v9988_v33  ;;  %v9993_v52 = vunpack.i.h.bf16 %v9991_v54  ;;  %v9992_v15 = vunpack.i.l.bf16 %v9991_v54 }
 0x1c3   : > { %v9996_v25 = vpop.permute.xlu0 %9995  ;;  %v3405_v41 = vpack.c.bf16 %v3132_v27, %v3131_v56  ;;  %10280 = vrot.lane.b32.xlu1 %v10279_v4, %s11521_s17  ;;  %3870 = vmatprep.mubr.bf16.mxu0 %v3406_v5  ;;  %v10294_v31 = vpack.i.bf16 %v1300_v23, %v1299_v14  ;;  %v3446_v10 = vpack.c.bf16 %v1428_v57, %v1427_v38  ;;  %v1148_v27 = vld [vmem:[#allocation2 + $0x229] sm:$0xff]  ;;  %v1149_v14 = vld [vmem:[#allocation2 + $0x231] sm:$0xff] }
 0x1c4   : > { %v9998_v1 = vunpack.i.h.bf16 %v9996_v25  ;;  %v9997_v7 = vunpack.i.l.bf16 %v9996_v25  ;;  %v3198_v3 = vsel %vm355_vm0, %v1147_v53, %v9993_v52  ;;  %v3197_v62 = vsel %vm355_vm0, %v1146_v42, %v9992_v15  ;;  %9198 = vmatprep.mubr.msk.bf16.mxu1 %vm355_vm0, %v3443_v59  ;;  %v11343_v42 = vld [vmem:[#allocation2 + $0x200] sm:$0xff]  ;;  %v5009_v57 = vld [vmem:[#allocation2 + $0xa] sm:$0xff] }
 0x1c5   : > { %10285 = vrot.lane.b32.xlu0 %v13001_v55, %s11521_s17  ;;  %3871 = vmatmul.mubr.bf16.gmra.mrb[72].mxu0 %v3405_v41  ;;  %v10001_v61 = vpop.permute.xlu1 %10000  ;;  %v10304_v4 = vpack.i.bf16 %v1364_v47, %v1363_v44  ;;  %v3004_v11 = vsel %vm355_vm0, %v11343_v42, %v9453_v32  ;;  %v5008_v59 = vld [vmem:[#allocation2 + $0x2] sm:$0xff] }
 0x1c6   : > { %v10003_v43 = vunpack.i.h.bf16 %v10001_v61  ;;  %v3261_v13 = vsel %vm3029_vm3, %v3197_v62, %v9997_v7  ;;  %v3262_v55 = vsel %vm3029_vm3, %v3198_v3, %v9998_v1  ;;  %v10002_v28 = vunpack.i.l.bf16 %v10001_v61  ;;  %9199 = vmatmul.mubr.msk.bf16.gmra.mrb[60].mxu1 %vm355_vm0, %v3446_v10  ;;  %v4944_v7 = vld [vmem:[#allocation2 + $0x1] sm:$0xff]  ;;  %v16272_v3 = vld [vmem:[#allocation15_spill] sm:$0xff]  ;;  %v13089_v61 = vpop.f32.mrb[18].mxu1 }
 0x1c7   : > { %v10006_v29 = vpop.permute.xlu0 %10005  ;;  %10290 = vrot.lane.b32.xlu1 %v10289_v60, %s11518_s20  ;;  %v4945_v60 = vld [vmem:[#allocation2 + $0x9] sm:$0xff]  ;;  %v9458_v62 = vunpack.i.h.bf16 %v16272_v3  ;;  %v9457_v8 = vunpack.i.l.bf16 %v16272_v3  ;;  %v10329_v39 = vpack.i.bf16 %v5009_v57, %v5008_v59 }
 0x1c8   : > { %v10008_v19 = vunpack.i.h.bf16 %v10006_v29  ;;  %v10007_v33 = vunpack.i.l.bf16 %v10006_v29  ;;  %v3068_v15 = vsel %vm3029_vm3, %v3003_v30, %v10002_v28  ;;  %v3069_v25 = vsel %vm3029_vm3, %v3004_v11, %v10003_v43  ;;  %v13094_v43 = vpop.f32.mrb[19].mxu1  ;;  %v892_v29 = vld [vmem:[#allocation2 + $0x210] sm:$0xff]  ;;  %v894_v59 = vld [vmem:[#allocation2 + $0x228] sm:$0xff] }
 0x1c9   : > { %10295 = vrot.lane.b32.xlu0 %v10294_v31, %s11520_s27  ;;  %v10011_v26 = vpop.permute.xlu1 %10010  ;;  %v10319_v38 = vpack.i.bf16 %v4945_v60, %v4944_v7  ;;  %v3006_v10 = vsel %vm355_vm0, %v893_v37, %v9458_v62  ;;  %v11293_v62 = vld [vmem:[%s16177_s3 + $0x88] sm:$0xff]   ;;  %v895_v37 = vld [vmem:[#allocation2 + $0x230] sm:$0xff] }
 0x1ca   : > { %v3325_v12 = vsel %vm3094_vm4, %v3261_v13, %v10007_v33  ;;  %v3326_v35 = vsel %vm3094_vm4, %v3262_v55, %v10008_v19  ;;  %v10013_v53 = vunpack.i.h.bf16 %v10011_v26  ;;  %v10012_v54 = vunpack.i.l.bf16 %v10011_v26 }
 0x1cb   : > { %v10016_v5 = vpop.permute.xlu0 %10015  ;;  %v3409_v56 = vpack.c.bf16 %v3326_v35, %v3325_v12  ;;  %10300 = vrot.lane.b32.xlu1 %v13024_v9, %s11520_s27  ;;  %v3005_v26 = vsel %vm355_vm0, %v892_v29, %v9457_v8 }
 0x1cc   : > { %v10018_v23 = vunpack.i.h.bf16 %v10016_v5  ;;  %v10017_v52 = vunpack.i.l.bf16 %v10016_v5  ;;  %v3133_v41 = vsel %vm3094_vm4, %v3068_v15, %v10012_v54  ;;  %v3134_v1 = vsel %vm3094_vm4, %v3069_v25, %v10013_v53 }
 0x1cd   : > { %10305 = vrot.lane.b32.xlu0 %v10304_v4, %s11521_s17  ;;  %3878 = vmatprep.mubr.bf16.mxu0 %v3409_v56  ;;  %v10021_v31 = vpop.permute.xlu1 %10020  ;;  %v3408_v44 = vpack.c.bf16 %v3134_v1, %v3133_v41  ;;  %v1150_v56 = vld [vmem:[#allocation2 + $0x241] sm:$0xff] }
 0x1ce   : > { %v3200_v47 = vsel %vm355_vm0, %v1149_v14, %v10018_v23  ;;  %v3199_v9 = vsel %vm355_vm0, %v1148_v27, %v10017_v52  ;;  %v10023_v18 = vunpack.i.h.bf16 %v10021_v31  ;;  %v10022_v32 = vunpack.i.l.bf16 %v10021_v31  ;;  %v1151_v27 = vld [vmem:[#allocation2 + $0x249] sm:$0xff]  ;;  %v13114_v31 = vpop.f32.mrb[20].mxu1 }
 0x1cf   : > { %v10026_v63 = vpop.permute.xlu0 %10025  ;;  %10310 = vrot.lane.b32.xlu1 %v13038_v16, %s11521_s17  ;;  %3879 = vmatmul.mubr.bf16.gmra.mrb[76].mxu0 %v3408_v44  ;;  %v11292_v16 = vld [vmem:[%s16177_s3 + $0x80] sm:$0xff]  }
 0x1d0   : > { %v10028_v13 = vunpack.i.h.bf16 %v10026_v63  ;;  %v10027_v55 = vunpack.i.l.bf16 %v10026_v63  ;;  %v3263_v19 = vsel %vm3029_vm3, %v3199_v9, %v10022_v32  ;;  %v3264_v33 = vsel %vm3029_vm3, %v3200_v47, %v10023_v18  ;;  %9202 = vmatprep.subr.bf16.mxu0 %v11292_v16  ;;  %v13118_v9 = vpop.f32.mrb[21].mxu1  ;;  %v16273_v18 = vld [vmem:[#allocation16_spill] sm:$0xff] }
 0x1d1   : > { %v10031_v28 = vpop.permute.xlu1 %10030  ;;  %9203 = vmatpush3.bf16.msra.mxu0 %v11292_v16  ;;  %v9463_v32 = vunpack.i.h.bf16 %v16273_v18  ;;  %v9462_v8 = vunpack.i.l.bf16 %v16273_v18  ;;  %v896_v18 = vld [vmem:[#allocation2 + $0x240] sm:$0xff] }
 0x1d2   : > { %v10033_v4 = vunpack.i.h.bf16 %v10031_v28  ;;  %v10032_v42 = vunpack.i.l.bf16 %v10031_v28  ;;  %v3070_v54 = vsel %vm3029_vm3, %v3005_v26, %v10027_v55  ;;  %v3071_v5 = vsel %vm3029_vm3, %v3006_v10, %v10028_v13  ;;  %9204 = vmatprep.subr.bf16.mxu0 %v11293_v62  ;;  %v13124_v55 = vpop.f32.mrb[22].mxu1 }
 0x1d3   : > { %v10036_v11 = vpop.permute.xlu0 %10035  ;;  %10320 = vrot.lane.b32.xlu1 %v10319_v38, %s11518_s20  ;;  %v13126_v10 = vpop.f32.mrb[23].mxu1  ;;  %v3007_v26 = vsel %vm355_vm0, %v894_v59, %v9462_v8 }
 0x1d4   : > { %v10038_v12 = vunpack.i.h.bf16 %v10036_v11  ;;  %v10037_v35 = vunpack.i.l.bf16 %v10036_v11  ;;  %v3327_v30 = vsel %vm3094_vm4, %v3263_v19, %v10032_v42  ;;  %v3328_v53 = vsel %vm3094_vm4, %v3264_v33, %v10033_v4 }
 0x1d5   : > { %v10041_v14 = vpop.permute.xlu1 %10040  ;;  %v3412_v23 = vpack.c.bf16 %v3328_v53, %v3327_v30  ;;  %9205 = vmatpush3.bf16.msra.mxu0 %v11293_v62  ;;  %v3008_v4 = vsel %vm355_vm0, %v895_v37, %v9463_v32  ;;  %v1152_v53 = vld [vmem:[#allocation2 + $0x259] sm:$0xff]  ;;  %v897_v32 = vld [vmem:[#allocation2 + $0x248] sm:$0xff] }
 0x1d6   : > { %v3135_v52 = vsel %vm3094_vm4, %v3070_v54, %v10037_v35  ;;  %v3136_v15 = vsel %vm3094_vm4, %v3071_v5, %v10038_v12  ;;  %v10043_v25 = vunpack.i.h.bf16 %v10041_v14  ;;  %v10042_v41 = vunpack.i.l.bf16 %v10041_v14  ;;  %v1153_v54 = vld [vmem:[#allocation2 + $0x261] sm:$0xff] }
 0x1d7   : > { %v10046_v1 = vpop.permute.xlu0 %10045  ;;  %v3411_v7 = vpack.c.bf16 %v3136_v15, %v3135_v52  ;;  %3886 = vmatprep.mubr.bf16.mxu0 %v3412_v23  ;;  %10330 = vrot.lane.b32.xlu1 %v10329_v39, %s11520_s27  ;;  %v16274_v62 = vld [vmem:[#allocation17_spill] sm:$0xff] }
 0x1d8   : > { %v10048_v60 = vunpack.i.h.bf16 %v10046_v1  ;;  %v10047_v3 = vunpack.i.l.bf16 %v10046_v1  ;;  %v3202_v44 = vsel %vm355_vm0, %v1151_v27, %v10043_v25  ;;  %v3201_v47 = vsel %vm355_vm0, %v1150_v56, %v10042_v41 }
 0x1d9   : > { %3887 = vmatmul.mubr.bf16.gmra.mrb[80].mxu0 %v3411_v7  ;;  %v10051_v63 = vpop.permute.xlu1 %10050 }
 0x1da   : > { %v3265_v29 = vsel %vm3029_vm3, %v3201_v47, %v10047_v3  ;;  %v3266_v13 = vsel %vm3029_vm3, %v3202_v44, %v10048_v60  ;;  %v10053_v57 = vunpack.i.h.bf16 %v10051_v63  ;;  %v10052_v28 = vunpack.i.l.bf16 %v10051_v63 }
 0x1db   : > { %v10056_v38 = vpop.permute.xlu0 %10055  ;;  %v9468_v44 = vunpack.i.h.bf16 %v16274_v62  ;;  %v9467_v47 = vunpack.i.l.bf16 %v16274_v62  ;;  %v16280_v62 = vld [vmem:[#allocation18_spill] sm:$0xff] }
 0x1dc   : > { %v10058_v19 = vunpack.i.h.bf16 %v10056_v38  ;;  %v10057_v33 = vunpack.i.l.bf16 %v10056_v38  ;;  %v3072_v27 = vsel %vm3029_vm3, %v3007_v26, %v10052_v28  ;;  %v3073_v14 = vsel %vm3029_vm3, %v3008_v4, %v10053_v57 }
 0x1dd   : > { %v10061_v42 = vpop.permute.xlu1 %10060  ;;  %v3009_v4 = vsel %vm355_vm0, %v896_v18, %v9467_v47 }
 0x1de   : > { %v3329_v11 = vsel %vm3094_vm4, %v3265_v29, %v10057_v33  ;;  %v3330_v16 = vsel %vm3094_vm4, %v3266_v13, %v10058_v19  ;;  %v10063_v12 = vunpack.i.h.bf16 %v10061_v42  ;;  %v10062_v35 = vunpack.i.l.bf16 %v10061_v42  ;;  %v11294_v13 = vld [vmem:[%s16177_s3] sm:$0xff]   ;;  %v13145_v19 = vpop.f32.mrb[24].mxu1 }
 0x1df   : > { %v10066_v39 = vpop.permute.xlu0 %10065  ;;  %v3415_v30 = vpack.c.bf16 %v3330_v16, %v3329_v11  ;;  %16275 = vst [vmem:[#allocation27_spill] sm:$0xff] %v13145_v19  ;;  %v3010_v33 = vsel %vm355_vm0, %v897_v32, %v9468_v44  ;;  %7720 = vmatpush1.bf16.msra.mxu1 %v11294_v13  ;;  %v11295_v16 = vld [vmem:[%s16177_s3 + $0x8] sm:$0xff]   ;;  %v13152_v26 = vpop.f32.mrb[25].mxu1  ;;  %v9473_v44 = vunpack.i.h.bf16 %v16280_v62  ;;  %v899_v32 = vld [vmem:[#allocation2 + $0x260] sm:$0xff] }
 0x1e0   : > { %v10068_v5 = vunpack.i.h.bf16 %v10066_v39  ;;  %v10067_v56 = vunpack.i.l.bf16 %v10066_v39  ;;  %v3137_v23 = vsel %vm3094_vm4, %v3072_v27, %v10062_v35  ;;  %v3138_v52 = vsel %vm3094_vm4, %v3073_v14, %v10063_v12  ;;  %16276 = vst [vmem:[#allocation9_spill] sm:$0xff] %v13152_v26  ;;  %v915_v19 = vld [vmem:[#allocation2 + $0x320] sm:$0xff] }
 0x1e1   : > { %3894 = vmatprep.mubr.bf16.mxu0 %v3415_v30  ;;  %v10071_v15 = vpop.permute.xlu1 %10070  ;;  %v3414_v25 = vpack.c.bf16 %v3138_v52, %v3137_v23 }
 0x1e2   : > { %v3204_v41 = vsel %vm355_vm0, %v1153_v54, %v10068_v5  ;;  %v3203_v1 = vsel %vm355_vm0, %v1152_v53, %v10067_v56  ;;  %v10073_v7 = vunpack.i.h.bf16 %v10071_v15  ;;  %v10072_v60 = vunpack.i.l.bf16 %v10071_v15  ;;  %v1154_v54 = vld [vmem:[#allocation2 + $0x271] sm:$0xff]  ;;  %v1155_v5 = vld [vmem:[#allocation2 + $0x279] sm:$0xff] }
 0x1e3   : > { %v10076_v3 = vpop.permute.xlu0 %10075  ;;  %3895 = vmatmul.mubr.bf16.gmra.mrb[84].mxu0 %v3414_v25  ;;  %v16277_v53 = vmov 0  }
 0x1e4   : > { %v10078_v63 = vunpack.i.h.bf16 %v10076_v3  ;;  %v10077_v37 = vunpack.i.l.bf16 %v10076_v3  ;;  %v3267_v38 = vsel %vm3029_vm3, %v3203_v1, %v10072_v60  ;;  %v3268_v29 = vsel %vm3029_vm3, %v3204_v41, %v10073_v7  ;;  %7721 = vmatprep.subr.bf16.mxu1 %v16277_v53  ;;  %v13161_v1 = vpop.f32.mrb[26].mxu1 }
 0x1e5   : > { %v10081_v8 = vpop.permute.xlu1 %10080  ;;  %16278 = vst [vmem:[#allocation10_spill] sm:$0xff] %v13161_v1  ;;  %7722 = vmatpush1.bf16.msra.mxu1 %v11295_v16  ;;  %v13163_v3 = vpop.f32.mrb[27].mxu1  ;;  %v909_v1 = vld [vmem:[#allocation2 + $0x2d8] sm:$0xff] }
 0x1e6   : > { %v10083_v59 = vunpack.i.h.bf16 %v10081_v8  ;;  %v10082_v57 = vunpack.i.l.bf16 %v10081_v8  ;;  %v3074_v39 = vsel %vm3029_vm3, %v3009_v4, %v10077_v37  ;;  %v3075_v30 = vsel %vm3029_vm3, %v3010_v33, %v10078_v63  ;;  %16279 = vst [vmem:[#allocation11_spill] sm:$0xff] %v13163_v3  ;;  %7723 = vmatprep.subr.bf16.mxu1 %v16277_v53  ;;  %v11296_v8 = vld [vmem:[%s16177_s3 + $0x10] sm:$0xff]  }
 0x1e7   : > { %v10086_v28 = vpop.permute.xlu0 %10085  ;;  %v9472_v63 = vunpack.i.l.bf16 %v16280_v62 }
 0x1e8   : > { %v10088_v42 = vunpack.i.h.bf16 %v10086_v28  ;;  %v10087_v11 = vunpack.i.l.bf16 %v10086_v28  ;;  %v3331_v12 = vsel %vm3094_vm4, %v3267_v38, %v10082_v57  ;;  %v3332_v35 = vsel %vm3094_vm4, %v3268_v29, %v10083_v59  ;;  %v898_v38 = vld [vmem:[#allocation2 + $0x258] sm:$0xff] }
 0x1e9   : > { %v10091_v56 = vpop.permute.xlu1 %10090  ;;  %v3418_v27 = vpack.c.bf16 %v3332_v35, %v3331_v12  ;;  %7724 = vmatpush1.bf16.msra.mxu1 %v11296_v8  ;;  %v3011_v35 = vsel %vm355_vm0, %v898_v38, %v9472_v63  ;;  %v902_v63 = vld [vmem:[#allocation2 + $0x288] sm:$0xff]  ;;  %v16283_v8 = vld [vmem:[#allocation21_spill] sm:$0xff] }
 0x1ea   : > { %v3139_v14 = vsel %vm3094_vm4, %v3074_v39, %v10087_v11  ;;  %v3140_v23 = vsel %vm3094_vm4, %v3075_v30, %v10088_v42  ;;  %v10093_v52 = vunpack.i.h.bf16 %v10091_v56  ;;  %v10092_v15 = vunpack.i.l.bf16 %v10091_v56  ;;  %v16281_v11 = vld [vmem:[#allocation19_spill] sm:$0xff]  ;;  %7725 = vmatprep.subr.bf16.mxu1 %v16277_v53  ;;  %v16282_v39 = vld [vmem:[#allocation20_spill] sm:$0xff] }
 0x1eb   : > { %v10096_v25 = vpop.permute.xlu0 %10095  ;;  %v3417_v41 = vpack.c.bf16 %v3140_v23, %v3139_v14  ;;  %3902 = vmatprep.mubr.bf16.mxu0 %v3418_v27  ;;  %v3012_v42 = vsel %vm355_vm0, %v899_v32, %v9473_v44  ;;  %v9478_v16 = vunpack.i.h.bf16 %v16281_v11  ;;  %v9477_v12 = vunpack.i.l.bf16 %v16281_v11  ;;  %v901_v32 = vld [vmem:[#allocation2 + $0x278] sm:$0xff]  ;;  %v16284_v11 = vld [vmem:[#allocation22_spill] sm:$0xff] }
 0x1ec   : > { %v10098_v7 = vunpack.i.h.bf16 %v10096_v25  ;;  %v10097_v60 = vunpack.i.l.bf16 %v10096_v25  ;;  %v3206_v47 = vsel %vm355_vm0, %v1155_v5, %v10093_v52  ;;  %v3205_v18 = vsel %vm355_vm0, %v1154_v54, %v10092_v15  ;;  %v11297_v25 = vld [vmem:[%s16177_s3 + $0x18] sm:$0xff]  }
 0x1ed   : > { %3903 = vmatmul.mubr.bf16.gmra.mrb[88].mxu0 %v3417_v41  ;;  %v10101_v37 = vpop.permute.xlu1 %10100  ;;  %v9483_v30 = vunpack.i.h.bf16 %v16282_v39  ;;  %v9482_v27 = vunpack.i.l.bf16 %v16282_v39  ;;  %v900_v41 = vld [vmem:[#allocation2 + $0x270] sm:$0xff]  ;;  %v9488_v38 = vunpack.i.h.bf16 %v16283_v8  ;;  %7726 = vmatpush1.bf16.msra.mxu1 %v11297_v25  ;;  %v9493_v39 = vunpack.i.h.bf16 %v16284_v11 }
 0x1ee   : > { %v3269_v13 = vsel %vm3029_vm3, %v3205_v18, %v10097_v60  ;;  %v3270_v59 = vsel %vm3029_vm3, %v3206_v47, %v10098_v7  ;;  %v10103_v57 = vunpack.i.h.bf16 %v10101_v37  ;;  %v10102_v28 = vunpack.i.l.bf16 %v10101_v37  ;;  %v1156_v7 = vld [vmem:[#allocation2 + $0x289] sm:$0xff]  ;;  %v1157_v60 = vld [vmem:[#allocation2 + $0x291] sm:$0xff]  ;;  %7727 = vmatprep.subr.bf16.mxu1 %v16277_v53 }
 0x1ef   : > { %v10106_v29 = vpop.permute.xlu0 %10105  ;;  %v903_v37 = vld [vmem:[#allocation2 + $0x290] sm:$0xff] }
 0x1f0   : > { %v10108_v33 = vunpack.i.h.bf16 %v10106_v29  ;;  %v10107_v4 = vunpack.i.l.bf16 %v10106_v29  ;;  %v3076_v47 = vsel %vm3029_vm3, %v3011_v35, %v10102_v28  ;;  %v3077_v18 = vsel %vm3029_vm3, %v3012_v42, %v10103_v57  ;;  %v16285_v57 = vld [vmem:[#allocation23_spill] sm:$0xff] }
 0x1f1   : > { %v10111_v54 = vpop.permute.xlu1 %10110  ;;  %v9487_v29 = vunpack.i.l.bf16 %v16283_v8  ;;  %v9492_v28 = vunpack.i.l.bf16 %v16284_v11  ;;  %v9498_v42 = vunpack.i.h.bf16 %v16285_v57  ;;  %v3013_v8 = vsel %vm355_vm0, %v900_v41, %v9477_v12  ;;  %v906_v11 = vld [vmem:[#allocation2 + $0x2b8] sm:$0xff]  ;;  %v11299_v12 = vld [vmem:[%s16177_s3 + $0x28] sm:$0xff]  }
 0x1f2   : > { %v3333_v5 = vsel %vm3094_vm4, %v3269_v13, %v10107_v4  ;;  %v3334_v56 = vsel %vm3094_vm4, %v3270_v59, %v10108_v33  ;;  %v10113_v14 = vunpack.i.h.bf16 %v10111_v54  ;;  %v10112_v23 = vunpack.i.l.bf16 %v10111_v54  ;;  %v904_v33 = vld [vmem:[#allocation2 + $0x2a0] sm:$0xff]  ;;  %v905_v4 = vld [vmem:[#allocation2 + $0x2a8] sm:$0xff] }
 0x1f3   : > { %v10116_v52 = vpop.permute.xlu0 %10115  ;;  %v3421_v15 = vpack.c.bf16 %v3334_v56, %v3333_v5  ;;  %v11298_v5 = vld [vmem:[%s16177_s3 + $0x20] sm:$0xff]  }
 0x1f4   : > { %v10118_v62 = vunpack.i.h.bf16 %v10116_v52  ;;  %v10117_v44 = vunpack.i.l.bf16 %v10116_v52  ;;  %v3141_v13 = vsel %vm3094_vm4, %v3076_v47, %v10112_v23  ;;  %v3142_v59 = vsel %vm3094_vm4, %v3077_v18, %v10113_v14  ;;  %v907_v56 = vld [vmem:[#allocation2 + $0x2c0] sm:$0xff]  ;;  %v13202_v47 = vpop.f32.mrb[28].mxu1  ;;  %7728 = vmatpush1.bf16.msra.mxu1 %v11298_v5 }
 0x1f5   : > { %3910 = vmatprep.mubr.bf16.mxu0 %v3421_v15  ;;  %v10121_v35 = vpop.permute.xlu1 %10120  ;;  %v3420_v54 = vpack.c.bf16 %v3142_v59, %v3141_v13  ;;  %16286 = vst [vmem:[#allocation12_spill] sm:$0xff] %v13202_v47  ;;  %v3014_v18 = vsel %vm355_vm0, %v901_v32, %v9478_v16  ;;  %v13207_v13 = vsel %vm355_vm0, %v903_v37, %v9483_v30 }
 0x1f6   : > { %v3208_v14 = vsel %vm355_vm0, %v1157_v60, %v10118_v62  ;;  %v3207_v23 = vsel %vm355_vm0, %v1156_v7, %v10117_v44  ;;  %v10123_v52 = vunpack.i.h.bf16 %v10121_v35  ;;  %v10122_v15 = vunpack.i.l.bf16 %v10121_v35  ;;  %v13212_v60 = vpop.f32.mrb[29].mxu1  ;;  %7729 = vmatprep.subr.bf16.mxu1 %v16277_v53  ;;  %v908_v35 = vld [vmem:[#allocation2 + $0x2d0] sm:$0xff] }
 0x1f7   : > { %v10126_v25 = vpop.permute.xlu0 %10125  ;;  %v13210_v59 = vsel %vm355_vm0, %v902_v63, %v9482_v27  ;;  %3911 = vmatmul.mubr.bf16.gmra.mrb[92].mxu0 %v3420_v54  ;;  %16287 = vst [vmem:[#allocation13_spill] sm:$0xff] %v13212_v60  ;;  %v13215_v7 = vsel %vm355_vm0, %v905_v4, %v9488_v38  ;;  %v13218_v62 = vsel %vm355_vm0, %v904_v33, %v9487_v29  ;;  %v9497_v27 = vunpack.i.l.bf16 %v16285_v57  ;;  %v16289_v57 = vld [vmem:[#allocation24_spill] sm:$0xff]  ;;  %v912_v60 = vld [vmem:[#allocation2 + $0x300] sm:$0xff] }
 0x1f8   : > { %v10128_v16 = vunpack.i.h.bf16 %v10126_v25  ;;  %v10127_v44 = vunpack.i.l.bf16 %v10126_v25  ;;  %v13224_v30 = vsel %vm355_vm0, %v907_v56, %v9493_v39  ;;  %v3271_v32 = vsel %vm3029_vm3, %v3207_v23, %v10122_v15  ;;  %v13236_v39 = vpop.f32.mrb[30].mxu1  ;;  %7730 = vmatpush1.bf16.msra.mxu1 %v11299_v12  ;;  %v16291_v25 = vld [vmem:[#allocation25_spill] sm:$0xff]  ;;  %v913_v12 = vld [vmem:[#allocation2 + $0x308] sm:$0xff] }
 0x1f9   : > { %v10131_v41 = vpop.permute.xlu1 %10130  ;;  %v3272_v63 = vsel %vm3029_vm3, %v3208_v14, %v10123_v52  ;;  %v13231_v37 = vsel %vm355_vm0, %v906_v11, %v9492_v28  ;;  %v13234_v38 = vsel %vm355_vm0, %v909_v1, %v9498_v42  ;;  %16288 = vst [vmem:[#allocation14_spill] sm:$0xff] %v13236_v39  ;;  %v9503_v54 = vunpack.i.h.bf16 %v16289_v57  ;;  %v13240_v23 = vpop.f32.mrb[31].mxu1  ;;  %v1158_v52 = vld [vmem:[#allocation2 + $0x2a1] sm:$0xff]  ;;  %7731 = vmatprep.subr.bf16.mxu1 %v16277_v53 }
 0x1fa   : > { %v10133_v29 = vunpack.i.h.bf16 %v10131_v41  ;;  %v10132_v33 = vunpack.i.l.bf16 %v10131_v41  ;;  %v9502_v5 = vunpack.i.l.bf16 %v16289_v57  ;;  %16290 = vst [vmem:[#allocation15_spill] sm:$0xff] %v13240_v23  ;;  %v3078_v42 = vsel %vm3029_vm3, %v3013_v8, %v10127_v44  ;;  %v1159_v41 = vld [vmem:[#allocation2 + $0x2a9] sm:$0xff] }
 0x1fb   : > { %v10136_v4 = vpop.permute.xlu0 %10135  ;;  %v3079_v15 = vsel %vm3029_vm3, %v3014_v18, %v10128_v16  ;;  %v9508_v11 = vunpack.i.h.bf16 %v16291_v25  ;;  %v11300_v18 = vld [vmem:[%s16177_s3 + $0x30] sm:$0xff]   ;;  %v13259_v8 = vsel %vm355_vm0, %v908_v35, %v9497_v27  ;;  %v910_v16 = vld [vmem:[#allocation2 + $0x2e8] sm:$0xff] }
 0x1fc   : > { %v10138_v56 = vunpack.i.h.bf16 %v10136_v4  ;;  %v10137_v14 = vunpack.i.l.bf16 %v10136_v4  ;;  %v3335_v28 = vsel %vm3094_vm4, %v3271_v32, %v10132_v33  ;;  %v3336_v1 = vsel %vm3094_vm4, %v3272_v63, %v10133_v29  ;;  %v13250_v4 = vld [vmem:[%s16176_s2] ss:$0 sm:$0xff]  ;;  %v911_v44 = vld [vmem:[#allocation2 + $0x2f0] sm:$0xff]  ;;  %7732 = vmatpush1.bf16.msra.mxu1 %v11300_v18 }
 0x1fd   : > { %v10141_v39 = vpop.permute.xlu1 %10140  ;;  %v3424_v57 = vpack.c.bf16 %v3336_v1, %v3335_v28  ;;  %v16292_v1 = vld [vmem:[#allocation26_spill] sm:$0xff]  ;;  %7733 = vmatprep.subr.bf16.mxu1 %v16277_v53 }
 0x1fe   : > { %v3143_v47 = vsel %vm3094_vm4, %v3078_v42, %v10137_v14  ;;  %v3144_v32 = vsel %vm3094_vm4, %v3079_v15, %v10138_v56  ;;  %v10143_v63 = vunpack.i.h.bf16 %v10141_v39  ;;  %v10142_v29 = vunpack.i.l.bf16 %v10141_v39 }
 0x1ff   : > { %v10146_v33 = vpop.permute.xlu0 %10145  ;;  %v3423_v28 = vpack.c.bf16 %v3144_v32, %v3143_v47  ;;  %v9507_v14 = vunpack.i.l.bf16 %v16291_v25  ;;  %v9513_v56 = vunpack.i.h.bf16 %v16292_v1  ;;  %3918 = vmatprep.mubr.bf16.mxu0 %v3424_v57  ;;  %v9512_v27 = vunpack.i.l.bf16 %v16292_v1  ;;  %v11301_v47 = vld [vmem:[%s16177_s3 + $0x38] sm:$0xff]  }
 0x200   : > { %v10148_v42 = vunpack.i.h.bf16 %v10146_v33  ;;  %v10147_v15 = vunpack.i.l.bf16 %v10146_v33  ;;  %v3728_v23 = vpop.f32.mrb[0].mxu0  ;;  %v3210_v35 = vsel %vm355_vm0, %v1159_v41, %v10143_v63  ;;  %v3209_v3 = vsel %vm355_vm0, %v1158_v52, %v10142_v29  ;;  %v914_v41 = vld [vmem:[#allocation2 + $0x318] sm:$0xff]  ;;  %7734 = vmatpush1.bf16.msra.mxu1 %v11301_v47 }
 0x201   : > { %v3729_v39 = vadd.f32 %v13250_v4, %v3728_v23  ;;  %v3730_v26 = vpop.f32.mrb[1].mxu0  ;;  %3919 = vmatmul.mubr.bf16.gmra.mrb[96].mxu0 %v3423_v28  ;;  %v13271_v25 = vsel %vm355_vm0, %v911_v44, %v9503_v54  ;;  %v13274_v57 = vsel %vm355_vm0, %v910_v16, %v9502_v5  ;;  %v13277_v32 = vsel %vm355_vm0, %v913_v12, %v9508_v11  ;;  %v13279_v52 = vpop.permute.xlu1 %10150 }
 0x202   : > { %v3731_v23 = vpop.f32.mrb[2].mxu0  ;;  %v3273_v26 = vsel %vm3029_vm3, %v3209_v3, %v10147_v15  ;;  %v10153_v63 = vunpack.i.h.bf16 %v13279_v52  ;;  %v3274_v16 = vsel %vm3029_vm3, %v3210_v35, %v10148_v42  ;;  %v13288_v11 = vsel %vm355_vm0, %v912_v60, %v9507_v14  ;;  %7735 = vmatprep.subr.bf16.mxu1 %v16277_v53  ;;  %v1160_v35 = vld [vmem:[#allocation2 + $0x2b9] sm:$0xff] }
 0x203   : > { %v4018_v18 = vadd.f32 %v12862_v0, %v3729_v39  ;;  %v10156_v54 = vpop.permute.xlu0 %10155  ;;  %v3732_v44 = vadd.f32 %v13250_v4, %v3731_v23  ;;  %v3733_v5 = vpop.f32.mrb[3].mxu0  ;;  %v13291_v12 = vsel %vm355_vm0, %v915_v19, %v9513_v56  ;;  %v13294_v33 = vsel %vm355_vm0, %v914_v41, %v9512_v27  ;;  %v1161_v39 = vld [vmem:[#allocation2 + $0x2c1] sm:$0xff] }
 0x204   : > { %v10158_v29 = vunpack.i.h.bf16 %v10156_v54  ;;  %v10157_v3 = vunpack.i.l.bf16 %v10156_v54  ;;  %v10152_v1 = vunpack.i.l.bf16 %v13279_v52  ;;  %v3081_v19 = vsel %vm3029_vm3, %v13207_v13, %v10153_v63 }
 0x205   : > { %vm4272_vm5 = vcmp.gt.f32.partialorder %v4018_v18, 0.0  ;;  %v4336_v0 = vmul.f32 0.2, %v4018_v18  ;;  %v4021_v28 = vadd.f32 %v12873_v50, %v3732_v44  ;;  %v10161_v15 = vpop.permute.xlu1 %10160 }
 0x206   : > { %v3337_v42 = vsel %vm3094_vm4, %v3273_v26, %v10157_v3  ;;  %v3338_v60 = vsel %vm3094_vm4, %v3274_v16, %v10158_v29  ;;  %v10163_v27 = vunpack.i.h.bf16 %v10161_v15  ;;  %v10162_v41 = vunpack.i.l.bf16 %v10161_v15  ;;  %v11302_v26 = vld [vmem:[%s16177_s3 + $0x40] sm:$0xff]  }
 0x207   : > { %v4400_v14 = vsel %vm4272_vm5, %v4018_v18, %v4336_v0  ;;  %vm4273_vm6 = vcmp.gt.f32.partialorder %v4021_v28, 0.0  ;;  %v4337_v56 = vmul.f32 0.2, %v4021_v28  ;;  %v10166_v50 = vpop.permute.xlu0 %10165  ;;  %v3427_v18 = vpack.c.bf16 %v3338_v60, %v3337_v42  ;;  %7736 = vmatpush1.bf16.msra.mxu1 %v11302_v26 }
 0x208   : > { %v4528_v47 = vrot.slane %v4400_v14, 7  ;;  %v10168_v52 = vunpack.i.h.bf16 %v10166_v50  ;;  %v10167_v23 = vunpack.i.l.bf16 %v10166_v50  ;;  %v3736_v54 = vpop.f32.mrb[4].mxu0  ;;  %v3146_v5 = vsel %vm3094_vm4, %v3081_v19, %v10163_v27  ;;  %7737 = vmatprep.subr.bf16.mxu1 %v16277_v53 }
 0x209   : > { %v4401_v44 = vsel %vm4273_vm6, %v4021_v28, %v4337_v56  ;;  %v3737_v13 = vadd.f32 %v13250_v4, %v3736_v54  ;;  %v3738_v63 = vpop.f32.mrb[5].mxu0  ;;  %v10171_v15 = vpop.permute.xlu1 %10170  ;;  %v11303_v28 = vld [vmem:[%s16177_s3 + $0x48] sm:$0xff]   ;;  %3926 = vmatprep.mubr.bf16.mxu0 %v3427_v18 }
 0x20a   : > { %v4720_v16 = vsel %vm498_vm2, 0.0, %v4528_v47  ;;  %v4529_v29 = vrot.slane %v4401_v44, 7  ;;  %v3212_v3 = vsel %vm355_vm0, %v1161_v39, %v10168_v52  ;;  %v3211_v0 = vsel %vm355_vm0, %v1160_v35, %v10167_v23  ;;  %v3739_v14 = vpop.f32.mrb[6].mxu0  ;;  %v13322_v54 = vpop.f32.mrb[32].mxu1 }
 0x20b   : > { %4784 = vst.msk [vmem:[#allocation2 + $0x18] sm:$0xff] %vm355_vm0, %v4720_v16  ;;  %v4026_v42 = vadd.f32 %v12857_v22, %v3737_v13  ;;  %v10173_v60 = vunpack.i.h.bf16 %v10171_v15  ;;  %v10172_v19 = vunpack.i.l.bf16 %v10171_v15  ;;  %v10176_v56 = vpop.permute.xlu0 %10175  ;;  %v3740_v27 = vadd.f32 %v13250_v4, %v3739_v14  ;;  %v3741_v50 = vpop.f32.mrb[7].mxu0  ;;  %7738 = vmatpush1.bf16.msra.mxu1 %v11303_v28 }
 0x20c   : > { %v4530_v35 = vsel %vm498_vm2, %v4528_v47, %v4529_v29  ;;  %v4752_v39 = vsel %vm498_vm2, %v4529_v29, 0.0  ;;  %v10177_v52 = vunpack.i.l.bf16 %v10176_v56  ;;  %v3080_v23 = vsel %vm3029_vm3, %v13210_v59, %v10152_v1  ;;  %v13328_v13 = vpop.f32.mrb[33].mxu1  ;;  %v11304_v1 = vld [vmem:[%s16177_s3 + $0x50] sm:$0xff]   ;;  %7739 = vmatprep.subr.bf16.mxu1 %v16277_v53 }
 0x20d   : > { %4786 = vst.msk [vmem:[#allocation2 + $0x28] sm:$0x3] %vm358_vm1, %v4752_v39  ;;  %vm4274_vm7 = vcmp.gt.f32.partialorder %v4026_v42, 0.0  ;;  %v4338_v22 = vmul.f32 0.2, %v4026_v42  ;;  %v4029_v26 = vadd.f32 %v12867_v2, %v3740_v27  ;;  %v3145_v44 = vsel %vm3094_vm4, %v3080_v23, %v10162_v41  ;;  %v10181_v18 = vpop.permute.xlu1 %10180  ;;  %v13336_v41 = vpop.f32.mrb[34].mxu1 }
 0x20e   : > { %4785 = vst.msk [vmem:[#allocation2 + $0x20] sm:$0xff] %vm355_vm0, %v4530_v35  ;;  %v10178_v47 = vunpack.i.h.bf16 %v10176_v56  ;;  %v3426_v63 = vpack.c.bf16 %v3146_v5, %v3145_v44  ;;  %v3275_v16 = vsel %vm3029_vm3, %v3211_v0, %v10172_v19  ;;  %v3276_v59 = vsel %vm3029_vm3, %v3212_v3, %v10173_v60  ;;  %v13340_v28 = vpop.f32.mrb[35].mxu1 }
 0x20f   : > { %v4402_v29 = vsel %vm4274_vm7, %v4026_v42, %v4338_v22  ;;  %vm4275_vm8 = vcmp.gt.f32.partialorder %v4029_v26, 0.0  ;;  %v4339_v15 = vmul.f32 0.2, %v4029_v26  ;;  %v10183_v2 = vunpack.i.h.bf16 %v10181_v18  ;;  %v10186_v14 = vpop.permute.xlu0 %10185  ;;  %v1163_v22 = vld [vmem:[#allocation2 + $0x2d9] sm:$0xff]  ;;  %7740 = vmatpush1.bf16.msra.mxu1 %v11304_v1 }
 0x210   : > { %v4531_v5 = vrot.slane %v4402_v29, 7  ;;  %3927 = vmatmul.mubr.bf16.gmra.mrb[100].mxu0 %v3426_v63  ;;  %v10182_v56 = vunpack.i.l.bf16 %v10181_v18  ;;  %v10187_v0 = vunpack.i.l.bf16 %v10186_v14  ;;  %v3744_v19 = vpop.f32.mrb[8].mxu0  ;;  %v3082_v3 = vsel %vm3029_vm3, %v13218_v62, %v10177_v52  ;;  %v11305_v52 = vld [vmem:[%s16177_s3 + $0x58] sm:$0xff]   ;;  %7741 = vmatprep.subr.bf16.mxu1 %v16277_v53 }
 0x211   : > { %v4403_v60 = vsel %vm4275_vm8, %v4029_v26, %v4339_v15  ;;  %v10188_v42 = vunpack.i.h.bf16 %v10186_v14  ;;  %v3745_v27 = vadd.f32 %v13250_v4, %v3744_v19  ;;  %v3746_v50 = vpop.f32.mrb[9].mxu0  ;;  %v3340_v35 = vsel %vm3094_vm4, %v3276_v59, %v10183_v2  ;;  %v10191_v44 = vpop.permute.xlu1 %10190 }
 0x212   : > { %v4721_v39 = vsel %vm498_vm2, 0.0, %v4531_v5  ;;  %v4532_v23 = vrot.slane %v4403_v60, 7  ;;  %v3747_v63 = vpop.f32.mrb[10].mxu0  ;;  %v3339_v18 = vsel %vm3094_vm4, %v3275_v16, %v10182_v56  ;;  %v3083_v62 = vsel %vm3029_vm3, %v13215_v7, %v10178_v47  ;;  %v1162_v16 = vld [vmem:[#allocation2 + $0x2d1] sm:$0xff] }
 0x213   : > { %4787 = vst.msk [vmem:[#allocation2 + $0x30] sm:$0xff] %vm355_vm0, %v4721_v39  ;;  %v4034_v26 = vadd.f32 %v12913_v34, %v3745_v27  ;;  %v10193_v59 = vunpack.i.h.bf16 %v10191_v44  ;;  %v10192_v29 = vunpack.i.l.bf16 %v10191_v44  ;;  %v13353_v15 = vpop.permute.xlu0 %10195  ;;  %v3748_v2 = vadd.f32 %v13250_v4, %v3747_v63  ;;  %v3749_v14 = vpop.f32.mrb[11].mxu0  ;;  %7742 = vmatpush1.bf16.msra.mxu1 %v11305_v52  ;;  %v11306_v63 = vld [vmem:[%s16177_s3 + $0x60] sm:$0xff]  }
 0x214   : > { %v4533_v7 = vsel %vm498_vm2, %v4531_v5, %v4532_v23  ;;  %v4753_v47 = vsel %vm498_vm2, %v4532_v23, 0.0  ;;  %v10198_v1 = vunpack.i.h.bf16 %v13353_v15  ;;  %v3147_v56 = vsel %vm3094_vm4, %v3082_v3, %v10187_v0  ;;  %7743 = vmatprep.subr.bf16.mxu1 %v16277_v53 }
 0x215   : > { %v5200_v19 = vld [vmem:[#allocation2 + $0x1a] sm:$0xff]  ;;  %v5201_v34 = vld [vmem:[#allocation2 + $0x22] sm:$0xff]  ;;  %4789 = vst.msk [vmem:[#allocation2 + $0x40] sm:$0x3] %vm358_vm1, %v4753_v47  ;;  %vm4276_vm9 = vcmp.gt.f32.partialorder %v4034_v26, 0.0  ;;  %v3214_v27 = vsel %vm355_vm0, %v1163_v22, %v10193_v59  ;;  %v10197_v50 = vunpack.i.l.bf16 %v13353_v15  ;;  %v3430_v5 = vpack.c.bf16 %v3340_v35, %v3339_v18  ;;  %v13367_v44 = vpop.permute.xlu1 %10200 }
 0x216   : > { %4788 = vst.msk [vmem:[#allocation2 + $0x38] sm:$0xff] %vm355_vm0, %v4533_v7  ;;  %v4340_v60 = vmul.f32 0.2, %v4034_v26  ;;  %v4037_v39 = vadd.f32 %v12921_v51, %v3748_v2  ;;  %v3148_v23 = vsel %vm3094_vm4, %v3083_v62, %v10188_v42  ;;  %v13369_v0 = vpack.i.bf16 %v5201_v34, %v5200_v19  ;;  %v5073_v3 = vld [vmem:[#allocation2 + $0x20] sm:$0xff] }
 0x217   : > { %v3213_v22 = vsel %vm355_vm0, %v1162_v16, %v10192_v29  ;;  %v3429_v59 = vpack.c.bf16 %v3148_v23, %v3147_v56  ;;  %v10206_v18 = vpop.permute.xlu0 %10205  ;;  %v4946_v51 = vld [vmem:[#allocation2 + $0x19] sm:$0xff]  ;;  %v4947_v15 = vld [vmem:[#allocation2 + $0x21] sm:$0xff]  ;;  %3934 = vmatprep.mubr.bf16.mxu0 %v3430_v5  ;;  %v10202_v52 = vunpack.i.l.bf16 %v13367_v44  ;;  %7744 = vmatpush1.bf16.msra.mxu1 %v11306_v63 }
 0x218   : > { %v4404_v14 = vsel %vm4276_vm9, %v4034_v26, %v4340_v60  ;;  %vm4277_vm10 = vcmp.gt.f32.partialorder %v4037_v39, 0.0  ;;  %v4341_v62 = vmul.f32 0.2, %v4037_v39  ;;  %10315 = vrot.lane.b32.xlu0 %v13369_v0, %s11518_s20  ;;  %v5072_v26 = vld [vmem:[#allocation2 + $0x18] sm:$0xff]  ;;  %v3752_v2 = vpop.f32.mrb[12].mxu0  ;;  %v10208_v29 = vunpack.i.h.bf16 %v10206_v18  ;;  %7745 = vmatprep.subr.bf16.mxu1 %v16277_v53 }
 0x219   : > { %v4534_v42 = vrot.slane %v4404_v14, 7  ;;  %3935 = vmatmul.mubr.bf16.gmra.mrb[104].mxu0 %v3429_v59  ;;  %v10207_v7 = vunpack.i.l.bf16 %v10206_v18  ;;  %v10339_v47 = vpack.i.bf16 %v5073_v3, %v5072_v26  ;;  %v3753_v16 = vadd.f32 %v13250_v4, %v3752_v2  ;;  %v3754_v56 = vpop.f32.mrb[13].mxu0  ;;  %v13382_v60 = vpop.permute.xlu1 %10210  ;;  %v1165_v18 = vld [vmem:[#allocation2 + $0x2f1] sm:$0xff] }
 0x21a   : > { %v4405_v34 = vsel %vm4277_vm10, %v4037_v39, %v4341_v62  ;;  %v3755_v5 = vpop.f32.mrb[14].mxu0  ;;  %v10349_v23 = vpack.i.bf16 %v4947_v15, %v4946_v51  ;;  %v3277_v14 = vsel %vm3029_vm3, %v3213_v22, %v10197_v50  ;;  %v10213_v59 = vunpack.i.h.bf16 %v13382_v60  ;;  %v1164_v51 = vld [vmem:[#allocation2 + $0x2e9] sm:$0xff] }
 0x21b   : > { %v4722_v19 = vsel %vm498_vm2, 0.0, %v4534_v42  ;;  %v4535_v35 = vrot.slane %v4405_v34, 7  ;;  %10340 = vrot.lane.b32.xlu1 %v10339_v47, %s11521_s17  ;;  %v4042_v3 = vadd.f32 %v12908_v17, %v3753_v16  ;;  %v10216_v26 = vpop.permute.xlu0 %10215  ;;  %v3757_v2 = vpop.f32.mrb[15].mxu0  ;;  %v3278_v39 = vsel %vm3029_vm3, %v3214_v27, %v10198_v1 }
 0x21c   : > { %4790 = vst.msk [vmem:[#allocation2 + $0x48] sm:$0xff] %vm355_vm0, %v4722_v19  ;;  %v10218_v15 = vunpack.i.h.bf16 %v10216_v26  ;;  %v10217_v50 = vunpack.i.l.bf16 %v10216_v26  ;;  %v3756_v63 = vadd.f32 %v13250_v4, %v3755_v5  ;;  %v3341_v22 = vsel %vm3094_vm4, %v3277_v14, %v10207_v7  ;;  %v13408_v19 = vpop.f32.mrb[36].mxu1 }
 0x21d   : > { %v4536_v62 = vsel %vm498_vm2, %v4534_v42, %v4535_v35  ;;  %v4754_v17 = vsel %vm498_vm2, %v4535_v35, 0.0  ;;  %vm4278_vm11 = vcmp.gt.f32.partialorder %v4042_v3, 0.0  ;;  %v4342_v47 = vmul.f32 0.2, %v4042_v3  ;;  %v13402_v56 = vpop.permute.xlu1 %10220  ;;  %v5265_v42 = vld [vmem:[#allocation2 + $0x38] sm:$0xff]  ;;  %v11307_v35 = vld [vmem:[%s16177_s3 + $0x68] sm:$0xff]  }
 0x21e   : > { %4792 = vst.msk [vmem:[#allocation2 + $0x58] sm:$0x3] %vm358_vm1, %v4754_v17  ;;  %v10212_v1 = vunpack.i.l.bf16 %v13382_v60  ;;  %v13399_v27 = vsel %vm355_vm0, %v1165_v18, %v10218_v15  ;;  %v4045_v16 = vadd.f32 %v12916_v6, %v3756_v63  ;;  %v3342_v7 = vsel %vm3094_vm4, %v3278_v39, %v10208_v29  ;;  %v5264_v18 = vld [vmem:[#allocation2 + $0x30] sm:$0xff]  ;;  %7746 = vmatpush1.bf16.msra.mxu1 %v11307_v35 }
 0x21f   : > { %4791 = vst.msk [vmem:[#allocation2 + $0x50] sm:$0xff] %vm355_vm0, %v4536_v62  ;;  %v4406_v34 = vsel %vm4278_vm11, %v4042_v3, %v4342_v47  ;;  %v3215_v5 = vsel %vm355_vm0, %v1164_v51, %v10217_v50  ;;  %10350 = vrot.lane.b32.xlu1 %v10349_v23, %s11518_s20  ;;  %v10223_v60 = vunpack.i.h.bf16 %v13402_v56  ;;  %v13413_v14 = vpop.permute.xlu0 %10225  ;;  %v3433_v6 = vpack.c.bf16 %v3342_v7, %v3341_v22  ;;  %v11308_v3 = vld [vmem:[%s16177_s3 + $0x70] sm:$0xff]   ;;  %v13426_v22 = vpop.f32.mrb[37].mxu1 }
 0x220   : > { %v4537_v26 = vrot.slane %v4406_v34, 7  ;;  %vm4279_vm12 = vcmp.gt.f32.partialorder %v4045_v16, 0.0  ;;  %v4343_v29 = vmul.f32 0.2, %v4045_v16  ;;  %v10222_v2 = vunpack.i.l.bf16 %v13402_v56  ;;  %v3760_v39 = vpop.f32.mrb[16].mxu0  ;;  %7747 = vmatprep.subr.bf16.mxu1 %v16277_v53 }
 0x221   : > { %3942 = vmatprep.mubr.bf16.mxu0 %v3433_v6  ;;  %v10324_v23 = vpack.i.bf16 %v5265_v42, %v5264_v18  ;;  %v3761_v15 = vadd.f32 %v13250_v4, %v3760_v39  ;;  %v3084_v50 = vsel %vm3029_vm3, %v13231_v37, %v10202_v52  ;;  %v3762_v63 = vpop.f32.mrb[17].mxu0  ;;  %v16293_v47 = vunpack.i.h.bf16 %v13367_v44  ;;  %v13434_v35 = vpop.permute.xlu1 %10230  ;;  %v5328_v6 = vld [vmem:[#allocation2 + $0x31] sm:$0xff]  ;;  %v5329_v18 = vld [vmem:[#allocation2 + $0x39] sm:$0xff] }
 0x222   : > { %v4723_v62 = vsel %vm498_vm2, 0.0, %v4537_v26  ;;  %v4407_v17 = vsel %vm4279_vm12, %v4045_v16, %v4343_v29  ;;  %v3149_v42 = vsel %vm3094_vm4, %v3084_v50, %v10212_v1  ;;  %v3763_v34 = vpop.f32.mrb[18].mxu0  ;;  %v10227_v52 = vunpack.i.l.bf16 %v13413_v14  ;;  %7748 = vmatpush1.bf16.msra.mxu1 %v11308_v3 }
 0x223   : > { %v3085_v7 = vsel %vm3029_vm3, %v13224_v30, %v16293_v47  ;;  %4793 = vst.msk [vmem:[#allocation2 + $0x60] sm:$0xff] %vm355_vm0, %v4723_v62  ;;  %v4538_v37 = vrot.slane %v4407_v17, 7  ;;  %10325 = vrot.lane.b32.xlu0 %v10324_v23, %s11520_s27  ;;  %10360 = vrot.lane.b32.xlu1 %v13369_v0, %s11520_s27  ;;  %v4050_v16 = vadd.f32 %v12967_v49, %v3761_v15  ;;  %v13443_v30 = vpop.permute.xlu0 %10235  ;;  %v3765_v1 = vpop.f32.mrb[19].mxu0  ;;  %v10233_v39 = vunpack.i.h.bf16 %v13434_v35  ;;  %v13448_v62 = vld [vmem:[#allocation2 + $0x32] sm:$0xff]  ;;  %v13450_v17 = vld [vmem:[#allocation2 + $0x3a] sm:$0xff] }
 0x224   : > { %v3150_v44 = vsel %vm3094_vm4, %v3085_v7, %v10213_v59  ;;  %v10232_v50 = vunpack.i.l.bf16 %v13434_v35  ;;  %v10238_v63 = vunpack.i.h.bf16 %v13443_v30  ;;  %v11309_v49 = vld [vmem:[%s16177_s3 + $0x78] sm:$0xff]   ;;  %v13455_v0 = vpop.f32.mrb[38].mxu1  ;;  %7749 = vmatprep.subr.bf16.mxu1 %v16277_v53  ;;  %v10237_v3 = vunpack.i.l.bf16 %v13443_v30  ;;  %v1167_v35 = vld [vmem:[#allocation2 + $0x309] sm:$0xff] }
 0x225   : > { %v3432_v29 = vpack.c.bf16 %v3150_v44, %v3149_v42  ;;  %v4539_v59 = vsel %vm498_vm2, %v4537_v26, %v4538_v37  ;;  %v4755_v15 = vsel %vm498_vm2, %v4538_v37, 0.0  ;;  %vm4280_vm13 = vcmp.gt.f32.partialorder %v4050_v16, 0.0  ;;  %v10241_v44 = vpop.permute.xlu1 %10240  ;;  %v13465_v1 = vpop.f32.mrb[39].mxu1 }
 0x226   : > { %v4344_v47 = vmul.f32 0.2, %v4050_v16  ;;  %4795 = vst.msk [vmem:[#allocation2 + $0x70] sm:$0x3] %vm358_vm1, %v4755_v15  ;;  %v3764_v7 = vadd.f32 %v13250_v4, %v3763_v34  ;;  %v10334_v42 = vpack.i.bf16 %v5329_v18, %v5328_v6  ;;  %v3279_v26 = vsel %vm3029_vm3, %v3215_v5, %v10222_v2  ;;  %7750 = vmatpush1.bf16.msra.mxu1 %v11309_v49  ;;  %v1166_v6 = vld [vmem:[#allocation2 + $0x301] sm:$0xff] }
 0x227   : > { %4794 = vst.msk [vmem:[#allocation2 + $0x68] sm:$0xff] %vm355_vm0, %v4539_v59  ;;  %3943 = vmatmul.mubr.bf16.gmra.mrb[108].mxu0 %v3432_v29  ;;  %10370 = vrot.lane.b32.xlu1 %v10324_v23, %s11521_s17  ;;  %v10243_v53 = vunpack.i.h.bf16 %v10241_v44  ;;  %v13468_v51 = vpop.permute.xlu0 %10245  ;;  %v10344_v29 = vpack.i.bf16 %v13450_v17, %v13448_v62  ;;  %v3280_v34 = vsel %vm3029_vm3, %v13399_v27, %v10223_v60  ;;  %v10242_v2 = vunpack.i.l.bf16 %v10241_v44 }
 0x228   : > { %v4408_v37 = vsel %vm4280_vm13, %v4050_v16, %v4344_v47  ;;  %10335 = vrot.lane.b32.xlu0 %v10334_v42, %s11521_s17  ;;  %v4053_v5 = vadd.f32 %v12984_v45, %v3764_v7  ;;  %v10248_v16 = vunpack.i.h.bf16 %v13468_v51  ;;  %v3768_v23 = vpop.f32.mrb[20].mxu0  ;;  %v10247_v59 = vunpack.i.l.bf16 %v13468_v51  ;;  %v11345_v45 = vld [vmem:[%s16177_s3 + $0x80] sm:$0xff]  }
 0x229   : > { %v4540_v30 = vrot.slane %v4408_v37, 7  ;;  %v13480_v18 = vsel %vm355_vm0, %v1167_v35, %v10243_v53  ;;  %v3769_v56 = vadd.f32 %v13250_v4, %v3768_v23  ;;  %v3343_v27 = vsel %vm3094_vm4, %v3279_v26, %v10232_v50  ;;  %v3770_v60 = vpop.f32.mrb[21].mxu0  ;;  %9292 = vmatprep.subr.bf16.mxu1 %v11345_v45  ;;  %v13490_v7 = vpop.permute.xlu1 %10250 }
 0x22a   : > { %vm4281_vm14 = vcmp.gt.f32.partialorder %v4053_v5, 0.0  ;;  %v4345_v49 = vmul.f32 0.2, %v4053_v5  ;;  %v3344_v47 = vsel %vm3094_vm4, %v3280_v34, %v10233_v39  ;;  %v3771_v35 = vpop.f32.mrb[22].mxu0  ;;  %v3086_v26 = vsel %vm3029_vm3, %v13259_v8, %v10227_v52 }
 0x22b   : > { %v4724_v15 = vsel %vm498_vm2, 0.0, %v4540_v30  ;;  %10380 = vrot.lane.b32.xlu1 %v10334_v42, %s11518_s20  ;;  %v4058_v50 = vadd.f32 %v12963_v46, %v3769_v56  ;;  %v3436_v44 = vpack.c.bf16 %v3344_v47, %v3343_v27  ;;  %v16294_v37 = vunpack.i.h.bf16 %v13413_v14  ;;  %v13503_v53 = vpop.permute.xlu0 %10255  ;;  %v3773_v34 = vpop.f32.mrb[23].mxu0  ;;  %v5267_v56 = vld [vmem:[#allocation2 + $0x50] sm:$0xff] }
 0x22c   : > { %4796 = vst.msk [vmem:[#allocation2 + $0x78] sm:$0xff] %vm355_vm0, %v4724_v15  ;;  %v4409_v23 = vsel %vm4281_vm14, %v4053_v5, %v4345_v49  ;;  %v3217_v60 = vsel %vm355_vm0, %v1166_v6, %v10242_v2  ;;  %10345 = vrot.lane.b32.xlu0 %v10344_v29, %s11518_s20  ;;  %v3151_v46 = vsel %vm3094_vm4, %v3086_v26, %v10237_v3  ;;  %v10252_v52 = vunpack.i.l.bf16 %v13490_v7  ;;  %v5266_v6 = vld [vmem:[#allocation2 + $0x48] sm:$0xff]  ;;  %v5331_v26 = vld [vmem:[#allocation2 + $0x51] sm:$0xff]  ;;  %v1168_v34 = vld [vmem:[#allocation2 + $0x319] sm:$0xff] }
 0x22d   : > { %v3087_v39 = vsel %vm3029_vm3, %v13234_v38, %v16294_v37  ;;  %v4541_v27 = vrot.slane %v4409_v23, 7  ;;  %vm4282_vm15 = vcmp.gt.f32.partialorder %v4058_v50, 0.0  ;;  %v4346_v8 = vmul.f32 0.2, %v4058_v50  ;;  %3950 = vmatprep.mubr.bf16.mxu0 %v3436_v44  ;;  %v13513_v45 = vpop.permute.xlu1 %10260  ;;  %v5330_v44 = vld [vmem:[#allocation2 + $0x49] sm:$0xff] }
 0x22e   : > { %v3152_v42 = vsel %vm3094_vm4, %v3087_v39, %v10238_v63  ;;  %v10253_v38 = vunpack.i.h.bf16 %v13490_v7  ;;  %v10258_v5 = vunpack.i.h.bf16 %v13503_v53  ;;  %v3772_v2 = vadd.f32 %v13250_v4, %v3771_v35 }
 0x22f   : > { %v3435_v14 = vpack.c.bf16 %v3152_v42, %v3151_v46  ;;  %v4542_v3 = vsel %vm498_vm2, %v4540_v30, %v4541_v27  ;;  %v4756_v63 = vsel %vm498_vm2, %v4541_v27, 0.0  ;;  %v4410_v15 = vsel %vm4282_vm15, %v4058_v50, %v4346_v8  ;;  %10390 = vrot.lane.b32.xlu1 %v10344_v29, %s11520_s27  ;;  %v10266_v47 = vpop.permute.xlu0 %10265  ;;  %v1169_v50 = vld [vmem:[#allocation2 + $0x321] sm:$0xff] }
 0x230   : > { %v10354_v49 = vpack.i.bf16 %v5267_v56, %v5266_v6  ;;  %4798 = vst.msk [vmem:[#allocation2 + $0x88] sm:$0x3] %vm358_vm1, %v4756_v63  ;;  %v4543_v35 = vrot.slane %v4410_v15, 7  ;;  %v10257_v37 = vunpack.i.l.bf16 %v13503_v53  ;;  %v4061_v39 = vadd.f32 %v12979_v21, %v3772_v2  ;;  %v3776_v23 = vpop.f32.mrb[24].mxu0 }
 0x231   : > { %3951 = vmatmul.mubr.bf16.gmra.mrb[112].mxu0 %v3435_v14  ;;  %4797 = vst.msk [vmem:[#allocation2 + $0x80] sm:$0xff] %vm355_vm0, %v4542_v3  ;;  %v10263_v30 = vunpack.i.h.bf16 %v13513_v45  ;;  %v10262_v29 = vunpack.i.l.bf16 %v13513_v45  ;;  %v10268_v46 = vunpack.i.h.bf16 %v10266_v47  ;;  %v10267_v42 = vunpack.i.l.bf16 %v10266_v47  ;;  %v3778_v27 = vpop.f32.mrb[25].mxu0  ;;  %v13527_v21 = vpop.permute.xlu1 %10270 }
 0x232   : > { %10355 = vrot.lane.b32.xlu0 %v10354_v49, %s11520_s27  ;;  %v3777_v56 = vadd.f32 %v13250_v4, %v3776_v23  ;;  %v4725_v8 = vsel %vm498_vm2, 0.0, %v4543_v35  ;;  %vm4283_vm5 = vcmp.gt.f32.partialorder %v4061_v39, 0.0  ;;  %v4347_v14 = vmul.f32 0.2, %v4061_v39  ;;  %v3779_v2 = vpop.f32.mrb[26].mxu0  ;;  %v13545_v23 = vld [vmem:[#allocation2 + $0x52] sm:$0xff] }
 0x233   : > { %v10364_v6 = vpack.i.bf16 %v5331_v26, %v5330_v44  ;;  %4799 = vst.msk [vmem:[#allocation2 + $0x90] sm:$0xff] %vm355_vm0, %v4725_v8  ;;  %v13531_v3 = vsel %vm355_vm0, %v1169_v50, %v10268_v46  ;;  %v13534_v45 = vsel %vm355_vm0, %v1168_v34, %v10267_v42  ;;  %10400 = vrot.lane.b32.xlu1 %v10354_v49, %s11521_s17  ;;  %v13538_v15 = vpop.permute.xlu0 %10275  ;;  %v3781_v47 = vpop.f32.mrb[27].mxu0  ;;  %v13543_v26 = vld [vmem:[#allocation2 + $0x4a] sm:$0xff]  ;;  %v10273_v46 = vunpack.i.h.bf16 %v13527_v21 }
 0x234   : > { %v4066_v63 = vadd.f32 %v13028_v58, %v3777_v56  ;;  %v3281_v44 = vsel %vm3029_vm3, %v3217_v60, %v10247_v59  ;;  %v4411_v50 = vsel %vm4283_vm5, %v4061_v39, %v4347_v14  ;;  %v10272_v34 = vunpack.i.l.bf16 %v13527_v21  ;;  %v13550_v42 = vpop.f32.mrb[40].mxu1 }
 0x235   : > { %v4544_v58 = vrot.slane %v4411_v50, 7  ;;  %v3780_v59 = vadd.f32 %v13250_v4, %v3779_v2  ;;  %v13554_v60 = vpop.f32.mrb[41].mxu1  ;;  %v3282_v39 = vsel %vm3029_vm3, %v13480_v18, %v10248_v16  ;;  %v3345_v27 = vsel %vm3094_vm4, %v3281_v44, %v10257_v37  ;;  %v13565_v47 = vpop.permute.xlu1 %10280 }
 0x236   : > { %10365 = vrot.lane.b32.xlu0 %v10364_v6, %s11521_s17  ;;  %vm4284_vm6 = vcmp.gt.f32.partialorder %v4066_v63, 0.0  ;;  %v4348_v56 = vmul.f32 0.2, %v4066_v63  ;;  %v10374_v8 = vpack.i.bf16 %v13545_v23, %v13543_v26  ;;  %v3088_v14 = vsel %vm3029_vm3, %v13274_v57, %v10252_v52  ;;  %v13575_v18 = vpop.f32.mrb[42].mxu1 }
 0x237   : > { %v4545_v50 = vsel %vm498_vm2, %v4543_v35, %v4544_v58  ;;  %v4757_v2 = vsel %vm498_vm2, %v4544_v58, 0.0  ;;  %v3346_v51 = vsel %vm3094_vm4, %v3282_v39, %v10258_v5  ;;  %10410 = vrot.lane.b32.xlu1 %v10364_v6, %s11518_s20  ;;  %v13573_v16 = vpop.permute.xlu0 %10285  ;;  %v3089_v35 = vsel %vm3029_vm3, %v13271_v25, %v10253_v38  ;;  %v5269_v5 = vld [vmem:[#allocation2 + $0x68] sm:$0xff]  ;;  %v13584_v6 = vpop.f32.mrb[43].mxu1  ;;  %v5268_v39 = vld [vmem:[#allocation2 + $0x60] sm:$0xff] }
 0x238   : > { %v4412_v49 = vsel %vm4284_vm6, %v4066_v63, %v4348_v56  ;;  %4801 = vst.msk [vmem:[#allocation2 + $0xa0] sm:$0x3] %vm358_vm1, %v4757_v2  ;;  %v3439_v52 = vpack.c.bf16 %v3346_v51, %v3345_v27  ;;  %v3153_v53 = vsel %vm3094_vm4, %v3088_v14, %v10262_v29  ;;  %v3784_v37 = vpop.f32.mrb[28].mxu0  ;;  %v10277_v63 = vunpack.i.l.bf16 %v13538_v15  ;;  %v1171_v27 = vld [vmem:[#allocation2 + $0x339] sm:$0xff]  ;;  %v5332_v51 = vld [vmem:[#allocation2 + $0x61] sm:$0xff] }
 0x239   : > { %4800 = vst.msk [vmem:[#allocation2 + $0x98] sm:$0xff] %vm355_vm0, %v4545_v50  ;;  %v4546_v57 = vrot.slane %v4412_v49, 7  ;;  %v3154_v44 = vsel %vm3094_vm4, %v3089_v35, %v10263_v30  ;;  %v4069_v49 = vadd.f32 %v13040_v20, %v3780_v59  ;;  %v10283_v58 = vunpack.i.h.bf16 %v13565_v47  ;;  %v3786_v7 = vpop.f32.mrb[29].mxu0  ;;  %v10291_v14 = vpop.permute.xlu1 %10290 }
 0x23a   : > { %10375 = vrot.lane.b32.xlu0 %v10374_v8, %s11518_s20  ;;  %3958 = vmatprep.mubr.bf16.mxu0 %v3439_v52  ;;  %v3438_v25 = vpack.c.bf16 %v3154_v44, %v3153_v53  ;;  %v10282_v38 = vunpack.i.l.bf16 %v13565_v47  ;;  %v10288_v29 = vunpack.i.h.bf16 %v13573_v16  ;;  %v3787_v50 = vpop.f32.mrb[30].mxu0  ;;  %v10384_v20 = vpack.i.bf16 %v5269_v5, %v5268_v39  ;;  %v5333_v52 = vld [vmem:[#allocation2 + $0x69] sm:$0xff] }
 0x23b   : > { %v4726_v56 = vsel %vm498_vm2, 0.0, %v4546_v57  ;;  %vm4285_vm7 = vcmp.gt.f32.partialorder %v4069_v49, 0.0  ;;  %v4349_v30 = vmul.f32 0.2, %v4069_v49  ;;  %10420 = vrot.lane.b32.xlu1 %v10374_v8, %s11520_s27  ;;  %v3785_v59 = vadd.f32 %v13250_v4, %v3784_v37  ;;  %v3789_v2 = vpop.f32.mrb[31].mxu0  ;;  %v13599_v7 = vpop.permute.xlu0 %10295 }
 0x23c   : > { %4802 = vst.msk [vmem:[#allocation2 + $0xa8] sm:$0xff] %vm355_vm0, %v4726_v56  ;;  %3959 = vmatmul.mubr.bf16.gmra.mrb[116].mxu0 %v3438_v25  ;;  %v10287_v47 = vunpack.i.l.bf16 %v13573_v16  ;;  %v10293_v35 = vunpack.i.h.bf16 %v10291_v14  ;;  %v10292_v53 = vunpack.i.l.bf16 %v10291_v14  ;;  %v3788_v44 = vadd.f32 %v13250_v4, %v3787_v50  ;;  %v1170_v25 = vld [vmem:[#allocation2 + $0x331] sm:$0xff] }
 0x23d   : > { %v4413_v56 = vsel %vm4285_vm7, %v4069_v49, %v4349_v30  ;;  %v4074_v5 = vadd.f32 %v13021_v36, %v3785_v59  ;;  %v3283_v8 = vsel %vm3029_vm3, %v13534_v45, %v10272_v34  ;;  %v3284_v16 = vsel %vm3029_vm3, %v13531_v3, %v10273_v46  ;;  %v13613_v50 = vpop.permute.xlu1 %10300 }
 0x23e   : > { %10385 = vrot.lane.b32.xlu0 %v10384_v20, %s11520_s27  ;;  %v4547_v37 = vrot.slane %v4413_v56, 7  ;;  %v3222_v39 = vsel %vm355_vm0, %v1171_v27, %v10293_v35  ;;  %v4077_v49 = vadd.f32 %v13033_v24, %v3788_v44  ;;  %v10394_v14 = vpack.i.bf16 %v5333_v52, %v5332_v51 }
 0x23f   : > { %vm4286_vm8 = vcmp.gt.f32.partialorder %v4074_v5, 0.0  ;;  %v4350_v36 = vmul.f32 0.2, %v4074_v5  ;;  %10430 = vrot.lane.b32.xlu1 %v10384_v20, %s11521_s17  ;;  %v3347_v45 = vsel %vm3094_vm4, %v3283_v8, %v10282_v38  ;;  %v3348_v21 = vsel %vm3094_vm4, %v3284_v16, %v10283_v58  ;;  %v13625_v58 = vld [vmem:[#allocation2 + $0x62] sm:$0xff]  ;;  %v10306_v44 = vpop.permute.xlu0 %10305 }
 0x240   : > { %v4548_v34 = vsel %vm498_vm2, %v4546_v57, %v4547_v37  ;;  %v4758_v3 = vsel %vm498_vm2, %v4547_v37, 0.0  ;;  %vm4287_vm9 = vcmp.gt.f32.partialorder %v4077_v49, 0.0  ;;  %v4351_v46 = vmul.f32 0.2, %v4077_v49  ;;  %v3792_v27 = vpop.f32.mrb[32].mxu0  ;;  %v13627_v57 = vld [vmem:[#allocation2 + $0x6a] sm:$0xff] }
 0x241   : > { %4804 = vst.msk [vmem:[#allocation2 + $0xb8] sm:$0x3] %vm358_vm1, %v4758_v3  ;;  %v4414_v24 = vsel %vm4286_vm8, %v4074_v5, %v4350_v36  ;;  %v3221_v30 = vsel %vm355_vm0, %v1170_v25, %v10292_v53  ;;  %v3442_v20 = vpack.c.bf16 %v3348_v21, %v3347_v45  ;;  %v10298_v38 = vunpack.i.h.bf16 %v13599_v7  ;;  %v3794_v59 = vpop.f32.mrb[33].mxu0  ;;  %v10311_v25 = vpop.permute.xlu1 %10310 }
 0x242   : > { %4803 = vst.msk [vmem:[#allocation2 + $0xb0] sm:$0xff] %vm355_vm0, %v4548_v34  ;;  %10395 = vrot.lane.b32.xlu0 %v10394_v14, %s11521_s17  ;;  %v4549_v2 = vrot.slane %v4414_v24, 7  ;;  %v4415_v51 = vsel %vm4287_vm9, %v4077_v49, %v4351_v46  ;;  %v3090_v52 = vsel %vm3029_vm3, %v13288_v11, %v10277_v63  ;;  %v16295_v35 = vunpack.i.h.bf16 %v13538_v15  ;;  %v3795_v56 = vpop.f32.mrb[34].mxu0 }
 0x243   : > { %v4550_v5 = vrot.slane %v4415_v51, 7  ;;  %3966 = vmatprep.mubr.bf16.mxu0 %v3442_v20  ;;  %v10297_v8 = vunpack.i.l.bf16 %v13599_v7  ;;  %v3155_v16 = vsel %vm3094_vm4, %v3090_v52, %v10287_v47  ;;  %10440 = vrot.lane.b32.xlu1 %v10394_v14, %s11518_s20  ;;  %v3797_v49 = vpop.f32.mrb[35].mxu0  ;;  %v10303_v63 = vunpack.i.h.bf16 %v13613_v50  ;;  %v5271_v14 = vld [vmem:[#allocation2 + $0x80] sm:$0xff]  ;;  %v5270_v20 = vld [vmem:[#allocation2 + $0x78] sm:$0xff] }
 0x244   : > { %v3091_v53 = vsel %vm3029_vm3, %v13277_v32, %v16295_v35  ;;  %v4727_v11 = vsel %vm498_vm2, 0.0, %v4549_v2  ;;  %v10404_v32 = vpack.i.bf16 %v13627_v57, %v13625_v58  ;;  %v10308_v36 = vunpack.i.h.bf16 %v10306_v44 }
 0x245   : > { %v3156_v37 = vsel %vm3094_vm4, %v3091_v53, %v10288_v29  ;;  %4805 = vst.msk [vmem:[#allocation2 + $0xc0] sm:$0xff] %vm355_vm0, %v4727_v11  ;;  %v4551_v7 = vsel %vm498_vm2, %v4549_v2, %v4550_v5  ;;  %v4759_v47 = vsel %vm498_vm2, %v4550_v5, 0.0  ;;  %v3793_v29 = vadd.f32 %v13250_v4, %v3792_v27  ;;  %v13658_v2 = vpop.f32.mrb[44].mxu1 }
 0x246   : > { %v3441_v15 = vpack.c.bf16 %v3156_v37, %v3155_v16  ;;  %4807 = vst.msk [vmem:[#allocation2 + $0xd0] sm:$0x3] %vm358_vm1, %v4759_v47  ;;  %v10302_v45 = vunpack.i.l.bf16 %v13613_v50  ;;  %10405 = vrot.lane.b32.xlu0 %v10404_v32, %s11518_s20  ;;  %v10307_v21 = vunpack.i.l.bf16 %v10306_v44  ;;  %v10313_v34 = vunpack.i.h.bf16 %v10311_v25  ;;  %v5334_v44 = vld [vmem:[#allocation2 + $0x79] sm:$0xff] }
 0x247   : > { %4806 = vst.msk [vmem:[#allocation2 + $0xc8] sm:$0xff] %vm355_vm0, %v4551_v7  ;;  %v3796_v3 = vadd.f32 %v13250_v4, %v3795_v56  ;;  %v4082_v46 = vadd.f32 %v13069_v48, %v3793_v29  ;;  %v10312_v24 = vunpack.i.l.bf16 %v10311_v25  ;;  %10450 = vrot.lane.b32.xlu1 %v10404_v32, %s11520_s27  ;;  %v3285_v27 = vsel %vm3029_vm3, %v3221_v30, %v10297_v8  ;;  %v5335_v56 = vld [vmem:[#allocation2 + $0x81] sm:$0xff]  ;;  %v13666_v30 = vld [vmem:[%s16176_s2] ss:$0 sm:$0xff] }
 0x248   : > { %3967 = vmatmul.mubr.bf16.gmra.mrb[120].mxu0 %v3441_v15  ;;  %v3286_v59 = vsel %vm3029_vm3, %v3222_v39, %v10298_v38  ;;  %v10414_v51 = vpack.i.bf16 %v5271_v14, %v5270_v20  ;;  %v3349_v52 = vsel %vm3094_vm4, %v3285_v27, %v10307_v21  ;;  %v3800_v4 = vpop.f32.mrb[36].mxu0  ;;  %v3092_v5 = vsel %vm3029_vm3, %v13294_v33, %v10302_v45  ;;  %v13677_v15 = vpop.f32.mrb[45].mxu1  ;;  %v13682_v14 = vld [vmem:[#allocation2 + $0x82] sm:$0xff] }
 0x249   : > { %v4085_v50 = vadd.f32 %v13094_v43, %v3796_v3  ;;  %v3350_v35 = vsel %vm3094_vm4, %v3286_v59, %v10308_v36  ;;  %vm4288_vm10 = vcmp.gt.f32.partialorder %v4082_v46, 0.0  ;;  %v4352_v48 = vmul.f32 0.2, %v4082_v46  ;;  %v3802_v38 = vpop.f32.mrb[37].mxu0  ;;  %v13680_v36 = vld [vmem:[#allocation2 + $0x7a] sm:$0xff]  ;;  %v13689_v3 = vpop.f32.mrb[46].mxu1 }
 0x24a   : > { %v3445_v53 = vpack.c.bf16 %v3350_v35, %v3349_v52  ;;  %v3801_v39 = vadd.f32 %v13666_v30, %v3800_v4  ;;  %10415 = vrot.lane.b32.xlu0 %v10414_v51, %s11520_s27  ;;  %v3093_v8 = vsel %vm3029_vm3, %v13291_v12, %v10303_v63  ;;  %v3803_v16 = vpop.f32.mrb[38].mxu0  ;;  %v3157_v49 = vsel %vm3094_vm4, %v3092_v5, %v10312_v24  ;;  %v13695_v20 = vpop.f32.mrb[47].mxu1 }
 0x24b   : > { %vm4289_vm11 = vcmp.gt.f32.partialorder %v4085_v50, 0.0  ;;  %v4353_v43 = vmul.f32 0.2, %v4085_v50  ;;  %v4416_v37 = vsel %vm4288_vm10, %v4082_v46, %v4352_v48  ;;  %10460 = vrot.lane.b32.xlu1 %v10414_v51, %s11521_s17  ;;  %v3805_v11 = vpop.f32.mrb[39].mxu0  ;;  %v10424_v47 = vpack.i.bf16 %v5335_v56, %v5334_v44  ;;  %v5273_v51 = vld [vmem:[#allocation2 + $0x98] sm:$0xff] }
 0x24c   : > { %3974 = vmatprep.mubr.bf16.mxu0 %v3445_v53  ;;  %v4090_v25 = vadd.f32 %v13065_v40, %v3801_v39  ;;  %v4552_v32 = vrot.slane %v4416_v37, 7  ;;  %v3158_v33 = vsel %vm3094_vm4, %v3093_v8, %v10313_v34  ;;  %v7378_v45 = vpack.c.bf16 %v13450_v17, %v13448_v62  ;;  %v5272_v53 = vld [vmem:[#allocation2 + $0x90] sm:$0xff]  ;;  %v5337_v37 = vld [vmem:[#allocation2 + $0x99] sm:$0xff] }
 0x24d   : > { %v4417_v7 = vsel %vm4289_vm11, %v4085_v50, %v4353_v43  ;;  %v3444_v63 = vpack.c.bf16 %v3158_v33, %v3157_v49  ;;  %v3804_v21 = vadd.f32 %v13666_v30, %v3803_v16  ;;  %v10434_v27 = vpack.i.bf16 %v13682_v14, %v13680_v36  ;;  %v5336_v16 = vld [vmem:[#allocation2 + $0x91] sm:$0xff] }
 0x24e   : > { %v4553_v29 = vrot.slane %v4417_v7, 7  ;;  %vm4290_vm12 = vcmp.gt.f32.partialorder %v4090_v25, 0.0  ;;  %v4354_v12 = vmul.f32 0.2, %v4090_v25  ;;  %v4728_v40 = vsel %vm498_vm2, 0.0, %v4552_v32  ;;  %10425 = vrot.lane.b32.xlu0 %v10424_v47, %s11521_s17  ;;  %v5211_v7 = vld [vmem:[#allocation2 + $0x9a] sm:$0xff] }
 0x24f   : > { %4808 = vst.msk [vmem:[#allocation2 + $0xd8] sm:$0xff] %vm355_vm0, %v4728_v40  ;;  %10470 = vrot.lane.b32.xlu1 %v10424_v47, %s11518_s20  ;;  %v4093_v17 = vadd.f32 %v13089_v61, %v3804_v21  ;;  %v10444_v38 = vpack.i.bf16 %v5273_v51, %v5272_v53  ;;  %v7381_v43 = vpack.c.bf16 %v13545_v23, %v13543_v26  ;;  %v5275_v51 = vld [vmem:[#allocation2 + $0xb0] sm:$0xff] }
 0x250   : > { %v4554_v34 = vsel %vm498_vm2, %v4552_v32, %v4553_v29  ;;  %v4760_v46 = vsel %vm498_vm2, %v4553_v29, 0.0  ;;  %v4418_v24 = vsel %vm4290_vm12, %v4090_v25, %v4354_v12  ;;  %3975 = vmatmul.mubr.bf16.gmra.mrb[124].mxu0 %v3444_v63  ;;  %v3808_v59 = vpop.f32.mrb[40].mxu0  ;;  %v7384_v49 = vpack.c.bf16 %v13627_v57, %v13625_v58  ;;  %v5210_v57 = vld [vmem:[#allocation2 + $0x92] sm:$0xff]  ;;  %v5338_v53 = vld [vmem:[#allocation2 + $0xa9] sm:$0xff] }
 0x251   : > { %4810 = vst.msk [vmem:[#allocation2 + $0xe8] sm:$0x3] %vm358_vm1, %v4760_v46  ;;  %v4555_v62 = vrot.slane %v4418_v24, 7  ;;  %9206 = vmatprep.mubr.msk.bf16.mxu0 %vm355_vm0, %v7378_v45  ;;  %v3809_v50 = vadd.f32 %v13666_v30, %v3808_v59  ;;  %v3810_v52 = vpop.f32.mrb[41].mxu0  ;;  %vm4291_vm13 = vcmp.gt.f32.partialorder %v4093_v17, 0.0  ;;  %v10454_v26 = vpack.i.bf16 %v5337_v37, %v5336_v16  ;;  %v13726_v40 = vpop.f32.mrb[48].mxu1 }
 0x252   : > { %4809 = vst.msk [vmem:[#allocation2 + $0xe0] sm:$0xff] %vm355_vm0, %v4554_v34  ;;  %v4355_v4 = vmul.f32 0.2, %v4093_v17  ;;  %10435 = vrot.lane.b32.xlu0 %v10434_v27, %s11518_s20  ;;  %v3811_v48 = vpop.f32.mrb[42].mxu0  ;;  %v10464_v24 = vpack.i.bf16 %v5211_v7, %v5210_v57 }
 0x253   : > { %v4729_v35 = vsel %vm498_vm2, 0.0, %v4555_v62  ;;  %10480 = vrot.lane.b32.xlu1 %v10434_v27, %s11520_s27  ;;  %v3812_v61 = vadd.f32 %v13666_v30, %v3811_v48  ;;  %v4098_v44 = vadd.f32 %v13118_v9, %v3809_v50  ;;  %v3813_v56 = vpop.f32.mrb[43].mxu0 }
 0x254   : > { %4811 = vst.msk [vmem:[#allocation2 + $0xf0] sm:$0xff] %vm355_vm0, %v4729_v35  ;;  %v4419_v39 = vsel %vm4291_vm13, %v4093_v17, %v4355_v4 }
 0x255   : > { %v4556_v5 = vrot.slane %v4419_v39, 7  ;;  %vm4292_vm14 = vcmp.gt.f32.partialorder %v4098_v44, 0.0  ;;  %v4356_v8 = vmul.f32 0.2, %v4098_v44  ;;  %v4101_v25 = vadd.f32 %v13126_v10, %v3812_v61  ;;  %v5403_v39 = vld [vmem:[#allocation2 + $0xb2] sm:$0xff] }
 0x256   : > { %10445 = vrot.lane.b32.xlu0 %v10444_v38, %s11520_s27 }
 0x257   : > { %v4557_v9 = vsel %vm498_vm2, %v4555_v62, %v4556_v5  ;;  %v4761_v11 = vsel %vm498_vm2, %v4556_v5, 0.0  ;;  %v4420_v32 = vsel %vm4292_vm14, %v4098_v44, %v4356_v8  ;;  %10490 = vrot.lane.b32.xlu1 %v10444_v38, %s11521_s17  ;;  %vm4293_vm15 = vcmp.gt.f32.partialorder %v4101_v25, 0.0  ;;  %v5339_v44 = vld [vmem:[#allocation2 + $0xb1] sm:$0xff] }
 0x258   : > { %9207 = vmatmul.mubr.msk.bf16.vlgmr.msra.gmra.mrb[128].mxu0 %vm355_vm0, %v7381_v43  ;;  %4813 = vst.msk [vmem:[#allocation2 + $0x100] sm:$0x3] %vm358_vm1, %v4761_v11  ;;  %v4558_v10 = vrot.slane %v4420_v32, 7  ;;  %v4357_v23 = vmul.f32 0.2, %v4101_v25  ;;  %v3816_v58 = vpop.f32.mrb[44].mxu0  ;;  %v7387_v62 = vpack.c.bf16 %v13682_v14, %v13680_v36 }
 0x259   : > { %4812 = vst.msk [vmem:[#allocation2 + $0xf8] sm:$0xff] %vm355_vm0, %v4557_v9  ;;  %9210 = vmatprep.mubr.msk.bf16.mxu0 %vm355_vm0, %v7384_v49  ;;  %v3817_v47 = vadd.f32 %v13666_v30, %v3816_v58  ;;  %v3818_v33 = vpop.f32.mrb[45].mxu0  ;;  %v5274_v36 = vld [vmem:[#allocation2 + $0xa8] sm:$0xff]  ;;  %v13742_v14 = vpop.f32.mrb[49].mxu1  ;;  %v16296_v32 = vld [vmem:[#allocation9_spill] sm:$0xff] }
 0x25a   : > { %v4730_v29 = vsel %vm498_vm2, 0.0, %v4558_v10  ;;  %10455 = vrot.lane.b32.xlu0 %v10454_v26, %s11521_s17  ;;  %v4421_v12 = vsel %vm4293_vm15, %v4101_v25, %v4357_v23  ;;  %v3819_v63 = vpop.f32.mrb[46].mxu0  ;;  %v10474_v48 = vpack.i.bf16 %v5275_v51, %v5274_v36  ;;  %v13746_v43 = vpop.f32.mrb[50].mxu1  ;;  %v13754_v49 = vld [vmem:[#allocation2 + $0xc2] sm:$0xff]  ;;  %v13756_v9 = vld [vmem:[#allocation2 + $0xca] sm:$0xff]  ;;  %v10484_v23 = vpack.i.bf16 %v5339_v44, %v5338_v53 }
 0x25b   : > { %4814 = vst.msk [vmem:[#allocation2 + $0x108] sm:$0xff] %vm355_vm0, %v4730_v29  ;;  %v4559_v45 = vrot.slane %v4421_v12, 7  ;;  %10500 = vrot.lane.b32.xlu1 %v10454_v26, %s11518_s20  ;;  %v4106_v21 = vadd.f32 %v13114_v31, %v3817_v47  ;;  %v3820_v34 = vadd.f32 %v13666_v30, %v3819_v63  ;;  %v3821_v46 = vpop.f32.mrb[47].mxu0  ;;  %v7390_v31 = vpack.c.bf16 %v5211_v7, %v5210_v57  ;;  %v13750_v37 = vpop.f32.mrb[51].mxu1  ;;  %v16297_v29 = vld [vmem:[#allocation11_spill] sm:$0xff]  ;;  %v5276_v36 = vld [vmem:[#allocation2 + $0xc0] sm:$0xff] }
 0x25c   : > { %v7396_v33 = vpack.c.bf16 %v13756_v9, %v13754_v49 }
 0x25d   : > { %v4560_v17 = vsel %vm498_vm2, %v4558_v10, %v4559_v45  ;;  %v4762_v27 = vsel %vm498_vm2, %v4559_v45, 0.0  ;;  %vm4294_vm5 = vcmp.gt.f32.partialorder %v4106_v21, 0.0  ;;  %v4358_v59 = vmul.f32 0.2, %v4106_v21 }
 0x25e   : > { %4816 = vst.msk [vmem:[#allocation2 + $0x118] sm:$0x3] %vm358_vm1, %v4762_v27  ;;  %10465 = vrot.lane.b32.xlu0 %v10464_v24, %s11518_s20  ;;  %v4109_v50 = vadd.f32 %v13124_v55, %v3820_v34  ;;  %v5402_v55 = vld [vmem:[#allocation2 + $0xaa] sm:$0xff]  ;;  %v13774_v27 = vld [vmem:[#allocation2 + $0xe2] sm:$0xff] }
 0x25f   : > { %4815 = vst.msk [vmem:[#allocation2 + $0x110] sm:$0xff] %vm355_vm0, %v4560_v17  ;;  %v4422_v52 = vsel %vm4294_vm5, %v4106_v21, %v4358_v59  ;;  %10510 = vrot.lane.b32.xlu1 %v10464_v24, %s11520_s27  ;;  %v7393_v58 = vpack.c.bf16 %v5403_v39, %v5402_v55  ;;  %v10494_v21 = vpack.i.bf16 %v5403_v39, %v5402_v55  ;;  %v5277_v24 = vld [vmem:[#allocation2 + $0xc8] sm:$0xff]  ;;  %v13772_v17 = vld [vmem:[#allocation2 + $0xda] sm:$0xff] }
 0x260   : > { %9211 = vmatmul.mubr.msk.bf16.gmra.mrb[132].mxu0 %vm355_vm0, %v7387_v62  ;;  %v4561_v35 = vrot.slane %v4422_v52, 7  ;;  %vm4295_vm6 = vcmp.gt.f32.partialorder %v4109_v50, 0.0  ;;  %v4359_v4 = vmul.f32 0.2, %v4109_v50  ;;  %v3824_v61 = vpop.f32.mrb[48].mxu0  ;;  %v13783_v53 = vld [vmem:[#allocation2 + $0xfa] sm:$0xff]  ;;  %v7399_v55 = vpack.c.bf16 %v13774_v27, %v13772_v17 }
 0x261   : > { %9214 = vmatprep.mubr.msk.bf16.mxu0 %vm355_vm0, %v7390_v31  ;;  %v3825_v56 = vadd.f32 %v13666_v30, %v3824_v61  ;;  %v3826_v38 = vpop.f32.mrb[49].mxu0 }
 0x262   : > { %v4731_v5 = vsel %vm498_vm2, 0.0, %v4561_v35  ;;  %v4423_v8 = vsel %vm4295_vm6, %v4109_v50, %v4359_v4  ;;  %10475 = vrot.lane.b32.xlu0 %v10474_v48, %s11520_s27  ;;  %v3827_v16 = vpop.f32.mrb[50].mxu0 }
 0x263   : > { %4817 = vst.msk [vmem:[#allocation2 + $0x120] sm:$0xff] %vm355_vm0, %v4731_v5  ;;  %v4562_v25 = vrot.slane %v4423_v8, 7  ;;  %10520 = vrot.lane.b32.xlu1 %v10474_v48, %s11521_s17  ;;  %v3828_v11 = vadd.f32 %v13666_v30, %v3827_v16  ;;  %v4114_v10 = vadd.f32 %v16296_v32, %v3825_v56  ;;  %v3829_v26 = vpop.f32.mrb[51].mxu0  ;;  %v13781_v48 = vld [vmem:[#allocation2 + $0xf2] sm:$0xff]  ;;  %v10504_v56 = vpack.i.bf16 %v5277_v24, %v5276_v36  ;;  %v5340_v8 = vld [vmem:[#allocation2 + $0xc1] sm:$0xff]  ;;  %v5341_v16 = vld [vmem:[#allocation2 + $0xc9] sm:$0xff] }
 0x265   : > { %v4563_v57 = vsel %vm498_vm2, %v4561_v35, %v4562_v25  ;;  %v4763_v7 = vsel %vm498_vm2, %v4562_v25, 0.0  ;;  %vm4296_vm7 = vcmp.gt.f32.partialorder %v4114_v10, 0.0  ;;  %v4360_v47 = vmul.f32 0.2, %v4114_v10  ;;  %v16298_v35 = vld [vmem:[#allocation27_spill] sm:$0xff] }
 0x266   : > { %4819 = vst.msk [vmem:[#allocation2 + $0x130] sm:$0x3] %vm358_vm1, %v4763_v7  ;;  %10485 = vrot.lane.b32.xlu0 %v10484_v23, %s11521_s17  ;;  %v4117_v12 = vadd.f32 %v16297_v29, %v3828_v11  ;;  %v7402_v25 = vpack.c.bf16 %v13783_v53, %v13781_v48  ;;  %v16299_v11 = vld [vmem:[#allocation10_spill] sm:$0xff]  ;;  %v13804_v29 = vld [vmem:[#allocation2 + $0x112] sm:$0xff] }
 0x267   : > { %4818 = vst.msk [vmem:[#allocation2 + $0x128] sm:$0xff] %vm355_vm0, %v4563_v57  ;;  %v4424_v63 = vsel %vm4296_vm7, %v4114_v10, %v4360_v47  ;;  %10530 = vrot.lane.b32.xlu1 %v10484_v23, %s11518_s20 }
 0x268   : > { %9215 = vmatmul.mubr.msk.bf16.gmra.mrb[136].mxu0 %vm355_vm0, %v7393_v58  ;;  %v4564_v45 = vrot.slane %v4424_v63, 7  ;;  %vm4297_vm8 = vcmp.gt.f32.partialorder %v4117_v12, 0.0  ;;  %v4361_v34 = vmul.f32 0.2, %v4117_v12  ;;  %v3832_v46 = vpop.f32.mrb[52].mxu0  ;;  %v10514_v58 = vpack.i.bf16 %v5341_v16, %v5340_v8 }
 0x269   : > { %9218 = vmatprep.mubr.msk.bf16.mxu0 %vm355_vm0, %v7396_v33  ;;  %v3833_v62 = vadd.f32 %v13666_v30, %v3832_v46  ;;  %v3834_v59 = vpop.f32.mrb[53].mxu0  ;;  %v13799_v7 = vpop.f32.mrb[52].mxu1  ;;  %v13802_v33 = vld [vmem:[#allocation2 + $0x10a] sm:$0xff] }
 0x26a   : > { %v4732_v51 = vsel %vm498_vm2, 0.0, %v4564_v45  ;;  %10495 = vrot.lane.b32.xlu0 %v10494_v21, %s11518_s20  ;;  %v4425_v31 = vsel %vm4297_vm8, %v4117_v12, %v4361_v34  ;;  %v3835_v50 = vpop.f32.mrb[54].mxu0  ;;  %16300 = vst [vmem:[#allocation16_spill] sm:$0xff] %v13799_v7  ;;  %v13806_v63 = vpop.f32.mrb[53].mxu1  ;;  %v7405_v36 = vpack.c.bf16 %v13804_v29, %v13802_v33  ;;  %v5139_v7 = vld [vmem:[#allocation2 + $0x39] sm:$0xff] }
 0x26b   : > { %4820 = vst.msk [vmem:[#allocation2 + $0x138] sm:$0xff] %vm355_vm0, %v4732_v51  ;;  %v4565_v52 = vrot.slane %v4425_v31, 7  ;;  %10540 = vrot.lane.b32.xlu1 %v10494_v21, %s11520_s27  ;;  %v4122_v4 = vadd.f32 %v16298_v35, %v3833_v62  ;;  %v3836_v61 = vadd.f32 %v13666_v30, %v3835_v50  ;;  %v3837_v44 = vpop.f32.mrb[55].mxu0  ;;  %v16301_v51 = vld [vmem:[#allocation13_spill] sm:$0xff] }
 0x26c   : > { %v5279_v44 = vld [vmem:[#allocation2 + $0xe0] sm:$0xff] }
 0x26d   : > { %v4566_v39 = vsel %vm498_vm2, %v4564_v45, %v4565_v52  ;;  %v4764_v38 = vsel %vm498_vm2, %v4565_v52, 0.0  ;;  %vm4298_vm9 = vcmp.gt.f32.partialorder %v4122_v4, 0.0  ;;  %v4362_v5 = vmul.f32 0.2, %v4122_v4 }
 0x26e   : > { %4822 = vst.msk [vmem:[#allocation2 + $0x148] sm:$0x3] %vm358_vm1, %v4764_v38  ;;  %10505 = vrot.lane.b32.xlu0 %v10504_v56, %s11520_s27  ;;  %v4125_v32 = vadd.f32 %v16299_v11, %v3836_v61  ;;  %v13812_v24 = vld [vmem:[#allocation2 + $0x122] sm:$0xff]  ;;  %v13814_v62 = vld [vmem:[#allocation2 + $0x12a] sm:$0xff]  ;;  %v10524_v52 = vpack.i.bf16 %v13756_v9, %v13754_v49  ;;  %v13837_v11 = vpop.f32.mrb[54].mxu1 }
 0x26f   : > { %4821 = vst.msk [vmem:[#allocation2 + $0x140] sm:$0xff] %vm355_vm0, %v4566_v39  ;;  %v4426_v10 = vsel %vm4298_vm9, %v4122_v4, %v4362_v5  ;;  %10550 = vrot.lane.b32.xlu1 %v10504_v56, %s11521_s17  ;;  %v7408_v56 = vpack.c.bf16 %v13814_v62, %v13812_v24  ;;  %v16302_v49 = vld [vmem:[#allocation15_spill] sm:$0xff]  ;;  %v5278_v39 = vld [vmem:[#allocation2 + $0xd8] sm:$0xff]  ;;  %16303 = vst [vmem:[#allocation17_spill] sm:$0xff] %v13837_v11 }
 0x270   : > { %9219 = vmatmul.mubr.msk.bf16.gmra.mrb[140].mxu0 %vm355_vm0, %v7399_v55  ;;  %v4567_v26 = vrot.slane %v4426_v10, 7  ;;  %vm4299_vm10 = vcmp.gt.f32.partialorder %v4125_v32, 0.0  ;;  %v4363_v23 = vmul.f32 0.2, %v4125_v32  ;;  %v3840_v57 = vpop.f32.mrb[56].mxu0  ;;  %v10534_v8 = vpack.i.bf16 %v5279_v44, %v5278_v39  ;;  %v5343_v10 = vld [vmem:[#allocation2 + $0xe1] sm:$0xff]  ;;  %v13867_v39 = vpop.permute.xlu1 %10320 }
 0x271   : > { %9222 = vmatprep.mubr.msk.bf16.mxu0 %vm355_vm0, %v7402_v25  ;;  %v3841_v47 = vadd.f32 %v13666_v30, %v3840_v57  ;;  %v3842_v12 = vpop.f32.mrb[57].mxu0 }
 0x272   : > { %v4733_v45 = vsel %vm498_vm2, 0.0, %v4567_v26  ;;  %v4427_v21 = vsel %vm4299_vm10, %v4125_v32, %v4363_v23  ;;  %10515 = vrot.lane.b32.xlu0 %v10514_v58, %s11521_s17  ;;  %v3843_v34 = vpop.f32.mrb[58].mxu0  ;;  %v5342_v32 = vld [vmem:[#allocation2 + $0xd9] sm:$0xff] }
 0x273   : > { %4823 = vst.msk [vmem:[#allocation2 + $0x150] sm:$0xff] %vm355_vm0, %v4733_v45  ;;  %v4568_v46 = vrot.slane %v4427_v21, 7  ;;  %10560 = vrot.lane.b32.xlu1 %v10514_v58, %s11518_s20  ;;  %v3844_v59 = vadd.f32 %v13666_v30, %v3843_v34  ;;  %v4130_v31 = vadd.f32 %v16301_v51, %v3841_v47  ;;  %v3845_v50 = vpop.f32.mrb[59].mxu0  ;;  %v10544_v45 = vpack.i.bf16 %v5343_v10, %v5342_v32  ;;  %v5280_v32 = vld [vmem:[#allocation2 + $0xf0] sm:$0xff] }
 0x275   : > { %v4569_v35 = vsel %vm498_vm2, %v4567_v26, %v4568_v46  ;;  %v4765_v4 = vsel %vm498_vm2, %v4568_v46, 0.0  ;;  %vm4300_vm11 = vcmp.gt.f32.partialorder %v4130_v31, 0.0  ;;  %v4364_v61 = vmul.f32 0.2, %v4130_v31  ;;  %v13839_v26 = vpop.f32.mrb[55].mxu1 }
 0x276   : > { %4825 = vst.msk [vmem:[#allocation2 + $0x160] sm:$0x3] %vm358_vm1, %v4765_v4  ;;  %10525 = vrot.lane.b32.xlu0 %v10524_v52, %s11518_s20  ;;  %v4133_v9 = vadd.f32 %v16302_v49, %v3844_v59  ;;  %v13832_v38 = vld [vmem:[#allocation2 + $0x13a] sm:$0xff]  ;;  %v13835_v25 = vld [vmem:[#allocation2 + $0x142] sm:$0xff] }
 0x277   : > { %4824 = vst.msk [vmem:[#allocation2 + $0x158] sm:$0xff] %vm355_vm0, %v4569_v35  ;;  %v4428_v55 = vsel %vm4300_vm11, %v4130_v31, %v4364_v61  ;;  %10570 = vrot.lane.b32.xlu1 %v10524_v52, %s11520_s27  ;;  %v7411_v47 = vpack.c.bf16 %v13835_v25, %v13832_v38  ;;  %v16304_v52 = vld [vmem:[#allocation12_spill] sm:$0xff]  ;;  %v16305_v49 = vld [vmem:[#allocation14_spill] sm:$0xff] }
 0x278   : > { %9223 = vmatmul.mubr.msk.bf16.gmra.mrb[144].mxu0 %vm355_vm0, %v7405_v36  ;;  %v4570_v5 = vrot.slane %v4428_v55, 7  ;;  %vm4301_vm12 = vcmp.gt.f32.partialorder %v4133_v9, 0.0  ;;  %v4365_v16 = vmul.f32 0.2, %v4133_v9  ;;  %v5281_v55 = vld [vmem:[#allocation2 + $0xf8] sm:$0xff] }
 0x279   : > { %9226 = vmatprep.mubr.msk.bf16.mxu0 %vm355_vm0, %v7408_v56  ;;  %v10554_v56 = vpack.i.bf16 %v13774_v27, %v13772_v17 }
 0x27a   : > { %v4734_v23 = vsel %vm498_vm2, 0.0, %v4570_v5  ;;  %10535 = vrot.lane.b32.xlu0 %v10534_v8, %s11520_s27  ;;  %v4429_v58 = vsel %vm4301_vm12, %v4133_v9, %v4365_v16  ;;  %v3848_v12 = vpop.f32.mrb[60].mxu0 }
 0x27b   : > { %4826 = vst.msk [vmem:[#allocation2 + $0x168] sm:$0xff] %vm355_vm0, %v4734_v23  ;;  %v4571_v57 = vrot.slane %v4429_v58, 7  ;;  %10580 = vrot.lane.b32.xlu1 %v10534_v8, %s11521_s17  ;;  %v3849_v21 = vadd.f32 %v13666_v30, %v3848_v12  ;;  %v3850_v34 = vpop.f32.mrb[61].mxu0  ;;  %v10564_v23 = vpack.i.bf16 %v5281_v55, %v5280_v32  ;;  %v5344_v58 = vld [vmem:[#allocation2 + $0xf1] sm:$0xff]  ;;  %v10584_v32 = vpack.i.bf16 %v13783_v53, %v13781_v48  ;;  %v5282_v48 = vld [vmem:[#allocation2 + $0x108] sm:$0xff] }
 0x27c   : > { %v3851_v51 = vpop.f32.mrb[62].mxu0 }
 0x27d   : > { %v4572_v46 = vsel %vm498_vm2, %v4570_v5, %v4571_v57  ;;  %v4766_v59 = vsel %vm498_vm2, %v4571_v57, 0.0  ;;  %v4138_v36 = vadd.f32 %v16304_v52, %v3849_v21  ;;  %v3852_v35 = vadd.f32 %v13666_v30, %v3851_v51  ;;  %v3853_v4 = vpop.f32.mrb[63].mxu0 }
 0x27e   : > { %v13850_v31 = vld [vmem:[#allocation2 + $0x152] sm:$0xff]  ;;  %v13852_v50 = vld [vmem:[#allocation2 + $0x15a] sm:$0xff]  ;;  %4828 = vst.msk [vmem:[#allocation2 + $0x178] sm:$0x3] %vm358_vm1, %v4766_v59  ;;  %10545 = vrot.lane.b32.xlu0 %v10544_v45, %s11521_s17 }
 0x27f   : > { %4827 = vst.msk [vmem:[#allocation2 + $0x170] sm:$0xff] %vm355_vm0, %v4572_v46  ;;  %v7414_v61 = vpack.c.bf16 %v13852_v50, %v13850_v31  ;;  %10590 = vrot.lane.b32.xlu1 %v10544_v45, %s11518_s20  ;;  %vm4302_vm13 = vcmp.gt.f32.partialorder %v4138_v36, 0.0  ;;  %v4366_v44 = vmul.f32 0.2, %v4138_v36  ;;  %v4141_v9 = vadd.f32 %v16305_v49, %v3852_v35  ;;  %v13886_v35 = vpop.permute.xlu1 %10330 }
 0x280   : > { %9227 = vmatmul.mubr.msk.bf16.gmra.mrb[148].mxu0 %vm355_vm0, %v7411_v47  ;;  %v5345_v47 = vld [vmem:[#allocation2 + $0xf9] sm:$0xff]  ;;  %v13893_v49 = vpop.f32.mrb[56].mxu1 }
 0x281   : > { %9230 = vmatprep.mubr.msk.bf16.mxu0 %vm355_vm0, %v7414_v61  ;;  %v4430_v5 = vsel %vm4302_vm13, %v4138_v36, %v4366_v44  ;;  %vm4303_vm14 = vcmp.gt.f32.partialorder %v4141_v9, 0.0  ;;  %v4367_v8 = vmul.f32 0.2, %v4141_v9  ;;  %16306 = vst [vmem:[#allocation18_spill] sm:$0xff] %v13893_v49 }
 0x282   : > { %10555 = vrot.lane.b32.xlu0 %v10554_v56, %s11518_s20  ;;  %v4573_v16 = vrot.slane %v4430_v5, 7  ;;  %v13896_v5 = vpop.f32.mrb[57].mxu1 }
 0x283   : > { %10600 = vrot.lane.b32.xlu1 %v10554_v56, %s11520_s27  ;;  %v4431_v10 = vsel %vm4303_vm14, %v4141_v9, %v4367_v8  ;;  %v10574_v56 = vpack.i.bf16 %v5345_v47, %v5344_v58  ;;  %16307 = vst [vmem:[#allocation19_spill] sm:$0xff] %v13896_v5 }
 0x284   : > { %v3856_v17 = vpop.f32.mrb[64].mxu0  ;;  %v4735_v27 = vsel %vm498_vm2, 0.0, %v4573_v16  ;;  %v4574_v57 = vrot.slane %v4431_v10, 7  ;;  %v5422_v10 = vld [vmem:[#allocation2 + $0x19a] sm:$0xff] }
 0x285   : > { %v3857_v12 = vadd.f32 %v13666_v30, %v3856_v17  ;;  %v3858_v45 = vpop.f32.mrb[65].mxu0  ;;  %4829 = vst.msk [vmem:[#allocation2 + $0x180] sm:$0xff] %vm355_vm0, %v4735_v27  ;;  %v5283_v27 = vld [vmem:[#allocation2 + $0x110] sm:$0xff] }
 0x286   : > { %v13873_v21 = vld [vmem:[#allocation2 + $0x16a] sm:$0xff]  ;;  %v13875_v34 = vld [vmem:[#allocation2 + $0x172] sm:$0xff]  ;;  %10565 = vrot.lane.b32.xlu0 %v10564_v23, %s11520_s27  ;;  %v3859_v46 = vpop.f32.mrb[66].mxu0  ;;  %v4575_v52 = vsel %vm498_vm2, %v4573_v16, %v4574_v57  ;;  %v4767_v36 = vsel %vm498_vm2, %v4574_v57, 0.0  ;;  %v4880_v57 = vld [vmem:[#allocation2] sm:$0xff]  ;;  %v13907_v45 = vpop.f32.mrb[58].mxu1 }
 0x287   : > { %v7417_v59 = vpack.c.bf16 %v13875_v34, %v13873_v21  ;;  %10610 = vrot.lane.b32.xlu1 %v10564_v23, %s11521_s17  ;;  %v3860_v4 = vadd.f32 %v13666_v30, %v3859_v46  ;;  %v4146_v61 = vadd.f32 %v13328_v13, %v3857_v12  ;;  %v3861_v44 = vpop.f32.mrb[67].mxu0  ;;  %4831 = vst.msk [vmem:[#allocation2 + $0x190] sm:$0x3] %vm358_vm1, %v4767_v36  ;;  %v5423_v23 = vld [vmem:[#allocation2 + $0x1a2] sm:$0xff]  ;;  %16308 = vst [vmem:[#allocation20_spill] sm:$0xff] %v13907_v45 }
 0x288   : > { %4830 = vst.msk [vmem:[#allocation2 + $0x188] sm:$0xff] %vm355_vm0, %v4575_v52  ;;  %v10323_v46 = vunpack.i.h.bf16 %v13867_v39  ;;  %v7423_v36 = vpack.c.bf16 %v5423_v23, %v5422_v10  ;;  %v5346_v10 = vld [vmem:[#allocation2 + $0x109] sm:$0xff]  ;;  %v5347_v23 = vld [vmem:[#allocation2 + $0x111] sm:$0xff] }
 0x289   : > { %9231 = vmatmul.mubr.msk.bf16.gmra.mrb[152].mxu0 %vm355_vm0, %v7417_v59  ;;  %vm4304_vm15 = vcmp.gt.f32.partialorder %v4146_v61, 0.0  ;;  %v4368_v9 = vmul.f32 0.2, %v4146_v61  ;;  %v4149_v55 = vadd.f32 %v13340_v28, %v3860_v4  ;;  %v10322_v28 = vunpack.i.l.bf16 %v13867_v39  ;;  %v13916_v4 = vpop.f32.mrb[59].mxu1 }
 0x28a   : > { %10575 = vrot.lane.b32.xlu0 %v10574_v56, %s11521_s17  ;;  %16309 = vst [vmem:[#allocation21_spill] sm:$0xff] %v13916_v4  ;;  %v5138_v4 = vld [vmem:[#allocation2 + $0x31] sm:$0xff] }
 0x28b   : > { %v4432_v8 = vsel %vm4304_vm15, %v4146_v61, %v4368_v9  ;;  %10620 = vrot.lane.b32.xlu1 %v10574_v56, %s11518_s20  ;;  %vm4305_vm5 = vcmp.gt.f32.partialorder %v4149_v55, 0.0  ;;  %v4369_v13 = vmul.f32 0.2, %v4149_v55  ;;  %v10316_v56 = vpop.permute.xlu0 %10315  ;;  %v10594_v9 = vpack.i.bf16 %v5283_v27, %v5282_v48 }
 0x28c   : > { %v4576_v16 = vrot.slane %v4432_v8, 7  ;;  %v4881_v8 = vld [vmem:[#allocation2 + $0x8] sm:$0xff]  ;;  %v6992_v27 = vsel %vm355_vm0, %v4880_v57, %v10322_v28  ;;  %v10333_v48 = vunpack.i.h.bf16 %v13886_v35  ;;  %v10604_v57 = vpack.i.bf16 %v5347_v23, %v5346_v10 }
 0x28d   : > { %v4433_v58 = vsel %vm4305_vm5, %v4149_v55, %v4369_v13  ;;  %v13902_v17 = vpop.permute.xlu1 %10340  ;;  %v10332_v13 = vunpack.i.l.bf16 %v13886_v35  ;;  %v5137_v10 = vld [vmem:[#allocation2 + $0x21] sm:$0xff] }
 0x28e   : > { %v4736_v47 = vsel %vm498_vm2, 0.0, %v4576_v16  ;;  %10585 = vrot.lane.b32.xlu0 %v10584_v32, %s11518_s20  ;;  %v4577_v12 = vrot.slane %v4433_v58, 7  ;;  %v3864_v53 = vpop.f32.mrb[68].mxu0 }
 0x28f   : > { %4832 = vst.msk [vmem:[#allocation2 + $0x1c8] sm:$0xff] %vm355_vm0, %v4736_v47  ;;  %10630 = vrot.lane.b32.xlu1 %v10584_v32, %s11520_s27  ;;  %v13912_v59 = vld [vmem:[#allocation2 + $0x182] sm:$0xff]  ;;  %v13914_v52 = vld [vmem:[#allocation2 + $0x18a] sm:$0xff]  ;;  %v3865_v39 = vadd.f32 %v13666_v30, %v3864_v53  ;;  %v3866_v55 = vpop.f32.mrb[69].mxu0 }
 0x290   : > { %v4578_v61 = vsel %vm498_vm2, %v4576_v16, %v4577_v12  ;;  %v4768_v44 = vsel %vm498_vm2, %v4577_v12, 0.0  ;;  %v3867_v58 = vpop.f32.mrb[70].mxu0  ;;  %v7420_v16 = vpack.c.bf16 %v13914_v52, %v13912_v59 }
 0x291   : > { %4834 = vst.msk [vmem:[#allocation2 + $0x1d8] sm:$0x3] %vm358_vm1, %v4768_v44  ;;  %v13924_v32 = vpop.permute.xlu1 %10350  ;;  %v4154_v47 = vadd.f32 %v13322_v54, %v3865_v39  ;;  %v3869_v12 = vpop.f32.mrb[71].mxu0  ;;  %v3868_v53 = vadd.f32 %v13666_v30, %v3867_v58  ;;  %v6993_v44 = vsel %vm355_vm0, %v4881_v8, %v10323_v46  ;;  %v7056_v54 = vsel %vm3029_vm3, %v6992_v27, %v10332_v13  ;;  %v5285_v58 = vld [vmem:[#allocation2 + $0x128] sm:$0xff] }
 0x292   : > { %4833 = vst.msk [vmem:[#allocation2 + $0x1d0] sm:$0xff] %vm355_vm0, %v4578_v61  ;;  %10595 = vrot.lane.b32.xlu0 %v10594_v9, %s11520_s27  ;;  %9234 = vmatprep.mubr.msk.bf16.mxu0 %vm355_vm0, %v7420_v16  ;;  %v10318_v39 = vunpack.i.h.bf16 %v10316_v56  ;;  %v10317_v16 = vunpack.i.l.bf16 %v10316_v56  ;;  %v10343_v12 = vunpack.i.h.bf16 %v13902_v17  ;;  %v10342_v61 = vunpack.i.l.bf16 %v13902_v17  ;;  %v5136_v17 = vld [vmem:[#allocation2 + $0x19] sm:$0xff] }
 0x293   : > { %10640 = vrot.lane.b32.xlu1 %v10594_v9, %s11521_s17  ;;  %vm4306_vm6 = vcmp.gt.f32.partialorder %v4154_v47, 0.0  ;;  %v4370_v28 = vmul.f32 0.2, %v4154_v47  ;;  %9235 = vmatmul.mubr.msk.bf16.gmra.mrb[156].mxu0 %vm355_vm0, %v7423_v36  ;;  %v4157_v35 = vadd.f32 %v13336_v41, %v3868_v53  ;;  %v7057_v8 = vsel %vm3029_vm3, %v6993_v44, %v10333_v48  ;;  %v5284_v41 = vld [vmem:[#allocation2 + $0x120] sm:$0xff] }
 0x294   : > { %v10614_v56 = vpack.i.bf16 %v13804_v29, %v13802_v33  ;;  %v10624_v53 = vpack.i.bf16 %v5285_v58, %v5284_v41  ;;  %v7184_v45 = vsel %vm355_vm0, %v5136_v17, %v10317_v16  ;;  %v7120_v49 = vsel %vm3094_vm4, %v7056_v54, %v10342_v61  ;;  %v13960_v58 = vld [vmem:[#allocation2 + $0x1b1] sm:$0xff]  ;;  %v13969_v54 = vld [vmem:[#allocation2 + $0x1a0] sm:$0xff] }
 0x295   : > { %v10326_v9 = vpop.permute.xlu0 %10325  ;;  %v13941_v55 = vpop.permute.xlu1 %10360  ;;  %v4434_v46 = vsel %vm4306_vm6, %v4154_v47, %v4370_v28  ;;  %vm4307_vm7 = vcmp.gt.f32.partialorder %v4157_v35, 0.0  ;;  %v4371_v13 = vmul.f32 0.2, %v4157_v35  ;;  %v7185_v47 = vsel %vm355_vm0, %v5137_v10, %v10318_v39  ;;  %v13967_v61 = vld [vmem:[#allocation2 + $0x198] sm:$0xff] }
 0x296   : > { %10605 = vrot.lane.b32.xlu0 %v10604_v57, %s11521_s17  ;;  %v4579_v36 = vrot.slane %v4434_v46, 7  ;;  %v10328_v23 = vunpack.i.h.bf16 %v10326_v9  ;;  %v10327_v27 = vunpack.i.l.bf16 %v10326_v9  ;;  %v7121_v9 = vsel %vm3094_vm4, %v7057_v8, %v10343_v12  ;;  %v13965_v8 = vld [vmem:[#allocation2 + $0x1b9] sm:$0xff] }
 0x297   : > { %10650 = vrot.lane.b32.xlu1 %v10604_v57, %s11518_s20  ;;  %v4435_v48 = vsel %vm4307_vm7, %v4157_v35, %v4371_v13 }
 0x298   : > { %v3872_v51 = vpop.f32.mrb[72].mxu0  ;;  %v4737_v28 = vsel %vm498_vm2, 0.0, %v4579_v36  ;;  %v4580_v33 = vrot.slane %v4435_v48, 7  ;;  %v7248_v17 = vsel %vm3029_vm3, %v7184_v45, %v10327_v27  ;;  %v13977_v48 = vld [vmem:[#allocation2 + $0x1ba] sm:$0xff] }
 0x299   : > { %v13952_v44 = vpop.permute.xlu1 %10370  ;;  %v3873_v46 = vadd.f32 %v13666_v30, %v3872_v51  ;;  %v3874_v57 = vpop.f32.mrb[73].mxu0  ;;  %4835 = vst.msk [vmem:[#allocation2 + $0x1e0] sm:$0xff] %vm355_vm0, %v4737_v28  ;;  %v7249_v28 = vsel %vm3029_vm3, %v7185_v47, %v10328_v23 }
 0x29a   : > { %10615 = vrot.lane.b32.xlu0 %v10614_v56, %s11518_s20  ;;  %v10336_v29 = vpop.permute.xlu0 %10335  ;;  %v3875_v39 = vpop.f32.mrb[74].mxu0  ;;  %v4581_v41 = vsel %vm498_vm2, %v4579_v36, %v4580_v33  ;;  %v4769_v10 = vsel %vm498_vm2, %v4580_v33, 0.0  ;;  %v5348_v57 = vld [vmem:[#allocation2 + $0x121] sm:$0xff]  ;;  %v5349_v36 = vld [vmem:[#allocation2 + $0x129] sm:$0xff] }
 0x29b   : > { %v10338_v35 = vunpack.i.h.bf16 %v10336_v29  ;;  %v10337_v13 = vunpack.i.l.bf16 %v10336_v29  ;;  %10660 = vrot.lane.b32.xlu1 %v10614_v56, %s11520_s27  ;;  %v3876_v51 = vadd.f32 %v13666_v30, %v3875_v39  ;;  %v4162_v16 = vadd.f32 %v13426_v22, %v3873_v46  ;;  %v3877_v12 = vpop.f32.mrb[75].mxu0  ;;  %v13975_v56 = vld [vmem:[#allocation2 + $0x1b2] sm:$0xff]  ;;  %4837 = vst.msk [vmem:[#allocation2 + $0x1f0] sm:$0x3] %vm358_vm1, %v4769_v10  ;;  %v13985_v27 = vpop.f32.mrb[60].mxu1 }
 0x29c   : > { %4836 = vst.msk [vmem:[#allocation2 + $0x1e8] sm:$0xff] %vm355_vm0, %v4581_v41  ;;  %16310 = vst [vmem:[#allocation22_spill] sm:$0xff] %v13985_v27  ;;  %v13995_v41 = vpop.f32.mrb[61].mxu1  ;;  %v10352_v10 = vunpack.i.l.bf16 %v13924_v32 }
 0x29d   : > { %v13981_v22 = vpop.permute.xlu1 %10380  ;;  %vm4308_vm8 = vcmp.gt.f32.partialorder %v4162_v16, 0.0  ;;  %v4372_v46 = vmul.f32 0.2, %v4162_v16  ;;  %v7312_v33 = vsel %vm3094_vm4, %v7248_v17, %v10337_v13  ;;  %v7313_v45 = vsel %vm3094_vm4, %v7249_v28, %v10338_v35  ;;  %16311 = vst [vmem:[#allocation23_spill] sm:$0xff] %v13995_v41  ;;  %v5287_v28 = vld [vmem:[#allocation2 + $0x140] sm:$0xff] }
 0x29e   : > { %10625 = vrot.lane.b32.xlu0 %v10624_v53, %s11520_s27  ;;  %v13988_v23 = vpop.permute.xlu0 %10345  ;;  %v7377_v47 = vpack.c.bf16 %v7313_v45, %v7312_v33  ;;  %v4165_v29 = vadd.f32 %v13465_v1, %v3876_v51  ;;  %v7376_v13 = vpack.c.bf16 %v7121_v9, %v7120_v49  ;;  %v10353_v35 = vunpack.i.h.bf16 %v13924_v32 }
 0x29f   : > { %v4436_v17 = vsel %vm4308_vm8, %v4162_v16, %v4372_v46  ;;  %10670 = vrot.lane.b32.xlu1 %v10624_v53, %s11521_s17  ;;  %v10634_v1 = vpack.i.bf16 %v5349_v36, %v5348_v57  ;;  %v10363_v45 = vunpack.i.h.bf16 %v13941_v55  ;;  %v10362_v49 = vunpack.i.l.bf16 %v13941_v55  ;;  %v5286_v53 = vld [vmem:[#allocation2 + $0x138] sm:$0xff]  ;;  %v4883_v46 = vld [vmem:[#allocation2 + $0x20] sm:$0xff] }
 0x2a0   : > { %v4582_v33 = vrot.slane %v4436_v17, 7  ;;  %7751 = vmatprep.mubr.bf16.mxu1 %v7377_v47  ;;  %vm4309_vm9 = vcmp.gt.f32.partialorder %v4165_v29, 0.0  ;;  %v4373_v9 = vmul.f32 0.2, %v4165_v29  ;;  %v10644_v32 = vpack.i.bf16 %v13814_v62, %v13812_v24  ;;  %v4882_v16 = vld [vmem:[#allocation2 + $0x18] sm:$0xff]  ;;  %v11347_v55 = vld [vmem:[%s16177_s3 + $0x80] sm:$0xff]  }
 0x2a1   : > { %7752 = vmatmul.mubr.bf16.vlgmr.msra.gmra.mrb[64].mxu1 %v7376_v13  ;;  %v14005_v12 = vpop.permute.xlu1 %10390  ;;  %v10373_v57 = vunpack.i.h.bf16 %v13952_v44  ;;  %v10372_v36 = vunpack.i.l.bf16 %v13952_v44  ;;  %v14013_v17 = vpack.i.bf16 %v5287_v28, %v5286_v53  ;;  %v6994_v24 = vsel %vm355_vm0, %v4882_v16, %v10352_v10  ;;  %v11348_v53 = vld [vmem:[%s16177_s3 + $0x88] sm:$0xff]  }
 0x2a2   : > { %v4738_v47 = vsel %vm498_vm2, 0.0, %v4582_v33  ;;  %10635 = vrot.lane.b32.xlu0 %v10634_v1, %s11521_s17  ;;  %9294 = vmatpush3.bf16.msra.mxu1 %v11347_v55  ;;  %v6995_v62 = vsel %vm355_vm0, %v4883_v46, %v10353_v35  ;;  %v10347_v13 = vunpack.i.l.bf16 %v13988_v23  ;;  %v4437_v44 = vsel %vm4309_vm9, %v4165_v29, %v4373_v9  ;;  %v3880_v28 = vpop.f32.mrb[76].mxu0  ;;  %v14033_v29 = vpop.f32.mrb[62].mxu1 }
 0x2a3   : > { %4838 = vst.msk [vmem:[#allocation2 + $0x1f8] sm:$0xff] %vm355_vm0, %v4738_v47  ;;  %10680 = vrot.lane.b32.xlu1 %v10634_v1, %s11518_s20  ;;  %9293 = vmatprep.subr.bf16.mxu1 %v11348_v53  ;;  %v10348_v55 = vunpack.i.h.bf16 %v13988_v23  ;;  %v4583_v10 = vrot.slane %v4437_v44, 7  ;;  %v3881_v35 = vadd.f32 %v13666_v30, %v3880_v28  ;;  %v3882_v46 = vpop.f32.mrb[77].mxu0  ;;  %v14029_v39 = vld [vmem:[#allocation2 + $0x1e2] sm:$0xff]  ;;  %v14031_v47 = vld [vmem:[#allocation2 + $0x1ea] sm:$0xff]  ;;  %16312 = vst [vmem:[#allocation24_spill] sm:$0xff] %v14033_v29 }
 0x2a4   : > { %v10356_v51 = vpop.permute.xlu0 %10355  ;;  %v3883_v27 = vpop.f32.mrb[78].mxu0  ;;  %v7426_v41 = vpack.c.bf16 %v14031_v47, %v14029_v39  ;;  %v7058_v23 = vsel %vm3029_vm3, %v6994_v24, %v10362_v49  ;;  %v7059_v44 = vsel %vm3029_vm3, %v6995_v62, %v10363_v45  ;;  %v7186_v49 = vsel %vm355_vm0, %v5138_v4, %v10347_v13 }
 0x2a5   : > { %v10357_v16 = vunpack.i.l.bf16 %v10356_v51  ;;  %v10358_v1 = vunpack.i.h.bf16 %v10356_v51  ;;  %v14035_v9 = vpop.permute.xlu1 %10400  ;;  %v4584_v28 = vsel %vm498_vm2, %v4582_v33, %v4583_v10  ;;  %v4770_v46 = vsel %vm498_vm2, %v4583_v10, 0.0  ;;  %v3885_v5 = vpop.f32.mrb[79].mxu0 }
 0x2a6   : > { %10645 = vrot.lane.b32.xlu0 %v10644_v32, %s11518_s20  ;;  %v7122_v51 = vsel %vm3094_vm4, %v7058_v23, %v10372_v36  ;;  %v7123_v29 = vsel %vm3094_vm4, %v7059_v44, %v10373_v57  ;;  %v14046_v11 = vpop.f32.mrb[63].mxu1  ;;  %9295 = vmatpush3.bf16.msra.mxu1 %v11348_v53  ;;  %v10382_v45 = vunpack.i.l.bf16 %v13981_v22  ;;  %4840 = vst.msk [vmem:[#allocation2 + $0x208] sm:$0x3] %vm358_vm1, %v4770_v46  ;;  %v5350_v57 = vld [vmem:[#allocation2 + $0x139] sm:$0xff]  ;;  %v5351_v36 = vld [vmem:[#allocation2 + $0x141] sm:$0xff]  ;;  %v5288_v46 = vld [vmem:[#allocation2 + $0x150] sm:$0xff] }
 0x2a7   : > { %4839 = vst.msk [vmem:[#allocation2 + $0x200] sm:$0xff] %vm355_vm0, %v4584_v28  ;;  %v4170_v24 = vadd.f32 %v13408_v19, %v3881_v35  ;;  %10690 = vrot.lane.b32.xlu1 %v10644_v32, %s11520_s27  ;;  %v3884_v5 = vadd.f32 %v13666_v30, %v3883_v27  ;;  %9238 = vmatprep.mubr.msk.bf16.mxu0 %vm355_vm0, %v7426_v41  ;;  %v5289_v32 = vld [vmem:[#allocation2 + $0x158] sm:$0xff] }
 0x2a8   : > { %v10366_v33 = vpop.permute.xlu0 %10365  ;;  %v7187_v62 = vsel %vm355_vm0, %v5139_v7, %v10348_v55  ;;  %v7250_v53 = vsel %vm3029_vm3, %v7186_v49, %v10357_v16  ;;  %v5352_v30 = vld [vmem:[#allocation2 + $0x151] sm:$0xff]  ;;  %v5353_v27 = vld [vmem:[#allocation2 + $0x159] sm:$0xff]  ;;  %v10664_v41 = vpack.i.bf16 %v5351_v36, %v5350_v57  ;;  %v10674_v16 = vpack.i.bf16 %v13835_v25, %v13832_v38 }
 0x2a9   : > { %v10368_v4 = vunpack.i.h.bf16 %v10366_v33  ;;  %v10367_v13 = vunpack.i.l.bf16 %v10366_v33  ;;  %vm4310_vm10 = vcmp.gt.f32.partialorder %v4170_v24, 0.0  ;;  %v4374_v10 = vmul.f32 0.2, %v4170_v24  ;;  %v14059_v44 = vpop.permute.xlu1 %10410  ;;  %v4884_v49 = vld [vmem:[#allocation2 + $0x30] sm:$0xff] }
 0x2aa   : > { %v4173_v23 = vadd.f32 %v13455_v0, %v3884_v5  ;;  %v7251_v19 = vsel %vm3029_vm3, %v7187_v62, %v10358_v1  ;;  %10655 = vrot.lane.b32.xlu0 %v14013_v17, %s11520_s27  ;;  %v7379_v5 = vpack.c.bf16 %v7123_v29, %v7122_v51  ;;  %v14072_v36 = vpack.i.bf16 %v5289_v32, %v5288_v46 }
 0x2ab   : > { %v7314_v7 = vsel %vm3094_vm4, %v7250_v53, %v10367_v13  ;;  %v7315_v55 = vsel %vm3094_vm4, %v7251_v19, %v10368_v4  ;;  %v4438_v35 = vsel %vm4310_vm10, %v4170_v24, %v4374_v10  ;;  %10700 = vrot.lane.b32.xlu1 %v14013_v17, %s11521_s17  ;;  %v14074_v62 = vpack.i.bf16 %v5353_v27, %v5352_v30  ;;  %v14083_v17 = vld [vmem:[%s16176_s2] ss:$0 sm:$0xff] }
 0x2ac   : > { %vm4311_vm11 = vcmp.gt.f32.partialorder %v4173_v23, 0.0  ;;  %v4375_v0 = vmul.f32 0.2, %v4173_v23  ;;  %v14068_v28 = vpop.permute.xlu0 %10375  ;;  %v7380_v1 = vpack.c.bf16 %v7315_v55, %v7314_v7  ;;  %v4585_v33 = vrot.slane %v4438_v35, 7  ;;  %v3888_v57 = vpop.f32.mrb[80].mxu0 }
 0x2ad   : > { %v10383_v38 = vunpack.i.h.bf16 %v13981_v22  ;;  %v6996_v25 = vsel %vm355_vm0, %v4884_v49, %v10382_v45  ;;  %v14078_v4 = vpop.permute.xlu1 %10420  ;;  %v3889_v29 = vadd.f32 %v14083_v17, %v3888_v57  ;;  %v3890_v51 = vpop.f32.mrb[81].mxu0  ;;  %v10393_v13 = vunpack.i.h.bf16 %v14005_v12  ;;  %v4885_v49 = vld [vmem:[#allocation2 + $0x38] sm:$0xff] }
 0x2ae   : > { %v4439_v24 = vsel %vm4311_vm11, %v4173_v23, %v4375_v0  ;;  %7759 = vmatprep.mubr.bf16.mxu1 %v7380_v1  ;;  %v10392_v53 = vunpack.i.l.bf16 %v14005_v12  ;;  %v4739_v22 = vsel %vm498_vm2, 0.0, %v4585_v33  ;;  %10665 = vrot.lane.b32.xlu0 %v10664_v41, %s11521_s17  ;;  %v3891_v45 = vpop.f32.mrb[82].mxu0  ;;  %v5426_v23 = vld [vmem:[#allocation2 + $0x1fa] sm:$0xff]  ;;  %v5427_v19 = vld [vmem:[#allocation2 + $0x202] sm:$0xff]  ;;  %v10403_v32 = vunpack.i.h.bf16 %v14035_v9 }
 0x2af   : > { %v4586_v10 = vrot.slane %v4439_v24, 7  ;;  %7760 = vmatmul.mubr.bf16.gmra.mrb[68].mxu1 %v7379_v5  ;;  %v10402_v30 = vunpack.i.l.bf16 %v14035_v9  ;;  %4841 = vst.msk [vmem:[#allocation2 + $0x210] sm:$0xff] %vm355_vm0, %v4739_v22  ;;  %10710 = vrot.lane.b32.xlu1 %v10664_v41, %s11518_s20  ;;  %v3892_v12 = vadd.f32 %v14083_v17, %v3891_v45  ;;  %v4178_v7 = vadd.f32 %v13554_v60, %v3889_v29  ;;  %v3893_v55 = vpop.f32.mrb[83].mxu0  ;;  %v5140_v45 = vld [vmem:[#allocation2 + $0x49] sm:$0xff] }
 0x2b0   : > { %v10386_v27 = vpop.permute.xlu0 %10385  ;;  %v10378_v1 = vunpack.i.h.bf16 %v14068_v28  ;;  %v10377_v46 = vunpack.i.l.bf16 %v14068_v28  ;;  %v7429_v5 = vpack.c.bf16 %v5427_v19, %v5426_v23  ;;  %v7060_v28 = vsel %vm3029_vm3, %v6996_v25, %v10392_v53 }
 0x2b1   : > { %v4587_v35 = vsel %vm498_vm2, %v4585_v33, %v4586_v10  ;;  %v4771_v0 = vsel %vm498_vm2, %v4586_v10, 0.0  ;;  %v14102_v9 = vpop.permute.xlu1 %10430  ;;  %vm4312_vm12 = vcmp.gt.f32.partialorder %v4178_v7, 0.0  ;;  %v4376_v41 = vmul.f32 0.2, %v4178_v7 }
 0x2b2   : > { %4843 = vst.msk [vmem:[#allocation2 + $0x220] sm:$0x3] %vm358_vm1, %v4771_v0  ;;  %v4181_v60 = vadd.f32 %v13584_v6, %v3892_v12  ;;  %v6997_v33 = vsel %vm355_vm0, %v4885_v49, %v10383_v38  ;;  %v10388_v57 = vunpack.i.h.bf16 %v10386_v27  ;;  %v10387_v24 = vunpack.i.l.bf16 %v10386_v27  ;;  %10675 = vrot.lane.b32.xlu0 %v10674_v16, %s11518_s20  ;;  %9239 = vmatmul.mubr.msk.bf16.gmra.mrb[160].mxu0 %vm355_vm0, %v7429_v5  ;;  %v5141_v6 = vld [vmem:[#allocation2 + $0x51] sm:$0xff] }
 0x2b3   : > { %4842 = vst.msk [vmem:[#allocation2 + $0x218] sm:$0xff] %vm355_vm0, %v4587_v35  ;;  %v4440_v51 = vsel %vm4312_vm12, %v4178_v7, %v4376_v41  ;;  %10720 = vrot.lane.b32.xlu1 %v10674_v16, %s11520_s27  ;;  %v7061_v10 = vsel %vm3029_vm3, %v6997_v33, %v10393_v13  ;;  %v7124_v27 = vsel %vm3094_vm4, %v7060_v28, %v10402_v30  ;;  %v10413_v30 = vunpack.i.h.bf16 %v14059_v44  ;;  %v5291_v49 = vld [vmem:[#allocation2 + $0x170] sm:$0xff] }
 0x2b4   : > { %v10396_v29 = vpop.permute.xlu0 %10395  ;;  %vm4313_vm13 = vcmp.gt.f32.partialorder %v4181_v60, 0.0  ;;  %v4377_v22 = vmul.f32 0.2, %v4181_v60  ;;  %v4588_v19 = vrot.slane %v4440_v51, 7  ;;  %v7189_v12 = vsel %vm355_vm0, %v5141_v6, %v10378_v1 }
 0x2b5   : > { %v10398_v23 = vunpack.i.h.bf16 %v10396_v29  ;;  %v10397_v38 = vunpack.i.l.bf16 %v10396_v29  ;;  %v7188_v25 = vsel %vm355_vm0, %v5140_v45, %v10377_v46  ;;  %v14114_v7 = vpop.permute.xlu1 %10440  ;;  %v7125_v16 = vsel %vm3094_vm4, %v7061_v10, %v10403_v32 }
 0x2b6   : > { %v4441_v53 = vsel %vm4313_vm13, %v4181_v60, %v4377_v22  ;;  %v4740_v55 = vsel %vm498_vm2, 0.0, %v4588_v19  ;;  %10685 = vrot.lane.b32.xlu0 %v14072_v36, %s11520_s27  ;;  %v7252_v35 = vsel %vm3029_vm3, %v7188_v25, %v10387_v24  ;;  %v7253_v0 = vsel %vm3029_vm3, %v7189_v12, %v10388_v57  ;;  %v3896_v46 = vpop.f32.mrb[84].mxu0  ;;  %v4886_v25 = vld [vmem:[#allocation2 + $0x48] sm:$0xff] }
 0x2b7   : > { %v4589_v13 = vrot.slane %v4441_v53, 7  ;;  %4844 = vst.msk [vmem:[#allocation2 + $0x228] sm:$0xff] %vm355_vm0, %v4740_v55  ;;  %10730 = vrot.lane.b32.xlu1 %v14072_v36, %s11521_s17  ;;  %v7316_v1 = vsel %vm3094_vm4, %v7252_v35, %v10397_v38  ;;  %v7317_v32 = vsel %vm3094_vm4, %v7253_v0, %v10398_v23  ;;  %v10824_v41 = vpack.i.bf16 %v14031_v47, %v14029_v39  ;;  %v3898_v36 = vpop.f32.mrb[85].mxu0  ;;  %v5290_v23 = vld [vmem:[#allocation2 + $0x168] sm:$0xff]  ;;  %v4887_v38 = vld [vmem:[#allocation2 + $0x50] sm:$0xff] }
 0x2b8   : > { %v10412_v5 = vunpack.i.l.bf16 %v14059_v44  ;;  %v10406_v57 = vpop.permute.xlu0 %10405  ;;  %v10704_v24 = vpack.i.bf16 %v13852_v50, %v13850_v31  ;;  %v10423_v51 = vunpack.i.h.bf16 %v14078_v4  ;;  %v10422_v22 = vunpack.i.l.bf16 %v14078_v4  ;;  %v3899_v6 = vpop.f32.mrb[86].mxu0  ;;  %v5150_v47 = vld [vmem:[#allocation2 + $0xc1] sm:$0xff] }
 0x2b9   : > { %v4590_v60 = vsel %vm498_vm2, %v4588_v19, %v4589_v13  ;;  %v4772_v33 = vsel %vm498_vm2, %v4589_v13, 0.0  ;;  %v7383_v44 = vpack.c.bf16 %v7317_v32, %v7316_v1  ;;  %v14139_v10 = vpop.permute.xlu1 %10450  ;;  %v3897_v45 = vadd.f32 %v14083_v17, %v3896_v46  ;;  %v3901_v19 = vpop.f32.mrb[87].mxu0  ;;  %v5355_v46 = vld [vmem:[#allocation2 + $0x171] sm:$0xff] }
 0x2ba   : > { %v5428_v28 = vld [vmem:[#allocation2 + $0x212] sm:$0xff]  ;;  %v5429_v29 = vld [vmem:[#allocation2 + $0x21a] sm:$0xff]  ;;  %4846 = vst.msk [vmem:[#allocation2 + $0x238] sm:$0x3] %vm358_vm1, %v4772_v33  ;;  %10695 = vrot.lane.b32.xlu0 %v14074_v62, %s11521_s17  ;;  %v7382_v31 = vpack.c.bf16 %v7125_v16, %v7124_v27  ;;  %v3900_v50 = vadd.f32 %v14083_v17, %v3899_v6  ;;  %v10714_v12 = vpack.i.bf16 %v5291_v49, %v5290_v23  ;;  %v10433_v55 = vunpack.i.h.bf16 %v14102_v9 }
 0x2bb   : > { %4845 = vst.msk [vmem:[#allocation2 + $0x230] sm:$0xff] %vm355_vm0, %v4590_v60  ;;  %v7432_v4 = vpack.c.bf16 %v5429_v29, %v5428_v28  ;;  %v6999_v53 = vsel %vm355_vm0, %v4887_v38, %v10413_v30  ;;  %v10432_v13 = vunpack.i.l.bf16 %v14102_v9  ;;  %7767 = vmatprep.mubr.bf16.mxu1 %v7383_v44  ;;  %v4186_v35 = vadd.f32 %v13550_v42, %v3897_v45  ;;  %v5354_v30 = vld [vmem:[#allocation2 + $0x169] sm:$0xff] }
 0x2bc   : > { %10740 = vrot.lane.b32.xlu1 %v14074_v62, %s11518_s20  ;;  %v6998_v27 = vsel %vm355_vm0, %v4886_v25, %v10412_v5  ;;  %v10408_v16 = vunpack.i.h.bf16 %v10406_v57  ;;  %v10407_v0 = vunpack.i.l.bf16 %v10406_v57  ;;  %7768 = vmatmul.mubr.bf16.gmra.mrb[72].mxu1 %v7382_v31  ;;  %v10416_v1 = vpop.permute.xlu0 %10415  ;;  %v4189_v32 = vadd.f32 %v13575_v18, %v3900_v50  ;;  %v5142_v57 = vld [vmem:[#allocation2 + $0x61] sm:$0xff]  ;;  %v5143_v18 = vld [vmem:[#allocation2 + $0x69] sm:$0xff] }
 0x2bd   : > { %9242 = vmatprep.mubr.msk.bf16.mxu0 %vm355_vm0, %v7432_v4  ;;  %vm4314_vm14 = vcmp.gt.f32.partialorder %v4186_v35, 0.0  ;;  %v4378_v9 = vmul.f32 0.2, %v4186_v35  ;;  %v14154_v49 = vpop.permute.xlu1 %10460  ;;  %v7062_v42 = vsel %vm3029_vm3, %v6998_v27, %v10422_v22  ;;  %v7063_v62 = vsel %vm3029_vm3, %v6999_v53, %v10423_v51 }
 0x2be   : > { %v10418_v60 = vunpack.i.h.bf16 %v10416_v1  ;;  %v10417_v5 = vunpack.i.l.bf16 %v10416_v1  ;;  %10705 = vrot.lane.b32.xlu0 %v10704_v24, %s11518_s20  ;;  %vm4315_vm15 = vcmp.gt.f32.partialorder %v4189_v32, 0.0  ;;  %v4379_v33 = vmul.f32 0.2, %v4189_v32 }
 0x2bf   : > { %v4442_v36 = vsel %vm4314_vm14, %v4186_v35, %v4378_v9  ;;  %v10724_v28 = vpack.i.bf16 %v5355_v46, %v5354_v30  ;;  %v7126_v29 = vsel %vm3094_vm4, %v7062_v42, %v10432_v13  ;;  %v7127_v44 = vsel %vm3094_vm4, %v7063_v62, %v10433_v55  ;;  %v5293_v42 = vld [vmem:[#allocation2 + $0x188] sm:$0xff] }
 0x2c0   : > { %10750 = vrot.lane.b32.xlu1 %v10704_v24, %s11520_s27  ;;  %v7191_v22 = vsel %vm355_vm0, %v5143_v18, %v10408_v16  ;;  %v7190_v51 = vsel %vm355_vm0, %v5142_v57, %v10407_v0  ;;  %v4591_v45 = vrot.slane %v4442_v36, 7  ;;  %v4443_v6 = vsel %vm4315_vm15, %v4189_v32, %v4379_v33  ;;  %v10426_v23 = vpop.permute.xlu0 %10425  ;;  %v3904_v38 = vpop.f32.mrb[88].mxu0  ;;  %v5038_v62 = vld [vmem:[#allocation2 + $0x16a] sm:$0xff] }
 0x2c1   : > { %v4592_v19 = vrot.slane %v4443_v6, 7  ;;  %v10428_v4 = vunpack.i.h.bf16 %v10426_v23  ;;  %v10427_v25 = vunpack.i.l.bf16 %v10426_v23  ;;  %v14164_v53 = vpop.permute.xlu1 %10470  ;;  %v3905_v24 = vadd.f32 %v14083_v17, %v3904_v38  ;;  %v3906_v13 = vpop.f32.mrb[89].mxu0 }
 0x2c2   : > { %v5430_v31 = vld [vmem:[#allocation2 + $0x22a] sm:$0xff]  ;;  %v5431_v50 = vld [vmem:[#allocation2 + $0x232] sm:$0xff]  ;;  %v4741_v55 = vsel %vm498_vm2, 0.0, %v4591_v45  ;;  %10715 = vrot.lane.b32.xlu0 %v10714_v12, %s11520_s27  ;;  %v7254_v35 = vsel %vm3029_vm3, %v7190_v51, %v10417_v5  ;;  %v7255_v27 = vsel %vm3029_vm3, %v7191_v22, %v10418_v60  ;;  %v3907_v16 = vpop.f32.mrb[90].mxu0  ;;  %v10443_v60 = vunpack.i.h.bf16 %v14114_v7 }
 0x2c3   : > { %v7435_v0 = vpack.c.bf16 %v5431_v50, %v5430_v31  ;;  %4847 = vst.msk [vmem:[#allocation2 + $0x240] sm:$0xff] %vm355_vm0, %v4741_v55  ;;  %v4593_v1 = vsel %vm498_vm2, %v4591_v45, %v4592_v19  ;;  %v4773_v32 = vsel %vm498_vm2, %v4592_v19, 0.0  ;;  %v7318_v30 = vsel %vm3094_vm4, %v7254_v35, %v10427_v25  ;;  %v3909_v9 = vpop.f32.mrb[91].mxu0  ;;  %v5039_v5 = vld [vmem:[#allocation2 + $0x172] sm:$0xff]  ;;  %v4888_v50 = vld [vmem:[#allocation2 + $0x60] sm:$0xff]  ;;  %v4889_v19 = vld [vmem:[#allocation2 + $0x68] sm:$0xff] }
 0x2c4   : > { %10760 = vrot.lane.b32.xlu1 %v10714_v12, %s11521_s17  ;;  %v7319_v46 = vsel %vm3094_vm4, %v7255_v27, %v10428_v4  ;;  %v10442_v33 = vunpack.i.l.bf16 %v14114_v7  ;;  %4849 = vst.msk [vmem:[#allocation2 + $0x250] sm:$0x3] %vm358_vm1, %v4773_v32  ;;  %v10436_v57 = vpop.permute.xlu0 %10435  ;;  %v3908_v12 = vadd.f32 %v14083_v17, %v3907_v16  ;;  %v10453_v36 = vunpack.i.h.bf16 %v14139_v10  ;;  %v5292_v7 = vld [vmem:[#allocation2 + $0x180] sm:$0xff] }
 0x2c5   : > { %4848 = vst.msk [vmem:[#allocation2 + $0x248] sm:$0xff] %vm355_vm0, %v4593_v1  ;;  %v7386_v18 = vpack.c.bf16 %v7319_v46, %v7318_v30  ;;  %9243 = vmatmul.mubr.msk.bf16.gmra.mrb[164].mxu0 %vm355_vm0, %v7435_v0  ;;  %v10452_v22 = vunpack.i.l.bf16 %v14139_v10  ;;  %v7385_v51 = vpack.c.bf16 %v7127_v44, %v7126_v29  ;;  %v14185_v45 = vpop.permute.xlu1 %10480  ;;  %v4194_v6 = vadd.f32 %v13677_v15, %v3905_v24  ;;  %v5144_v0 = vld [vmem:[#allocation2 + $0x79] sm:$0xff]  ;;  %v5145_v1 = vld [vmem:[#allocation2 + $0x81] sm:$0xff] }
 0x2c6   : > { %10725 = vrot.lane.b32.xlu0 %v10724_v28, %s11521_s17  ;;  %v4197_v23 = vadd.f32 %v13695_v20, %v3908_v12  ;;  %v10744_v38 = vpack.i.bf16 %v5293_v42, %v5292_v7  ;;  %v10779_v31 = vpack.i.bf16 %v5039_v5, %v5038_v62  ;;  %v10438_v4 = vunpack.i.h.bf16 %v10436_v57 }
 0x2c7   : > { %7775 = vmatprep.mubr.bf16.mxu1 %v7386_v18  ;;  %v10437_v25 = vunpack.i.l.bf16 %v10436_v57  ;;  %vm4316_vm5 = vcmp.gt.f32.partialorder %v4194_v6, 0.0  ;;  %v4380_v10 = vmul.f32 0.2, %v4194_v6  ;;  %v7001_v29 = vsel %vm355_vm0, %v4889_v19, %v10443_v60  ;;  %v5357_v19 = vld [vmem:[#allocation2 + $0x189] sm:$0xff] }
 0x2c8   : > { %7776 = vmatmul.mubr.bf16.gmra.mrb[76].mxu1 %v7385_v51  ;;  %10770 = vrot.lane.b32.xlu1 %v10724_v28, %s11518_s20  ;;  %v7000_v15 = vsel %vm355_vm0, %v4888_v50, %v10442_v33  ;;  %v10446_v44 = vpop.permute.xlu0 %10445  ;;  %vm4317_vm6 = vcmp.gt.f32.partialorder %v4197_v23, 0.0  ;;  %v4381_v24 = vmul.f32 0.2, %v4197_v23  ;;  %v7065_v27 = vsel %vm3029_vm3, %v7001_v29, %v10453_v36  ;;  %v5356_v50 = vld [vmem:[#allocation2 + $0x181] sm:$0xff] }
 0x2c9   : > { %v10447_v13 = vunpack.i.l.bf16 %v10446_v44  ;;  %v4444_v20 = vsel %vm4316_vm5, %v4194_v6, %v4380_v10  ;;  %v14193_v55 = vpop.permute.xlu1 %10490  ;;  %v7064_v35 = vsel %vm3029_vm3, %v7000_v15, %v10452_v22  ;;  %v10463_v16 = vunpack.i.h.bf16 %v14154_v49 }
 0x2ca   : > { %v10448_v28 = vunpack.i.h.bf16 %v10446_v44  ;;  %v4594_v32 = vrot.slane %v4444_v20, 7  ;;  %v16313_v30 = vpack.i.bf16 %v13875_v34, %v13873_v21  ;;  %v4445_v46 = vsel %vm4317_vm6, %v4197_v23, %v4381_v24  ;;  %v3912_v60 = vpop.f32.mrb[92].mxu0 }
 0x2cb   : > { %v10462_v9 = vunpack.i.l.bf16 %v14154_v49  ;;  %v7193_v42 = vsel %vm355_vm0, %v5145_v1, %v10438_v4  ;;  %v7192_v62 = vsel %vm355_vm0, %v5144_v0, %v10437_v25  ;;  %v4595_v5 = vrot.slane %v4445_v46, 7  ;;  %v3914_v34 = vpop.f32.mrb[93].mxu0  ;;  %v14209_v49 = vld [vmem:[#allocation2 + $0x199] sm:$0xff]  ;;  %v14216_v25 = vld [vmem:[#allocation2 + $0x1a1] sm:$0xff] }
 0x2cc   : > { %10735 = vrot.lane.b32.xlu0 %v16313_v30, %s11518_s20  ;;  %10780 = vrot.lane.b32.xlu1 %v10779_v31, %s11520_s27  ;;  %v5432_v33 = vld [vmem:[#allocation2 + $0x242] sm:$0xff]  ;;  %v5433_v57 = vld [vmem:[#allocation2 + $0x24a] sm:$0xff]  ;;  %v4742_v18 = vsel %vm498_vm2, 0.0, %v4594_v32  ;;  %v10456_v12 = vpop.permute.xlu0 %10455  ;;  %v3913_v36 = vadd.f32 %v14083_v17, %v3912_v60  ;;  %v7256_v21 = vsel %vm3029_vm3, %v7192_v62, %v10447_v13  ;;  %v3915_v4 = vpop.f32.mrb[94].mxu0  ;;  %v10472_v10 = vunpack.i.l.bf16 %v14164_v53 }
 0x2cd   : > { %v7438_v22 = vpack.c.bf16 %v5433_v57, %v5432_v33  ;;  %4850 = vst.msk [vmem:[#allocation2 + $0x258] sm:$0xff] %vm355_vm0, %v4742_v18  ;;  %v4596_v51 = vsel %vm498_vm2, %v4594_v32, %v4595_v5  ;;  %v4774_v6 = vsel %vm498_vm2, %v4595_v5, 0.0  ;;  %v10458_v7 = vunpack.i.h.bf16 %v10456_v12  ;;  %v14214_v31 = vpop.permute.xlu1 %10500  ;;  %v3917_v24 = vpop.f32.mrb[95].mxu0  ;;  %v14231_v32 = vld [vmem:[#allocation2 + $0x1d0] sm:$0xff] }
 0x2ce   : > { %v10457_v23 = vunpack.i.l.bf16 %v10456_v12  ;;  %4852 = vst.msk [vmem:[#allocation2 + $0x268] sm:$0x3] %vm358_vm1, %v4774_v6  ;;  %v4202_v29 = vadd.f32 %v13658_v2, %v3913_v36  ;;  %v7257_v15 = vsel %vm3029_vm3, %v7193_v42, %v10448_v28  ;;  %v3916_v44 = vadd.f32 %v14083_v17, %v3915_v4  ;;  %v4890_v42 = vld [vmem:[#allocation2 + $0x78] sm:$0xff]  ;;  %v4891_v36 = vld [vmem:[#allocation2 + $0x80] sm:$0xff] }
 0x2cf   : > { %4851 = vst.msk [vmem:[#allocation2 + $0x260] sm:$0xff] %vm355_vm0, %v4596_v51  ;;  %9246 = vmatprep.mubr.msk.bf16.mxu0 %vm355_vm0, %v7438_v22  ;;  %v7321_v20 = vsel %vm3094_vm4, %v7257_v15, %v10458_v7  ;;  %v7128_v0 = vsel %vm3094_vm4, %v7064_v35, %v10462_v9  ;;  %v7129_v1 = vsel %vm3094_vm4, %v7065_v27, %v10463_v16  ;;  %v10482_v62 = vunpack.i.l.bf16 %v14185_v45  ;;  %v14240_v27 = vld [vmem:[#allocation2 + $0x1c8] sm:$0xff] }
 0x2d0   : > { %10745 = vrot.lane.b32.xlu0 %v10744_v38, %s11520_s27  ;;  %10790 = vrot.lane.b32.xlu1 %v10744_v38, %s11521_s17  ;;  %v7320_v13 = vsel %vm3094_vm4, %v7256_v21, %v10457_v23  ;;  %v10466_v2 = vpop.permute.xlu0 %10465  ;;  %vm4318_vm7 = vcmp.gt.f32.partialorder %v4202_v29, 0.0  ;;  %v4382_v28 = vmul.f32 0.2, %v4202_v29  ;;  %v10754_v30 = vpack.i.bf16 %v5357_v19, %v5356_v50 }
 0x2d1   : > { %v10784_v46 = vpack.i.bf16 %v14216_v25, %v14209_v49  ;;  %v10473_v38 = vunpack.i.h.bf16 %v14164_v53  ;;  %v7389_v5 = vpack.c.bf16 %v7321_v20, %v7320_v13  ;;  %v4205_v60 = vadd.f32 %v13689_v3, %v3916_v44  ;;  %v14238_v35 = vpop.permute.xlu1 %10510  ;;  %v5146_v20 = vld [vmem:[#allocation2 + $0x91] sm:$0xff] }
 0x2d2   : > { %v7002_v16 = vsel %vm355_vm0, %v4890_v42, %v10472_v10  ;;  %v4446_v9 = vsel %vm4318_vm7, %v4202_v29, %v4382_v28  ;;  %v7388_v33 = vpack.c.bf16 %v7129_v1, %v7128_v0  ;;  %v10819_v57 = vpack.i.bf16 %v14231_v32, %v14240_v27  ;;  %v5147_v0 = vld [vmem:[#allocation2 + $0x99] sm:$0xff] }
 0x2d3   : > { %v10483_v53 = vunpack.i.h.bf16 %v14185_v45  ;;  %v10493_v18 = vunpack.i.h.bf16 %v14193_v55  ;;  %v4597_v12 = vrot.slane %v4446_v9, 7  ;;  %7783 = vmatprep.mubr.bf16.mxu1 %v7389_v5  ;;  %vm4319_vm8 = vcmp.gt.f32.partialorder %v4205_v60, 0.0  ;;  %v4979_v9 = vld [vmem:[#allocation2 + $0x1d1] sm:$0xff] }
 0x2d4   : > { %10755 = vrot.lane.b32.xlu0 %v10754_v30, %s11521_s17  ;;  %v16314_v3 = vpack.i.bf16 %v13965_v8, %v13960_v58  ;;  %v10492_v21 = vunpack.i.l.bf16 %v14193_v55  ;;  %v10468_v34 = vunpack.i.h.bf16 %v10466_v2  ;;  %v10467_v22 = vunpack.i.l.bf16 %v10466_v2  ;;  %7784 = vmatmul.mubr.bf16.gmra.mrb[80].mxu1 %v7388_v33  ;;  %v10476_v6 = vpop.permute.xlu0 %10475  ;;  %v3920_v7 = vpop.f32.mrb[96].mxu0 }
 0x2d5   : > { %v4383_v51 = vmul.f32 0.2, %v4205_v60  ;;  %v7003_v45 = vsel %vm355_vm0, %v4891_v36, %v10473_v38  ;;  %v4743_v23 = vsel %vm498_vm2, 0.0, %v4597_v12  ;;  %v14255_v50 = vpop.permute.xlu1 %10520  ;;  %v3921_v19 = vadd.f32 %v14083_v17, %v3920_v7  ;;  %v3922_v4 = vpop.f32.mrb[97].mxu0 }
 0x2d6   : > { %10800 = vrot.lane.b32.xlu1 %v16314_v3, %s11518_s20  ;;  %v5434_v58 = vld [vmem:[#allocation2 + $0x25a] sm:$0xff]  ;;  %v5435_v8 = vld [vmem:[#allocation2 + $0x262] sm:$0xff]  ;;  %v7066_v10 = vsel %vm3029_vm3, %v7002_v16, %v10482_v62  ;;  %4853 = vst.msk [vmem:[#allocation2 + $0x270] sm:$0xff] %vm355_vm0, %v4743_v23  ;;  %v10478_v29 = vunpack.i.h.bf16 %v10476_v6  ;;  %v10477_v15 = vunpack.i.l.bf16 %v10476_v6  ;;  %v16315_v44 = vpack.i.bf16 %v13914_v52, %v13912_v59  ;;  %v3923_v24 = vpop.f32.mrb[98].mxu0  ;;  %v5232_v23 = vld [vmem:[#allocation2 + $0x1ca] sm:$0xff] }
 0x2d7   : > { %v4447_v55 = vsel %vm4319_vm8, %v4205_v60, %v4383_v51  ;;  %v7441_v13 = vpack.c.bf16 %v5435_v8, %v5434_v58  ;;  %v16316_v32 = vpack.i.bf16 %v13977_v48, %v13975_v56  ;;  %v3924_v2 = vadd.f32 %v14083_v17, %v3923_v24  ;;  %v3925_v30 = vpop.f32.mrb[99].mxu0  ;;  %v4978_v16 = vld [vmem:[#allocation2 + $0x1c9] sm:$0xff] }
 0x2d8   : > { %10765 = vrot.lane.b32.xlu0 %v16315_v44, %s11518_s20  ;;  %v4598_v1 = vrot.slane %v4447_v55, 7  ;;  %v4210_v28 = vadd.f32 %v13742_v14, %v3921_v19  ;;  %v7067_v42 = vsel %vm3029_vm3, %v7003_v45, %v10483_v53  ;;  %v7195_v59 = vsel %vm355_vm0, %v5147_v0, %v10468_v34  ;;  %v10486_v38 = vpop.permute.xlu0 %10485  ;;  %v4893_v55 = vld [vmem:[#allocation2 + $0x98] sm:$0xff]  ;;  %v5148_v30 = vld [vmem:[#allocation2 + $0xa9] sm:$0xff] }
 0x2d9   : > { %v7194_v52 = vsel %vm355_vm0, %v5146_v20, %v10467_v22  ;;  %9247 = vmatmul.mubr.msk.bf16.gmra.mrb[168].mxu0 %vm355_vm0, %v7441_v13  ;;  %v7130_v62 = vsel %vm3094_vm4, %v7066_v10, %v10492_v21  ;;  %v7131_v5 = vsel %vm3094_vm4, %v7067_v42, %v10493_v18  ;;  %v10488_v60 = vunpack.i.h.bf16 %v10486_v38  ;;  %v14279_v27 = vpop.permute.xlu1 %10530  ;;  %v4892_v10 = vld [vmem:[#allocation2 + $0x90] sm:$0xff]  ;;  %v5297_v20 = vld [vmem:[#allocation2 + $0x1e8] sm:$0xff] }
 0x2da   : > { %10810 = vrot.lane.b32.xlu1 %v16316_v32, %s11520_s27  ;;  %v4599_v56 = vsel %vm498_vm2, %v4597_v12, %v4598_v1  ;;  %v4775_v48 = vsel %vm498_vm2, %v4598_v1, 0.0  ;;  %v10487_v14 = vunpack.i.l.bf16 %v10486_v38  ;;  %v16317_v33 = vpack.i.bf16 %v13969_v54, %v13967_v61  ;;  %v5296_v38 = vld [vmem:[#allocation2 + $0x1e0] sm:$0xff] }
 0x2db   : > { %4855 = vst.msk [vmem:[#allocation2 + $0x280] sm:$0x3] %vm358_vm1, %v4775_v48  ;;  %vm4320_vm9 = vcmp.gt.f32.partialorder %v4210_v28, 0.0  ;;  %v4384_v53 = vmul.f32 0.2, %v4210_v28  ;;  %v7258_v18 = vsel %vm3029_vm3, %v7194_v52, %v10477_v15  ;;  %v7259_v12 = vsel %vm3029_vm3, %v7195_v59, %v10478_v29 }
 0x2dc   : > { %4854 = vst.msk [vmem:[#allocation2 + $0x278] sm:$0xff] %vm355_vm0, %v4599_v56  ;;  %10775 = vrot.lane.b32.xlu0 %v16317_v33, %s11520_s27  ;;  %v7322_v3 = vsel %vm3094_vm4, %v7258_v18, %v10487_v14  ;;  %v7323_v36 = vsel %vm3094_vm4, %v7259_v12, %v10488_v60  ;;  %v4213_v21 = vadd.f32 %v13750_v37, %v3924_v2  ;;  %v14293_v34 = vpop.permute.xlu0 %10495  ;;  %v10503_v54 = vunpack.i.h.bf16 %v14214_v31  ;;  %v5149_v56 = vld [vmem:[#allocation2 + $0xb1] sm:$0xff]  ;;  %v5361_v33 = vld [vmem:[#allocation2 + $0x1e9] sm:$0xff] }
 0x2dd   : > { %v4448_v22 = vsel %vm4320_vm9, %v4210_v28, %v4384_v53  ;;  %v7392_v51 = vpack.c.bf16 %v7323_v36, %v7322_v3  ;;  %v10829_v61 = vpack.i.bf16 %v4979_v9, %v4978_v16  ;;  %v7391_v7 = vpack.c.bf16 %v7131_v5, %v7130_v62  ;;  %v14296_v45 = vpop.permute.xlu1 %10540  ;;  %v5360_v9 = vld [vmem:[#allocation2 + $0x1e1] sm:$0xff] }
 0x2de   : > { %10820 = vrot.lane.b32.xlu1 %v10819_v57, %s11521_s17  ;;  %v4600_v6 = vrot.slane %v4448_v22, 7  ;;  %vm4321_vm10 = vcmp.gt.f32.partialorder %v4213_v21, 0.0  ;;  %v5233_v57 = vld [vmem:[#allocation2 + $0x1d2] sm:$0xff]  ;;  %v10502_v19 = vunpack.i.l.bf16 %v14214_v31  ;;  %v4385_v37 = vmul.f32 0.2, %v4213_v21 }
 0x2df   : > { %7791 = vmatprep.mubr.bf16.mxu1 %v7392_v51  ;;  %v10513_v4 = vunpack.i.h.bf16 %v14238_v35  ;;  %v10512_v58 = vunpack.i.l.bf16 %v14238_v35  ;;  %v10523_v31 = vunpack.i.h.bf16 %v14255_v50  ;;  %v10522_v29 = vunpack.i.l.bf16 %v14255_v50  ;;  %v5299_v51 = vld [vmem:[#allocation2 + $0x200] sm:$0xff] }
 0x2e0   : > { %10785 = vrot.lane.b32.xlu0 %v10784_v46, %s11521_s17  ;;  %v4744_v8 = vsel %vm498_vm2, 0.0, %v4600_v6  ;;  %7792 = vmatmul.mubr.bf16.gmra.mrb[84].mxu1 %v7391_v7  ;;  %v4449_v49 = vsel %vm4321_vm10, %v4213_v21, %v4385_v37  ;;  %v10506_v25 = vpop.permute.xlu0 %10505  ;;  %v10794_v46 = vpack.i.bf16 %v5233_v57, %v5232_v23  ;;  %v7005_v15 = vsel %vm355_vm0, %v4893_v55, %v10503_v54  ;;  %v5044_v57 = vld [vmem:[#allocation2 + $0x1e2] sm:$0xff] }
 0x2e1   : > { %4856 = vst.msk [vmem:[#allocation2 + $0x288] sm:$0xff] %vm355_vm0, %v4744_v8  ;;  %v10498_v35 = vunpack.i.h.bf16 %v14293_v34  ;;  %v10497_v44 = vunpack.i.l.bf16 %v14293_v34  ;;  %v4601_v24 = vrot.slane %v4449_v49, 7  ;;  %v14314_v13 = vpop.permute.xlu1 %10550  ;;  %v7004_v50 = vsel %vm355_vm0, %v4892_v10, %v10502_v19  ;;  %v5045_v19 = vld [vmem:[#allocation2 + $0x1ea] sm:$0xff]  ;;  %v5298_v8 = vld [vmem:[#allocation2 + $0x1f8] sm:$0xff] }
 0x2e2   : > { %10830 = vrot.lane.b32.xlu1 %v10829_v61, %s11518_s20  ;;  %v10508_v32 = vunpack.i.h.bf16 %v10506_v25  ;;  %v10507_v2 = vunpack.i.l.bf16 %v10506_v25  ;;  %v7068_v62 = vsel %vm3029_vm3, %v7004_v50, %v10512_v58  ;;  %v7069_v5 = vsel %vm3029_vm3, %v7005_v15, %v10513_v4 }
 0x2e3   : > { %v5436_v0 = vld [vmem:[#allocation2 + $0x272] sm:$0xff]  ;;  %v5437_v1 = vld [vmem:[#allocation2 + $0x27a] sm:$0xff]  ;;  %v4602_v42 = vsel %vm498_vm2, %v4600_v6, %v4601_v24  ;;  %v4776_v59 = vsel %vm498_vm2, %v4601_v24, 0.0  ;;  %v3928_v52 = vpop.f32.mrb[100].mxu0  ;;  %v10804_v14 = vpack.i.bf16 %v5297_v20, %v5296_v38  ;;  %v7132_v53 = vsel %vm3094_vm4, %v7068_v62, %v10522_v29 }
 0x2e4   : > { %10795 = vrot.lane.b32.xlu0 %v10794_v46, %s11518_s20  ;;  %v7444_v28 = vpack.c.bf16 %v5437_v1, %v5436_v0  ;;  %4858 = vst.msk [vmem:[#allocation2 + $0x298] sm:$0x3] %vm358_vm1, %v4776_v59  ;;  %v10516_v48 = vpop.permute.xlu0 %10515  ;;  %v3929_v60 = vadd.f32 %v14083_v17, %v3928_v52  ;;  %v3930_v16 = vpop.f32.mrb[101].mxu0  ;;  %v7133_v18 = vsel %vm3094_vm4, %v7069_v5, %v10523_v31  ;;  %v10533_v37 = vunpack.i.h.bf16 %v14279_v27 }
 0x2e5   : > { %4857 = vst.msk [vmem:[#allocation2 + $0x290] sm:$0xff] %vm355_vm0, %v4602_v42  ;;  %v7197_v12 = vsel %vm355_vm0, %v5149_v56, %v10498_v35  ;;  %v7196_v3 = vsel %vm355_vm0, %v5148_v30, %v10497_v44  ;;  %v10518_v36 = vunpack.i.h.bf16 %v10516_v48  ;;  %v10517_v21 = vunpack.i.l.bf16 %v10516_v48  ;;  %v3931_v34 = vpop.f32.mrb[102].mxu0  ;;  %v14331_v22 = vpop.permute.xlu1 %10560  ;;  %v4895_v44 = vld [vmem:[#allocation2 + $0xb0] sm:$0xff] }
 0x2e6   : > { %10840 = vrot.lane.b32.xlu1 %v10794_v46, %s11520_s27  ;;  %9250 = vmatprep.mubr.msk.bf16.mxu0 %vm355_vm0, %v7444_v28  ;;  %v4218_v61 = vadd.f32 %v13726_v40, %v3929_v60  ;;  %v3932_v54 = vadd.f32 %v14083_v17, %v3931_v34  ;;  %v3933_v6 = vpop.f32.mrb[103].mxu0  ;;  %v7260_v7 = vsel %vm3029_vm3, %v7196_v3, %v10507_v2  ;;  %v10532_v49 = vunpack.i.l.bf16 %v14279_v27  ;;  %v4894_v28 = vld [vmem:[#allocation2 + $0xa8] sm:$0xff] }
 0x2e7   : > { %v7261_v23 = vsel %vm3029_vm3, %v7197_v12, %v10508_v32  ;;  %v10814_v4 = vpack.i.bf16 %v5361_v33, %v5360_v9  ;;  %v7324_v58 = vsel %vm3094_vm4, %v7260_v7, %v10517_v21  ;;  %v14343_v29 = vpack.i.bf16 %v5299_v51, %v5298_v8  ;;  %v5151_v3 = vld [vmem:[#allocation2 + $0xc9] sm:$0xff] }
 0x2e8   : > { %10805 = vrot.lane.b32.xlu0 %v10804_v14, %s11520_s27  ;;  %v7325_v40 = vsel %vm3094_vm4, %v7261_v23, %v10518_v36  ;;  %vm4322_vm11 = vcmp.gt.f32.partialorder %v4218_v61, 0.0  ;;  %v4386_v10 = vmul.f32 0.2, %v4218_v61  ;;  %v4221_v55 = vadd.f32 %v13746_v43, %v3932_v54  ;;  %v10526_v31 = vpop.permute.xlu0 %10525 }
 0x2e9   : > { %v7395_v25 = vpack.c.bf16 %v7325_v40, %v7324_v58  ;;  %v7394_v46 = vpack.c.bf16 %v7133_v18, %v7132_v53  ;;  %v14346_v15 = vpop.permute.xlu1 %10570  ;;  %v10869_v35 = vpack.i.bf16 %v5045_v19, %v5044_v57  ;;  %v10542_v24 = vunpack.i.l.bf16 %v14296_v45  ;;  %v5362_v19 = vld [vmem:[#allocation2 + $0x1f9] sm:$0xff] }
 0x2ea   : > { %10850 = vrot.lane.b32.xlu1 %v10804_v14, %s11521_s17  ;;  %v4450_v20 = vsel %vm4322_vm11, %v4218_v61, %v4386_v10  ;;  %vm4323_vm12 = vcmp.gt.f32.partialorder %v4221_v55, 0.0  ;;  %v4387_v0 = vmul.f32 0.2, %v4221_v55  ;;  %v7007_v43 = vsel %vm355_vm0, %v4895_v44, %v10533_v37  ;;  %v5363_v37 = vld [vmem:[#allocation2 + $0x201] sm:$0xff] }
 0x2eb   : > { %v10543_v1 = vunpack.i.h.bf16 %v14296_v45  ;;  %v10553_v50 = vunpack.i.h.bf16 %v14314_v13  ;;  %v4603_v27 = vrot.slane %v4450_v20, 7  ;;  %7799 = vmatprep.mubr.bf16.mxu1 %v7395_v25  ;;  %v10552_v30 = vunpack.i.l.bf16 %v14314_v13 }
 0x2ec   : > { %10815 = vrot.lane.b32.xlu0 %v10814_v4, %s11521_s17  ;;  %v5438_v32 = vld [vmem:[#allocation2 + $0x28a] sm:$0xff]  ;;  %v5439_v2 = vld [vmem:[#allocation2 + $0x292] sm:$0xff]  ;;  %v4451_v42 = vsel %vm4323_vm12, %v4221_v55, %v4387_v0  ;;  %v10528_v59 = vunpack.i.h.bf16 %v10526_v31  ;;  %7800 = vmatmul.mubr.bf16.gmra.mrb[88].mxu1 %v7394_v46  ;;  %v10536_v52 = vpop.permute.xlu0 %10535  ;;  %v3936_v38 = vpop.f32.mrb[104].mxu0  ;;  %v7006_v5 = vsel %vm355_vm0, %v4894_v28, %v10532_v49  ;;  %v10527_v48 = vunpack.i.l.bf16 %v10526_v31  ;;  %v5236_v46 = vld [vmem:[#allocation2 + $0x1fa] sm:$0xff] }
 0x2ed   : > { %v7447_v62 = vpack.c.bf16 %v5439_v2, %v5438_v32  ;;  %v4745_v45 = vsel %vm498_vm2, 0.0, %v4603_v27  ;;  %v4604_v56 = vrot.slane %v4451_v42, 7  ;;  %v3938_v60 = vpop.f32.mrb[105].mxu0  ;;  %v14357_v14 = vpop.permute.xlu1 %10580  ;;  %v10538_v16 = vunpack.i.h.bf16 %v10536_v52  ;;  %v4896_v42 = vld [vmem:[#allocation2 + $0xc0] sm:$0xff] }
 0x2ee   : > { %10860 = vrot.lane.b32.xlu1 %v10814_v4, %s11518_s20  ;;  %4859 = vst.msk [vmem:[#allocation2 + $0x2a0] sm:$0xff] %vm355_vm0, %v4745_v45  ;;  %v10537_v9 = vunpack.i.l.bf16 %v10536_v52  ;;  %v3937_v13 = vadd.f32 %v14083_v17, %v3936_v38  ;;  %v3939_v33 = vpop.f32.mrb[106].mxu0  ;;  %v7070_v53 = vsel %vm3029_vm3, %v7006_v5, %v10542_v24  ;;  %v7071_v39 = vsel %vm3029_vm3, %v7007_v43, %v10543_v1  ;;  %v5301_v45 = vld [vmem:[#allocation2 + $0x218] sm:$0xff] }
 0x2ef   : > { %9251 = vmatmul.mubr.msk.bf16.gmra.mrb[172].mxu0 %vm355_vm0, %v7447_v62  ;;  %v4605_v18 = vsel %vm498_vm2, %v4603_v27, %v4604_v56  ;;  %v4777_v12 = vsel %vm498_vm2, %v4604_v56, 0.0  ;;  %v3940_v36 = vadd.f32 %v14083_v17, %v3939_v33  ;;  %v3941_v21 = vpop.f32.mrb[107].mxu0  ;;  %v7134_v61 = vsel %vm3094_vm4, %v7070_v53, %v10552_v30  ;;  %v14417_v33 = vld [vmem:[%s16176_s2] ss:$0 sm:$0xff] }
 0x2f0   : > { %10825 = vrot.lane.b32.xlu0 %v10824_v41, %s11518_s20  ;;  %4861 = vst.msk [vmem:[#allocation2 + $0x2b0] sm:$0x3] %vm358_vm1, %v4777_v12  ;;  %v7199_v41 = vsel %vm355_vm0, %v5151_v3, %v10528_v59  ;;  %v10546_v34 = vpop.permute.xlu0 %10545  ;;  %v4226_v51 = vadd.f32 %v13806_v63, %v3937_v13  ;;  %v7135_v54 = vsel %vm3094_vm4, %v7071_v39, %v10553_v50  ;;  %v10563_v44 = vunpack.i.h.bf16 %v14331_v22  ;;  %v4897_v59 = vld [vmem:[#allocation2 + $0xc8] sm:$0xff]  ;;  %v5300_v12 = vld [vmem:[#allocation2 + $0x210] sm:$0xff]  ;;  %v5152_v21 = vld [vmem:[#allocation2 + $0xd9] sm:$0xff] }
 0x2f1   : > { %4860 = vst.msk [vmem:[#allocation2 + $0x2a8] sm:$0xff] %vm355_vm0, %v4605_v18  ;;  %v7198_v17 = vsel %vm355_vm0, %v5150_v47, %v10527_v48  ;;  %v10548_v6 = vunpack.i.h.bf16 %v10546_v34  ;;  %v10547_v7 = vunpack.i.l.bf16 %v10546_v34  ;;  %v4229_v23 = vadd.f32 %v13839_v26, %v3940_v36  ;;  %v14380_v57 = vpop.permute.xlu1 %10590 }
 0x2f2   : > { %10870 = vrot.lane.b32.xlu1 %v10869_v35, %s11520_s27  ;;  %vm4324_vm13 = vcmp.gt.f32.partialorder %v4226_v51, 0.0  ;;  %v4388_v4 = vmul.f32 0.2, %v4226_v51  ;;  %v7262_v63 = vsel %vm3029_vm3, %v7198_v17, %v10537_v9  ;;  %v7263_v58 = vsel %vm3029_vm3, %v7199_v41, %v10538_v16  ;;  %v5237_v35 = vld [vmem:[#allocation2 + $0x202] sm:$0xff] }
 0x2f3   : > { %vm4325_vm14 = vcmp.gt.f32.partialorder %v4229_v23, 0.0  ;;  %v4389_v40 = vmul.f32 0.2, %v4229_v23  ;;  %v7326_v26 = vsel %vm3094_vm4, %v7262_v63, %v10547_v7  ;;  %v7327_v8 = vsel %vm3094_vm4, %v7263_v58, %v10548_v6  ;;  %v16318_v6 = vld [vmem:[#allocation16_spill] sm:$0xff] }
 0x2f4   : > { %10835 = vrot.lane.b32.xlu0 %v14343_v29, %s11520_s27  ;;  %v4452_v10 = vsel %vm4324_vm13, %v4226_v51, %v4388_v4  ;;  %v14390_v55 = vpop.permute.xlu0 %10555  ;;  %v10844_v31 = vpack.i.bf16 %v5363_v37, %v5362_v19  ;;  %v7398_v49 = vpack.c.bf16 %v7327_v8, %v7326_v26  ;;  %v7397_v25 = vpack.c.bf16 %v7135_v54, %v7134_v61  ;;  %v5153_v61 = vld [vmem:[#allocation2 + $0xe1] sm:$0xff]  ;;  %v5364_v4 = vld [vmem:[#allocation2 + $0x211] sm:$0xff]  ;;  %v5365_v63 = vld [vmem:[#allocation2 + $0x219] sm:$0xff] }
 0x2f5   : > { %v10562_v24 = vunpack.i.l.bf16 %v14331_v22  ;;  %v4606_v20 = vrot.slane %v4452_v10, 7  ;;  %v4453_v0 = vsel %vm4325_vm14, %v4229_v23, %v4389_v40  ;;  %v14394_v43 = vpop.permute.xlu1 %10600  ;;  %v10572_v1 = vunpack.i.l.bf16 %v14346_v15 }
 0x2f6   : > { %10880 = vrot.lane.b32.xlu1 %v14343_v29, %s11521_s17  ;;  %v10573_v29 = vunpack.i.h.bf16 %v14346_v15  ;;  %v4607_v50 = vrot.slane %v4453_v0, 7  ;;  %7807 = vmatprep.mubr.bf16.mxu1 %v7398_v49  ;;  %v10583_v27 = vunpack.i.h.bf16 %v14357_v14  ;;  %v10582_v32 = vunpack.i.l.bf16 %v14357_v14 }
 0x2f7   : > { %v4746_v2 = vsel %vm498_vm2, 0.0, %v4606_v20  ;;  %7808 = vmatmul.mubr.bf16.gmra.mrb[92].mxu1 %v7397_v25  ;;  %v10854_v22 = vpack.i.bf16 %v5237_v35, %v5236_v46  ;;  %v10557_v38 = vunpack.i.l.bf16 %v14390_v55  ;;  %v7009_v56 = vsel %vm355_vm0, %v4897_v59, %v10563_v44  ;;  %v5238_v25 = vld [vmem:[#allocation2 + $0x212] sm:$0xff]  ;;  %v5239_v46 = vld [vmem:[#allocation2 + $0x21a] sm:$0xff] }
 0x2f8   : > { %10845 = vrot.lane.b32.xlu0 %v10844_v31, %s11521_s17  ;;  %v5440_v28 = vld [vmem:[#allocation2 + $0x2a2] sm:$0xff]  ;;  %v5441_v30 = vld [vmem:[#allocation2 + $0x2aa] sm:$0xff]  ;;  %4862 = vst.msk [vmem:[#allocation2 + $0x2b8] sm:$0xff] %vm355_vm0, %v4746_v2  ;;  %v4608_v15 = vsel %vm498_vm2, %v4606_v20, %v4607_v50  ;;  %v4778_v52 = vsel %vm498_vm2, %v4607_v50, 0.0  ;;  %v10566_v62 = vpop.permute.xlu0 %10565  ;;  %v7008_v48 = vsel %vm355_vm0, %v4896_v42, %v10562_v24  ;;  %v10558_v60 = vunpack.i.h.bf16 %v14390_v55 }
 0x2f9   : > { %v7450_v5 = vpack.c.bf16 %v5441_v30, %v5440_v28  ;;  %4864 = vst.msk [vmem:[#allocation2 + $0x2c8] sm:$0x3] %vm358_vm1, %v4778_v52  ;;  %v10567_v14 = vunpack.i.l.bf16 %v10566_v62  ;;  %v14412_v9 = vpop.permute.xlu1 %10610  ;;  %v10568_v13 = vunpack.i.h.bf16 %v10566_v62  ;;  %v7072_v3 = vsel %vm3029_vm3, %v7008_v48, %v10572_v1  ;;  %v4899_v20 = vld [vmem:[#allocation2 + $0xe0] sm:$0xff] }
 0x2fa   : > { %10890 = vrot.lane.b32.xlu1 %v10844_v31, %s11518_s20  ;;  %4863 = vst.msk [vmem:[#allocation2 + $0x2c0] sm:$0xff] %vm355_vm0, %v4608_v15  ;;  %v3944_v16 = vpop.f32.mrb[108].mxu0  ;;  %v7073_v36 = vsel %vm3029_vm3, %v7009_v56, %v10573_v29  ;;  %v10593_v39 = vunpack.i.h.bf16 %v14380_v57  ;;  %v10864_v41 = vpack.i.bf16 %v5301_v45, %v5300_v12  ;;  %v14427_v34 = vsel %vm3094_vm4, %v7072_v3, %v10582_v32  ;;  %v16319_v31 = vld [vmem:[#allocation17_spill] sm:$0xff]  ;;  %v5303_v12 = vld [vmem:[#allocation2 + $0x230] sm:$0xff] }
 0x2fb   : > { %v3945_v53 = vadd.f32 %v14417_v33, %v3944_v16  ;;  %v3946_v18 = vpop.f32.mrb[109].mxu0  ;;  %9254 = vmatprep.mubr.msk.bf16.mxu0 %vm355_vm0, %v7450_v5  ;;  %v14430_v51 = vsel %vm3094_vm4, %v7073_v36, %v10583_v27  ;;  %v7200_v54 = vsel %vm355_vm0, %v5152_v21, %v10557_v38  ;;  %v10592_v17 = vunpack.i.l.bf16 %v14380_v57  ;;  %v4898_v27 = vld [vmem:[#allocation2 + $0xd8] sm:$0xff] }
 0x2fc   : > { %10855 = vrot.lane.b32.xlu0 %v10854_v22, %s11518_s20  ;;  %v3947_v47 = vpop.f32.mrb[110].mxu0  ;;  %v10576_v19 = vpop.permute.xlu0 %10575  ;;  %v7201_v58 = vsel %vm355_vm0, %v5153_v61, %v10558_v60  ;;  %v7264_v10 = vsel %vm3029_vm3, %v7200_v54, %v10567_v14  ;;  %v10874_v35 = vpack.i.bf16 %v5365_v63, %v5364_v4  ;;  %v10602_v0 = vunpack.i.l.bf16 %v14394_v43  ;;  %v16320_v61 = vld [vmem:[#allocation19_spill] sm:$0xff]  ;;  %v5155_v4 = vld [vmem:[#allocation2 + $0xf9] sm:$0xff] }
 0x2fd   : > { %v4234_v7 = vadd.f32 %v16318_v6, %v3945_v53  ;;  %v3948_v23 = vadd.f32 %v14417_v33, %v3947_v47  ;;  %v3949_v37 = vpop.f32.mrb[111].mxu0  ;;  %v10578_v40 = vunpack.i.h.bf16 %v10576_v19  ;;  %v10577_v26 = vunpack.i.l.bf16 %v10576_v19  ;;  %v14437_v8 = vpop.permute.xlu1 %10620 }
 0x2fe   : > { %10900 = vrot.lane.b32.xlu1 %v10854_v22, %s11520_s27  ;;  %v7265_v49 = vsel %vm3029_vm3, %v7201_v58, %v10568_v13  ;;  %v7011_v32 = vsel %vm355_vm0, %v4899_v20, %v10593_v39  ;;  %v7400_v22 = vpack.c.bf16 %v14430_v51, %v14427_v34  ;;  %v10884_v59 = vpack.i.bf16 %v5239_v46, %v5238_v25 }
 0x2ff   : > { %vm4326_vm15 = vcmp.gt.f32.partialorder %v4234_v7, 0.0  ;;  %v4390_v55 = vmul.f32 0.2, %v4234_v7  ;;  %v4237_v57 = vadd.f32 %v16319_v31, %v3948_v23  ;;  %v7328_v44 = vsel %vm3094_vm4, %v7264_v10, %v10577_v26  ;;  %v5367_v31 = vld [vmem:[#allocation2 + $0x231] sm:$0xff] }
 0x300   : > { %10865 = vrot.lane.b32.xlu0 %v10864_v41, %s11520_s27  ;;  %v7329_v24 = vsel %vm3094_vm4, %v7265_v49, %v10578_v40  ;;  %v10586_v50 = vpop.permute.xlu0 %10585  ;;  %v7010_v15 = vsel %vm355_vm0, %v4898_v27, %v10592_v17  ;;  %v10603_v52 = vunpack.i.h.bf16 %v14394_v43  ;;  %v10613_v48 = vunpack.i.h.bf16 %v14412_v9  ;;  %v5302_v17 = vld [vmem:[#allocation2 + $0x228] sm:$0xff]  ;;  %v16321_v40 = vld [vmem:[#allocation21_spill] sm:$0xff] }
 0x301   : > { %v4454_v29 = vsel %vm4326_vm15, %v4234_v7, %v4390_v55  ;;  %vm4327_vm5 = vcmp.gt.f32.partialorder %v4237_v57, 0.0  ;;  %v4391_v1 = vmul.f32 0.2, %v4237_v57  ;;  %v14450_v28 = vpop.permute.xlu1 %10630  ;;  %v5442_v30 = vld [vmem:[#allocation2 + $0x2ba] sm:$0xff]  ;;  %v5443_v42 = vld [vmem:[#allocation2 + $0x2c2] sm:$0xff]  ;;  %v7401_v62 = vpack.c.bf16 %v7329_v24, %v7328_v44  ;;  %v5154_v7 = vld [vmem:[#allocation2 + $0xf1] sm:$0xff] }
 0x302   : > { %10910 = vrot.lane.b32.xlu1 %v10864_v41, %s11521_s17  ;;  %v4609_v2 = vrot.slane %v4454_v29, 7  ;;  %v10612_v60 = vunpack.i.l.bf16 %v14412_v9  ;;  %v10587_v16 = vunpack.i.l.bf16 %v10586_v50  ;;  %v7453_v18 = vpack.c.bf16 %v5443_v42, %v5442_v30  ;;  %v5366_v55 = vld [vmem:[#allocation2 + $0x229] sm:$0xff] }
 0x303   : > { %v4455_v38 = vsel %vm4327_vm5, %v4237_v57, %v4391_v1  ;;  %7815 = vmatprep.mubr.bf16.mxu1 %v7401_v62  ;;  %v7074_v3 = vsel %vm3029_vm3, %v7010_v15, %v10602_v0  ;;  %v10588_v9 = vunpack.i.h.bf16 %v10586_v50  ;;  %v7075_v6 = vsel %vm3029_vm3, %v7011_v32, %v10603_v52  ;;  %v5240_v62 = vld [vmem:[#allocation2 + $0x22a] sm:$0xff] }
 0x304   : > { %10875 = vrot.lane.b32.xlu0 %v10874_v35, %s11521_s17  ;;  %v3952_v5 = vpop.f32.mrb[112].mxu0  ;;  %v4747_v45 = vsel %vm498_vm2, 0.0, %v4609_v2  ;;  %v4610_v56 = vrot.slane %v4455_v38, 7  ;;  %v10596_v13 = vpop.permute.xlu0 %10595  ;;  %7816 = vmatmul.mubr.bf16.gmra.mrb[96].mxu1 %v7400_v22  ;;  %v10894_v23 = vpack.i.bf16 %v5303_v12, %v5302_v17  ;;  %v7138_v19 = vsel %vm3094_vm4, %v7074_v3, %v10612_v60 }
 0x305   : > { %v3954_v14 = vpop.f32.mrb[113].mxu0  ;;  %4865 = vst.msk [vmem:[#allocation2 + $0x2d0] sm:$0xff] %vm355_vm0, %v4747_v45  ;;  %v3953_v43 = vadd.f32 %v14417_v33, %v3952_v5  ;;  %v10597_v39 = vunpack.i.l.bf16 %v10596_v13  ;;  %v14464_v41 = vpop.permute.xlu1 %10640  ;;  %v10598_v34 = vunpack.i.h.bf16 %v10596_v13  ;;  %9255 = vmatmul.mubr.msk.bf16.gmra.mrb[176].mxu0 %vm355_vm0, %v7453_v18  ;;  %v7139_v37 = vsel %vm3094_vm4, %v7075_v6, %v10613_v48  ;;  %v5241_v5 = vld [vmem:[#allocation2 + $0x232] sm:$0xff] }
 0x306   : > { %10920 = vrot.lane.b32.xlu1 %v10874_v35, %s11518_s20  ;;  %v3955_v53 = vpop.f32.mrb[114].mxu0  ;;  %v4611_v36 = vsel %vm498_vm2, %v4609_v2, %v4610_v56  ;;  %v4779_v21 = vsel %vm498_vm2, %v4610_v56, 0.0  ;;  %v7202_v63 = vsel %vm355_vm0, %v5154_v7, %v10587_v16  ;;  %v7203_v57 = vsel %vm355_vm0, %v5155_v4, %v10588_v9  ;;  %v4900_v56 = vld [vmem:[#allocation2 + $0xf0] sm:$0xff]  ;;  %v5304_v7 = vld [vmem:[#allocation2 + $0x240] sm:$0xff] }
 0x307   : > { %v3957_v47 = vpop.f32.mrb[115].mxu0  ;;  %4867 = vst.msk [vmem:[#allocation2 + $0x2e0] sm:$0x3] %vm358_vm1, %v4779_v21  ;;  %v3956_v51 = vadd.f32 %v14417_v33, %v3955_v53  ;;  %v4242_v54 = vadd.f32 %v16320_v61, %v3953_v43  ;;  %v7266_v35 = vsel %vm3029_vm3, %v7202_v63, %v10597_v39  ;;  %v7267_v20 = vsel %vm3029_vm3, %v7203_v57, %v10598_v34  ;;  %v4901_v43 = vld [vmem:[#allocation2 + $0xf8] sm:$0xff] }
 0x308   : > { %4866 = vst.msk [vmem:[#allocation2 + $0x2d8] sm:$0xff] %vm355_vm0, %v4611_v36  ;;  %10885 = vrot.lane.b32.xlu0 %v10884_v59, %s11518_s20  ;;  %v10606_v10 = vpop.permute.xlu0 %10605  ;;  %v10904_v29 = vpack.i.bf16 %v5367_v31, %v5366_v55  ;;  %v10622_v27 = vunpack.i.l.bf16 %v14437_v8  ;;  %v7403_v30 = vpack.c.bf16 %v7139_v37, %v7138_v19  ;;  %v10623_v42 = vunpack.i.h.bf16 %v14437_v8  ;;  %v5305_v36 = vld [vmem:[#allocation2 + $0x248] sm:$0xff]  ;;  %v16323_v55 = vld [vmem:[#allocation20_spill] sm:$0xff] }
 0x309   : > { %vm4328_vm6 = vcmp.gt.f32.partialorder %v4242_v54, 0.0  ;;  %v4392_v58 = vmul.f32 0.2, %v4242_v54  ;;  %v4245_v26 = vadd.f32 %v16321_v40, %v3956_v51  ;;  %v10608_v49 = vunpack.i.h.bf16 %v10606_v10  ;;  %v14479_v46 = vpop.permute.xlu1 %10650  ;;  %v16322_v51 = vld [vmem:[#allocation18_spill] sm:$0xff]  ;;  %v5157_v40 = vld [vmem:[#allocation2 + $0x111] sm:$0xff] }
 0x30a   : > { %10930 = vrot.lane.b32.xlu1 %v10884_v59, %s11520_s27  ;;  %v10607_v25 = vunpack.i.l.bf16 %v10606_v10  ;;  %v10632_v59 = vunpack.i.l.bf16 %v14450_v28  ;;  %v10633_v45 = vunpack.i.h.bf16 %v14450_v28  ;;  %v10643_v60 = vunpack.i.h.bf16 %v14464_v41  ;;  %v5156_v19 = vld [vmem:[#allocation2 + $0x109] sm:$0xff] }
 0x30b   : > { %v4456_v44 = vsel %vm4328_vm6, %v4242_v54, %v4392_v58  ;;  %vm4329_vm7 = vcmp.gt.f32.partialorder %v4245_v26, 0.0  ;;  %v4393_v24 = vmul.f32 0.2, %v4245_v26  ;;  %v7331_v50 = vsel %vm3094_vm4, %v7267_v20, %v10608_v49  ;;  %v5369_v20 = vld [vmem:[#allocation2 + $0x249] sm:$0xff] }
 0x30c   : > { %10895 = vrot.lane.b32.xlu0 %v10894_v23, %s11520_s27  ;;  %v4612_v0 = vrot.slane %v4456_v44, 7  ;;  %v7330_v1 = vsel %vm3094_vm4, %v7266_v35, %v10607_v25  ;;  %v10616_v2 = vpop.permute.xlu0 %10615  ;;  %v10642_v14 = vunpack.i.l.bf16 %v14464_v41  ;;  %v7012_v28 = vsel %vm355_vm0, %v4900_v56, %v10622_v27 }
 0x30d   : > { %v4457_v32 = vsel %vm4329_vm7, %v4245_v26, %v4393_v24  ;;  %v7404_v22 = vpack.c.bf16 %v7331_v50, %v7330_v1  ;;  %v14491_v38 = vpop.permute.xlu1 %10660  ;;  %v10617_v13 = vunpack.i.l.bf16 %v10616_v2  ;;  %v10914_v3 = vpack.i.bf16 %v5241_v5, %v5240_v62  ;;  %v5368_v24 = vld [vmem:[#allocation2 + $0x241] sm:$0xff]  ;;  %v4903_v5 = vld [vmem:[#allocation2 + $0x110] sm:$0xff] }
 0x30e   : > { %10940 = vrot.lane.b32.xlu1 %v10894_v23, %s11521_s17  ;;  %v4748_v15 = vsel %vm498_vm2, 0.0, %v4612_v0  ;;  %v4613_v52 = vrot.slane %v4457_v32, 7  ;;  %v7013_v21 = vsel %vm355_vm0, %v4901_v43, %v10623_v42  ;;  %v10618_v9 = vunpack.i.h.bf16 %v10616_v2 }
 0x30f   : > { %4868 = vst.msk [vmem:[#allocation2 + $0x2e8] sm:$0xff] %vm355_vm0, %v4748_v15  ;;  %7823 = vmatprep.mubr.bf16.mxu1 %v7404_v22  ;;  %v3960_v16 = vpop.f32.mrb[116].mxu0  ;;  %v7076_v34 = vsel %vm3029_vm3, %v7012_v28, %v10632_v59  ;;  %v7077_v23 = vsel %vm3029_vm3, %v7013_v21, %v10633_v45  ;;  %v10653_v37 = vunpack.i.h.bf16 %v14479_v46  ;;  %v10924_v4 = vpack.i.bf16 %v5305_v36, %v5304_v7  ;;  %v5242_v22 = vld [vmem:[#allocation2 + $0x242] sm:$0xff] }
 0x310   : > { %10905 = vrot.lane.b32.xlu0 %v10904_v29, %s11521_s17  ;;  %v4614_v48 = vsel %vm498_vm2, %v4612_v0, %v4613_v52  ;;  %v4780_v8 = vsel %vm498_vm2, %v4613_v52, 0.0  ;;  %7824 = vmatmul.mubr.bf16.gmra.mrb[100].mxu1 %v7403_v30  ;;  %v3961_v53 = vadd.f32 %v14417_v33, %v3960_v16  ;;  %v3962_v18 = vpop.f32.mrb[117].mxu0  ;;  %v10626_v12 = vpop.permute.xlu0 %10625  ;;  %v7140_v63 = vsel %vm3094_vm4, %v7076_v34, %v10642_v14  ;;  %v5243_v30 = vld [vmem:[#allocation2 + $0x24a] sm:$0xff] }
 0x311   : > { %4870 = vst.msk [vmem:[#allocation2 + $0x2f8] sm:$0x3] %vm358_vm1, %v4780_v8  ;;  %v3963_v39 = vpop.f32.mrb[118].mxu0  ;;  %v10627_v47 = vunpack.i.l.bf16 %v10626_v12  ;;  %v14506_v41 = vpop.permute.xlu1 %10670  ;;  %v10628_v17 = vunpack.i.h.bf16 %v10626_v12  ;;  %v7141_v58 = vsel %vm3094_vm4, %v7077_v23, %v10643_v60  ;;  %v7204_v26 = vsel %vm355_vm0, %v5156_v19, %v10617_v13  ;;  %v4902_v13 = vld [vmem:[#allocation2 + $0x108] sm:$0xff] }
 0x312   : > { %10950 = vrot.lane.b32.xlu1 %v10904_v29, %s11518_s20  ;;  %4869 = vst.msk [vmem:[#allocation2 + $0x2f0] sm:$0xff] %vm355_vm0, %v4614_v48  ;;  %v4250_v61 = vadd.f32 %v16322_v51, %v3961_v53  ;;  %v3964_v54 = vadd.f32 %v14417_v33, %v3963_v39  ;;  %v3965_v6 = vpop.f32.mrb[119].mxu0  ;;  %v7205_v49 = vsel %vm355_vm0, %v5157_v40, %v10618_v9  ;;  %v10652_v42 = vunpack.i.l.bf16 %v14479_v46 }
 0x313   : > { %v7268_v0 = vsel %vm3029_vm3, %v7204_v26, %v10627_v47  ;;  %v7269_v50 = vsel %vm3029_vm3, %v7205_v49, %v10628_v17  ;;  %v10934_v52 = vpack.i.bf16 %v5369_v20, %v5368_v24  ;;  %v10662_v48 = vunpack.i.l.bf16 %v14491_v38  ;;  %v16324_v47 = vld [vmem:[#allocation23_spill] sm:$0xff]  ;;  %v5370_v49 = vld [vmem:[#allocation2 + $0x259] sm:$0xff] }
 0x314   : > { %10915 = vrot.lane.b32.xlu0 %v10914_v3, %s11518_s20  ;;  %vm4330_vm8 = vcmp.gt.f32.partialorder %v4250_v61, 0.0  ;;  %v4394_v10 = vmul.f32 0.2, %v4250_v61  ;;  %v4253_v31 = vadd.f32 %v16323_v55, %v3964_v54  ;;  %v10636_v57 = vpop.permute.xlu0 %10635  ;;  %v7406_v60 = vpack.c.bf16 %v7141_v58, %v7140_v63  ;;  %v5306_v63 = vld [vmem:[#allocation2 + $0x258] sm:$0xff]  ;;  %v5159_v58 = vld [vmem:[#allocation2 + $0x129] sm:$0xff] }
 0x315   : > { %v10638_v25 = vunpack.i.h.bf16 %v10636_v57  ;;  %v10637_v35 = vunpack.i.l.bf16 %v10636_v57  ;;  %v14520_v44 = vpop.permute.xlu1 %10680  ;;  %v7015_v16 = vsel %vm355_vm0, %v4903_v5, %v10653_v37  ;;  %v10944_v28 = vpack.i.bf16 %v5243_v30, %v5242_v22 }
 0x316   : > { %10960 = vrot.lane.b32.xlu1 %v10914_v3, %s11520_s27  ;;  %v4458_v29 = vsel %vm4330_vm8, %v4250_v61, %v4394_v10  ;;  %vm4331_vm9 = vcmp.gt.f32.partialorder %v4253_v31, 0.0  ;;  %v4395_v1 = vmul.f32 0.2, %v4253_v31  ;;  %v10663_v12 = vunpack.i.h.bf16 %v14491_v38  ;;  %v5307_v38 = vld [vmem:[#allocation2 + $0x260] sm:$0xff] }
 0x317   : > { %v4615_v27 = vrot.slane %v4458_v29, 7  ;;  %v7332_v32 = vsel %vm3094_vm4, %v7268_v0, %v10637_v35  ;;  %v7333_v2 = vsel %vm3094_vm4, %v7269_v50, %v10638_v25  ;;  %v10672_v3 = vunpack.i.l.bf16 %v14506_v41  ;;  %v5158_v10 = vld [vmem:[#allocation2 + $0x121] sm:$0xff] }
 0x318   : > { %10925 = vrot.lane.b32.xlu0 %v10924_v4, %s11520_s27  ;;  %v4459_v59 = vsel %vm4331_vm9, %v4253_v31, %v4395_v1  ;;  %v10646_v15 = vpop.permute.xlu0 %10645  ;;  %v7407_v62 = vpack.c.bf16 %v7333_v2, %v7332_v32  ;;  %v7014_v21 = vsel %vm355_vm0, %v4902_v13, %v10652_v42  ;;  %v10673_v54 = vunpack.i.h.bf16 %v14506_v41  ;;  %v5371_v29 = vld [vmem:[#allocation2 + $0x261] sm:$0xff] }
 0x319   : > { %v4749_v45 = vsel %vm498_vm2, 0.0, %v4615_v27  ;;  %v4616_v56 = vrot.slane %v4459_v59, 7  ;;  %v14531_v14 = vpop.permute.xlu1 %10690  ;;  %v10648_v9 = vunpack.i.h.bf16 %v10646_v15  ;;  %v10647_v17 = vunpack.i.l.bf16 %v10646_v15  ;;  %v5244_v1 = vld [vmem:[#allocation2 + $0x25a] sm:$0xff]  ;;  %v5245_v50 = vld [vmem:[#allocation2 + $0x262] sm:$0xff] }
 0x31a   : > { %10970 = vrot.lane.b32.xlu1 %v10924_v4, %s11521_s17  ;;  %4871 = vst.msk [vmem:[#allocation2 + $0x300] sm:$0xff] %vm355_vm0, %v4749_v45  ;;  %7831 = vmatprep.mubr.bf16.mxu1 %v7407_v62  ;;  %v7078_v23 = vsel %vm3029_vm3, %v7014_v21, %v10662_v48  ;;  %v10954_v40 = vpack.i.bf16 %v5307_v38, %v5306_v63  ;;  %v10683_v5 = vunpack.i.h.bf16 %v14520_v44  ;;  %vm8536_vm14 = vcmask 15360  }
 0x31b   : > { %v3968_v8 = vpop.f32.mrb[120].mxu0  ;;  %v4617_v53 = vsel %vm498_vm2, %v4615_v27, %v4616_v56  ;;  %v4781_v18 = vsel %vm498_vm2, %v4616_v56, 0.0  ;;  %7832 = vmatmul.mubr.bf16.gmra.mrb[104].mxu1 %v7406_v60  ;;  %v7079_v41 = vsel %vm3029_vm3, %v7015_v16, %v10663_v12  ;;  %v14556_v26 = vsel %vm3094_vm4, %v7078_v23, %v10672_v3 }
 0x31c   : > { %v3969_v46 = vadd.f32 %v14417_v33, %v3968_v8  ;;  %v3970_v43 = vpop.f32.mrb[121].mxu0  ;;  %10935 = vrot.lane.b32.xlu0 %v10934_v52, %s11521_s17  ;;  %4873 = vst.msk [vmem:[#allocation2 + $0x310] sm:$0x3] %vm358_vm1, %v4781_v18  ;;  %v10656_v61 = vpop.permute.xlu0 %10655  ;;  %v7207_v55 = vsel %vm355_vm0, %v5159_v58, %v10648_v9  ;;  %v7206_v25 = vsel %vm355_vm0, %v5158_v10, %v10647_v17  ;;  %v10682_v12 = vunpack.i.l.bf16 %v14520_v44  ;;  %v4905_v9 = vld [vmem:[#allocation2 + $0x128] sm:$0xff]  ;;  %v5309_v17 = vld [vmem:[#allocation2 + $0x278] sm:$0xff] }
 0x31d   : > { %v3971_v36 = vpop.f32.mrb[122].mxu0  ;;  %4872 = vst.msk [vmem:[#allocation2 + $0x308] sm:$0xff] %vm355_vm0, %v4617_v53  ;;  %v10658_v6 = vunpack.i.h.bf16 %v10656_v61  ;;  %v14548_v7 = vpop.permute.xlu1 %10700  ;;  %v10657_v4 = vunpack.i.l.bf16 %v10656_v61  ;;  %v7143_v30 = vsel %vm3094_vm4, %v7079_v41, %v10673_v54  ;;  %v10964_v48 = vpack.i.bf16 %v5371_v29, %v5370_v49  ;;  %v16325_v43 = vld [vmem:[#allocation22_spill] sm:$0xff] }
 0x31e   : > { %10980 = vrot.lane.b32.xlu1 %v10934_v52, %s11518_s20  ;;  %v3972_v39 = vadd.f32 %v14417_v33, %v3971_v36  ;;  %v4258_v34 = vadd.f32 %v16324_v47, %v3969_v46  ;;  %v3973_v51 = vpop.f32.mrb[123].mxu0  ;;  %v10974_v60 = vpack.i.bf16 %v5245_v50, %v5244_v1  ;;  %v10693_v3 = vunpack.i.h.bf16 %v14531_v14  ;;  %v16326_v47 = vld [vmem:[#allocation24_spill] sm:$0xff] }
 0x31f   : > { %v7270_v2 = vsel %vm3029_vm3, %v7206_v25, %v10657_v4  ;;  %v7271_v22 = vsel %vm3029_vm3, %v7207_v55, %v10658_v6  ;;  %v7409_v21 = vpack.c.bf16 %v7143_v30, %v14556_v26  ;;  %v7017_v44 = vsel %vm355_vm0, %v4905_v9, %v10683_v5  ;;  %v4904_v6 = vld [vmem:[#allocation2 + $0x120] sm:$0xff] }
 0x320   : > { %vm4332_vm10 = vcmp.gt.f32.partialorder %v4258_v34, 0.0  ;;  %v4396_v19 = vmul.f32 0.2, %v4258_v34  ;;  %v4261_v37 = vadd.f32 %v14046_v11, %v3972_v39  ;;  %10945 = vrot.lane.b32.xlu0 %v10944_v28, %s11518_s20  ;;  %v10666_v11 = vpop.permute.xlu0 %10665  ;;  %v10692_v39 = vunpack.i.l.bf16 %v14531_v14  ;;  %v5160_v25 = vld [vmem:[#allocation2 + $0x139] sm:$0xff] }
 0x321   : > { %v10668_v24 = vunpack.i.h.bf16 %v10666_v11  ;;  %v10667_v20 = vunpack.i.l.bf16 %v10666_v11  ;;  %v14560_v0 = vpop.permute.xlu1 %10710  ;;  %v10703_v51 = vunpack.i.h.bf16 %v14548_v7  ;;  %v10702_v61 = vunpack.i.l.bf16 %v14548_v7  ;;  %v5308_v7 = vld [vmem:[#allocation2 + $0x270] sm:$0xff] }
 0x322   : > { %10990 = vrot.lane.b32.xlu1 %v10944_v28, %s11520_s27  ;;  %v4460_v31 = vsel %vm4332_vm10, %v4258_v34, %v4396_v19  ;;  %vm4333_vm11 = vcmp.gt.f32.partialorder %v4261_v37, 0.0  ;;  %v4397_v57 = vmul.f32 0.2, %v4261_v37  ;;  %v7016_v4 = vsel %vm355_vm0, %v4904_v6, %v10682_v12 }
 0x323   : > { %v4618_v35 = vrot.slane %v4460_v31, 7  ;;  %v3976_v32 = vpop.f32.mrb[124].mxu0  ;;  %v7334_v62 = vsel %vm3094_vm4, %v7270_v2, %v10667_v20  ;;  %v7335_v8 = vsel %vm3094_vm4, %v7271_v22, %v10668_v24  ;;  %v10984_v55 = vpack.i.bf16 %v5309_v17, %v5308_v7 }
 0x324   : > { %v4461_v27 = vsel %vm4333_vm11, %v4261_v37, %v4397_v57  ;;  %10955 = vrot.lane.b32.xlu0 %v10954_v40, %s11520_s27  ;;  %v3977_v15 = vadd.f32 %v14417_v33, %v3976_v32  ;;  %v3978_v52 = vpop.f32.mrb[125].mxu0  ;;  %v10676_v56 = vpop.permute.xlu0 %10675  ;;  %v7410_v36 = vpack.c.bf16 %v7335_v8, %v7334_v62  ;;  %v7080_v31 = vsel %vm3029_vm3, %v7016_v4, %v10692_v39  ;;  %v5162_v4 = vld [vmem:[#allocation2 + $0x151] sm:$0xff] }
 0x325   : > { %v4750_v42 = vsel %vm498_vm2, 0.0, %v4618_v35  ;;  %v4619_v59 = vrot.slane %v4461_v27, 7  ;;  %v3979_v45 = vpop.f32.mrb[126].mxu0  ;;  %v14577_v18 = vpop.permute.xlu1 %10720  ;;  %v10678_v38 = vunpack.i.h.bf16 %v10676_v56  ;;  %v10677_v19 = vunpack.i.l.bf16 %v10676_v56 }
 0x326   : > { %11000 = vrot.lane.b32.xlu1 %v10954_v40, %s11521_s17  ;;  %4874 = vst.msk [vmem:[#allocation2 + $0x318] sm:$0xff] %vm355_vm0, %v4750_v42  ;;  %v4266_v28 = vadd.f32 %v16325_v43, %v3977_v15  ;;  %v3980_v13 = vadd.f32 %v14417_v33, %v3979_v45  ;;  %v3981_v53 = vpop.f32.mrb[127].mxu0  ;;  %7839 = vmatprep.mubr.bf16.mxu1 %v7410_v36  ;;  %v5372_v42 = vld [vmem:[#allocation2 + $0x271] sm:$0xff]  ;;  %v10712_v12 = vunpack.i.l.bf16 %v14560_v0  ;;  %v10723_v36 = vunpack.i.h.bf16 %v14577_v18 }
 0x327   : > { %v4620_v16 = vsel %vm498_vm2, %v4618_v35, %v4619_v59  ;;  %v4782_v46 = vsel %vm498_vm2, %v4619_v59, 0.0  ;;  %7840 = vmatmul.mubr.bf16.gmra.mrb[108].mxu1 %v7409_v21  ;;  %v7081_v57 = vsel %vm3029_vm3, %v7017_v44, %v10693_v3  ;;  %v5161_v35 = vld [vmem:[#allocation2 + $0x141] sm:$0xff]  ;;  %v7144_v29 = vsel %vm3094_vm4, %v7080_v31, %v10702_v61  ;;  %v5373_v59 = vld [vmem:[#allocation2 + $0x279] sm:$0xff] }
 0x328   : > { %4876 = vst.msk [vmem:[#allocation2 + $0x328] sm:$0x3] %vm358_vm1, %v4782_v46  ;;  %10965 = vrot.lane.b32.xlu0 %v10964_v48, %s11521_s17  ;;  %vm4334_vm12 = vcmp.gt.f32.partialorder %v4266_v28, 0.0  ;;  %v4398_v33 = vmul.f32 0.2, %v4266_v28  ;;  %v4269_v34 = vadd.f32 %v16326_v47, %v3980_v13  ;;  %v10686_v54 = vpop.permute.xlu0 %10685  ;;  %v7145_v1 = vsel %vm3094_vm4, %v7081_v57, %v10703_v51  ;;  %v5246_v43 = vld [vmem:[#allocation2 + $0x272] sm:$0xff] }
 0x329   : > { %4875 = vst.msk [vmem:[#allocation2 + $0x320] sm:$0xff] %vm355_vm0, %v4620_v16  ;;  %v14591_v37 = vpop.permute.xlu1 %10730  ;;  %v10688_v58 = vunpack.i.h.bf16 %v10686_v54  ;;  %v10687_v40 = vunpack.i.l.bf16 %v10686_v54  ;;  %v7209_v50 = vsel %vm355_vm0, %v5161_v35, %v10678_v38  ;;  %v7208_v27 = vsel %vm355_vm0, %v5160_v25, %v10677_v19  ;;  %v4906_v61 = vld [vmem:[#allocation2 + $0x138] sm:$0xff]  ;;  %v4907_v38 = vld [vmem:[#allocation2 + $0x140] sm:$0xff]  ;;  %v5310_v19 = vld [vmem:[#allocation2 + $0x288] sm:$0xff] }
 0x32a   : > { %11010 = vrot.lane.b32.xlu1 %v10964_v48, %s11518_s20  ;;  %v4462_v23 = vsel %vm4334_vm12, %v4266_v28, %v4398_v33  ;;  %vm4335_vm13 = vcmp.gt.f32.partialorder %v4269_v34, 0.0  ;;  %v4399_v14 = vmul.f32 0.2, %v4269_v34  ;;  %v10994_v8 = vpack.i.bf16 %v5373_v59, %v5372_v42  ;;  %v5247_v28 = vld [vmem:[#allocation2 + $0x27a] sm:$0xff]  ;;  %v5375_v25 = vld [vmem:[#allocation2 + $0x291] sm:$0xff] }
 0x32b   : > { %v4621_v63 = vrot.slane %v4462_v23, 7  ;;  %v14594_v41 = vpop.f32.mrb[128].mxu0  ;;  %v7272_v62 = vsel %vm3029_vm3, %v7208_v27, %v10687_v40  ;;  %v7273_v5 = vsel %vm3029_vm3, %v7209_v50, %v10688_v58  ;;  %v7412_v16 = vpack.c.bf16 %v7145_v1, %v7144_v29 }
 0x32c   : > { %10975 = vrot.lane.b32.xlu0 %v10974_v60, %s11518_s20  ;;  %v4463_v26 = vsel %vm4335_vm13, %v4269_v34, %v4399_v14  ;;  %v14597_v10 = vpop.f32.mrb[129].mxu0  ;;  %v10696_v20 = vpop.permute.xlu0 %10695  ;;  %v10713_v53 = vunpack.i.h.bf16 %v14560_v0  ;;  %v10722_v21 = vunpack.i.l.bf16 %v14577_v18  ;;  %v11004_v33 = vpack.i.bf16 %v5247_v28, %v5246_v43  ;;  %v5311_v0 = vld [vmem:[#allocation2 + $0x290] sm:$0xff] }
 0x32d   : > { %v4751_v11 = vsel %vm498_vm2, 0.0, %v4621_v63  ;;  %v4622_v49 = vrot.slane %v4463_v26, 7  ;;  %v14603_v24 = vpop.f32.mrb[130].mxu0  ;;  %v10698_v32 = vunpack.i.h.bf16 %v10696_v20  ;;  %v10697_v2 = vunpack.i.l.bf16 %v10696_v20 }
 0x32e   : > { %11020 = vrot.lane.b32.xlu1 %v10974_v60, %s11520_s27  ;;  %4877 = vst.msk [vmem:[#allocation2 + $0x330] sm:$0xff] %vm355_vm0, %v4751_v11  ;;  %v14610_v22 = vpop.f32.mrb[131].mxu0  ;;  %v14612_v30 = vpop.permute.xlu1 %10740  ;;  %v10733_v54 = vunpack.i.h.bf16 %v14591_v37  ;;  %v10732_v17 = vunpack.i.l.bf16 %v14591_v37  ;;  %v7019_v18 = vsel %vm355_vm0, %v4907_v38, %v10713_v53  ;;  %v7018_v14 = vsel %vm355_vm0, %v4906_v61, %v10712_v12 }
 0x32f   : > { %v4623_v15 = vsel %vm498_vm2, %v4621_v63, %v4622_v49  ;;  %v4783_v52 = vsel %vm498_vm2, %v4622_v49, 0.0  ;;  %v7336_v45 = vsel %vm3094_vm4, %v7272_v62, %v10697_v2  ;;  %v7337_v56 = vsel %vm3094_vm4, %v7273_v5, %v10698_v32  ;;  %v5163_v63 = vld [vmem:[#allocation2 + $0x159] sm:$0xff]  ;;  %v5374_v49 = vld [vmem:[#allocation2 + $0x289] sm:$0xff] }
 0x330   : > { %10985 = vrot.lane.b32.xlu0 %v10984_v55, %s11520_s27  ;;  %4879 = vst.msk [vmem:[#allocation2 + $0x340] sm:$0x3] %vm358_vm1, %v4783_v52  ;;  %v10706_v48 = vpop.permute.xlu0 %10705  ;;  %v7413_v60 = vpack.c.bf16 %v7337_v56, %v7336_v45  ;;  %v11014_v40 = vpack.i.bf16 %v5311_v0, %v5310_v19  ;;  %v7082_v7 = vsel %vm3029_vm3, %v7018_v14, %v10722_v21  ;;  %v5248_v56 = vld [vmem:[#allocation2 + $0x28a] sm:$0xff]  ;;  %vm11523_vm1 = vmmov 0  }
 0x331   : > { %4878 = vst.msk [vmem:[#allocation2 + $0x338] sm:$0xff] %vm355_vm0, %v4623_v15  ;;  %v10708_v47 = vunpack.i.h.bf16 %v10706_v48  ;;  %v10707_v34 = vunpack.i.l.bf16 %v10706_v48  ;;  %v7083_v26 = vsel %vm3029_vm3, %v7019_v18, %v10723_v36  ;;  %v7146_v1 = vsel %vm3094_vm4, %v7082_v7, %v10732_v17  ;;  %v5249_v48 = vld [vmem:[#allocation2 + $0x292] sm:$0xff] }
 0x332   : > { %11030 = vrot.lane.b32.xlu1 %v10984_v55, %s11521_s17  ;;  %v14624_v46 = vpop.permute.xlu1 %10750  ;;  %7847 = vmatprep.mubr.bf16.mxu1 %v7413_v60  ;;  %v7147_v50 = vsel %vm3094_vm4, %v7083_v26, %v10733_v54  ;;  %v11024_v15 = vpack.i.bf16 %v5375_v25, %v5374_v49  ;;  %v10742_v60 = vunpack.i.l.bf16 %v14612_v30  ;;  %v11034_v53 = vpack.i.bf16 %v5249_v48, %v5248_v56  ;;  %v5165_v18 = vld [vmem:[#allocation2 + $0x171] sm:$0xff] }
 0x333   : > { %v14626_v13 = vpop.f32.mrb[132].mxu0  ;;  %7848 = vmatmul.mubr.bf16.gmra.mrb[112].mxu1 %v7412_v16  ;;  %v7211_v37 = vsel %vm355_vm0, %v5163_v63, %v10708_v47  ;;  %v7210_v55 = vsel %vm355_vm0, %v5162_v4, %v10707_v34  ;;  %v7415_v5 = vpack.c.bf16 %v7147_v50, %v7146_v1  ;;  %v10753_v16 = vunpack.i.h.bf16 %v14624_v46  ;;  %v4909_v47 = vld [vmem:[#allocation2 + $0x158] sm:$0xff]  ;;  %v5251_v56 = vld [vmem:[#allocation2 + $0x2aa] sm:$0xff] }
 0x334   : > { %10995 = vrot.lane.b32.xlu0 %v10994_v8, %s11521_s17  ;;  %v14631_v3 = vpop.f32.mrb[133].mxu0  ;;  %v10716_v39 = vpop.permute.xlu0 %10715  ;;  %v10752_v43 = vunpack.i.l.bf16 %v14624_v46  ;;  %vm8451_vm2 = vcmask 1041409  }
 0x335   : > { %v14636_v9 = vpop.f32.mrb[134].mxu0  ;;  %v10718_v6 = vunpack.i.h.bf16 %v10716_v39  ;;  %v10717_v23 = vunpack.i.l.bf16 %v10716_v39  ;;  %v5313_v39 = vld [vmem:[#allocation2 + $0x2a8] sm:$0xff] }
 0x336   : > { %11040 = vrot.lane.b32.xlu1 %v10994_v8, %s11518_s20  ;;  %v14638_v44 = vpop.f32.mrb[135].mxu0  ;;  %v14640_v51 = vpop.permute.xlu1 %10760  ;;  %v10743_v8 = vunpack.i.h.bf16 %v14612_v30 }
 0x337   : > { %v7274_v20 = vsel %vm3029_vm3, %v7210_v55, %v10717_v23  ;;  %v7275_v29 = vsel %vm3029_vm3, %v7211_v37, %v10718_v6  ;;  %v10763_v34 = vunpack.i.h.bf16 %v14640_v51  ;;  %v10762_v30 = vunpack.i.l.bf16 %v14640_v51  ;;  %v5312_v6 = vld [vmem:[#allocation2 + $0x2a0] sm:$0xff]  ;;  %v5164_v23 = vld [vmem:[#allocation2 + $0x169] sm:$0xff] }
 0x338   : > { %11005 = vrot.lane.b32.xlu0 %v11004_v33, %s11518_s20  ;;  %v10726_v58 = vpop.permute.xlu0 %10725  ;;  %v7021_v46 = vsel %vm355_vm0, %v4909_v47, %v10743_v8  ;;  %v11044_v19 = vpack.i.bf16 %v5313_v39, %v5312_v6 }
 0x339   : > { %v10728_v31 = vunpack.i.h.bf16 %v10726_v58  ;;  %v10727_v57 = vunpack.i.l.bf16 %v10726_v58  ;;  %v7085_v63 = vsel %vm3029_vm3, %v7021_v46, %v10753_v16 }
 0x33a   : > { %11050 = vrot.lane.b32.xlu1 %v11004_v33, %s11520_s27  ;;  %v14652_v11 = vpop.permute.xlu1 %10770  ;;  %v4908_v33 = vld [vmem:[#allocation2 + $0x150] sm:$0xff] }
 0x33b   : > { %v14654_v35 = vpop.f32.mrb[136].mxu0  ;;  %v7338_v32 = vsel %vm3094_vm4, %v7274_v20, %v10727_v57  ;;  %v7339_v2 = vsel %vm3094_vm4, %v7275_v29, %v10728_v31  ;;  %v7020_v54 = vsel %vm355_vm0, %v4908_v33, %v10742_v60  ;;  %v5376_v31 = vld [vmem:[#allocation2 + $0x2a1] sm:$0xff]  ;;  %v5377_v57 = vld [vmem:[#allocation2 + $0x2a9] sm:$0xff]  ;;  %v7149_v29 = vsel %vm3094_vm4, %v7085_v63, %v10763_v34 }
 0x33c   : > { %11015 = vrot.lane.b32.xlu0 %v11014_v40, %s11520_s27  ;;  %v14661_v27 = vpop.f32.mrb[137].mxu0  ;;  %v7416_v52 = vpack.c.bf16 %v7339_v2, %v7338_v32  ;;  %v7084_v4 = vsel %vm3029_vm3, %v7020_v54, %v10752_v43  ;;  %v11054_v2 = vpack.i.bf16 %v5377_v57, %v5376_v31  ;;  %v10773_v8 = vunpack.i.h.bf16 %v14652_v11 }
 0x33d   : > { %v14666_v42 = vpop.f32.mrb[138].mxu0  ;;  %v7148_v20 = vsel %vm3094_vm4, %v7084_v4, %v10762_v30  ;;  %v10772_v60 = vunpack.i.l.bf16 %v14652_v11  ;;  %v5315_v11 = vld [vmem:[#allocation2 + $0x2c0] sm:$0xff]  ;;  %v4910_v30 = vld [vmem:[#allocation2 + $0x168] sm:$0xff] }
 0x33e   : > { %11060 = vrot.lane.b32.xlu1 %v11014_v40, %s11521_s17  ;;  %v10736_v59 = vpop.permute.xlu0 %10735  ;;  %v14668_v62 = vpop.f32.mrb[139].mxu0  ;;  %7855 = vmatprep.mubr.bf16.mxu1 %v7416_v52 }
 0x33f   : > { %v14670_v45 = vpop.permute.xlu1 %10780  ;;  %7856 = vmatmul.mubr.bf16.gmra.mrb[116].mxu1 %v7415_v5  ;;  %v10738_v12 = vunpack.i.h.bf16 %v10736_v59  ;;  %v10737_v36 = vunpack.i.l.bf16 %v10736_v59  ;;  %v5250_v5 = vld [vmem:[#allocation2 + $0x2a2] sm:$0xff] }
 0x340   : > { %11025 = vrot.lane.b32.xlu0 %v11024_v15, %s11521_s17  ;;  %v10783_v43 = vunpack.i.h.bf16 %v14670_v45 }
 0x341   : > { %v7213_v58 = vsel %vm355_vm0, %v5165_v18, %v10738_v12  ;;  %v7212_v40 = vsel %vm355_vm0, %v5164_v23, %v10737_v36  ;;  %v11064_v36 = vpack.i.bf16 %v5251_v56, %v5250_v5  ;;  %v7022_v23 = vsel %vm355_vm0, %v4910_v30, %v10772_v60  ;;  %v5314_v18 = vld [vmem:[#allocation2 + $0x2b8] sm:$0xff]  ;;  %v4912_v5 = vld [vmem:[#allocation2 + $0x1b0] sm:$0xff] }
 0x342   : > { %11070 = vrot.lane.b32.xlu1 %v11024_v15, %s11518_s20  ;;  %v10746_v28 = vpop.permute.xlu0 %10745  ;;  %v7418_v15 = vpack.c.bf16 %v7149_v29, %v7148_v20  ;;  %v11074_v63 = vpack.i.bf16 %v5315_v11, %v5314_v18  ;;  %v5252_v30 = vld [vmem:[#allocation2 + $0x2ba] sm:$0xff] }
 0x343   : > { %v14678_v21 = vpop.permute.xlu1 %10790  ;;  %v10748_v0 = vunpack.i.h.bf16 %v10746_v28  ;;  %v10747_v61 = vunpack.i.l.bf16 %v10746_v28  ;;  %v14682_v38 = vpop.f32.mrb[140].mxu0  ;;  %v10782_v28 = vunpack.i.l.bf16 %v14670_v45 }
 0x344   : > { %11035 = vrot.lane.b32.xlu0 %v11034_v53, %s11518_s20  ;;  %v14687_v17 = vpop.f32.mrb[141].mxu0  ;;  %v10792_v46 = vunpack.i.l.bf16 %v14678_v21 }
 0x345   : > { %v14690_v14 = vpop.f32.mrb[142].mxu0  ;;  %v7276_v49 = vsel %vm3029_vm3, %v7212_v40, %v10747_v61  ;;  %v7277_v25 = vsel %vm3029_vm3, %v7213_v58, %v10748_v0  ;;  %v4911_v0 = vld [vmem:[#allocation2 + $0x170] sm:$0xff]  ;;  %v10793_v61 = vunpack.i.h.bf16 %v14678_v21  ;;  %v7086_v58 = vsel %vm3029_vm3, %v7022_v23, %v10782_v28 }
 0x346   : > { %11080 = vrot.lane.b32.xlu1 %v11034_v53, %s11520_s27  ;;  %v10756_v51 = vpop.permute.xlu0 %10755  ;;  %v14696_v37 = vpop.f32.mrb[143].mxu0  ;;  %v7023_v45 = vsel %vm355_vm0, %v4911_v0, %v10773_v8  ;;  %v5253_v0 = vld [vmem:[#allocation2 + $0x2c2] sm:$0xff] }
 0x347   : > { %v10758_v7 = vunpack.i.h.bf16 %v10756_v51  ;;  %v10757_v26 = vunpack.i.l.bf16 %v10756_v51  ;;  %v5166_v51 = vld [vmem:[#allocation2 + $0x181] sm:$0xff]  ;;  %v7087_v40 = vsel %vm3029_vm3, %v7023_v45, %v10783_v43  ;;  %v11094_v45 = vpack.i.bf16 %v5253_v0, %v5252_v30 }
 0x348   : > { %v14698_v55 = vpop.permute.xlu1 %10800  ;;  %11045 = vrot.lane.b32.xlu0 %v11044_v19, %s11520_s27 }
 0x349   : > { %v7340_v1 = vsel %vm3094_vm4, %v7276_v49, %v10757_v26  ;;  %v7341_v50 = vsel %vm3094_vm4, %v7277_v25, %v10758_v7  ;;  %v5378_v49 = vld [vmem:[#allocation2 + $0x2b9] sm:$0xff]  ;;  %v5379_v25 = vld [vmem:[#allocation2 + $0x2c1] sm:$0xff]  ;;  %v10803_v56 = vunpack.i.h.bf16 %v14698_v55  ;;  %v10802_v8 = vunpack.i.l.bf16 %v14698_v55 }
 0x34a   : > { %11090 = vrot.lane.b32.xlu1 %v11044_v19, %s11521_s17  ;;  %v10766_v32 = vpop.permute.xlu0 %10765  ;;  %v7419_v59 = vpack.c.bf16 %v7341_v50, %v7340_v1  ;;  %v5167_v19 = vld [vmem:[#allocation2 + $0x189] sm:$0xff]  ;;  %v7150_v50 = vsel %vm3094_vm4, %v7086_v58, %v10792_v46  ;;  %v11084_v28 = vpack.i.bf16 %v5379_v25, %v5378_v49  ;;  %v5169_v49 = vld [vmem:[#allocation2 + $0x1d1] sm:$0xff] }
 0x34b   : > { %v14710_v48 = vpop.f32.mrb[144].mxu0  ;;  %v10768_v39 = vunpack.i.h.bf16 %v10766_v32  ;;  %v10767_v33 = vunpack.i.l.bf16 %v10766_v32  ;;  %v7151_v32 = vsel %vm3094_vm4, %v7087_v40, %v10793_v61 }
 0x34c   : > { %v14708_v52 = vpop.permute.xlu1 %10810  ;;  %11055 = vrot.lane.b32.xlu0 %v11054_v2, %s11521_s17  ;;  %7863 = vmatprep.mubr.bf16.mxu1 %v7419_v59  ;;  %v14715_v16 = vpop.f32.mrb[145].mxu0 }
 0x34d   : > { %7864 = vmatmul.mubr.bf16.gmra.mrb[120].mxu1 %v7418_v15  ;;  %v14720_v53 = vpop.f32.mrb[146].mxu0  ;;  %v7215_v21 = vsel %vm355_vm0, %v5167_v19, %v10768_v39  ;;  %v7214_v7 = vsel %vm355_vm0, %v5166_v51, %v10767_v33  ;;  %v7421_v33 = vpack.c.bf16 %v7151_v32, %v7150_v50  ;;  %v10813_v61 = vunpack.i.h.bf16 %v14708_v52  ;;  %v5317_v19 = vld [vmem:[#allocation2 + $0x2d8] sm:$0xff] }
 0x34e   : > { %11100 = vrot.lane.b32.xlu1 %v11054_v2, %s11518_s20  ;;  %v10776_v12 = vpop.permute.xlu0 %10775  ;;  %v14722_v47 = vpop.f32.mrb[147].mxu0  ;;  %v10812_v55 = vunpack.i.l.bf16 %v14708_v52 }
 0x34f   : > { %v10778_v54 = vunpack.i.h.bf16 %v10776_v12  ;;  %v10777_v6 = vunpack.i.l.bf16 %v10776_v12 }
 0x350   : > { %v14724_v34 = vpop.permute.xlu1 %10820  ;;  %11065 = vrot.lane.b32.xlu0 %v11064_v36, %s11518_s20 }
 0x351   : > { %v7278_v29 = vsel %vm3029_vm3, %v7214_v7, %v10777_v6  ;;  %v7279_v1 = vsel %vm3029_vm3, %v7215_v21, %v10778_v54  ;;  %v7024_v54 = vsel %vm355_vm0, %v4912_v5, %v10802_v8  ;;  %v5316_v7 = vld [vmem:[#allocation2 + $0x2d0] sm:$0xff] }
 0x352   : > { %11110 = vrot.lane.b32.xlu1 %v11064_v36, %s11520_s27  ;;  %v10786_v4 = vpop.permute.xlu0 %10785  ;;  %v4913_v36 = vld [vmem:[#allocation2 + $0x1b8] sm:$0xff]  ;;  %v7088_v40 = vsel %vm3029_vm3, %v7024_v54, %v10812_v55 }
 0x353   : > { %v10788_v26 = vunpack.i.h.bf16 %v10786_v4  ;;  %v10787_v31 = vunpack.i.l.bf16 %v10786_v4  ;;  %v14738_v20 = vpop.f32.mrb[148].mxu0  ;;  %v7025_v46 = vsel %vm355_vm0, %v4913_v36, %v10803_v56  ;;  %v10823_v4 = vunpack.i.h.bf16 %v14724_v34  ;;  %v5380_v5 = vld [vmem:[#allocation2 + $0x2d1] sm:$0xff]  ;;  %v5381_v56 = vld [vmem:[#allocation2 + $0x2d9] sm:$0xff] }
 0x354   : > { %v14736_v57 = vpop.permute.xlu1 %10830  ;;  %11075 = vrot.lane.b32.xlu0 %v11074_v63, %s11520_s27  ;;  %v14745_v2 = vpop.f32.mrb[149].mxu0  ;;  %v7089_v21 = vsel %vm3029_vm3, %v7025_v46, %v10813_v61  ;;  %v11114_v55 = vpack.i.bf16 %v5381_v56, %v5380_v5 }
 0x355   : > { %v7342_v59 = vsel %vm3094_vm4, %v7278_v29, %v10787_v31  ;;  %v7343_v15 = vsel %vm3094_vm4, %v7279_v1, %v10788_v26  ;;  %v14752_v60 = vpop.f32.mrb[150].mxu0  ;;  %v5168_v31 = vld [vmem:[#allocation2 + $0x1c9] sm:$0xff]  ;;  %v11104_v29 = vpack.i.bf16 %v5317_v19, %v5316_v7  ;;  %v7153_v36 = vsel %vm3094_vm4, %v7089_v21, %v10823_v4 }
 0x356   : > { %11120 = vrot.lane.b32.xlu1 %v11074_v63, %s11521_s17  ;;  %v10796_v43 = vpop.permute.xlu0 %10795  ;;  %v7422_v12 = vpack.c.bf16 %v7343_v15, %v7342_v59  ;;  %v14754_v39 = vpop.f32.mrb[151].mxu0  ;;  %v10822_v63 = vunpack.i.l.bf16 %v14724_v34  ;;  %v10832_v19 = vunpack.i.l.bf16 %v14736_v57 }
 0x357   : > { %v10798_v23 = vunpack.i.h.bf16 %v10796_v43  ;;  %v10797_v18 = vunpack.i.l.bf16 %v10796_v43 }
 0x358   : > { %v14756_v11 = vpop.permute.xlu1 %10840  ;;  %11085 = vrot.lane.b32.xlu0 %v11084_v28, %s11521_s17  ;;  %7871 = vmatprep.mubr.bf16.mxu1 %v7422_v12  ;;  %v7152_v12 = vsel %vm3094_vm4, %v7088_v40, %v10822_v63 }
 0x359   : > { %7872 = vmatmul.mubr.bf16.gmra.mrb[124].mxu1 %v7421_v33  ;;  %v7217_v34 = vsel %vm355_vm0, %v5169_v49, %v10798_v23  ;;  %v7216_v50 = vsel %vm355_vm0, %v5168_v31, %v10797_v18  ;;  %v7424_v54 = vpack.c.bf16 %v7153_v36, %v7152_v12  ;;  %v5255_v23 = vld [vmem:[#allocation2 + $0x2da] sm:$0xff]  ;;  %v10833_v18 = vunpack.i.h.bf16 %v14736_v57  ;;  %v5319_v31 = vld [vmem:[#allocation2 + $0x2f0] sm:$0xff]  ;;  %v4914_v49 = vld [vmem:[#allocation2 + $0x1c8] sm:$0xff] }
 0x35a   : > { %11130 = vrot.lane.b32.xlu1 %v11084_v28, %s11518_s20  ;;  %v10806_v6 = vpop.permute.xlu0 %10805  ;;  %v10843_v4 = vunpack.i.h.bf16 %v14756_v11  ;;  %v10842_v63 = vunpack.i.l.bf16 %v14756_v11  ;;  %v7026_v11 = vsel %vm355_vm0, %v4914_v49, %v10832_v19  ;;  %v5171_v12 = vld [vmem:[#allocation2 + $0x1e9] sm:$0xff] }
 0x35b   : > { %v10808_v58 = vunpack.i.h.bf16 %v10806_v6  ;;  %v10807_v52 = vunpack.i.l.bf16 %v10806_v6 }
 0x35c   : > { %v14764_v51 = vpop.permute.xlu1 %10850  ;;  %11095 = vrot.lane.b32.xlu0 %v11094_v45, %s11518_s20  ;;  %v14772_v26 = vpop.f32.mrb[152].mxu0  ;;  %v7090_v56 = vsel %vm3029_vm3, %v7026_v11, %v10842_v63  ;;  %v5257_v11 = vld [vmem:[#allocation2 + $0x2f2] sm:$0xff] }
 0x35d   : > { %v14774_v1 = vpop.f32.mrb[153].mxu0  ;;  %v7280_v43 = vsel %vm3029_vm3, %v7216_v50, %v10807_v52  ;;  %v7281_v28 = vsel %vm3029_vm3, %v7217_v34, %v10808_v58  ;;  %v10852_v57 = vunpack.i.l.bf16 %v14764_v51 }
 0x35e   : > { %11140 = vrot.lane.b32.xlu1 %v11094_v45, %s11520_s27  ;;  %v10816_v25 = vpop.permute.xlu0 %10815  ;;  %v14780_v8 = vpop.f32.mrb[154].mxu0  ;;  %v5254_v45 = vld [vmem:[#allocation2 + $0x2d2] sm:$0xff] }
 0x35f   : > { %v10818_v32 = vunpack.i.h.bf16 %v10816_v25  ;;  %v10817_v59 = vunpack.i.l.bf16 %v10816_v25  ;;  %v14787_v33 = vpop.f32.mrb[155].mxu0  ;;  %v11124_v52 = vpack.i.bf16 %v5255_v23, %v5254_v45  ;;  %v4915_v25 = vld [vmem:[#allocation2 + $0x1d0] sm:$0xff]  ;;  %v7154_v63 = vsel %vm3094_vm4, %v7090_v56, %v10852_v57 }
 0x360   : > { %v14778_v15 = vpop.permute.xlu1 %10860  ;;  %11105 = vrot.lane.b32.xlu0 %v11104_v29, %s11520_s27  ;;  %v5382_v45 = vld [vmem:[#allocation2 + $0x2e9] sm:$0xff]  ;;  %v5383_v23 = vld [vmem:[#allocation2 + $0x2f1] sm:$0xff] }
 0x361   : > { %v7344_v30 = vsel %vm3094_vm4, %v7280_v43, %v10817_v59  ;;  %v7345_v0 = vsel %vm3094_vm4, %v7281_v28, %v10818_v32  ;;  %v7027_v32 = vsel %vm355_vm0, %v4915_v25, %v10833_v18  ;;  %v5318_v59 = vld [vmem:[#allocation2 + $0x2e8] sm:$0xff]  ;;  %v11144_v49 = vpack.i.bf16 %v5383_v23, %v5382_v45 }
 0x362   : > { %11150 = vrot.lane.b32.xlu1 %v11104_v29, %s11521_s17  ;;  %v10826_v61 = vpop.permute.xlu0 %10825  ;;  %v7425_v46 = vpack.c.bf16 %v7345_v0, %v7344_v30  ;;  %v10853_v29 = vunpack.i.h.bf16 %v14764_v51  ;;  %v7091_v43 = vsel %vm3029_vm3, %v7027_v32, %v10843_v4  ;;  %v5170_v28 = vld [vmem:[#allocation2 + $0x1e1] sm:$0xff]  ;;  %v11134_v36 = vpack.i.bf16 %v5319_v31, %v5318_v59 }
 0x363   : > { %v10828_v40 = vunpack.i.h.bf16 %v10826_v61  ;;  %v10827_v21 = vunpack.i.l.bf16 %v10826_v61  ;;  %v10862_v57 = vunpack.i.l.bf16 %v14778_v15 }
 0x364   : > { %v14792_v6 = vpop.permute.xlu1 %10870  ;;  %11115 = vrot.lane.b32.xlu0 %v11114_v55, %s11521_s17  ;;  %7879 = vmatprep.mubr.bf16.mxu1 %v7425_v46 }
 0x365   : > { %7880 = vmatmul.mubr.bf16.gmra.mrb[128].mxu1 %v7424_v54  ;;  %v7219_v0 = vsel %vm355_vm0, %v5171_v12, %v10828_v40  ;;  %v7218_v61 = vsel %vm355_vm0, %v5170_v28, %v10827_v21  ;;  %v10873_v59 = vunpack.i.h.bf16 %v14792_v6  ;;  %v10872_v56 = vunpack.i.l.bf16 %v14792_v6  ;;  %v14846_v6 = vld [vmem:[%s16178_s4] ss:$0 sm:$0xff] }
 0x366   : > { %11160 = vrot.lane.b32.xlu1 %v11114_v55, %s11518_s20  ;;  %v10836_v58 = vpop.permute.xlu0 %10835  ;;  %v14808_v5 = vpop.f32.mrb[156].mxu0 }
 0x367   : > { %v10838_v34 = vunpack.i.h.bf16 %v10836_v58  ;;  %v10837_v50 = vunpack.i.l.bf16 %v10836_v58  ;;  %v14812_v30 = vpop.f32.mrb[157].mxu0  ;;  %v7155_v58 = vsel %vm3094_vm4, %v7091_v43, %v10853_v29  ;;  %v10863_v29 = vunpack.i.h.bf16 %v14778_v15 }
 0x368   : > { %v14800_v7 = vpop.permute.xlu1 %10880  ;;  %11125 = vrot.lane.b32.xlu0 %v11124_v52, %s11518_s20  ;;  %v14818_v18 = vpop.f32.mrb[158].mxu0 }
 0x369   : > { %v7282_v19 = vsel %vm3029_vm3, %v7218_v61, %v10837_v50  ;;  %v7283_v4 = vsel %vm3029_vm3, %v7219_v0, %v10838_v34  ;;  %v7427_v50 = vpack.c.bf16 %v7155_v58, %v7154_v63  ;;  %v5256_v34 = vld [vmem:[#allocation2 + $0x2ea] sm:$0xff]  ;;  %v4916_v61 = vld [vmem:[#allocation2 + $0x1e0] sm:$0xff]  ;;  %v10882_v15 = vunpack.i.l.bf16 %v14800_v7 }
 0x36a   : > { %11170 = vrot.lane.b32.xlu1 %v11124_v52, %s11520_s27  ;;  %v10846_v51 = vpop.permute.xlu0 %10845  ;;  %v14825_v52 = vpop.f32.mrb[159].mxu0  ;;  %v11154_v12 = vpack.i.bf16 %v5257_v11, %v5256_v34  ;;  %v5321_v0 = vld [vmem:[#allocation2 + $0x308] sm:$0xff]  ;;  %v5320_v58 = vld [vmem:[#allocation2 + $0x300] sm:$0xff] }
 0x36b   : > { %v10848_v55 = vunpack.i.h.bf16 %v10846_v51  ;;  %v10847_v46 = vunpack.i.l.bf16 %v10846_v51  ;;  %v5173_v63 = vld [vmem:[#allocation2 + $0x201] sm:$0xff] }
 0x36c   : > { %v14816_v54 = vpop.permute.xlu1 %10890  ;;  %11135 = vrot.lane.b32.xlu0 %v11134_v36, %s11520_s27 }
 0x36d   : > { %v7346_v40 = vsel %vm3094_vm4, %v7282_v19, %v10847_v46  ;;  %v7347_v21 = vsel %vm3094_vm4, %v7283_v4, %v10848_v55  ;;  %v4917_v55 = vld [vmem:[#allocation2 + $0x1e8] sm:$0xff]  ;;  %v10883_v46 = vunpack.i.h.bf16 %v14800_v7  ;;  %v7028_v4 = vsel %vm355_vm0, %v4916_v61, %v10862_v57 }
 0x36e   : > { %11180 = vrot.lane.b32.xlu1 %v11134_v36, %s11521_s17  ;;  %v10856_v31 = vpop.permute.xlu0 %10855  ;;  %v7428_v25 = vpack.c.bf16 %v7347_v21, %v7346_v40  ;;  %v7029_v19 = vsel %vm355_vm0, %v4917_v55, %v10863_v29  ;;  %v7092_v40 = vsel %vm3029_vm3, %v7028_v4, %v10872_v56  ;;  %v5172_v21 = vld [vmem:[#allocation2 + $0x1f9] sm:$0xff]  ;;  %v5385_v55 = vld [vmem:[#allocation2 + $0x309] sm:$0xff] }
 0x36f   : > { %v10858_v43 = vunpack.i.h.bf16 %v10856_v31  ;;  %v10857_v51 = vunpack.i.l.bf16 %v10856_v31  ;;  %v7093_v7 = vsel %vm3029_vm3, %v7029_v19, %v10873_v59 }
 0x370   : > { %v14830_v32 = vpop.permute.xlu1 %10900  ;;  %11145 = vrot.lane.b32.xlu0 %v11144_v49, %s11521_s17  ;;  %7887 = vmatprep.mubr.bf16.mxu1 %v7428_v25  ;;  %v11164_v25 = vpack.i.bf16 %v5321_v0, %v5320_v58  ;;  %v7156_v0 = vsel %vm3094_vm4, %v7092_v40, %v10882_v15  ;;  %v5259_v40 = vld [vmem:[#allocation2 + $0x30a] sm:$0xff] }
 0x371   : > { %7888 = vmatmul.mubr.bf16.gmra.mrb[132].mxu1 %v7427_v50  ;;  %v7221_v31 = vsel %vm355_vm0, %v5173_v63, %v10858_v43  ;;  %v7220_v34 = vsel %vm355_vm0, %v5172_v21, %v10857_v51  ;;  %v7157_v51 = vsel %vm3094_vm4, %v7093_v7, %v10883_v46  ;;  %v10892_v7 = vunpack.i.l.bf16 %v14816_v54 }
 0x372   : > { %11190 = vrot.lane.b32.xlu1 %v11144_v49, %s11518_s20  ;;  %v10866_v28 = vpop.permute.xlu0 %10865  ;;  %v7430_v15 = vpack.c.bf16 %v7157_v51, %v7156_v0 }
 0x373   : > { %v10868_v45 = vunpack.i.h.bf16 %v10866_v28  ;;  %v10867_v23 = vunpack.i.l.bf16 %v10866_v28 }
 0x374   : > { %v14838_v36 = vpop.permute.xlu1 %10910  ;;  %11155 = vrot.lane.b32.xlu0 %v11154_v12, %s11518_s20  ;;  %v7753_v50 = vpop.f32.mrb[64].mxu1 }
 0x375   : > { %v7754_v57 = vadd.f32 %v14846_v6, %v7753_v50  ;;  %v7755_v28 = vpop.f32.mrb[65].mxu1  ;;  %v7284_v56 = vsel %vm3029_vm3, %v7220_v34, %v10867_v23  ;;  %v7285_v59 = vsel %vm3029_vm3, %v7221_v31, %v10868_v45  ;;  %v10902_v50 = vunpack.i.l.bf16 %v14830_v32 }
 0x376   : > { %11200 = vrot.lane.b32.xlu1 %v11154_v12, %s11520_s27  ;;  %v10876_v49 = vpop.permute.xlu0 %10875  ;;  %v5384_v12 = vld [vmem:[#allocation2 + $0x301] sm:$0xff]  ;;  %v7756_v43 = vpop.f32.mrb[66].mxu1  ;;  %v10912_v51 = vunpack.i.l.bf16 %v14838_v36 }
 0x377   : > { %v10878_v11 = vunpack.i.h.bf16 %v10876_v49  ;;  %v10877_v29 = vunpack.i.l.bf16 %v10876_v49  ;;  %v14864_v19 = vadd.f32 %v14597_v10, %v7754_v57  ;;  %v7757_v4 = vadd.f32 %v14846_v6, %v7756_v43  ;;  %v7758_v63 = vpop.f32.mrb[67].mxu1  ;;  %v5258_v10 = vld [vmem:[#allocation2 + $0x302] sm:$0xff] }
 0x378   : > { %v14856_v61 = vpop.permute.xlu1 %10920  ;;  %11165 = vrot.lane.b32.xlu0 %v11164_v25, %s11520_s27  ;;  %v11174_v21 = vpack.i.bf16 %v5385_v55, %v5384_v12  ;;  %v5323_v28 = vld [vmem:[#allocation2 + $0x320] sm:$0xff]  ;;  %v4918_v12 = vld [vmem:[#allocation2 + $0x1f8] sm:$0xff]  ;;  %v10903_v55 = vunpack.i.h.bf16 %v14830_v32 }
 0x379   : > { %16327 = vst [vmem:[#allocation25_spill] sm:$0xff] %v14864_v19  ;;  %v7348_v58 = vsel %vm3094_vm4, %v7284_v56, %v10877_v29  ;;  %v7349_v23 = vsel %vm3094_vm4, %v7285_v59, %v10878_v11  ;;  %v14871_v49 = vadd.f32 %v14610_v22, %v7757_v4  ;;  %v11184_v22 = vpack.i.bf16 %v5259_v40, %v5258_v10  ;;  %v4919_v43 = vld [vmem:[#allocation2 + $0x200] sm:$0xff]  ;;  %v5322_v4 = vld [vmem:[#allocation2 + $0x318] sm:$0xff] }
 0x37a   : > { %11210 = vrot.lane.b32.xlu1 %v11164_v25, %s11521_s17  ;;  %v10886_v45 = vpop.permute.xlu0 %10885  ;;  %v7431_v31 = vpack.c.bf16 %v7349_v23, %v7348_v58  ;;  %v10893_v25 = vunpack.i.h.bf16 %v14816_v54  ;;  %v7030_v0 = vsel %vm355_vm0, %v4918_v12, %v10892_v7  ;;  %v10913_v54 = vunpack.i.h.bf16 %v14838_v36  ;;  %v5174_v23 = vld [vmem:[#allocation2 + $0x211] sm:$0xff]  ;;  %v5175_v32 = vld [vmem:[#allocation2 + $0x219] sm:$0xff]  ;;  %v5387_v12 = vld [vmem:[#allocation2 + $0x321] sm:$0xff] }
 0x37b   : > { %v10888_v11 = vunpack.i.h.bf16 %v10886_v45  ;;  %v10887_v29 = vunpack.i.l.bf16 %v10886_v45  ;;  %v7094_v58 = vsel %vm3029_vm3, %v7030_v0, %v10902_v50  ;;  %v5386_v36 = vld [vmem:[#allocation2 + $0x319] sm:$0xff] }
 0x37c   : > { %v14873_v46 = vpop.permute.xlu1 %10930  ;;  %11175 = vrot.lane.b32.xlu0 %v11174_v21, %s11521_s17  ;;  %7895 = vmatprep.mubr.bf16.mxu1 %v7431_v31  ;;  %v7031_v63 = vsel %vm355_vm0, %v4919_v43, %v10893_v25 }
 0x37d   : > { %7896 = vmatmul.mubr.bf16.gmra.mrb[136].mxu1 %v7430_v15  ;;  %v7223_v31 = vsel %vm355_vm0, %v5175_v32, %v10888_v11  ;;  %v7222_v15 = vsel %vm355_vm0, %v5174_v23, %v10887_v29  ;;  %v11204_v32 = vpack.i.bf16 %v5387_v12, %v5386_v36  ;;  %v10932_v36 = vunpack.i.l.bf16 %v14873_v46 }
 0x37e   : > { %11220 = vrot.lane.b32.xlu1 %v11174_v21, %s11518_s20  ;;  %v10896_v34 = vpop.permute.xlu0 %10895  ;;  %v11194_v21 = vpack.i.bf16 %v5323_v28, %v5322_v4  ;;  %v7158_v4 = vsel %vm3094_vm4, %v7094_v58, %v10912_v51  ;;  %v10922_v58 = vunpack.i.l.bf16 %v14856_v61 }
 0x37f   : > { %v10898_v56 = vunpack.i.h.bf16 %v10896_v34  ;;  %v10897_v59 = vunpack.i.l.bf16 %v10896_v34 }
 0x380   : > { %v14880_v57 = vpop.permute.xlu1 %10940  ;;  %11185 = vrot.lane.b32.xlu0 %v11184_v22, %s11518_s20 }
 0x381   : > { %v7286_v25 = vsel %vm3029_vm3, %v7222_v15, %v10897_v59  ;;  %v7287_v50 = vsel %vm3029_vm3, %v7223_v31, %v10898_v56  ;;  %v5261_v15 = vld [vmem:[#allocation2 + $0x322] sm:$0xff] }
 0x382   : > { %11230 = vrot.lane.b32.xlu1 %v11184_v22, %s11520_s27  ;;  %v10906_v45 = vpop.permute.xlu0 %10905  ;;  %v7761_v7 = vpop.f32.mrb[68].mxu1  ;;  %v7095_v22 = vsel %vm3029_vm3, %v7031_v63, %v10903_v55 }
 0x383   : > { %v10908_v10 = vunpack.i.h.bf16 %v10906_v45  ;;  %v10907_v40 = vunpack.i.l.bf16 %v10906_v45  ;;  %v7762_v28 = vadd.f32 %v14846_v6, %v7761_v7  ;;  %v7763_v11 = vpop.f32.mrb[69].mxu1  ;;  %v7159_v55 = vsel %vm3094_vm4, %v7095_v22, %v10913_v54 }
 0x384   : > { %v14892_v34 = vpop.permute.xlu1 %10950  ;;  %11195 = vrot.lane.b32.xlu0 %v11194_v21, %s11520_s27  ;;  %v7764_v43 = vpop.f32.mrb[70].mxu1  ;;  %v7433_v51 = vpack.c.bf16 %v7159_v55, %v7158_v4  ;;  %v10933_v7 = vunpack.i.h.bf16 %v14873_v46  ;;  %v10942_v4 = vunpack.i.l.bf16 %v14880_v57 }
 0x385   : > { %v7350_v29 = vsel %vm3094_vm4, %v7286_v25, %v10907_v40  ;;  %v7351_v0 = vsel %vm3094_vm4, %v7287_v50, %v10908_v10  ;;  %v14905_v59 = vadd.f32 %v14594_v41, %v7762_v28  ;;  %v7765_v63 = vadd.f32 %v14846_v6, %v7764_v43  ;;  %v7766_v23 = vpop.f32.mrb[71].mxu1  ;;  %v14914_v54 = vpop.f32.mrb[160].mxu0  ;;  %v4920_v43 = vld [vmem:[#allocation2 + $0x210] sm:$0xff] }
 0x386   : > { %11240 = vrot.lane.b32.xlu1 %v11194_v21, %s11521_s17  ;;  %v10916_v56 = vpop.permute.xlu0 %10915  ;;  %v7434_v45 = vpack.c.bf16 %v7351_v0, %v7350_v29  ;;  %v5260_v21 = vld [vmem:[#allocation2 + $0x31a] sm:$0xff]  ;;  %v10923_v41 = vunpack.i.h.bf16 %v14856_v61  ;;  %v14918_v10 = vpop.f32.mrb[161].mxu0  ;;  %v10943_v0 = vunpack.i.h.bf16 %v14880_v57  ;;  %v7032_v23 = vsel %vm355_vm0, %v4920_v43, %v10922_v58  ;;  %v5388_v58 = vld [vmem:[#allocation2 + $0x331] sm:$0xff] }
 0x387   : > { %16328 = vst [vmem:[#allocation26_spill] sm:$0xff] %v14905_v59  ;;  %v14911_v40 = vadd.f32 %v14603_v24, %v7765_v63  ;;  %v11214_v12 = vpack.i.bf16 %v5261_v15, %v5260_v21  ;;  %v14923_v22 = vpop.f32.mrb[162].mxu0  ;;  %v10918_v25 = vunpack.i.h.bf16 %v10916_v56  ;;  %v10917_v50 = vunpack.i.l.bf16 %v10916_v56  ;;  %v5325_v61 = vld [vmem:[#allocation2 + $0x338] sm:$0xff]  ;;  %v5324_v56 = vld [vmem:[#allocation2 + $0x330] sm:$0xff] }
 0x388   : > { %v14908_v31 = vpop.permute.xlu1 %10960  ;;  %11205 = vrot.lane.b32.xlu0 %v11204_v32, %s11521_s17  ;;  %7903 = vmatprep.mubr.bf16.mxu1 %v7434_v45  ;;  %v14925_v28 = vpop.f32.mrb[163].mxu0  ;;  %v4921_v29 = vld [vmem:[#allocation2 + $0x218] sm:$0xff]  ;;  %v5176_v21 = vld [vmem:[#allocation2 + $0x229] sm:$0xff] }
 0x389   : > { %16329 = vst [vmem:[#allocation9_spill] sm:$0xff] %v14911_v40  ;;  %7904 = vmatmul.mubr.bf16.gmra.mrb[140].mxu1 %v7433_v51  ;;  %v7033_v63 = vsel %vm355_vm0, %v4921_v29, %v10923_v41  ;;  %v5177_v15 = vld [vmem:[#allocation2 + $0x231] sm:$0xff]  ;;  %v11224_v40 = vpack.i.bf16 %v5325_v61, %v5324_v56  ;;  %v5389_v43 = vld [vmem:[#allocation2 + $0x339] sm:$0xff] }
 0x38a   : > { %11250 = vrot.lane.b32.xlu1 %v11204_v32, %s11518_s20  ;;  %v10926_v24 = vpop.permute.xlu0 %10925  ;;  %v7096_v32 = vsel %vm3029_vm3, %v7032_v23, %v10932_v36  ;;  %v7097_v45 = vsel %vm3029_vm3, %v7033_v63, %v10933_v7  ;;  %v7225_v57 = vsel %vm355_vm0, %v5177_v15, %v10918_v25 }
 0x38b   : > { %v10928_v55 = vunpack.i.h.bf16 %v10926_v24  ;;  %v10927_v46 = vunpack.i.l.bf16 %v10926_v24  ;;  %v7224_v24 = vsel %vm355_vm0, %v5176_v21, %v10917_v50  ;;  %v7160_v7 = vsel %vm3094_vm4, %v7096_v32, %v10942_v4  ;;  %v5262_v4 = vld [vmem:[#allocation2 + $0x332] sm:$0xff]  ;;  %v5263_v32 = vld [vmem:[#allocation2 + $0x33a] sm:$0xff] }
 0x38c   : > { %v14927_v11 = vpop.permute.xlu1 %10970  ;;  %11215 = vrot.lane.b32.xlu0 %v11214_v12, %s11518_s20  ;;  %v7161_v61 = vsel %vm3094_vm4, %v7097_v45, %v10943_v0  ;;  %v5327_v45 = vld [vmem:[#allocation2 + $0x350] sm:$0xff] }
 0x38d   : > { %v7289_v36 = vsel %vm3029_vm3, %v7225_v57, %v10928_v55  ;;  %v7436_v15 = vpack.c.bf16 %v7161_v61, %v7160_v7  ;;  %v10953_v57 = vunpack.i.h.bf16 %v14892_v34 }
 0x38e   : > { %11260 = vrot.lane.b32.xlu1 %v11214_v12, %s11520_s27  ;;  %v10936_v51 = vpop.permute.xlu0 %10935  ;;  %v7288_v12 = vsel %vm3029_vm3, %v7224_v24, %v10927_v46  ;;  %v11234_v46 = vpack.i.bf16 %v5389_v43, %v5388_v58  ;;  %v10952_v24 = vunpack.i.l.bf16 %v14892_v34  ;;  %v10963_v58 = vunpack.i.h.bf16 %v14908_v31 }
 0x38f   : > { %v10938_v59 = vunpack.i.h.bf16 %v10936_v51  ;;  %v10937_v19 = vunpack.i.l.bf16 %v10936_v51  ;;  %v7769_v29 = vpop.f32.mrb[72].mxu1  ;;  %v10962_v43 = vunpack.i.l.bf16 %v14908_v31  ;;  %v10973_v34 = vunpack.i.h.bf16 %v14927_v11 }
 0x390   : > { %v14939_v41 = vpop.permute.xlu1 %10980  ;;  %11225 = vrot.lane.b32.xlu0 %v11224_v40, %s11520_s27  ;;  %v7770_v63 = vadd.f32 %v14846_v6, %v7769_v29  ;;  %v7771_v23 = vpop.f32.mrb[73].mxu1 }
 0x391   : > { %v7352_v25 = vsel %vm3094_vm4, %v7288_v12, %v10937_v19  ;;  %v7353_v50 = vsel %vm3094_vm4, %v7289_v36, %v10938_v59  ;;  %v7772_v55 = vpop.f32.mrb[74].mxu1  ;;  %v5326_v59 = vld [vmem:[#allocation2 + $0x348] sm:$0xff]  ;;  %v11244_v36 = vpack.i.bf16 %v5263_v32, %v5262_v4 }
 0x392   : > { %11270 = vrot.lane.b32.xlu1 %v11224_v40, %s11521_s17  ;;  %v10946_v56 = vpop.permute.xlu0 %10945  ;;  %v7437_v21 = vpack.c.bf16 %v7353_v50, %v7352_v25  ;;  %v14953_v0 = vadd.f32 %v14631_v3, %v7770_v63  ;;  %v7773_v40 = vadd.f32 %v14846_v6, %v7772_v55  ;;  %v7774_v19 = vpop.f32.mrb[75].mxu1  ;;  %v11254_v25 = vpack.i.bf16 %v5327_v45, %v5326_v59  ;;  %v5390_v50 = vld [vmem:[#allocation2 + $0x349] sm:$0xff]  ;;  %v5391_v63 = vld [vmem:[#allocation2 + $0x351] sm:$0xff] }
 0x393   : > { %v10948_v7 = vunpack.i.h.bf16 %v10946_v56  ;;  %v10947_v61 = vunpack.i.l.bf16 %v10946_v56  ;;  %v4922_v23 = vld [vmem:[#allocation2 + $0x228] sm:$0xff] }
 0x394   : > { %v14950_v51 = vpop.permute.xlu1 %10990  ;;  %16330 = vst [vmem:[#allocation11_spill] sm:$0xff] %v14953_v0  ;;  %11235 = vrot.lane.b32.xlu0 %v11234_v46, %s11521_s17  ;;  %7911 = vmatprep.mubr.bf16.mxu1 %v7437_v21  ;;  %v14962_v3 = vadd.f32 %v14638_v44, %v7773_v40  ;;  %v4923_v46 = vld [vmem:[#allocation2 + $0x230] sm:$0xff]  ;;  %v10972_v21 = vunpack.i.l.bf16 %v14927_v11  ;;  %v5178_v40 = vld [vmem:[#allocation2 + $0x241] sm:$0xff]  ;;  %v11264_v11 = vpack.i.bf16 %v5391_v63, %v5390_v50 }
 0x395   : > { %7912 = vmatmul.mubr.bf16.gmra.mrb[144].mxu1 %v7436_v15  ;;  %v7035_v44 = vsel %vm355_vm0, %v4923_v46, %v10953_v57  ;;  %v7034_v15 = vsel %vm355_vm0, %v4922_v23, %v10952_v24  ;;  %v5179_v19 = vld [vmem:[#allocation2 + $0x249] sm:$0xff] }
 0x396   : > { %16331 = vst [vmem:[#allocation27_spill] sm:$0xff] %v14962_v3  ;;  %v10956_v12 = vpop.permute.xlu0 %10955  ;;  %v7098_v4 = vsel %vm3029_vm3, %v7034_v15, %v10962_v43  ;;  %v7099_v32 = vsel %vm3029_vm3, %v7035_v44, %v10963_v58 }
 0x397   : > { %v10958_v55 = vunpack.i.h.bf16 %v10956_v12  ;;  %v10957_v31 = vunpack.i.l.bf16 %v10956_v12  ;;  %v7227_v12 = vsel %vm355_vm0, %v5179_v19, %v10948_v7  ;;  %v7162_v44 = vsel %vm3094_vm4, %v7098_v4, %v10972_v21 }
 0x398   : > { %v14964_v29 = vpop.permute.xlu1 %11000  ;;  %11245 = vrot.lane.b32.xlu0 %v11244_v36, %s11518_s20  ;;  %v14971_v56 = vpop.f32.mrb[164].mxu0  ;;  %v7226_v36 = vsel %vm355_vm0, %v5178_v40, %v10947_v61  ;;  %v7163_v50 = vsel %vm3094_vm4, %v7099_v32, %v10973_v34  ;;  %v10983_v32 = vunpack.i.h.bf16 %v14939_v41 }
 0x399   : > { %v14975_v45 = vpop.f32.mrb[165].mxu0  ;;  %v7290_v43 = vsel %vm3029_vm3, %v7226_v36, %v10957_v31  ;;  %v7291_v58 = vsel %vm3029_vm3, %v7227_v12, %v10958_v55  ;;  %v7439_v4 = vpack.c.bf16 %v7163_v50, %v7162_v44  ;;  %v10982_v12 = vunpack.i.l.bf16 %v14939_v41  ;;  %v4924_v44 = vld [vmem:[#allocation2 + $0x240] sm:$0xff] }
 0x39a   : > { %v10966_v59 = vpop.permute.xlu0 %10965  ;;  %v14981_v24 = vpop.f32.mrb[166].mxu0  ;;  %v10992_v36 = vunpack.i.l.bf16 %v14950_v51  ;;  %v11003_v50 = vunpack.i.h.bf16 %v14964_v29 }
 0x39b   : > { %v10968_v3 = vunpack.i.h.bf16 %v10966_v59  ;;  %v10967_v57 = vunpack.i.l.bf16 %v10966_v59  ;;  %v7777_v23 = vpop.f32.mrb[76].mxu1  ;;  %v14988_v7 = vpop.f32.mrb[167].mxu0 }
 0x39c   : > { %v14979_v46 = vpop.permute.xlu1 %11010  ;;  %11255 = vrot.lane.b32.xlu0 %v11254_v25, %s11520_s27  ;;  %v7778_v61 = vadd.f32 %v14846_v6, %v7777_v23  ;;  %v7779_v63 = vpop.f32.mrb[77].mxu1 }
 0x39d   : > { %v7354_v15 = vsel %vm3094_vm4, %v7290_v43, %v10967_v57  ;;  %v7355_v40 = vsel %vm3094_vm4, %v7291_v58, %v10968_v3  ;;  %v7780_v31 = vpop.f32.mrb[78].mxu1 }
 0x39e   : > { %v10976_v19 = vpop.permute.xlu0 %10975  ;;  %v7440_v59 = vpack.c.bf16 %v7355_v40, %v7354_v15  ;;  %v14994_v55 = vadd.f32 %v14626_v13, %v7778_v61  ;;  %v7781_v25 = vadd.f32 %v14846_v6, %v7780_v31  ;;  %v7782_v21 = vpop.f32.mrb[79].mxu1  ;;  %v10993_v13 = vunpack.i.h.bf16 %v14950_v51  ;;  %v5180_v31 = vld [vmem:[#allocation2 + $0x259] sm:$0xff] }
 0x39f   : > { %v10978_v43 = vunpack.i.h.bf16 %v10976_v19  ;;  %v10977_v58 = vunpack.i.l.bf16 %v10976_v19  ;;  %v11002_v61 = vunpack.i.l.bf16 %v14964_v29  ;;  %v7036_v15 = vsel %vm355_vm0, %v4924_v44, %v10982_v12  ;;  %v5181_v19 = vld [vmem:[#allocation2 + $0x261] sm:$0xff] }
 0x3a0   : > { %16332 = vst [vmem:[#allocation10_spill] sm:$0xff] %v14994_v55  ;;  %v14997_v34 = vpop.permute.xlu1 %11020  ;;  %11265 = vrot.lane.b32.xlu0 %v11264_v11, %s11521_s17  ;;  %7919 = vmatprep.mubr.bf16.mxu1 %v7440_v59  ;;  %v15003_v3 = vadd.f32 %v14636_v9, %v7781_v25  ;;  %v4925_v11 = vld [vmem:[#allocation2 + $0x248] sm:$0xff]  ;;  %v7100_v40 = vsel %vm3029_vm3, %v7036_v15, %v10992_v36  ;;  %s16106_s17 = scalar_lea.hbm %s16183_s9, %s9058_s23 }
 0x3a1   : > { %7920 = vmatmul.mubr.bf16.gmra.mrb[148].mxu1 %v7439_v4  ;;  %v7037_v9 = vsel %vm355_vm0, %v4925_v11, %v10983_v32  ;;  %v7229_v25 = vsel %vm355_vm0, %v5181_v19, %v10978_v43  ;;  %v7228_v21 = vsel %vm355_vm0, %v5180_v31, %v10977_v58  ;;  %v7164_v12 = vsel %vm3094_vm4, %v7100_v40, %v11002_v61 }
 0x3a2   : > { %16333 = vst [vmem:[#allocation13_spill] sm:$0xff] %v15003_v3  ;;  %v10986_v57 = vpop.permute.xlu0 %10985  ;;  %v7101_v51 = vsel %vm3029_vm3, %v7037_v9, %v10993_v13 }
 0x3a3   : > { %v10988_v41 = vunpack.i.h.bf16 %v10986_v57  ;;  %v10987_v63 = vunpack.i.l.bf16 %v10986_v57  ;;  %v7165_v36 = vsel %vm3094_vm4, %v7101_v51, %v11003_v50  ;;  %v11023_v51 = vunpack.i.h.bf16 %v14997_v34 }
 0x3a4   : > { %v15007_v23 = vpop.permute.xlu1 %11030  ;;  %v7442_v19 = vpack.c.bf16 %v7165_v36, %v7164_v12 }
 0x3a5   : > { %v7292_v57 = vsel %vm3029_vm3, %v7228_v21, %v10987_v63  ;;  %v7293_v32 = vsel %vm3029_vm3, %v7229_v25, %v10988_v41  ;;  %v11012_v63 = vunpack.i.l.bf16 %v14979_v46  ;;  %v11022_v25 = vunpack.i.l.bf16 %v14997_v34 }
 0x3a6   : > { %v10996_v59 = vpop.permute.xlu0 %10995 }
 0x3a7   : > { %v10998_v4 = vunpack.i.h.bf16 %v10996_v59  ;;  %v10997_v3 = vunpack.i.l.bf16 %v10996_v59  ;;  %v7785_v13 = vpop.f32.mrb[80].mxu1 }
 0x3a8   : > { %v15017_v29 = vpop.permute.xlu1 %11040  ;;  %v7786_v43 = vadd.f32 %v14846_v6, %v7785_v13  ;;  %v7787_v58 = vpop.f32.mrb[81].mxu1  ;;  %v4927_v13 = vld [vmem:[#allocation2 + $0x260] sm:$0xff] }
 0x3a9   : > { %v7356_v44 = vsel %vm3094_vm4, %v7292_v57, %v10997_v3  ;;  %v7357_v11 = vsel %vm3094_vm4, %v7293_v32, %v10998_v4  ;;  %v7788_v31 = vpop.f32.mrb[82].mxu1  ;;  %v11013_v3 = vunpack.i.h.bf16 %v14979_v46  ;;  %v4926_v46 = vld [vmem:[#allocation2 + $0x258] sm:$0xff] }
 0x3aa   : > { %v11006_v9 = vpop.permute.xlu0 %11005  ;;  %v7443_v15 = vpack.c.bf16 %v7357_v11, %v7356_v44  ;;  %v15029_v41 = vadd.f32 %v14661_v27, %v7786_v43  ;;  %v7789_v61 = vadd.f32 %v14846_v6, %v7788_v31  ;;  %v7790_v50 = vpop.f32.mrb[83].mxu1  ;;  %v11033_v44 = vunpack.i.h.bf16 %v15007_v23 }
 0x3ab   : > { %v11008_v57 = vunpack.i.h.bf16 %v11006_v9  ;;  %v11007_v32 = vunpack.i.l.bf16 %v11006_v9  ;;  %v11032_v11 = vunpack.i.l.bf16 %v15007_v23 }
 0x3ac   : > { %v15026_v59 = vpop.permute.xlu1 %11050  ;;  %16334 = vst [vmem:[#allocation15_spill] sm:$0xff] %v15029_v41  ;;  %7927 = vmatprep.mubr.bf16.mxu1 %v7443_v15  ;;  %v15034_v40 = vpop.f32.mrb[168].mxu0  ;;  %v15039_v21 = vadd.f32 %v14668_v62, %v7789_v61  ;;  %v7039_v62 = vsel %vm355_vm0, %v4927_v13, %v11013_v3  ;;  %v7038_v15 = vsel %vm355_vm0, %v4926_v46, %v11012_v63  ;;  %v5183_v61 = vld [vmem:[#allocation2 + $0x279] sm:$0xff] }
 0x3ad   : > { %7928 = vmatmul.mubr.bf16.gmra.mrb[152].mxu1 %v7442_v19  ;;  %v15041_v4 = vpop.f32.mrb[169].mxu0  ;;  %v7102_v9 = vsel %vm3029_vm3, %v7038_v15, %v11022_v25  ;;  %v7103_v31 = vsel %vm3029_vm3, %v7039_v62, %v11023_v51  ;;  %v5182_v19 = vld [vmem:[#allocation2 + $0x271] sm:$0xff] }
 0x3ae   : > { %16335 = vst [vmem:[#allocation12_spill] sm:$0xff] %v15039_v21  ;;  %v11016_v27 = vpop.permute.xlu0 %11015  ;;  %v15045_v36 = vpop.f32.mrb[170].mxu0  ;;  %v7231_v21 = vsel %vm355_vm0, %v5183_v61, %v11008_v57  ;;  %v7230_v41 = vsel %vm355_vm0, %v5182_v19, %v11007_v32  ;;  %v7166_v25 = vsel %vm3094_vm4, %v7102_v9, %v11032_v11  ;;  %v7167_v51 = vsel %vm3094_vm4, %v7103_v31, %v11033_v44 }
 0x3af   : > { %v11018_v43 = vunpack.i.h.bf16 %v11016_v27  ;;  %v11017_v34 = vunpack.i.l.bf16 %v11016_v27  ;;  %v15049_v58 = vpop.f32.mrb[171].mxu0  ;;  %v11043_v44 = vunpack.i.h.bf16 %v15017_v29 }
 0x3b0   : > { %v15043_v12 = vpop.permute.xlu1 %11060 }
 0x3b1   : > { %v7294_v0 = vsel %vm3029_vm3, %v7230_v41, %v11017_v34  ;;  %v7295_v3 = vsel %vm3029_vm3, %v7231_v21, %v11018_v43  ;;  %v7445_v43 = vpack.c.bf16 %v7167_v51, %v7166_v25  ;;  %v11042_v34 = vunpack.i.l.bf16 %v15017_v29 }
 0x3b2   : > { %v11026_v50 = vpop.permute.xlu0 %11025  ;;  %v11063_v25 = vunpack.i.h.bf16 %v15043_v12  ;;  %v11062_v51 = vunpack.i.l.bf16 %v15043_v12 }
 0x3b3   : > { %v11028_v23 = vunpack.i.h.bf16 %v11026_v50  ;;  %v11027_v55 = vunpack.i.l.bf16 %v11026_v50  ;;  %v7793_v63 = vpop.f32.mrb[84].mxu1 }
 0x3b4   : > { %v15057_v27 = vpop.permute.xlu1 %11070  ;;  %v7794_v46 = vadd.f32 %v14846_v6, %v7793_v63  ;;  %v7795_v13 = vpop.f32.mrb[85].mxu1  ;;  %v4929_v63 = vld [vmem:[#allocation2 + $0x278] sm:$0xff] }
 0x3b5   : > { %v7358_v57 = vsel %vm3094_vm4, %v7294_v0, %v11027_v55  ;;  %v7359_v32 = vsel %vm3094_vm4, %v7295_v3, %v11028_v23  ;;  %v7796_v15 = vpop.f32.mrb[86].mxu1  ;;  %v11053_v55 = vunpack.i.h.bf16 %v15026_v59  ;;  %v4928_v3 = vld [vmem:[#allocation2 + $0x270] sm:$0xff] }
 0x3b6   : > { %v11036_v62 = vpop.permute.xlu0 %11035  ;;  %v7446_v19 = vpack.c.bf16 %v7359_v32, %v7358_v57  ;;  %v15067_v61 = vadd.f32 %v14654_v35, %v7794_v46  ;;  %v7797_v41 = vadd.f32 %v14846_v6, %v7796_v15  ;;  %v7798_v21 = vpop.f32.mrb[87].mxu1  ;;  %v11052_v35 = vunpack.i.l.bf16 %v15026_v59  ;;  %v5184_v32 = vld [vmem:[#allocation2 + $0x289] sm:$0xff] }
 0x3b7   : > { %v11038_v31 = vunpack.i.h.bf16 %v11036_v62  ;;  %v11037_v50 = vunpack.i.l.bf16 %v11036_v62  ;;  %v7040_v13 = vsel %vm355_vm0, %v4928_v3, %v11042_v34  ;;  %v5185_v62 = vld [vmem:[#allocation2 + $0x291] sm:$0xff] }
 0x3b8   : > { %16336 = vst [vmem:[#allocation14_spill] sm:$0xff] %v15067_v61  ;;  %v15070_v11 = vpop.permute.xlu1 %11080  ;;  %7935 = vmatprep.mubr.bf16.mxu1 %v7446_v19  ;;  %v15075_v0 = vadd.f32 %v14666_v42, %v7797_v41  ;;  %v7041_v42 = vsel %vm355_vm0, %v4929_v63, %v11043_v44  ;;  %v7104_v57 = vsel %vm3029_vm3, %v7040_v13, %v11052_v35 }
 0x3b9   : > { %7936 = vmatmul.mubr.bf16.gmra.mrb[156].mxu1 %v7445_v43  ;;  %v7105_v59 = vsel %vm3029_vm3, %v7041_v42, %v11053_v55  ;;  %v7233_v19 = vsel %vm355_vm0, %v5185_v62, %v11038_v31  ;;  %v7232_v41 = vsel %vm355_vm0, %v5184_v32, %v11037_v50  ;;  %v7168_v34 = vsel %vm3094_vm4, %v7104_v57, %v11062_v51 }
 0x3ba   : > { %16337 = vst [vmem:[#allocation16_spill] sm:$0xff] %v15075_v0  ;;  %v11046_v9 = vpop.permute.xlu0 %11045  ;;  %v7169_v35 = vsel %vm3094_vm4, %v7105_v59, %v11063_v25  ;;  %v11073_v57 = vunpack.i.h.bf16 %v15057_v27  ;;  %v11072_v59 = vunpack.i.l.bf16 %v15057_v27  ;;  %v4930_v27 = vld [vmem:[#allocation2 + $0x288] sm:$0xff] }
 0x3bb   : > { %v11048_v29 = vunpack.i.h.bf16 %v11046_v9  ;;  %v11047_v46 = vunpack.i.l.bf16 %v11046_v9  ;;  %v7448_v62 = vpack.c.bf16 %v7169_v35, %v7168_v34 }
 0x3bc   : > { %v15079_v23 = vpop.permute.xlu1 %11090 }
 0x3bd   : > { %v7296_v9 = vsel %vm3029_vm3, %v7232_v41, %v11047_v46  ;;  %v7297_v44 = vsel %vm3029_vm3, %v7233_v19, %v11048_v29  ;;  %v11083_v41 = vunpack.i.h.bf16 %v15070_v11 }
 0x3be   : > { %v11056_v15 = vpop.permute.xlu0 %11055 }
 0x3bf   : > { %v11058_v21 = vunpack.i.h.bf16 %v11056_v15  ;;  %v11057_v43 = vunpack.i.l.bf16 %v11056_v15  ;;  %v7801_v55 = vpop.f32.mrb[88].mxu1 }
 0x3c0   : > { %v15089_v12 = vpop.permute.xlu1 %11100  ;;  %v7802_v31 = vadd.f32 %v14846_v6, %v7801_v55  ;;  %v7803_v50 = vpop.f32.mrb[89].mxu1 }
 0x3c1   : > { %v7360_v3 = vsel %vm3094_vm4, %v7296_v9, %v11057_v43  ;;  %v7361_v63 = vsel %vm3094_vm4, %v7297_v44, %v11058_v21  ;;  %v7804_v32 = vpop.f32.mrb[90].mxu1  ;;  %v11082_v21 = vunpack.i.l.bf16 %v15070_v11 }
 0x3c2   : > { %v11066_v42 = vpop.permute.xlu0 %11065  ;;  %v7449_v13 = vpack.c.bf16 %v7361_v63, %v7360_v3  ;;  %v15101_v29 = vadd.f32 %v14687_v17, %v7802_v31  ;;  %v7805_v51 = vadd.f32 %v14846_v6, %v7804_v32  ;;  %v7806_v25 = vpop.f32.mrb[91].mxu1  ;;  %v4931_v3 = vld [vmem:[#allocation2 + $0x290] sm:$0xff]  ;;  %v11093_v63 = vunpack.i.h.bf16 %v15079_v23 }
 0x3c3   : > { %v15104_v46 = vpop.f32.mrb[172].mxu0  ;;  %v11068_v44 = vunpack.i.h.bf16 %v11066_v42  ;;  %v11067_v34 = vunpack.i.l.bf16 %v11066_v42  ;;  %v11092_v31 = vunpack.i.l.bf16 %v15079_v23 }
 0x3c4   : > { %v15098_v15 = vpop.permute.xlu1 %11110  ;;  %16338 = vst [vmem:[#allocation17_spill] sm:$0xff] %v15101_v29  ;;  %7943 = vmatprep.mubr.bf16.mxu1 %v7449_v13  ;;  %v15108_v19 = vpop.f32.mrb[173].mxu0  ;;  %v15113_v17 = vadd.f32 %v14696_v37, %v7805_v51  ;;  %v7043_v37 = vsel %vm355_vm0, %v4931_v3, %v11073_v57  ;;  %v7042_v13 = vsel %vm355_vm0, %v4930_v27, %v11072_v59  ;;  %v5187_v51 = vld [vmem:[#allocation2 + $0x2a9] sm:$0xff] }
 0x3c5   : > { %7944 = vmatmul.mubr.bf16.gmra.mrb[160].mxu1 %v7448_v62  ;;  %v15115_v9 = vpop.f32.mrb[174].mxu0  ;;  %v7106_v32 = vsel %vm3029_vm3, %v7042_v13, %v11082_v21  ;;  %v7107_v42 = vsel %vm3029_vm3, %v7043_v37, %v11083_v41  ;;  %v5186_v62 = vld [vmem:[#allocation2 + $0x2a1] sm:$0xff] }
 0x3c6   : > { %16339 = vst [vmem:[#allocation19_spill] sm:$0xff] %v15113_v17  ;;  %v11076_v43 = vpop.permute.xlu0 %11075  ;;  %v15117_v35 = vpop.f32.mrb[175].mxu0  ;;  %v7235_v17 = vsel %vm355_vm0, %v5187_v51, %v11068_v44  ;;  %v7234_v29 = vsel %vm355_vm0, %v5186_v62, %v11067_v34  ;;  %v7170_v21 = vsel %vm3094_vm4, %v7106_v32, %v11092_v31  ;;  %v7171_v41 = vsel %vm3094_vm4, %v7107_v42, %v11093_v63 }
 0x3c7   : > { %v11078_v50 = vunpack.i.h.bf16 %v11076_v43  ;;  %v11077_v11 = vunpack.i.l.bf16 %v11076_v43  ;;  %v11103_v63 = vunpack.i.h.bf16 %v15089_v12 }
 0x3c8   : > { %v15119_v55 = vpop.permute.xlu1 %11120 }
 0x3c9   : > { %v7298_v43 = vsel %vm3029_vm3, %v7234_v29, %v11077_v11  ;;  %v7299_v57 = vsel %vm3029_vm3, %v7235_v17, %v11078_v50  ;;  %v7451_v50 = vpack.c.bf16 %v7171_v41, %v7170_v21  ;;  %v11102_v11 = vunpack.i.l.bf16 %v15089_v12 }
 0x3ca   : > { %v11086_v25 = vpop.permute.xlu0 %11085  ;;  %v7809_v59 = vpop.f32.mrb[92].mxu1  ;;  %v11123_v21 = vunpack.i.h.bf16 %v15119_v55  ;;  %v11122_v41 = vunpack.i.l.bf16 %v15119_v55 }
 0x3cb   : > { %v11088_v0 = vunpack.i.h.bf16 %v11086_v25  ;;  %v11087_v61 = vunpack.i.l.bf16 %v11086_v25  ;;  %v7810_v27 = vadd.f32 %v14846_v6, %v7809_v59  ;;  %v7811_v3 = vpop.f32.mrb[93].mxu1  ;;  %v4933_v59 = vld [vmem:[#allocation2 + $0x2a8] sm:$0xff] }
 0x3cc   : > { %v15129_v23 = vpop.permute.xlu1 %11130  ;;  %v7812_v13 = vpop.f32.mrb[94].mxu1 }
 0x3cd   : > { %v7362_v44 = vsel %vm3094_vm4, %v7298_v43, %v11087_v61  ;;  %v7363_v34 = vsel %vm3094_vm4, %v7299_v57, %v11088_v0  ;;  %v15139_v51 = vadd.f32 %v14682_v38, %v7810_v27  ;;  %v7813_v29 = vadd.f32 %v14846_v6, %v7812_v13  ;;  %v7814_v17 = vpop.f32.mrb[95].mxu1  ;;  %v4932_v57 = vld [vmem:[#allocation2 + $0x2a0] sm:$0xff] }
 0x3ce   : > { %v11096_v37 = vpop.permute.xlu0 %11095  ;;  %v7452_v62 = vpack.c.bf16 %v7363_v34, %v7362_v44  ;;  %v11113_v0 = vunpack.i.h.bf16 %v15098_v15  ;;  %v11112_v38 = vunpack.i.l.bf16 %v15098_v15  ;;  %v7044_v3 = vsel %vm355_vm0, %v4932_v57, %v11102_v11  ;;  %v5188_v34 = vld [vmem:[#allocation2 + $0x2b9] sm:$0xff] }
 0x3cf   : > { %16340 = vst [vmem:[#allocation21_spill] sm:$0xff] %v15139_v51  ;;  %v15147_v61 = vadd.f32 %v14690_v14, %v7813_v29  ;;  %v11098_v42 = vunpack.i.h.bf16 %v11096_v37  ;;  %v11097_v25 = vunpack.i.l.bf16 %v11096_v37  ;;  %v7045_v14 = vsel %vm355_vm0, %v4933_v59, %v11103_v63  ;;  %v5189_v37 = vld [vmem:[#allocation2 + $0x2c1] sm:$0xff] }
 0x3d0   : > { %v15142_v31 = vpop.permute.xlu1 %11140  ;;  %7951 = vmatprep.mubr.bf16.mxu1 %v7452_v62  ;;  %v7108_v44 = vsel %vm3029_vm3, %v7044_v3, %v11112_v38  ;;  %v7109_v15 = vsel %vm3029_vm3, %v7045_v14, %v11113_v0 }
 0x3d1   : > { %16341 = vst [vmem:[#allocation18_spill] sm:$0xff] %v15147_v61  ;;  %7952 = vmatmul.mubr.bf16.gmra.mrb[164].mxu1 %v7451_v50  ;;  %v7237_v62 = vsel %vm355_vm0, %v5189_v37, %v11098_v42  ;;  %v7236_v29 = vsel %vm355_vm0, %v5188_v34, %v11097_v25  ;;  %v7172_v63 = vsel %vm3094_vm4, %v7108_v44, %v11122_v41  ;;  %v11132_v44 = vunpack.i.l.bf16 %v15129_v23 }
 0x3d2   : > { %v11106_v32 = vpop.permute.xlu0 %11105  ;;  %v7173_v11 = vsel %vm3094_vm4, %v7109_v15, %v11123_v21  ;;  %v11133_v21 = vunpack.i.h.bf16 %v15129_v23 }
 0x3d3   : > { %v11108_v12 = vunpack.i.h.bf16 %v11106_v32  ;;  %v11107_v27 = vunpack.i.l.bf16 %v11106_v32 }
 0x3d4   : > { %v15151_v43 = vpop.permute.xlu1 %11150 }
 0x3d5   : > { %v7300_v55 = vsel %vm3029_vm3, %v7236_v29, %v11107_v27  ;;  %v7301_v32 = vsel %vm3029_vm3, %v7237_v62, %v11108_v12  ;;  %v7454_v27 = vpack.c.bf16 %v7173_v11, %v7172_v63  ;;  %v11143_v29 = vunpack.i.h.bf16 %v15142_v31  ;;  %v4934_v11 = vld [vmem:[#allocation2 + $0x2b8] sm:$0xff] }
 0x3d6   : > { %v11116_v13 = vpop.permute.xlu0 %11115 }
 0x3d7   : > { %v11118_v17 = vunpack.i.h.bf16 %v11116_v13  ;;  %v11117_v50 = vunpack.i.l.bf16 %v11116_v13  ;;  %v7817_v59 = vpop.f32.mrb[96].mxu1 }
 0x3d8   : > { %v15165_v38 = vpop.permute.xlu1 %11160  ;;  %v7818_v25 = vadd.f32 %v14846_v6, %v7817_v59  ;;  %v7819_v3 = vpop.f32.mrb[97].mxu1  ;;  %v11152_v59 = vunpack.i.l.bf16 %v15151_v43 }
 0x3d9   : > { %v7364_v0 = vsel %vm3094_vm4, %v7300_v55, %v11117_v50  ;;  %v7365_v57 = vsel %vm3094_vm4, %v7301_v32, %v11118_v17  ;;  %v15170_v34 = vpop.f32.mrb[176].mxu0  ;;  %v7820_v12 = vpop.f32.mrb[98].mxu1  ;;  %v11142_v17 = vunpack.i.l.bf16 %v15142_v31  ;;  %v7046_v31 = vsel %vm355_vm0, %v4934_v11, %v11132_v44 }
 0x3da   : > { %v11126_v42 = vpop.permute.xlu0 %11125  ;;  %v7455_v14 = vpack.c.bf16 %v7365_v57, %v7364_v0  ;;  %v15172_v41 = vpop.f32.mrb[177].mxu0  ;;  %v15177_v15 = vadd.f32 %v14715_v16, %v7818_v25  ;;  %v7821_v37 = vadd.f32 %v14846_v6, %v7820_v12  ;;  %v4935_v0 = vld [vmem:[#allocation2 + $0x2c0] sm:$0xff]  ;;  %v11153_v57 = vunpack.i.h.bf16 %v15151_v43  ;;  %v5190_v12 = vld [vmem:[#allocation2 + $0x2d1] sm:$0xff] }
 0x3db   : > { %v7822_v13 = vpop.f32.mrb[99].mxu1  ;;  %v15180_v62 = vpop.f32.mrb[178].mxu0  ;;  %v11128_v32 = vunpack.i.h.bf16 %v11126_v42  ;;  %v11127_v63 = vunpack.i.l.bf16 %v11126_v42  ;;  %v7047_v3 = vsel %vm355_vm0, %v4935_v0, %v11133_v21 }
 0x3dc   : > { %7959 = vmatprep.mubr.bf16.mxu1 %v7455_v14  ;;  %16342 = vst [vmem:[#allocation20_spill] sm:$0xff] %v15177_v15  ;;  %v15184_v50 = vpop.f32.mrb[179].mxu0  ;;  %v15187_v23 = vadd.f32 %v14722_v47, %v7821_v37  ;;  %v11171_v16 = vpop.permute.xlu1 %11170  ;;  %v7111_v42 = vsel %vm3029_vm3, %v7047_v3, %v11143_v29  ;;  %v5191_v47 = vld [vmem:[#allocation2 + $0x2d9] sm:$0xff] }
 0x3dd   : > { %7960 = vmatmul.mubr.bf16.gmra.mrb[168].mxu1 %v7454_v27  ;;  %v7110_v27 = vsel %vm3029_vm3, %v7046_v31, %v11142_v17  ;;  %v7239_v13 = vsel %vm355_vm0, %v5191_v47, %v11128_v32  ;;  %v7175_v17 = vsel %vm3094_vm4, %v7111_v42, %v11153_v57  ;;  %v11163_v57 = vunpack.i.h.bf16 %v15165_v38 }
 0x3de   : > { %v11136_v55 = vpop.permute.xlu0 %11135  ;;  %16343 = vst [vmem:[#allocation23_spill] sm:$0xff] %v15187_v23  ;;  %v7238_v23 = vsel %vm355_vm0, %v5190_v12, %v11127_v63  ;;  %v7174_v44 = vsel %vm3094_vm4, %v7110_v27, %v11152_v59  ;;  %v11162_v27 = vunpack.i.l.bf16 %v15165_v38  ;;  %v11172_v42 = vunpack.i.l.bf16 %v11171_v16 }
 0x3df   : > { %v11138_v14 = vunpack.i.h.bf16 %v11136_v55  ;;  %v11137_v25 = vunpack.i.l.bf16 %v11136_v55 }
 0x3e0   : > { %v11181_v43 = vpop.permute.xlu1 %11180 }
 0x3e1   : > { %v7302_v55 = vsel %vm3029_vm3, %v7238_v23, %v11137_v25  ;;  %v7303_v21 = vsel %vm3029_vm3, %v7239_v13, %v11138_v14  ;;  %v7457_v25 = vpack.c.bf16 %v7175_v17, %v7174_v44 }
 0x3e2   : > { %v11146_v37 = vpop.permute.xlu0 %11145 }
 0x3e3   : > { %v11148_v15 = vunpack.i.h.bf16 %v11146_v37  ;;  %v11147_v61 = vunpack.i.l.bf16 %v11146_v37  ;;  %v7825_v0 = vpop.f32.mrb[100].mxu1 }
 0x3e4   : > { %v7826_v29 = vadd.f32 %v14846_v6, %v7825_v0  ;;  %v7827_v11 = vpop.f32.mrb[101].mxu1  ;;  %v15207_v23 = vpop.permute.xlu1 %11190  ;;  %v4937_v0 = vld [vmem:[#allocation2 + $0x2d8] sm:$0xff] }
 0x3e5   : > { %v7366_v3 = vsel %vm3094_vm4, %v7302_v55, %v11147_v61  ;;  %v7367_v32 = vsel %vm3094_vm4, %v7303_v21, %v11148_v15  ;;  %v7828_v31 = vpop.f32.mrb[102].mxu1  ;;  %v11173_v15 = vunpack.i.h.bf16 %v11171_v16  ;;  %v4936_v21 = vld [vmem:[#allocation2 + $0x2d0] sm:$0xff]  ;;  %v7049_v11 = vsel %vm355_vm0, %v4937_v0, %v11163_v57 }
 0x3e6   : > { %v11156_v63 = vpop.permute.xlu0 %11155  ;;  %v7458_v12 = vpack.c.bf16 %v7367_v32, %v7366_v3  ;;  %v15205_v47 = vadd.f32 %v14710_v48, %v7826_v29  ;;  %v7829_v14 = vadd.f32 %v14846_v6, %v7828_v31  ;;  %v7830_v59 = vpop.f32.mrb[103].mxu1  ;;  %v11183_v6 = vunpack.i.h.bf16 %v11181_v43  ;;  %v5192_v32 = vld [vmem:[#allocation2 + $0x2e9] sm:$0xff]  ;;  %v5193_v16 = vld [vmem:[#allocation2 + $0x2f1] sm:$0xff] }
 0x3e7   : > { %v11158_v48 = vunpack.i.h.bf16 %v11156_v63  ;;  %v11157_v13 = vunpack.i.l.bf16 %v11156_v63  ;;  %v11182_v29 = vunpack.i.l.bf16 %v11181_v43  ;;  %v7048_v38 = vsel %vm355_vm0, %v4936_v21, %v11162_v27 }
 0x3e8   : > { %7967 = vmatprep.mubr.bf16.mxu1 %v7458_v12  ;;  %v15213_v61 = vadd.f32 %v14720_v53, %v7829_v14  ;;  %v11201_v55 = vpop.permute.xlu1 %11200  ;;  %v7112_v53 = vsel %vm3029_vm3, %v7048_v38, %v11172_v42  ;;  %v7113_v3 = vsel %vm3029_vm3, %v7049_v11, %v11173_v15  ;;  %v15228_v15 = vld [vmem:[%s16178_s4] ss:$0 sm:$0xff] }
 0x3e9   : > { %7968 = vmatmul.mubr.bf16.gmra.mrb[172].mxu1 %v7457_v25  ;;  %v7241_v63 = vsel %vm355_vm0, %v5193_v16, %v11158_v48  ;;  %v7240_v12 = vsel %vm355_vm0, %v5192_v32, %v11157_v13  ;;  %v7176_v27 = vsel %vm3094_vm4, %v7112_v53, %v11182_v29  ;;  %v7177_v42 = vsel %vm3094_vm4, %v7113_v3, %v11183_v6 }
 0x3ea   : > { %v11166_v37 = vpop.permute.xlu0 %11165  ;;  %v7460_v3 = vpack.c.bf16 %v7177_v42, %v7176_v27  ;;  %v11193_v32 = vunpack.i.h.bf16 %v15207_v23  ;;  %v11192_v16 = vunpack.i.l.bf16 %v15207_v23 }
 0x3eb   : > { %v11168_v44 = vunpack.i.h.bf16 %v11166_v37  ;;  %v11167_v17 = vunpack.i.l.bf16 %v11166_v37 }
 0x3ec   : > { %v11211_v43 = vpop.permute.xlu1 %11210 }
 0x3ed   : > { %v7304_v25 = vsel %vm3029_vm3, %v7240_v12, %v11167_v17  ;;  %v7305_v57 = vsel %vm3029_vm3, %v7241_v63, %v11168_v44  ;;  %v11203_v63 = vunpack.i.h.bf16 %v11201_v55  ;;  %v11202_v12 = vunpack.i.l.bf16 %v11201_v55  ;;  %v5195_v55 = vld [vmem:[#allocation2 + $0x309] sm:$0xff] }
 0x3ee   : > { %v11176_v31 = vpop.permute.xlu0 %11175  ;;  %v7833_v37 = vpop.f32.mrb[104].mxu1 }
 0x3ef   : > { %v11178_v14 = vunpack.i.h.bf16 %v11176_v31  ;;  %v11177_v59 = vunpack.i.l.bf16 %v11176_v31  ;;  %v7834_v48 = vadd.f32 %v15228_v15, %v7833_v37  ;;  %v7835_v13 = vpop.f32.mrb[105].mxu1  ;;  %v4939_v37 = vld [vmem:[#allocation2 + $0x2f0] sm:$0xff] }
 0x3f0   : > { %v7836_v11 = vpop.f32.mrb[106].mxu1  ;;  %v15236_v29 = vpop.permute.xlu1 %11220  ;;  %v11212_v13 = vunpack.i.l.bf16 %v11211_v43 }
 0x3f1   : > { %v7368_v21 = vsel %vm3094_vm4, %v7304_v25, %v11177_v59  ;;  %v7369_v0 = vsel %vm3094_vm4, %v7305_v57, %v11178_v14  ;;  %v15234_v38 = vadd.f32 %v14745_v2, %v7834_v48  ;;  %v7837_v6 = vadd.f32 %v15228_v15, %v7836_v11  ;;  %v7838_v53 = vpop.f32.mrb[107].mxu1  ;;  %v4938_v57 = vld [vmem:[#allocation2 + $0x2e8] sm:$0xff] }
 0x3f2   : > { %v11186_v17 = vpop.permute.xlu0 %11185  ;;  %v7461_v44 = vpack.c.bf16 %v7369_v0, %v7368_v21  ;;  %v11213_v48 = vunpack.i.h.bf16 %v11211_v43  ;;  %v7051_v21 = vsel %vm355_vm0, %v4939_v37, %v11193_v32  ;;  %v7050_v23 = vsel %vm355_vm0, %v4938_v57, %v11192_v16  ;;  %v5194_v11 = vld [vmem:[#allocation2 + $0x301] sm:$0xff] }
 0x3f3   : > { %v15242_v31 = vadd.f32 %v14754_v39, %v7837_v6  ;;  %v11188_v2 = vunpack.i.h.bf16 %v11186_v17  ;;  %v11187_v59 = vunpack.i.l.bf16 %v11186_v17  ;;  %v7114_v39 = vsel %vm3029_vm3, %v7050_v23, %v11202_v12 }
 0x3f4   : > { %7975 = vmatprep.mubr.bf16.mxu1 %v7461_v44  ;;  %v11231_v25 = vpop.permute.xlu1 %11230  ;;  %v7115_v0 = vsel %vm3029_vm3, %v7051_v21, %v11203_v63  ;;  %v7178_v16 = vsel %vm3094_vm4, %v7114_v39, %v11212_v13 }
 0x3f5   : > { %7976 = vmatmul.mubr.bf16.gmra.mrb[176].mxu1 %v7460_v3  ;;  %v7243_v17 = vsel %vm355_vm0, %v5195_v55, %v11188_v2  ;;  %v7242_v6 = vsel %vm355_vm0, %v5194_v11, %v11187_v59  ;;  %v7179_v12 = vsel %vm3094_vm4, %v7115_v0, %v11213_v48 }
 0x3f6   : > { %v11196_v14 = vpop.permute.xlu0 %11195  ;;  %v7463_v11 = vpack.c.bf16 %v7179_v12, %v7178_v16  ;;  %v4941_v16 = vld [vmem:[#allocation2 + $0x308] sm:$0xff] }
 0x3f7   : > { %v11198_v27 = vunpack.i.h.bf16 %v11196_v14  ;;  %v11197_v42 = vunpack.i.l.bf16 %v11196_v14 }
 0x3f8   : > { %v11241_v43 = vpop.permute.xlu1 %11240 }
 0x3f9   : > { %v7306_v14 = vsel %vm3029_vm3, %v7242_v6, %v11197_v42  ;;  %v7307_v32 = vsel %vm3029_vm3, %v7243_v17, %v11198_v27  ;;  %v11223_v42 = vunpack.i.h.bf16 %v15236_v29  ;;  %v11222_v27 = vunpack.i.l.bf16 %v15236_v29 }
 0x3fa   : > { %v11206_v44 = vpop.permute.xlu0 %11205  ;;  %v7841_v37 = vpop.f32.mrb[108].mxu1  ;;  %v11232_v17 = vunpack.i.l.bf16 %v11231_v25  ;;  %v11243_v29 = vunpack.i.h.bf16 %v11241_v43  ;;  %v11242_v12 = vunpack.i.l.bf16 %v11241_v43 }
 0x3fb   : > { %v11208_v53 = vunpack.i.h.bf16 %v11206_v44  ;;  %v11207_v3 = vunpack.i.l.bf16 %v11206_v44  ;;  %v7842_v59 = vadd.f32 %v15228_v15, %v7841_v37  ;;  %v7843_v23 = vpop.f32.mrb[109].mxu1  ;;  %v11233_v44 = vunpack.i.h.bf16 %v11231_v25 }
 0x3fc   : > { %v7844_v55 = vpop.f32.mrb[110].mxu1  ;;  %v15262_v48 = vpop.permute.xlu1 %11250  ;;  %v5197_v23 = vld [vmem:[#allocation2 + $0x321] sm:$0xff] }
 0x3fd   : > { %v7370_v63 = vsel %vm3094_vm4, %v7306_v14, %v11207_v3  ;;  %v7371_v57 = vsel %vm3094_vm4, %v7307_v32, %v11208_v53  ;;  %v15260_v13 = vadd.f32 %v14738_v20, %v7842_v59  ;;  %v7845_v39 = vadd.f32 %v15228_v15, %v7844_v55  ;;  %v7846_v0 = vpop.f32.mrb[111].mxu1  ;;  %v4940_v32 = vld [vmem:[#allocation2 + $0x300] sm:$0xff] }
 0x3fe   : > { %v11216_v21 = vpop.permute.xlu0 %11215  ;;  %v7464_v2 = vpack.c.bf16 %v7371_v57, %v7370_v63  ;;  %v7053_v57 = vsel %vm355_vm0, %v4941_v16, %v11223_v42  ;;  %v7052_v37 = vsel %vm355_vm0, %v4940_v32, %v11222_v27  ;;  %v5196_v59 = vld [vmem:[#allocation2 + $0x319] sm:$0xff] }
 0x3ff   : > { %v11218_v53 = vunpack.i.h.bf16 %v11216_v21  ;;  %v11217_v3 = vunpack.i.l.bf16 %v11216_v21  ;;  %v15266_v14 = vadd.f32 %v14752_v60, %v7845_v39  ;;  %v7117_v25 = vsel %vm3029_vm3, %v7053_v57, %v11233_v44 }
 0x400   : > { %7983 = vmatprep.mubr.bf16.mxu1 %v7464_v2  ;;  %v7116_v2 = vsel %vm3029_vm3, %v7052_v37, %v11232_v17  ;;  %v11261_v55 = vpop.permute.xlu1 %11260  ;;  %v7181_v17 = vsel %vm3094_vm4, %v7117_v25, %v11243_v29  ;;  %v11253_v29 = vunpack.i.h.bf16 %v15262_v48 }
 0x401   : > { %7984 = vmatmul.mubr.bf16.gmra.mrb[180].mxu1 %v7463_v11  ;;  %v7245_v60 = vsel %vm355_vm0, %v5197_v23, %v11218_v53  ;;  %v7244_v11 = vsel %vm355_vm0, %v5196_v59, %v11217_v3  ;;  %v7180_v27 = vsel %vm3094_vm4, %v7116_v2, %v11242_v12  ;;  %v11252_v12 = vunpack.i.l.bf16 %v15262_v48 }
 0x402   : > { %v11226_v6 = vpop.permute.xlu0 %11225  ;;  %v7466_v23 = vpack.c.bf16 %v7181_v17, %v7180_v27 }
 0x403   : > { %v11228_v20 = vunpack.i.h.bf16 %v11226_v6  ;;  %v11227_v63 = vunpack.i.l.bf16 %v11226_v6 }
 0x404   : > { %v11271_v2 = vpop.permute.xlu1 %11270 }
 0x405   : > { %v7308_v0 = vsel %vm3029_vm3, %v7244_v11, %v11227_v63  ;;  %v7309_v42 = vsel %vm3029_vm3, %v7245_v60, %v11228_v20  ;;  %v11262_v60 = vunpack.i.l.bf16 %v11261_v55 }
 0x406   : > { %v11236_v21 = vpop.permute.xlu0 %11235  ;;  %v7849_v6 = vpop.f32.mrb[112].mxu1 }
 0x407   : > { %v11238_v39 = vunpack.i.h.bf16 %v11236_v21  ;;  %v11237_v43 = vunpack.i.l.bf16 %v11236_v21  ;;  %v7850_v44 = vadd.f32 %v15228_v15, %v7849_v6  ;;  %v7851_v32 = vpop.f32.mrb[113].mxu1  ;;  %v11263_v21 = vunpack.i.h.bf16 %v11261_v55 }
 0x408   : > { %v7852_v57 = vpop.f32.mrb[114].mxu1  ;;  %v11272_v6 = vunpack.i.l.bf16 %v11271_v2 }
 0x409   : > { %v7372_v16 = vsel %vm3094_vm4, %v7308_v0, %v11237_v43  ;;  %v7373_v53 = vsel %vm3094_vm4, %v7309_v42, %v11238_v39  ;;  %v15282_v59 = vadd.f32 %v14774_v1, %v7850_v44  ;;  %v7853_v20 = vadd.f32 %v15228_v15, %v7852_v57  ;;  %v7854_v63 = vpop.f32.mrb[115].mxu1  ;;  %v4942_v43 = vld [vmem:[#allocation2 + $0x318] sm:$0xff]  ;;  %v4943_v0 = vld [vmem:[#allocation2 + $0x320] sm:$0xff] }
 0x40a   : > { %v11246_v3 = vpop.permute.xlu0 %11245  ;;  %v7467_v37 = vpack.c.bf16 %v7373_v53, %v7372_v16  ;;  %v11273_v42 = vunpack.i.h.bf16 %v11271_v2  ;;  %v7055_v44 = vsel %vm355_vm0, %v4943_v0, %v11253_v29  ;;  %v7054_v48 = vsel %vm355_vm0, %v4942_v43, %v11252_v12  ;;  %v5198_v16 = vld [vmem:[#allocation2 + $0x331] sm:$0xff]  ;;  %v5199_v53 = vld [vmem:[#allocation2 + $0x339] sm:$0xff] }
 0x40b   : > { %v15288_v25 = vadd.f32 %v14787_v33, %v7853_v20  ;;  %v11248_v39 = vunpack.i.h.bf16 %v11246_v3  ;;  %v11247_v1 = vunpack.i.l.bf16 %v11246_v3  ;;  %v7118_v32 = vsel %vm3029_vm3, %v7054_v48, %v11262_v60  ;;  %v5444_v43 = vld [vmem:[#allocation2 + $0x2d2] sm:$0xff] }
 0x40c   : > { %7991 = vmatprep.mubr.bf16.mxu1 %v7467_v37  ;;  %v7119_v33 = vsel %vm3029_vm3, %v7055_v44, %v11263_v21  ;;  %v7182_v12 = vsel %vm3094_vm4, %v7118_v32, %v11272_v6 }
 0x40d   : > { %7992 = vmatmul.mubr.bf16.gmra.mrb[184].mxu1 %v7466_v23  ;;  %v7247_v57 = vsel %vm355_vm0, %v5199_v53, %v11248_v39  ;;  %v7246_v3 = vsel %vm355_vm0, %v5198_v16, %v11247_v1  ;;  %v7183_v2 = vsel %vm3094_vm4, %v7119_v33, %v11273_v42  ;;  %v5445_v1 = vld [vmem:[#allocation2 + $0x2da] sm:$0xff]  ;;  %v5446_v33 = vld [vmem:[#allocation2 + $0x2ea] sm:$0xff]  ;;  %v5447_v16 = vld [vmem:[#allocation2 + $0x2f2] sm:$0xff] }
 0x40e   : > { %v11256_v11 = vpop.permute.xlu0 %11255  ;;  %v7469_v6 = vpack.c.bf16 %v7183_v2, %v7182_v12  ;;  %v7456_v42 = vpack.c.bf16 %v5445_v1, %v5444_v43  ;;  %v5448_v53 = vld [vmem:[#allocation2 + $0x302] sm:$0xff]  ;;  %v5450_v12 = vld [vmem:[#allocation2 + $0x31a] sm:$0xff]  ;;  %v5454_v1 = vld [vmem:[#allocation2 + $0x34a] sm:$0xff] }
 0x40f   : > { %v11258_v27 = vunpack.i.h.bf16 %v11256_v11  ;;  %v11257_v17 = vunpack.i.l.bf16 %v11256_v11  ;;  %v5451_v2 = vld [vmem:[#allocation2 + $0x322] sm:$0xff] }
 0x411   : > { %v7310_v63 = vsel %vm3029_vm3, %v7246_v3, %v11257_v17  ;;  %v7311_v23 = vsel %vm3029_vm3, %v7247_v57, %v11258_v27  ;;  %v7459_v57 = vpack.c.bf16 %v5447_v16, %v5446_v33  ;;  %vm8540_vm3 = vcmask 1041408  }
 0x412   : > { %v11266_v55 = vpop.permute.xlu0 %11265  ;;  %v7857_v29 = vpop.f32.mrb[116].mxu1 }
 0x413   : > { %v11268_v37 = vunpack.i.h.bf16 %v11266_v55  ;;  %v11267_v20 = vunpack.i.l.bf16 %v11266_v55  ;;  %v7858_v21 = vadd.f32 %v15228_v15, %v7857_v29  ;;  %v7859_v60 = vpop.f32.mrb[117].mxu1  ;;  %v5449_v55 = vld [vmem:[#allocation2 + $0x30a] sm:$0xff] }
 0x414   : > { %v7860_v0 = vpop.f32.mrb[118].mxu1  ;;  %v5452_v60 = vld [vmem:[#allocation2 + $0x332] sm:$0xff] }
 0x415   : > { %v7374_v11 = vsel %vm3094_vm4, %v7310_v63, %v11267_v20  ;;  %v7375_v39 = vsel %vm3094_vm4, %v7311_v23, %v11268_v37  ;;  %v15304_v17 = vadd.f32 %v14772_v26, %v7858_v21  ;;  %v7861_v27 = vadd.f32 %v15228_v15, %v7860_v0  ;;  %v7862_v48 = vpop.f32.mrb[119].mxu1  ;;  %v5455_v0 = vld [vmem:[#allocation2 + $0x352] sm:$0xff] }
 0x416   : > { %v7470_v44 = vpack.c.bf16 %v7375_v39, %v7374_v11  ;;  %v7462_v26 = vpack.c.bf16 %v5449_v55, %v5448_v53  ;;  %v5453_v11 = vld [vmem:[#allocation2 + $0x33a] sm:$0xff]  ;;  %v7465_v39 = vpack.c.bf16 %v5451_v2, %v5450_v12  ;;  %v7471_v48 = vpack.c.bf16 %v5455_v0, %v5454_v1 }
 0x417   : > { %v15308_v32 = vadd.f32 %v14780_v8, %v7861_v27  ;;  %v7468_v43 = vpack.c.bf16 %v5453_v11, %v5452_v60 }
 0x418   : > { %7999 = vmatprep.mubr.bf16.mxu1 %v7470_v44 }
 0x419   : > { %8000 = vmatmul.mubr.bf16.gmra.mrb[188].mxu1 %v7469_v6 }
 0x41a   : > { %9258 = vmatprep.mubr.msk.bf16.mxu1 %vm355_vm0, %v7456_v42 }
 0x420   : > { %v7865_v3 = vpop.f32.mrb[120].mxu1 }
 0x421   : > { %v7866_v37 = vadd.f32 %v15228_v15, %v7865_v3  ;;  %v7867_v20 = vpop.f32.mrb[121].mxu1  ;;  %9259 = vmatmul.mubr.msk.bf16.vlgmr.msra.gmra.mrb[192].mxu1 %vm355_vm0, %v7459_v57 }
 0x422   : > { %v7868_v63 = vpop.f32.mrb[122].mxu1  ;;  %9262 = vmatprep.mubr.msk.bf16.mxu1 %vm355_vm0, %v7462_v26 }
 0x423   : > { %v15315_v8 = vadd.f32 %v14812_v30, %v7866_v37  ;;  %v7869_v23 = vadd.f32 %v15228_v15, %v7868_v63  ;;  %v7870_v29 = vpop.f32.mrb[123].mxu1 }
 0x425   : > { %v15319_v21 = vadd.f32 %v14825_v52, %v7869_v23 }
 0x429   : > { %9263 = vmatmul.mubr.msk.bf16.gmra.mrb[196].mxu1 %vm355_vm0, %v7465_v39 }
 0x42a   : > { %9266 = vmatprep.mubr.msk.bf16.mxu1 %vm355_vm0, %v7468_v43 }
 0x42c   : > { %v7873_v30 = vpop.f32.mrb[124].mxu1 }
 0x42d   : > { %v7874_v44 = vadd.f32 %v15228_v15, %v7873_v30  ;;  %v7875_v27 = vpop.f32.mrb[125].mxu1 }
 0x42e   : > { %v7876_v6 = vpop.f32.mrb[126].mxu1 }
 0x42f   : > { %v15325_v42 = vadd.f32 %v14808_v5, %v7874_v44  ;;  %v7877_v52 = vadd.f32 %v15228_v15, %v7876_v6  ;;  %v7878_v33 = vpop.f32.mrb[127].mxu1 }
 0x431   : > { %v15329_v16 = vadd.f32 %v14818_v18, %v7877_v52  ;;  %9267 = vmatmul.mubr.msk.bf16.gmra.mrb[200].mxu1 %vm355_vm0, %v7471_v48 }
 0x438   : > { %v7881_v53 = vpop.f32.mrb[128].mxu1 }
 0x439   : > { %v7882_v55 = vadd.f32 %v15228_v15, %v7881_v53  ;;  %v7883_v57 = vpop.f32.mrb[129].mxu1 }
 0x43a   : > { %v7884_v3 = vpop.f32.mrb[130].mxu1 }
 0x43b   : > { %v15334_v26 = vadd.f32 %v14918_v10, %v7882_v55  ;;  %v7885_v37 = vadd.f32 %v15228_v15, %v7884_v3  ;;  %v7886_v5 = vpop.f32.mrb[131].mxu1 }
 0x43d   : > { %16344 = vst [vmem:[#allocation22_spill] sm:$0xff] %v15334_v26  ;;  %v15338_v20 = vadd.f32 %v14925_v28, %v7885_v37 }
 0x43f   : > { %16345 = vst [vmem:[#allocation24_spill] sm:$0xff] %v15338_v20 }
 0x444   : > { %v7889_v63 = vpop.f32.mrb[132].mxu1 }
 0x445   : > { %v7890_v18 = vadd.f32 %v15228_v15, %v7889_v63  ;;  %v7891_v23 = vpop.f32.mrb[133].mxu1 }
 0x446   : > { %v7892_v29 = vpop.f32.mrb[134].mxu1 }
 0x447   : > { %v15342_v12 = vadd.f32 %v14914_v54, %v7890_v18  ;;  %v7893_v2 = vadd.f32 %v15228_v15, %v7892_v29  ;;  %v7894_v60 = vpop.f32.mrb[135].mxu1 }
 0x449   : > { %16346 = vst [vmem:[#allocation28_spill] sm:$0xff] %v15342_v12  ;;  %v15346_v10 = vadd.f32 %v14923_v22, %v7893_v2 }
 0x44b   : > { %16347 = vst [vmem:[#allocation29_spill] sm:$0xff] %v15346_v10 }
 0x450   : > { %v7897_v11 = vpop.f32.mrb[136].mxu1 }
 0x451   : > { %v7898_v39 = vadd.f32 %v15228_v15, %v7897_v11  ;;  %v7899_v43 = vpop.f32.mrb[137].mxu1 }
 0x452   : > { %v7900_v28 = vpop.f32.mrb[138].mxu1 }
 0x453   : > { %v15350_v1 = vadd.f32 %v14975_v45, %v7898_v39  ;;  %v7901_v0 = vadd.f32 %v15228_v15, %v7900_v28  ;;  %v7902_v30 = vpop.f32.mrb[139].mxu1 }
 0x455   : > { %16348 = vst [vmem:[#allocation30_spill] sm:$0xff] %v15350_v1  ;;  %v15354_v54 = vadd.f32 %v14988_v7, %v7901_v0 }
 0x457   : > { %16349 = vst [vmem:[#allocation31_spill] sm:$0xff] %v15354_v54 }
 0x45c   : > { %v7905_v44 = vpop.f32.mrb[140].mxu1 }
 0x45d   : > { %v7906_v27 = vadd.f32 %v15228_v15, %v7905_v44  ;;  %v7907_v48 = vpop.f32.mrb[141].mxu1 }
 0x45e   : > { %v7908_v22 = vpop.f32.mrb[142].mxu1 }
 0x45f   : > { %v15358_v6 = vadd.f32 %v14971_v56, %v7906_v27  ;;  %v7909_v52 = vadd.f32 %v15228_v15, %v7908_v22  ;;  %v7910_v33 = vpop.f32.mrb[143].mxu1 }
 0x461   : > { %v15362_v45 = vadd.f32 %v14981_v24, %v7909_v52 }
 0x463   : > { %16350 = vst [vmem:[#allocation32_spill] sm:$0xff] %v15362_v45 }
 0x468   : > { %v7913_v53 = vpop.f32.mrb[144].mxu1 }
 0x469   : > { %v7914_v55 = vadd.f32 %v15228_v15, %v7913_v53  ;;  %v7915_v57 = vpop.f32.mrb[145].mxu1 }
 0x46a   : > { %v7916_v7 = vpop.f32.mrb[146].mxu1 }
 0x46b   : > { %v15366_v3 = vadd.f32 %v15041_v4, %v7914_v55  ;;  %v7917_v37 = vadd.f32 %v15228_v15, %v7916_v7  ;;  %v7918_v5 = vpop.f32.mrb[147].mxu1  ;;  %v8439_v7 = vld [vmem:[%s16179_s5 + $0x8] sm:$0xff] }
 0x46c   : > { %v11522_v5 = vmov 0.0|0.0  }
 0x46d   : > { %v15370_v56 = vadd.f32 %v15049_v58, %v7917_v37  ;;  %9286 = vmatprep.subr.bf16.mxu1 %v11522_v5 }
 0x46f   : > { %16351 = vst [vmem:[#allocation33_spill] sm:$0xff] %v15370_v56 }
 0x474   : > { %v7921_v63 = vpop.f32.mrb[148].mxu1 }
 0x475   : > { %v7922_v18 = vadd.f32 %v15228_v15, %v7921_v63  ;;  %v7923_v23 = vpop.f32.mrb[149].mxu1  ;;  %v8441_v63 = vld [vmem:[%s16179_s5 + $0x18] sm:$0xff] }
 0x476   : > { %v7924_v24 = vpop.f32.mrb[150].mxu1 }
 0x477   : > { %v15374_v29 = vadd.f32 %v15034_v40, %v7922_v18  ;;  %v7925_v2 = vadd.f32 %v15228_v15, %v7924_v24  ;;  %v7926_v60 = vpop.f32.mrb[151].mxu1  ;;  %v16356_v18 = vmov 0.0  }
 0x478   : > { %9278 = vmatprep.mubr.msk.f32.mxu1 %vm11523_vm1, %v16356_v18 }
 0x479   : > { %v15378_v4 = vadd.f32 %v15045_v36, %v7925_v2 }
 0x47b   : > { %16352 = vst [vmem:[#allocation34_spill] sm:$0xff] %v15378_v4 }
 0x480   : > { %v7929_v11 = vpop.f32.mrb[152].mxu1 }
 0x481   : > { %v7930_v39 = vadd.f32 %v15228_v15, %v7929_v11  ;;  %v7931_v43 = vpop.f32.mrb[153].mxu1 }
 0x482   : > { %v7932_v58 = vpop.f32.mrb[154].mxu1 }
 0x483   : > { %v15382_v28 = vadd.f32 %v15108_v19, %v7930_v39  ;;  %v7933_v0 = vadd.f32 %v15228_v15, %v7932_v58  ;;  %v7934_v30 = vpop.f32.mrb[155].mxu1  ;;  %v8298_v39 = vsel %vm355_vm0, %v14871_v49, 0.0 }
 0x485   : > { %v15386_v40 = vadd.f32 %v15117_v35, %v7933_v0  ;;  %v8438_v35 = vld [vmem:[%s16179_s5] sm:$0xff] }
 0x486   : > { %v16358_v0 = vld [vmem:[#allocation25_spill] sm:$0xff] }
 0x487   : > { %16353 = vst [vmem:[#allocation35_spill] sm:$0xff] %v15386_v40  ;;  %v8297_v30 = vsel %vm355_vm0, %v16358_v0, 0.0 }
 0x48c   : > { %v7937_v44 = vpop.f32.mrb[156].mxu1 }
 0x48d   : > { %v7938_v27 = vadd.f32 %v15228_v15, %v7937_v44  ;;  %v7939_v48 = vpop.f32.mrb[157].mxu1  ;;  %v16359_v44 = vld [vmem:[#allocation26_spill] sm:$0xff] }
 0x48e   : > { %v7940_v36 = vpop.f32.mrb[158].mxu1 }
 0x48f   : > { %v15390_v22 = vadd.f32 %v15104_v46, %v7938_v27  ;;  %v7941_v52 = vadd.f32 %v15228_v15, %v7940_v36  ;;  %v7942_v33 = vpop.f32.mrb[159].mxu1  ;;  %v8440_v46 = vld [vmem:[%s16179_s5 + $0x10] sm:$0xff]  ;;  %v8300_v27 = vsel %vm355_vm0, %v16359_v44, 0.0 }
 0x490   : > { %v9290_v60 = vpack.c.bf16 %v8441_v63, %v8440_v46 }
 0x491   : > { %16354 = vst [vmem:[#allocation36_spill] sm:$0xff] %v15390_v22  ;;  %v15394_v19 = vadd.f32 %v15115_v9, %v7941_v52  ;;  %v9287_v9 = vpack.c.bf16 %v8439_v7, %v8438_v35  ;;  %v16363_v7 = vld [vmem:[#allocation11_spill] sm:$0xff] }
 0x492   : > { %v8304_v46 = vsel %vm355_vm0, %v16363_v7, 0.0 }
 0x493   : > { %16355 = vst [vmem:[#allocation37_spill] sm:$0xff] %v15394_v19  ;;  %9288 = vmatpush3.bf16.msra.mxu1 %v9287_v9  ;;  %v16364_v9 = vld [vmem:[#allocation27_spill] sm:$0xff] }
 0x494   : > { %9289 = vmatprep.subr.bf16.mxu1 %v11522_v5  ;;  %v8306_v63 = vsel %vm355_vm0, %v16364_v9, 0.0 }
 0x497   : > { %9291 = vmatpush3.bf16.msra.mxu1 %v9290_v60 }
 0x498   : > { %v7945_v53 = vpop.f32.mrb[160].mxu1  ;;  %9281 = vmatprep.subr.mxu1 %v16356_v18 }
 0x499   : > { %v7946_v55 = vadd.f32 %v15228_v15, %v7945_v53  ;;  %v7947_v57 = vpop.f32.mrb[161].mxu1 }
 0x49a   : > { %v7948_v37 = vpop.f32.mrb[162].mxu1  ;;  %v16362_v57 = vld [vmem:[#allocation9_spill] sm:$0xff] }
 0x49b   : > { %v15412_v23 = vadd.f32 %v15172_v41, %v7946_v55  ;;  %v7949_v24 = vadd.f32 %v15228_v15, %v7948_v37  ;;  %v7950_v2 = vpop.f32.mrb[163].mxu1  ;;  %v8302_v35 = vsel %vm355_vm0, %v16362_v57, 0.0 }
 0x49c   : > { %v16365_v2 = vld [vmem:[#allocation10_spill] sm:$0xff] }
 0x49d   : > { %v15416_v11 = vadd.f32 %v15184_v50, %v7949_v24  ;;  %v8299_v50 = vadd.f32 %v8298_v39, %v8297_v30  ;;  %v8308_v60 = vsel %vm355_vm0, %v16365_v2, 0.0 }
 0x49f   : > { %16357 = vst [vmem:[#allocation38_spill] sm:$0xff] %v15416_v11  ;;  %v8301_v53 = vadd.f32 %v8300_v27, %v8299_v50  ;;  %v16367_v27 = vld [vmem:[#allocation15_spill] sm:$0xff] }
 0x4a1   : > { %v8303_v37 = vadd.f32 %v8302_v35, %v8301_v53 }
 0x4a3   : > { %v8305_v5 = vadd.f32 %v8304_v46, %v8303_v37  ;;  %v16369_v37 = vld [vmem:[#allocation14_spill] sm:$0xff] }
 0x4a4   : > { %v7953_v43 = vpop.f32.mrb[164].mxu1 }
 0x4a5   : > { %v7954_v58 = vadd.f32 %v15228_v15, %v7953_v43  ;;  %v7955_v41 = vpop.f32.mrb[165].mxu1 }
 0x4a6   : > { %v7956_v48 = vpop.f32.mrb[166].mxu1  ;;  %v16366_v41 = vld [vmem:[#allocation13_spill] sm:$0xff] }
 0x4a7   : > { %v15427_v36 = vadd.f32 %v15170_v34, %v7954_v58  ;;  %v7957_v52 = vadd.f32 %v15228_v15, %v7956_v48  ;;  %v7958_v33 = vpop.f32.mrb[167].mxu1  ;;  %v8310_v30 = vsel %vm355_vm0, %v16366_v41, 0.0  ;;  %v8312_v48 = vsel %vm355_vm0, %v16367_v27, 0.0  ;;  %v16372_v41 = vld [vmem:[#allocation19_spill] sm:$0xff] }
 0x4a8   : > { %v16368_v33 = vld [vmem:[#allocation12_spill] sm:$0xff] }
 0x4a9   : > { %16360 = vst [vmem:[#allocation25_spill] sm:$0xff] %v15427_v36  ;;  %v15431_v55 = vadd.f32 %v15180_v62, %v7957_v52  ;;  %v8307_v62 = vadd.f32 %v8306_v63, %v8305_v5  ;;  %v8314_v53 = vsel %vm355_vm0, %v16368_v33, 0.0  ;;  %v8367_v5 = vsel %vm355_vm0, %v15338_v20, 0.0 }
 0x4aa   : > { %v8371_v20 = vsel %vm355_vm0, %v15346_v10, 0.0 }
 0x4ab   : > { %16361 = vst [vmem:[#allocation26_spill] sm:$0xff] %v15431_v55  ;;  %v8309_v58 = vadd.f32 %v8308_v60, %v8307_v62 }
 0x4ad   : > { %v8311_v50 = vadd.f32 %v8310_v30, %v8309_v58  ;;  %v8369_v58 = vsel %vm355_vm0, %v15342_v12, 0.0  ;;  %v8379_v12 = vsel %vm355_vm0, %v15362_v45, 0.0 }
 0x4af   : > { %v8313_v52 = vadd.f32 %v8312_v48, %v8311_v50  ;;  %v16370_v50 = vld [vmem:[#allocation16_spill] sm:$0xff] }
 0x4b0   : > { %v15439_v34 = vpop.f32.mrb[168].mxu1 }
 0x4b1   : > { %v7963_v24 = vpop.f32.mrb[169].mxu1  ;;  %v8315_v60 = vadd.f32 %v8314_v53, %v8313_v52  ;;  %v8373_v53 = vsel %vm355_vm0, %v15350_v1, 0.0 }
 0x4b2   : > { %v15443_v39 = vpop.f32.mrb[170].mxu1  ;;  %v8316_v24 = vsel %vm355_vm0, %v16369_v37, 0.0  ;;  %v16371_v37 = vld [vmem:[#allocation17_spill] sm:$0xff] }
 0x4b3   : > { %v7966_v43 = vpop.f32.mrb[171].mxu1  ;;  %v8317_v30 = vadd.f32 %v8316_v24, %v8315_v60  ;;  %v8320_v27 = vsel %vm355_vm0, %v16371_v37, 0.0  ;;  %v8322_v24 = vsel %vm355_vm0, %v16372_v41, 0.0 }
 0x4b4   : > { %v8366_v43 = vsel %vm355_vm0, %v15334_v26, 0.0 }
 0x4b5   : > { %v8368_v48 = vadd.f32 %v8367_v5, %v8366_v43 }
 0x4b7   : > { %v8370_v33 = vadd.f32 %v8369_v58, %v8368_v48  ;;  %v8324_v58 = vsel %vm355_vm0, %v15139_v51, 0.0  ;;  %v8375_v48 = vsel %vm355_vm0, %v15354_v54, 0.0  ;;  %v16375_v51 = vld [vmem:[#allocation23_spill] sm:$0xff] }
 0x4b9   : > { %v8372_v26 = vadd.f32 %v8371_v20, %v8370_v33  ;;  %v8377_v20 = vsel %vm355_vm0, %v15358_v6, 0.0 }
 0x4bb   : > { %v8374_v60 = vadd.f32 %v8373_v53, %v8372_v26  ;;  %v16374_v53 = vld [vmem:[#allocation20_spill] sm:$0xff] }
 0x4bc   : > { %v15451_v35 = vpop.f32.mrb[172].mxu1 }
 0x4bd   : > { %v7971_v46 = vpop.f32.mrb[173].mxu1  ;;  %v8376_v33 = vadd.f32 %v8375_v48, %v8374_v60 }
 0x4be   : > { %v15457_v63 = vpop.f32.mrb[174].mxu1  ;;  %v8318_v46 = vsel %vm355_vm0, %v16370_v50, 0.0 }
 0x4bf   : > { %v7974_v62 = vpop.f32.mrb[175].mxu1  ;;  %v8319_v52 = vadd.f32 %v8318_v46, %v8317_v30  ;;  %v8378_v26 = vadd.f32 %v8377_v20, %v8376_v33  ;;  %v8332_v20 = vsel %vm355_vm0, %v15205_v47, 0.0  ;;  %v8383_v33 = vsel %vm355_vm0, %v15370_v56, 0.0 }
 0x4c1   : > { %v8321_v62 = vadd.f32 %v8320_v27, %v8319_v52  ;;  %v16373_v52 = vld [vmem:[#allocation18_spill] sm:$0xff] }
 0x4c2   : > { %v8326_v1 = vsel %vm355_vm0, %v16373_v52, 0.0 }
 0x4c3   : > { %v8323_v30 = vadd.f32 %v8322_v24, %v8321_v62  ;;  %v8381_v62 = vsel %vm355_vm0, %v15366_v3, 0.0 }
 0x4c5   : > { %v8325_v27 = vadd.f32 %v8324_v58, %v8323_v30  ;;  %v8330_v58 = vsel %vm355_vm0, %v16375_v51, 0.0 }
 0x4c7   : > { %v8327_v54 = vadd.f32 %v8326_v1, %v8325_v27 }
 0x4c8   : > { %v15473_v5 = vpop.f32.mrb[176].mxu1 }
 0x4c9   : > { %v7979_v43 = vpop.f32.mrb[177].mxu1 }
 0x4ca   : > { %v15479_v10 = vpop.f32.mrb[178].mxu1  ;;  %v8328_v43 = vsel %vm355_vm0, %v16374_v53, 0.0 }
 0x4cb   : > { %v7982_v46 = vpop.f32.mrb[179].mxu1  ;;  %v8329_v24 = vadd.f32 %v8328_v43, %v8327_v54  ;;  %v8334_v43 = vsel %vm355_vm0, %v15213_v61, 0.0 }
 0x4cc   : > { %v8380_v46 = vadd.f32 %v8379_v12, %v8378_v26  ;;  %v8385_v12 = vsel %vm355_vm0, %v15374_v29, 0.0 }
 0x4cd   : > { %v8331_v1 = vadd.f32 %v8330_v58, %v8329_v24  ;;  %v8389_v24 = vsel %vm355_vm0, %v15382_v28, 0.0 }
 0x4ce   : > { %v8382_v48 = vadd.f32 %v8381_v62, %v8380_v46  ;;  %v8336_v46 = vsel %vm355_vm0, %v15234_v38, 0.0 }
 0x4cf   : > { %v8333_v54 = vadd.f32 %v8332_v20, %v8331_v1  ;;  %v8338_v20 = vsel %vm355_vm0, %v15242_v31, 0.0 }
 0x4d0   : > { %v8384_v26 = vadd.f32 %v8383_v33, %v8382_v48 }
 0x4d1   : > { %v8335_v56 = vadd.f32 %v8334_v43, %v8333_v54 }
 0x4d2   : > { %v8386_v62 = vadd.f32 %v8385_v12, %v8384_v26  ;;  %v8340_v12 = vsel %vm355_vm0, %v15260_v13, 0.0  ;;  %v8391_v26 = vsel %vm355_vm0, %v15386_v40, 0.0 }
 0x4d3   : > { %v8337_v58 = vadd.f32 %v8336_v46, %v8335_v56  ;;  %v8393_v56 = vsel %vm355_vm0, %v15390_v22, 0.0 }
 0x4d4   : > { %v15493_v60 = vpop.f32.mrb[180].mxu1 }
 0x4d5   : > { %v7987_v30 = vpop.f32.mrb[181].mxu1  ;;  %v8339_v54 = vadd.f32 %v8338_v20, %v8337_v58  ;;  %v8397_v58 = vsel %vm355_vm0, %v15412_v23, 0.0 }
 0x4d6   : > { %v15499_v45 = vpop.f32.mrb[182].mxu1  ;;  %v8387_v30 = vsel %vm355_vm0, %v15378_v4, 0.0 }
 0x4d7   : > { %v7990_v27 = vpop.f32.mrb[183].mxu1 }
 0x4d8   : > { %v8388_v27 = vadd.f32 %v8387_v30, %v8386_v62  ;;  %v8341_v62 = vadd.f32 %v8340_v12, %v8339_v54  ;;  %v8342_v30 = vsel %vm355_vm0, %v15266_v14, 0.0  ;;  %v8346_v12 = vsel %vm355_vm0, %v15288_v25, 0.0 }
 0x4da   : > { %v8390_v33 = vadd.f32 %v8389_v24, %v8388_v27  ;;  %v8344_v27 = vsel %vm355_vm0, %v15282_v59, 0.0  ;;  %v8343_v40 = vadd.f32 %v8342_v30, %v8341_v62  ;;  %v8401_v30 = vsel %vm355_vm0, %v15427_v36, 0.0 }
 0x4dc   : > { %v8392_v46 = vadd.f32 %v8391_v26, %v8390_v33  ;;  %v8345_v20 = vadd.f32 %v8344_v27, %v8343_v40  ;;  %v8350_v27 = vsel %vm355_vm0, %v15308_v32, 0.0 }
 0x4de   : > { %v8394_v24 = vadd.f32 %v8393_v56, %v8392_v46  ;;  %v8348_v56 = vsel %vm355_vm0, %v15304_v17, 0.0  ;;  %v8399_v46 = vsel %vm355_vm0, %v15416_v11, 0.0 }
 0x4e0   : > { %v15513_v48 = vpop.f32.mrb[184].mxu1 }
 0x4e1   : > { %v7995_v1 = vpop.f32.mrb[185].mxu1 }
 0x4e2   : > { %v15519_v4 = vpop.f32.mrb[186].mxu1  ;;  %v8395_v1 = vsel %vm355_vm0, %v15394_v19, 0.0  ;;  %v8347_v19 = vadd.f32 %v8346_v12, %v8345_v20  ;;  %v7962_v20 = vadd.f32 %v15228_v15, %v15439_v34  ;;  %v8354_v34 = vsel %vm355_vm0, %v15319_v21, 0.0 }
 0x4e3   : > { %v7998_v43 = vpop.f32.mrb[187].mxu1 }
 0x4e4   : > { %v8396_v43 = vadd.f32 %v8395_v1, %v8394_v24  ;;  %v8349_v40 = vadd.f32 %v8348_v56, %v8347_v19  ;;  %v7973_v19 = vadd.f32 %v15228_v15, %v15457_v63 }
 0x4e6   : > { %v8398_v26 = vadd.f32 %v8397_v58, %v8396_v43  ;;  %v7970_v58 = vadd.f32 %v15228_v15, %v15451_v35  ;;  %v8352_v43 = vsel %vm355_vm0, %v15315_v8, 0.0  ;;  %v7965_v35 = vadd.f32 %v15228_v15, %v15443_v39 }
 0x4e7   : > { %v8356_v39 = vsel %vm355_vm0, %v15325_v42, 0.0 }
 0x4e8   : > { %v8400_v24 = vadd.f32 %v8399_v46, %v8398_v26 }
 0x4ea   : > { %v8402_v1 = vadd.f32 %v8401_v30, %v8400_v24 }
 0x4ec   : > { %v8001_v33 = vpop.f32.mrb[188].mxu1 }
 0x4ed   : > { %v8003_v54 = vpop.f32.mrb[189].mxu1 }
 0x4ee   : > { %v8004_v22 = vpop.f32.mrb[190].mxu1  ;;  %v8403_v54 = vsel %vm355_vm0, %v15431_v55, 0.0 }
 0x4ef   : > { %v8006_v62 = vpop.f32.mrb[191].mxu1  ;;  %v8404_v36 = vadd.f32 %v8403_v54, %v8402_v1  ;;  %v7986_v1 = vadd.f32 %v15228_v15, %v15493_v60  ;;  %v7981_v60 = vadd.f32 %v15228_v15, %v15479_v10 }
 0x4f0   : > { %v8351_v62 = vadd.f32 %v8350_v27, %v8349_v40 }
 0x4f2   : > { %v8353_v24 = vadd.f32 %v8352_v43, %v8351_v62 }
 0x4f4   : > { %v9260_v12 = vpop.f32.mrb[192].mxu1  ;;  %v8355_v43 = vadd.f32 %v8354_v34, %v8353_v24 }
 0x4f5   : > { %v15551_v26 = vadd.f32 %v9260_v12, %v7970_v58  ;;  %v8250_v56 = vpop.f32.mrb[193].mxu1 }
 0x4f6   : > { %v15555_v46 = vadd.f32 %v8250_v56, %v7962_v20  ;;  %v9261_v30 = vpop.f32.mrb[194].mxu1  ;;  %v7978_v20 = vadd.f32 %v15228_v15, %v15473_v5  ;;  %v8357_v62 = vadd.f32 %v8356_v39, %v8355_v43 }
 0x4f7   : > { %v15557_v55 = vadd.f32 %v9261_v30, %v7973_v19  ;;  %v8253_v11 = vpop.f32.mrb[195].mxu1  ;;  %v8409_v12 = vsel %vm355_vm0, %v15551_v26, 0.0  ;;  %v8358_v30 = vsel %vm355_vm0, %v15329_v16, 0.0 }
 0x4f8   : > { %v8405_v63 = vsel %vm355_vm0, %v15555_v46, 0.0  ;;  %v15563_v40 = vadd.f32 %v8253_v11, %v7965_v35  ;;  %v8359_v43 = vadd.f32 %v8358_v30, %v8357_v62  ;;  %v7997_v30 = vadd.f32 %v15228_v15, %v15519_v4 }
 0x4f9   : > { %v8406_v27 = vadd.f32 %v8405_v63, %v8404_v36  ;;  %v7989_v36 = vadd.f32 %v15228_v15, %v15499_v45  ;;  %v8411_v5 = vsel %vm355_vm0, %v15557_v55, 0.0 }
 0x4fa   : > { %v8407_v58 = vsel %vm355_vm0, %v15563_v40, 0.0 }
 0x4fb   : > { %v8408_v54 = vadd.f32 %v8407_v58, %v8406_v27 }
 0x4fc   : > { %v9264_v11 = vpop.f32.mrb[196].mxu1 }
 0x4fd   : > { %v8410_v19 = vadd.f32 %v8409_v12, %v8408_v54  ;;  %v15577_v56 = vadd.f32 %v9264_v11, %v7986_v1  ;;  %v8266_v35 = vpop.f32.mrb[197].mxu1  ;;  %v8002_v54 = vadd.f32 %v15228_v15, %v8001_v33 }
 0x4fe   : > { %v15585_v24 = vadd.f32 %v8266_v35, %v7978_v20  ;;  %v9265_v34 = vpop.f32.mrb[198].mxu1  ;;  %v7994_v20 = vadd.f32 %v15228_v15, %v15513_v48  ;;  %v8005_v35 = vadd.f32 %v15228_v15, %v8004_v22 }
 0x4ff   : > { %v8412_v63 = vadd.f32 %v8411_v5, %v8410_v19  ;;  %v15587_v27 = vadd.f32 %v9265_v34, %v7989_v36  ;;  %v8269_v45 = vpop.f32.mrb[199].mxu1  ;;  %v8417_v11 = vsel %vm355_vm0, %v15577_v56, 0.0  ;;  %v8360_v19 = vrot.slane %v8359_v43, 4 }
 0x500   : > { %v8413_v39 = vsel %vm355_vm0, %v15585_v24, 0.0  ;;  %v15591_v58 = vadd.f32 %v8269_v45, %v7981_v60 }
 0x501   : > { %v8414_v1 = vadd.f32 %v8413_v39, %v8412_v63  ;;  %v8419_v33 = vsel %vm355_vm0, %v15587_v27, 0.0 }
 0x502   : > { %v8415_v10 = vsel %vm355_vm0, %v15591_v58, 0.0 }
 0x503   : > { %v8416_v12 = vadd.f32 %v8415_v10, %v8414_v1  ;;  %v8361_v10 = vadd.f32 %v8360_v19, %v8359_v43 }
 0x504   : > { %v9268_v36 = vpop.f32.mrb[200].mxu1 }
 0x505   : > { %v8418_v60 = vadd.f32 %v8417_v11, %v8416_v12  ;;  %v15601_v5 = vadd.f32 %v9268_v36, %v8002_v54  ;;  %v8282_v62 = vpop.f32.mrb[201].mxu1 }
 0x506   : > { %v15607_v34 = vadd.f32 %v8282_v62, %v7994_v20  ;;  %v9269_v48 = vpop.f32.mrb[202].mxu1  ;;  %v8362_v20 = vrot.slane %v8361_v10, 2 }
 0x507   : > { %v8420_v63 = vadd.f32 %v8419_v33, %v8418_v60  ;;  %v15609_v45 = vadd.f32 %v9269_v48, %v8005_v35  ;;  %v8285_v39 = vpop.f32.mrb[203].mxu1  ;;  %v8425_v12 = vsel %vm355_vm0, %v15601_v5, 0.0 }
 0x508   : > { %v8421_v22 = vsel %vm355_vm0, %v15607_v34, 0.0  ;;  %v15613_v1 = vadd.f32 %v8285_v39, %v7997_v30  ;;  %v8363_v60 = vadd.f32 %v8362_v20, %v8361_v10  ;;  %v8528_v10 = vld [vmem:[%s16181_s7] sm:$0x3] }
 0x509   : > { %v8422_v54 = vadd.f32 %v8421_v22, %v8420_v63  ;;  %v8427_v36 = vsel %vm355_vm0, %v15609_v45, 0.0 }
 0x50a   : > { %v8423_v15 = vsel %vm355_vm0, %v15613_v1, 0.0  ;;  %v8364_v30 = vrot.slane %v8363_v60, 1 }
 0x50b   : > { %v8424_v4 = vadd.f32 %v8423_v15, %v8422_v54 }
 0x50c   : > { %v8365_v19 = vadd.f32 %v8364_v30, %v8363_v60 }
 0x50d   : > { %v8426_v11 = vadd.f32 %v8425_v12, %v8424_v4  ;;  %v9044_v4 = vld [vmem:[%s16180_s6] ss:$0 sm:$0xff] }
 0x50e   : > { %v8436_v22 = vmul.f32 0.00390625, %v8365_v19 }
 0x50f   : > { %v8428_v35 = vadd.f32 %v8427_v36, %v8426_v11 }
 0x511   : > { %v8429_v62 = vrot.slane %v8428_v35, 4 }
 0x513   : > { %v8430_v33 = vadd.f32 %v8429_v62, %v8428_v35 }
 0x515   : > { %v8431_v48 = vrot.slane %v8430_v33, 2 }
 0x517   : > { %v8432_v43 = vadd.f32 %v8431_v48, %v8430_v33 }
 0x519   : > { %v8433_v63 = vrot.slane %v8432_v43, 1 }
 0x51b   : > { %v8434_v39 = vadd.f32 %v8433_v63, %v8432_v43  ;;  %v11524_v63 = vmov 1966171168  }
 0x51d   : > { %v8437_v54 = vmul.f32 0.00390625, %v8434_v39  ;;  %v8621_v39 = vunpack.c.l.s4 %v11524_v63 }
 0x51f   : > { %v8452_v15 = vsel %vm8451_vm2, %v8437_v54, %v8436_v22  ;;  %v8623_v22 = vlaneseq  ;;  %v8622_v54 = vunpack.c.0.s8 %v8621_v39 }
 0x520   : > { %9279 = vmatmul.mubr.msk.f32.vlgmr.msra.gmra.mrb[204].mxu1 %vm355_vm0, %v8452_v15 }
 0x521   : > { %9283 = vmatprep.mubr.msk.f32.mxu1 %vm11523_vm1, %v16356_v18  ;;  %9282 = vmatpush3.msk.msra.mxu1 %vm8540_vm3, %v8528_v10  ;;  %v9046_v18 = vld [vmem:[%s16182_s8] ss:$0 sm:$0xff]  ;;  %v8624_v15 = vshrl.u32 %v8623_v22, 7 }
 0x523   : > { %v8625_v10 = vsub.s32 %v8622_v54, %v8624_v15 }
 0x5f3   : > { %v8521_v12 = vpop.f32.mrb[204].mxu1 }
 0x5f4   : > { %v8522_v20 = vadd.f32 %v9044_v4, %v8521_v12  ;;  %v9280_v11 = vpop.f32.mrb[205].mxu1 }
 0x5f6   : > { %vm8525_vm4 = vcmp.gt.f32.partialorder %v8522_v20, 0.0  ;;  %v8526_v36 = vmul.f32 0.2, %v8522_v20 }
 0x5f8   : > { %v8527_v35 = vsel %vm8525_vm4, %v8522_v20, %v8526_v36  ;;  %v8644_v20 = vsub.s32 0, %v8624_v15 }
 0x5f9   : > { %9284 = vmatmul.mubr.msk.f32.vlgmr.msra.gmra.mrb[206].mxu1 %vm8536_vm14, %v8527_v35 }
 0x6cc   : > { %v8610_v60 = vpop.f32.mrb[206].mxu1 }
 0x6cd   : > { %v8611_v62 = vadd.f32 %v9046_v18, %v8610_v60  ;;  %v9285_v33 = vpop.f32.mrb[207].mxu1 }
 0x6cf   : > { %v8614_v30 = vsub.f32 0.0, %v8611_v62 }
 0x6d1   : > { %v8615_v48 = vmul.f32 1.442695, %v8614_v30 }
 0x6d3   : > { %11310 = vpow2.f32 %v8615_v48 }
 0x6dd   : > { %v11311_v43 = vpop.eup %11310 }
 0x6de   : > { %v8617_v19 = vadd.f32 1.0, %v11311_v43 }
 0x6e0   : > { %11312 = vrcp.f32 %v8617_v19 }
 0x6ea   : > { %v11313_v4 = vpop.eup %11312 }
 0x6eb   : > { %v8626_v12 = vrot.slane %v11313_v4, %v8625_v10 }
 0x6ed   : > { %v8627_v11 = vcombine.high %v8626_v12, %v8626_v12  ;;  %v8634_v36 = vrot.slane %v8626_v12, %v8625_v10 }
 0x6ef   : > { %v8641_v35 = vrot.slane %v8627_v11, %v8625_v10  ;;  %v8645_v18 = vrot.slane %v8634_v36, %v8644_v20  ;;  %v16380_v10 = vld [vmem:[#allocation21_spill] sm:$0xff] }
 0x6f1   : > { %v15633_v60 = vrot.slane %v8641_v35, %v8644_v20  ;;  %v15636_v62 = vmul.f32 %v8645_v18, %v16358_v0  ;;  %v15639_v33 = vmul.f32 %v8645_v18, %v14871_v49  ;;  %v15642_v30 = vmul.f32 %v8645_v18, %v16359_v44  ;;  %v16376_v0 = vld [vmem:[#allocation13_spill] sm:$0xff]  ;;  %v16377_v49 = vld [vmem:[#allocation15_spill] sm:$0xff]  ;;  %v16378_v44 = vld [vmem:[#allocation12_spill] sm:$0xff] }
 0x6f2   : > { %v15645_v48 = vmul.f32 %v8645_v18, %v16362_v57  ;;  %v15648_v43 = vmul.f32 %v8645_v18, %v16363_v7  ;;  %v15651_v19 = vmul.f32 %v8645_v18, %v16364_v9  ;;  %v15654_v63 = vmul.f32 %v8645_v18, %v16365_v2  ;;  %v16379_v57 = vld [vmem:[#allocation14_spill] sm:$0xff] }
 0x6f3   : > { %v15657_v39 = vmul.f32 %v8645_v18, %v16376_v0  ;;  %v15660_v22 = vmul.f32 %v8645_v18, %v16377_v49  ;;  %v15663_v54 = vmul.f32 %v8645_v18, %v16378_v44  ;;  %v15666_v15 = vmul.f32 %v8645_v18, %v16379_v57  ;;  %v16383_v0 = vld [vmem:[#allocation28_spill] sm:$0xff] }
 0x6f4   : > { %v15669_v7 = vmul.f32 %v8645_v18, %v16370_v50  ;;  %v15672_v9 = vmul.f32 %v8645_v18, %v16371_v37  ;;  %v15675_v2 = vmul.f32 %v8645_v18, %v16372_v41  ;;  %v15678_v4 = vmul.f32 %v8645_v18, %v16380_v10  ;;  %v16387_v10 = vld [vmem:[#allocation32_spill] sm:$0xff] }
 0x6f5   : > { %v15681_v12 = vmul.f32 %v8645_v18, %v16373_v52  ;;  %v15684_v20 = vmul.f32 %v8645_v18, %v16374_v53  ;;  %v15687_v11 = vmul.f32 %v8645_v18, %v16375_v51  ;;  %v15690_v50 = vmul.f32 %v8645_v18, %v15205_v47 }
 0x6f6   : > { %v15693_v37 = vmul.f32 %v8645_v18, %v15213_v61  ;;  %v15696_v41 = vmul.f32 %v8645_v18, %v15234_v38  ;;  %v15699_v36 = vmul.f32 %v8645_v18, %v15242_v31  ;;  %v15702_v52 = vmul.f32 %v8645_v18, %v15260_v13 }
 0x6f7   : > { %v15705_v53 = vmul.f32 %v8645_v18, %v15266_v14  ;;  %v15708_v51 = vmul.f32 %v8645_v18, %v15282_v59  ;;  %v15711_v47 = vmul.f32 %v8645_v18, %v15288_v25  ;;  %v15714_v61 = vmul.f32 %v8645_v18, %v15304_v17  ;;  %v16381_v25 = vld [vmem:[#allocation22_spill] sm:$0xff]  ;;  %v16382_v17 = vld [vmem:[#allocation24_spill] sm:$0xff] }
 0x6f8   : > { %v15717_v38 = vmul.f32 %v8645_v18, %v15308_v32  ;;  %v15720_v31 = vmul.f32 %v8645_v18, %v15315_v8  ;;  %v15723_v13 = vmul.f32 %v8645_v18, %v15319_v21  ;;  %v15726_v14 = vmul.f32 %v8645_v18, %v15325_v42  ;;  %v16384_v21 = vld [vmem:[#allocation29_spill] sm:$0xff]  ;;  %v16385_v42 = vld [vmem:[#allocation30_spill] sm:$0xff] }
 0x6f9   : > { %v15729_v59 = vmul.f32 %v8645_v18, %v15329_v16  ;;  %v15733_v35 = vmul.f32 %v15633_v60, %v16381_v25  ;;  %v15737_v32 = vmul.f32 %v15633_v60, %v16382_v17  ;;  %v15741_v8 = vmul.f32 %v15633_v60, %v16383_v0  ;;  %v16386_v18 = vld [vmem:[#allocation31_spill] sm:$0xff]  ;;  %v16390_v0 = vld [vmem:[#allocation33_spill] sm:$0xff] }
 0x6fa   : > { %v15745_v49 = vmul.f32 %v15633_v60, %v16384_v21  ;;  %v15749_v16 = vmul.f32 %v15633_v60, %v16385_v42  ;;  %v15753_v44 = vmul.f32 %v15633_v60, %v16386_v18  ;;  %v15757_v57 = vmul.f32 %v15633_v60, %v15358_v6  ;;  %v16392_v18 = vld [vmem:[#allocation34_spill] sm:$0xff] }
 0x6fb   : > { %v15761_v25 = vmul.f32 %v15633_v60, %v16387_v10  ;;  %v15765_v17 = vmul.f32 %v15633_v60, %v15366_v3  ;;  %v15769_v21 = vmul.f32 %v15633_v60, %v16390_v0  ;;  %v15773_v42 = vmul.f32 %v15633_v60, %v15374_v29 }
 0x6fc   : > { %v15777_v6 = vmul.f32 %v15633_v60, %v16392_v18  ;;  %v15781_v10 = vmul.f32 %v15633_v60, %v15382_v28  ;;  %v15797_v18 = vmul.f32 %v15633_v60, %v15412_v23  ;;  %v15817_v23 = vmul.f32 %v15633_v60, %v15563_v40 }
 0x6fd   : > { %16388 = vst [vmem:[#allocation9_spill] sm:$0xff] %v15761_v25  ;;  %16389 = vst [vmem:[#allocation11_spill] sm:$0xff] %v15765_v17  ;;  %v16395_v25 = vld [vmem:[#allocation35_spill] sm:$0xff]  ;;  %v16397_v17 = vld [vmem:[#allocation36_spill] sm:$0xff]  ;;  %v15837_v40 = vmul.f32 %v15633_v60, %v15577_v56  ;;  %v15857_v56 = vmul.f32 %v15633_v60, %v15609_v45 }
 0x6fe   : > { %16391 = vst [vmem:[#allocation27_spill] sm:$0xff] %v15769_v21  ;;  %16393 = vst [vmem:[#allocation10_spill] sm:$0xff] %v15777_v6  ;;  %v15785_v3 = vmul.f32 %v15633_v60, %v16395_v25  ;;  %v15789_v0 = vmul.f32 %v15633_v60, %v16397_v17  ;;  %v16398_v21 = vld [vmem:[#allocation37_spill] sm:$0xff]  ;;  %v16399_v6 = vld [vmem:[#allocation38_spill] sm:$0xff] }
 0x6ff   : > { %16394 = vst [vmem:[#allocation16_spill] sm:$0xff] %v15781_v10  ;;  %v15793_v29 = vmul.f32 %v15633_v60, %v16398_v21  ;;  %v15801_v28 = vmul.f32 %v15633_v60, %v16399_v6  ;;  %v16400_v10 = vld [vmem:[#allocation25_spill] sm:$0xff]  ;;  %v15813_v21 = vmul.f32 %v15633_v60, %v15555_v46  ;;  %v15821_v6 = vmul.f32 %v15633_v60, %v15551_v26 }
 0x700   : > { %16396 = vst [vmem:[#allocation17_spill] sm:$0xff] %v15785_v3  ;;  %v15805_v25 = vmul.f32 %v15633_v60, %v16400_v10  ;;  %v16401_v3 = vld [vmem:[#allocation26_spill] sm:$0xff]  ;;  %v15825_v10 = vmul.f32 %v15633_v60, %v15557_v55  ;;  %v15833_v46 = vmul.f32 %v15633_v60, %v15591_v58  ;;  %16402 = vst [vmem:[#allocation19_spill] sm:$0xff] %v15837_v40  ;;  %v11354_v40 = vld [vmem:[%s11688_s19 + $0x10] sm:$0xff] }
 0x701   : > { %v15809_v17 = vmul.f32 %v15633_v60, %v16401_v3  ;;  %v15829_v3 = vmul.f32 %v15633_v60, %v15585_v24  ;;  %v15841_v26 = vmul.f32 %v15633_v60, %v15587_v27  ;;  %v15845_v55 = vmul.f32 %v15633_v60, %v15607_v34  ;;  %16407 = vst [vmem:[#allocation15_spill] sm:$0xff] %v15857_v56  ;;  %v11352_v27 = vld [vmem:[%s11688_s19] sm:$0xff]  ;;  %v11353_v34 = vld [vmem:[%s11688_s19 + $0x8] sm:$0xff] }
 0x702   : > { %v15849_v24 = vmul.f32 %v15633_v60, %v15613_v1  ;;  %v15853_v58 = vmul.f32 %v15633_v60, %v15601_v5  ;;  %v8718_v1 = vadd.f32 %v11354_v40, %v15642_v30  ;;  %v11357_v60 = vld [vmem:[%s11688_s19 + $0x28] sm:$0xff]  ;;  %v11360_v30 = vld [vmem:[%s11688_s19 + $0x40] sm:$0xff] }
 0x703   : > { %16403 = vst [vmem:[#allocation18_spill] sm:$0xff] %v15841_v26  ;;  %16404 = vst [vmem:[#allocation20_spill] sm:$0xff] %v15845_v55  ;;  %v8716_v26 = vadd.f32 %v11352_v27, %v15636_v62  ;;  %v8717_v55 = vadd.f32 %v11353_v34, %v15639_v33  ;;  %v8721_v56 = vadd.f32 %v11357_v60, %v15651_v19  ;;  %v11358_v62 = vld [vmem:[%s11688_s19 + $0x30] sm:$0xff]  ;;  %v11359_v33 = vld [vmem:[%s11688_s19 + $0x38] sm:$0xff] }
 0x704   : > { %16405 = vst [vmem:[#allocation23_spill] sm:$0xff] %v15849_v24  ;;  %16406 = vst [vmem:[#allocation13_spill] sm:$0xff] %v15853_v58  ;;  %v11355_v24 = vld [vmem:[%s11688_s19 + $0x18] sm:$0xff]  ;;  %v11356_v58 = vld [vmem:[%s11688_s19 + $0x20] sm:$0xff]  ;;  %v8722_v27 = vadd.f32 %v11358_v62, %v15654_v63  ;;  %v8723_v34 = vadd.f32 %v11359_v33, %v15657_v39  ;;  %v8724_v40 = vadd.f32 %v11360_v30, %v15660_v22 }
 0x705   : > { %v8719_v5 = vadd.f32 %v11355_v24, %v15645_v48  ;;  %v8720_v45 = vadd.f32 %v11356_v58, %v15648_v43  ;;  %v11361_v48 = vld [vmem:[%s11688_s19 + $0x48] sm:$0xff]  ;;  %v11362_v43 = vld [vmem:[%s11688_s19 + $0x50] sm:$0xff]  ;;  %8780 = vst.msk [vmem:[%s15883_s24] sm:$0xff] %vm355_vm0, %v8716_v26  ;;  %8781 = vst.msk [vmem:[%s15883_s24 + $0x8] sm:$0xff] %vm355_vm0, %v8717_v55 }
 0x706   : > { %v8725_v24 = vadd.f32 %v11361_v48, %v15663_v54  ;;  %v8726_v58 = vadd.f32 %v11362_v43, %v15666_v15  ;;  %8782 = vst.msk [vmem:[%s15883_s24 + $0x10] sm:$0xff] %vm355_vm0, %v8718_v1  ;;  %v11363_v19 = vld [vmem:[%s11688_s19 + $0x58] sm:$0xff]  ;;  %v11364_v39 = vld [vmem:[%s11688_s19 + $0x60] sm:$0xff]  ;;  %v11365_v54 = vld [vmem:[%s11688_s19 + $0x68] sm:$0xff] }
 0x707   : > { %v8727_v63 = vadd.f32 %v11363_v19, %v15669_v7  ;;  %v8728_v22 = vadd.f32 %v11364_v39, %v15672_v9  ;;  %v8729_v15 = vadd.f32 %v11365_v54, %v15675_v2  ;;  %v11366_v60 = vld [vmem:[%s11688_s19 + $0x70] sm:$0xff]  ;;  %8783 = vst.msk [vmem:[%s15883_s24 + $0x18] sm:$0xff] %vm355_vm0, %v8719_v5  ;;  %8784 = vst.msk [vmem:[%s15883_s24 + $0x20] sm:$0xff] %vm355_vm0, %v8720_v45  ;;  %v11367_v7 = vld [vmem:[%s11688_s19 + $0x78] sm:$0xff] }
 0x708   : > { %v8730_v26 = vadd.f32 %v11366_v60, %v15678_v4  ;;  %8785 = vst.msk [vmem:[%s15883_s24 + $0x28] sm:$0xff] %vm355_vm0, %v8721_v56  ;;  %8786 = vst.msk [vmem:[%s15883_s24 + $0x30] sm:$0xff] %vm355_vm0, %v8722_v27  ;;  %v8731_v9 = vadd.f32 %v11367_v7, %v15681_v12  ;;  %v11368_v2 = vld [vmem:[%s11688_s19 + $0x80] sm:$0xff]  ;;  %v11369_v4 = vld [vmem:[%s11688_s19 + $0x88] sm:$0xff] }
 0x709   : > { %v8732_v55 = vadd.f32 %v11368_v2, %v15684_v20  ;;  %v8733_v1 = vadd.f32 %v11369_v4, %v15687_v11  ;;  %v11370_v5 = vld [vmem:[%s11688_s19 + $0x90] sm:$0xff]  ;;  %8787 = vst.msk [vmem:[%s15883_s24 + $0x38] sm:$0xff] %vm355_vm0, %v8723_v34  ;;  %8788 = vst.msk [vmem:[%s15883_s24 + $0x40] sm:$0xff] %vm355_vm0, %v8724_v40  ;;  %v11371_v12 = vld [vmem:[%s11688_s19 + $0x98] sm:$0xff] }
 0x70a   : > { %v8734_v56 = vadd.f32 %v11370_v5, %v15690_v50  ;;  %8789 = vst.msk [vmem:[%s15883_s24 + $0x48] sm:$0xff] %vm355_vm0, %v8725_v24  ;;  %8790 = vst.msk [vmem:[%s15883_s24 + $0x50] sm:$0xff] %vm355_vm0, %v8726_v58  ;;  %v8735_v20 = vadd.f32 %v11371_v12, %v15693_v37  ;;  %v11372_v11 = vld [vmem:[%s11688_s19 + $0xa0] sm:$0xff]  ;;  %v11373_v50 = vld [vmem:[%s11688_s19 + $0xa8] sm:$0xff] }
 0x70b   : > { %v8736_v45 = vadd.f32 %v11372_v11, %v15696_v41  ;;  %v8737_v62 = vadd.f32 %v11373_v50, %v15699_v36  ;;  %v11374_v27 = vld [vmem:[%s11688_s19 + $0xb0] sm:$0xff]  ;;  %8791 = vst.msk [vmem:[%s15883_s24 + $0x58] sm:$0xff] %vm355_vm0, %v8727_v63  ;;  %8792 = vst.msk [vmem:[%s15883_s24 + $0x60] sm:$0xff] %vm355_vm0, %v8728_v22  ;;  %v11375_v37 = vld [vmem:[%s11688_s19 + $0xb8] sm:$0xff] }
 0x70c   : > { %v8738_v33 = vadd.f32 %v11374_v27, %v15702_v52  ;;  %8793 = vst.msk [vmem:[%s15883_s24 + $0x68] sm:$0xff] %vm355_vm0, %v8729_v15  ;;  %8794 = vst.msk [vmem:[%s15883_s24 + $0x70] sm:$0xff] %vm355_vm0, %v8730_v26  ;;  %v8739_v41 = vadd.f32 %v11375_v37, %v15705_v53  ;;  %v11376_v36 = vld [vmem:[%s11688_s19 + $0xc0] sm:$0xff]  ;;  %v11377_v52 = vld [vmem:[%s11688_s19 + $0xc8] sm:$0xff] }
 0x70d   : > { %v8740_v34 = vadd.f32 %v11376_v36, %v15708_v51  ;;  %v8741_v30 = vadd.f32 %v11377_v52, %v15711_v47  ;;  %v11378_v40 = vld [vmem:[%s11688_s19 + $0xd0] sm:$0xff]  ;;  %8795 = vst.msk [vmem:[%s15883_s24 + $0x78] sm:$0xff] %vm355_vm0, %v8731_v9  ;;  %8796 = vst.msk [vmem:[%s15883_s24 + $0x80] sm:$0xff] %vm355_vm0, %v8732_v55  ;;  %v11379_v53 = vld [vmem:[%s11688_s19 + $0xd8] sm:$0xff] }
 0x70e   : > { %v8742_v48 = vadd.f32 %v11378_v40, %v15714_v61  ;;  %8797 = vst.msk [vmem:[%s15883_s24 + $0x88] sm:$0xff] %vm355_vm0, %v8733_v1  ;;  %8798 = vst.msk [vmem:[%s15883_s24 + $0x90] sm:$0xff] %vm355_vm0, %v8734_v56  ;;  %v8743_v51 = vadd.f32 %v11379_v53, %v15717_v38  ;;  %v11380_v47 = vld [vmem:[%s11688_s19 + $0xe0] sm:$0xff]  ;;  %v11381_v61 = vld [vmem:[%s11688_s19 + $0xe8] sm:$0xff] }
 0x70f   : > { %v8744_v24 = vadd.f32 %v11380_v47, %v15720_v31  ;;  %v8745_v43 = vadd.f32 %v11381_v61, %v15723_v13  ;;  %v11382_v58 = vld [vmem:[%s11688_s19 + $0xf0] sm:$0xff]  ;;  %8799 = vst.msk [vmem:[%s15883_s24 + $0x98] sm:$0xff] %vm355_vm0, %v8735_v20  ;;  %8800 = vst.msk [vmem:[%s15883_s24 + $0xa0] sm:$0xff] %vm355_vm0, %v8736_v45  ;;  %v11383_v38 = vld [vmem:[%s11688_s19 + $0xf8] sm:$0xff] }
 0x710   : > { %v8746_v19 = vadd.f32 %v11382_v58, %v15726_v14  ;;  %8801 = vst.msk [vmem:[%s15883_s24 + $0xa8] sm:$0xff] %vm355_vm0, %v8737_v62  ;;  %8802 = vst.msk [vmem:[%s15883_s24 + $0xb0] sm:$0xff] %vm355_vm0, %v8738_v33  ;;  %v8747_v31 = vadd.f32 %v11383_v38, %v15729_v59  ;;  %v11384_v13 = vld [vmem:[%s11688_s19 + $0x100] sm:$0xff]  ;;  %v11385_v14 = vld [vmem:[%s11688_s19 + $0x108] sm:$0xff] }
 0x711   : > { %v8748_v63 = vadd.f32 %v11384_v13, %v15733_v35  ;;  %v8749_v39 = vadd.f32 %v11385_v14, %v15737_v32  ;;  %v11386_v22 = vld [vmem:[%s11688_s19 + $0x110] sm:$0xff]  ;;  %8803 = vst.msk [vmem:[%s15883_s24 + $0xb8] sm:$0xff] %vm355_vm0, %v8739_v41  ;;  %8804 = vst.msk [vmem:[%s15883_s24 + $0xc0] sm:$0xff] %vm355_vm0, %v8740_v34  ;;  %v11387_v59 = vld [vmem:[%s11688_s19 + $0x118] sm:$0xff] }
 0x712   : > { %v8750_v54 = vadd.f32 %v11386_v22, %v15741_v8  ;;  %8805 = vst.msk [vmem:[%s15883_s24 + $0xc8] sm:$0xff] %vm355_vm0, %v8741_v30  ;;  %8806 = vst.msk [vmem:[%s15883_s24 + $0xd0] sm:$0xff] %vm355_vm0, %v8742_v48  ;;  %v8751_v35 = vadd.f32 %v11387_v59, %v15745_v49  ;;  %v11388_v32 = vld [vmem:[%s11688_s19 + $0x120] sm:$0xff]  ;;  %v11389_v8 = vld [vmem:[%s11688_s19 + $0x128] sm:$0xff] }
 0x713   : > { %v8752_v15 = vadd.f32 %v11388_v32, %v15749_v16  ;;  %v8753_v60 = vadd.f32 %v11389_v8, %v15753_v44  ;;  %v11390_v26 = vld [vmem:[%s11688_s19 + $0x130] sm:$0xff]  ;;  %8807 = vst.msk [vmem:[%s15883_s24 + $0xd8] sm:$0xff] %vm355_vm0, %v8743_v51  ;;  %8808 = vst.msk [vmem:[%s15883_s24 + $0xe0] sm:$0xff] %vm355_vm0, %v8744_v24  ;;  %v11391_v49 = vld [vmem:[%s11688_s19 + $0x138] sm:$0xff] }
 0x714   : > { %v8754_v7 = vadd.f32 %v11390_v26, %v15757_v57  ;;  %8809 = vst.msk [vmem:[%s15883_s24 + $0xe8] sm:$0xff] %vm355_vm0, %v8745_v43  ;;  %8810 = vst.msk [vmem:[%s15883_s24 + $0xf0] sm:$0xff] %vm355_vm0, %v8746_v19  ;;  %v16408_v16 = vld [vmem:[#allocation9_spill] sm:$0xff]  ;;  %v16409_v2 = vld [vmem:[#allocation11_spill] sm:$0xff] }
 0x715   : > { %v8755_v44 = vadd.f32 %v11391_v49, %v16408_v16  ;;  %v11392_v9 = vld [vmem:[%s11688_s19 + $0x140] sm:$0xff]  ;;  %v11393_v57 = vld [vmem:[%s11688_s19 + $0x148] sm:$0xff]  ;;  %v16410_v4 = vld [vmem:[#allocation27_spill] sm:$0xff]  ;;  %8811 = vst.msk [vmem:[%s15883_s24 + $0xf8] sm:$0xff] %vm355_vm0, %v8747_v31 }
 0x716   : > { %v8756_v55 = vadd.f32 %v11392_v9, %v16409_v2  ;;  %v8757_v1 = vadd.f32 %v11393_v57, %v16410_v4  ;;  %v11394_v5 = vld [vmem:[%s11688_s19 + $0x150] sm:$0xff]  ;;  %8812 = vst.msk [vmem:[%s15883_s24 + $0x100] sm:$0xff] %vm355_vm0, %v8748_v63  ;;  %8813 = vst.msk [vmem:[%s15883_s24 + $0x108] sm:$0xff] %vm355_vm0, %v8749_v39  ;;  %v11395_v12 = vld [vmem:[%s11688_s19 + $0x158] sm:$0xff] }
 0x717   : > { %v8758_v56 = vadd.f32 %v11394_v5, %v15773_v42  ;;  %8814 = vst.msk [vmem:[%s15883_s24 + $0x110] sm:$0xff] %vm355_vm0, %v8750_v54  ;;  %v16411_v20 = vld [vmem:[#allocation10_spill] sm:$0xff]  ;;  %v11396_v45 = vld [vmem:[%s11688_s19 + $0x160] sm:$0xff]  ;;  %v16412_v50 = vld [vmem:[#allocation16_spill] sm:$0xff] }
 0x718   : > { %v8759_v11 = vadd.f32 %v11395_v12, %v16411_v20  ;;  %v8760_v62 = vadd.f32 %v11396_v45, %v16412_v50  ;;  %v11397_v42 = vld [vmem:[%s11688_s19 + $0x168] sm:$0xff]  ;;  %v16413_v27 = vld [vmem:[#allocation17_spill] sm:$0xff]  ;;  %v11398_v37 = vld [vmem:[%s11688_s19 + $0x170] sm:$0xff]  ;;  %8815 = vst.msk [vmem:[%s15883_s24 + $0x118] sm:$0xff] %vm355_vm0, %v8751_v35 }
 0x719   : > { %v8761_v33 = vadd.f32 %v11397_v42, %v16413_v27  ;;  %v8762_v41 = vadd.f32 %v11398_v37, %v15789_v0  ;;  %8816 = vst.msk [vmem:[%s15883_s24 + $0x120] sm:$0xff] %vm355_vm0, %v8752_v15  ;;  %8817 = vst.msk [vmem:[%s15883_s24 + $0x128] sm:$0xff] %vm355_vm0, %v8753_v60  ;;  %v11399_v36 = vld [vmem:[%s11688_s19 + $0x178] sm:$0xff]  ;;  %v11400_v52 = vld [vmem:[%s11688_s19 + $0x180] sm:$0xff] }
 0x71a   : > { %8818 = vst.msk [vmem:[%s15883_s24 + $0x130] sm:$0xff] %vm355_vm0, %v8754_v7  ;;  %v8763_v34 = vadd.f32 %v11399_v36, %v15793_v29  ;;  %v8764_v0 = vadd.f32 %v11400_v52, %v15797_v18  ;;  %v11401_v30 = vld [vmem:[%s11688_s19 + $0x188] sm:$0xff]  ;;  %v11402_v48 = vld [vmem:[%s11688_s19 + $0x190] sm:$0xff]  ;;  %8819 = vst.msk [vmem:[%s15883_s24 + $0x138] sm:$0xff] %vm355_vm0, %v8755_v44 }
 0x71b   : > { %v8765_v40 = vadd.f32 %v11401_v30, %v15801_v28  ;;  %v8766_v53 = vadd.f32 %v11402_v48, %v15805_v25  ;;  %8820 = vst.msk [vmem:[%s15883_s24 + $0x140] sm:$0xff] %vm355_vm0, %v8756_v55  ;;  %8821 = vst.msk [vmem:[%s15883_s24 + $0x148] sm:$0xff] %vm355_vm0, %v8757_v1  ;;  %v11403_v29 = vld [vmem:[%s11688_s19 + $0x198] sm:$0xff]  ;;  %v11404_v28 = vld [vmem:[%s11688_s19 + $0x1a0] sm:$0xff] }
 0x71c   : > { %8822 = vst.msk [vmem:[%s15883_s24 + $0x150] sm:$0xff] %vm355_vm0, %v8758_v56  ;;  %v8767_v18 = vadd.f32 %v11403_v29, %v15809_v17  ;;  %v8768_v25 = vadd.f32 %v11404_v28, %v15813_v21  ;;  %v11405_v51 = vld [vmem:[%s11688_s19 + $0x1a8] sm:$0xff]  ;;  %v11406_v24 = vld [vmem:[%s11688_s19 + $0x1b0] sm:$0xff]  ;;  %8823 = vst.msk [vmem:[%s15883_s24 + $0x158] sm:$0xff] %vm355_vm0, %v8759_v11 }
 0x71d   : > { %v8769_v47 = vadd.f32 %v11405_v51, %v15817_v23  ;;  %v8770_v61 = vadd.f32 %v11406_v24, %v15821_v6  ;;  %8824 = vst.msk [vmem:[%s15883_s24 + $0x160] sm:$0xff] %vm355_vm0, %v8760_v62  ;;  %8825 = vst.msk [vmem:[%s15883_s24 + $0x168] sm:$0xff] %vm355_vm0, %v8761_v33  ;;  %v11407_v17 = vld [vmem:[%s11688_s19 + $0x1b8] sm:$0xff]  ;;  %v11408_v23 = vld [vmem:[%s11688_s19 + $0x1c0] sm:$0xff] }
 0x71e   : > { %8826 = vst.msk [vmem:[%s15883_s24 + $0x170] sm:$0xff] %vm355_vm0, %v8762_v41  ;;  %v8771_v21 = vadd.f32 %v11407_v17, %v15825_v10  ;;  %v8772_v43 = vadd.f32 %v11408_v23, %v15829_v3  ;;  %v11409_v6 = vld [vmem:[%s11688_s19 + $0x1c8] sm:$0xff]  ;;  %v11410_v19 = vld [vmem:[%s11688_s19 + $0x1d0] sm:$0xff]  ;;  %8827 = vst.msk [vmem:[%s15883_s24 + $0x178] sm:$0xff] %vm355_vm0, %v8763_v34 }
 0x71f   : > { %v8773_v58 = vadd.f32 %v11409_v6, %v15833_v46  ;;  %v16414_v38 = vld [vmem:[#allocation19_spill] sm:$0xff]  ;;  %8828 = vst.msk [vmem:[%s15883_s24 + $0x180] sm:$0xff] %vm355_vm0, %v8764_v0  ;;  %8829 = vst.msk [vmem:[%s15883_s24 + $0x188] sm:$0xff] %vm355_vm0, %v8765_v40  ;;  %v11411_v10 = vld [vmem:[%s11688_s19 + $0x1d8] sm:$0xff] }
 0x720   : > { %v8774_v31 = vadd.f32 %v11410_v19, %v16414_v38  ;;  %8830 = vst.msk [vmem:[%s15883_s24 + $0x190] sm:$0xff] %vm355_vm0, %v8766_v53  ;;  %v16415_v3 = vld [vmem:[#allocation18_spill] sm:$0xff]  ;;  %v11412_v13 = vld [vmem:[%s11688_s19 + $0x1e0] sm:$0xff]  ;;  %v16416_v63 = vld [vmem:[#allocation20_spill] sm:$0xff] }
 0x721   : > { %v8775_v46 = vadd.f32 %v11411_v10, %v16415_v3  ;;  %v8776_v14 = vadd.f32 %v11412_v13, %v16416_v63  ;;  %v11413_v39 = vld [vmem:[%s11688_s19 + $0x1e8] sm:$0xff]  ;;  %v16417_v22 = vld [vmem:[#allocation23_spill] sm:$0xff]  ;;  %v16418_v35 = vld [vmem:[#allocation13_spill] sm:$0xff]  ;;  %8831 = vst.msk [vmem:[%s15883_s24 + $0x198] sm:$0xff] %vm355_vm0, %v8767_v18 }
 0x722   : > { %v8777_v54 = vadd.f32 %v11413_v39, %v16417_v22  ;;  %v11414_v59 = vld [vmem:[%s11688_s19 + $0x1f0] sm:$0xff]  ;;  %8832 = vst.msk [vmem:[%s15883_s24 + $0x1a0] sm:$0xff] %vm355_vm0, %v8768_v25  ;;  %8833 = vst.msk [vmem:[%s15883_s24 + $0x1a8] sm:$0xff] %vm355_vm0, %v8769_v47  ;;  %v11415_v15 = vld [vmem:[%s11688_s19 + $0x1f8] sm:$0xff]  ;;  %s11446_s19 = scalar_lea.vmem %s16110_s28, 8192 }
 0x723   : > { %v8778_v32 = vadd.f32 %v11414_v59, %v16418_v35  ;;  %8834 = vst.msk [vmem:[%s15883_s24 + $0x1b0] sm:$0xff] %vm355_vm0, %v8770_v61  ;;  %v16419_v8 = vld [vmem:[#allocation15_spill] sm:$0xff]  ;;  %8835 = vst.msk [vmem:[%s15883_s24 + $0x1b8] sm:$0xff] %vm355_vm0, %v8771_v21  ;;  %p11447_p6 = scmp.ne.s32.totalorder %s16110_s28, %s11446_s19  ;;  %p11454_p10 = scmp.lt.s32.totalorder %s11452_s26, %s11446_s19 }
 0x724   : > { %v8779_v60 = vadd.f32 %v11415_v15, %v16419_v8  ;;  %8836 = vst.msk [vmem:[%s15883_s24 + $0x1c0] sm:$0xff] %vm355_vm0, %v8772_v43  ;;  %8837 = vst.msk [vmem:[%s15883_s24 + $0x1c8] sm:$0xff] %vm355_vm0, %v8773_v58 }
 0x725   : > { %8838 = vst.msk [vmem:[%s15883_s24 + $0x1d0] sm:$0xff] %vm355_vm0, %v8774_v31  ;;  %8839 = vst.msk [vmem:[%s15883_s24 + $0x1d8] sm:$0xff] %vm355_vm0, %v8775_v46  ;;  %p11448_p12 = pnand %p11447_p6, %p16420_p11  ;;  %p11455_p0 = por %p11454_p10, %p11453_p8 }
 0x726   : > { %8840 = vst.msk [vmem:[%s15883_s24 + $0x1e0] sm:$0xff] %vm355_vm0, %v8776_v14  ;;  %8841 = vst.msk [vmem:[%s15883_s24 + $0x1e8] sm:$0xff] %vm355_vm0, %v8777_v54 }
 0x727   : > { %8842 = vst.msk [vmem:[%s15883_s24 + $0x1f0] sm:$0xff] %vm355_vm0, %v8778_v32  ;;  %8843 = vst.msk [vmem:[%s15883_s24 + $0x1f8] sm:$0xff] %vm355_vm0, %v8779_v60  ;;  %p11449_p13 = pneg %p11448_p12 }
 0x729   : > { %p11456_p2 = pnand %p11455_p0, %p11449_p13 }
 0x72b   : > { %11459 = shalt.err (!%p11456_p2)
}
 0x72c   : > { %s11460_s25 = scalar_lea.hbm %s16106_s17, 8192  ;;  %s11464_s20 = scalar_lea.hbm %s16183_s9, 16384 }
 0x72d   : > { %p11461_p4 = scmp.ne.s32.totalorder %s16106_s17, %s11460_s25  ;;  %p11465_p9 = scmp.lt.u32.totalorder %s16106_s17, %s16183_s9 }
 0x72e   : > { %p11466_p1 = scmp.lt.u32.totalorder %s11464_s20, %s11460_s25  ;;  %p11468_p6 = scmp.lt.u32.totalorder %s11460_s25, %s16106_s17 }
 0x72f   : > { %p11462_p5 = pnand %p11461_p4, %p16420_p11 }
 0x730   : > { %p11467_p3 = por %p11466_p1, %p11465_p9 }
 0x731   : > { %p11463_p7 = pneg %p11462_p5 }
 0x732   : > { %p11469_p12 = por %p11468_p6, %p11467_p3 }
 0x734   : > { %p11470_p13 = pnand %p11469_p12, %p11463_p7 }
 0x736   : > { %11473 = shalt.err (!%p11470_p13)
}
 0x737   : > { %s11526_s19 = smov 128   ;;  %s11527_s16 = smov 8  }
 0x738   : > { %9298 = dma.vmem_to_hbm [thread:$0]  (%p16420_p11), %s16110_s28, 8192, %s16106_s17, %s8845_s13, %s11526_s19, %s11526_s19, %s11527_s16  }
 0x739 PF: > { %s8874_s26 = sand.u32 1, %s11500_s30   ;;  %p16421_p8 = scmp.ne.s32.totalorder %s16243_s22, 0 }
 0x73a   : > { %p16422_p10 = scmp.ge.s32.totalorder %s11512_s12, 2  ;;  %s8875_s25 = scalar_lea.sflag [#allocation5], %s8874_s26 }
 0x73c   : > { %p9305_p0 = pnand %p16422_p10, %p16421_p8 }
 0x73e   : > { %11495 = dma.done.wait (!%p9305_p0), %s8875_s25, 8192  }
 0x73f   : > { %11497 = vsyncadd (!%p9305_p0), %s8875_s25, 4294959104  ;;  %p22_p2 = scmp.ge.s32.totalorder %s11603_s15, 4   ;;  %s16423_s30 = smov %s11504_s10 }
 0x740   : > { %s16424_s10 = smov %s11508_s11  ;;  %s16425_s11 = smov %s11615_s18 }
 0x741   : > { %s16426_s12 = smov %s11603_s15  ;;  %24 = sbr.rel (!%p22_p2) target bundleno = 5 (0x5), region = 104 }
 0x748   :  { %8880 = vsyncpa [#allocation4], 1 }
 0x749   :  { %8882 = vsyncpa [#allocation4 + $0x1], 1 }
 0x74a   :  { %8883 = vsyncpa [#allocation5], 1 }
 0x74b   :  { %8885 = vsyncpa [#allocation5 + $0x1], 1 }

</bundles_post_ra>
